<compile_context>
chip_gen: v6e
topology: v6e:2x2x1
jax: 0.10.0
libtpu: 0.0.40
codegen_flags: <defaults>
</compile_context>

<pallas_src>
import functools

import jax
import jax.numpy as jnp
from jax.experimental import pallas as pl
from jax.experimental.pallas import tpu as pltpu


# --------------------------------------------------------------------------
# Compiler params (generation-aware VMEM budget)
# --------------------------------------------------------------------------

_DEFAULT_VMEM_LIMIT = 32 * 1024 * 1024


@functools.lru_cache(maxsize=None)
def _vmem_limit_bytes():
    # v5e/v6e have 128 MiB VMEM per TC, v7x only 64 MiB: take ~3/4 of physical,
    # capped at 96 MiB (-> 96 MiB on v5e/v6e, 48 MiB on v7x), fall back to 32 MiB.
    try:
        cap = int(pltpu.get_tpu_info().vmem_capacity_bytes)
        return max(_DEFAULT_VMEM_LIMIT, min(96 * 1024 * 1024, (cap * 3) // 4))
    except Exception:
        return _DEFAULT_VMEM_LIMIT


def _mosaic_params(dimension_semantics):
    return pltpu.CompilerParams(dimension_semantics=tuple(dimension_semantics),
                                vmem_limit_bytes=_vmem_limit_bytes())


def _fast_reciprocal(x):
    if hasattr(pl, "reciprocal"):
        return pl.reciprocal(x, approx=True)   # EUP slot; effectively free
    return 1.0 / x


# --------------------------------------------------------------------------
# Tiled dense: y = act(x @ w + b)      x:(M,K) bf16, w:(K,N) bf16, b:(N,) f32
# gk==1  -> direct matmul + epilogue (no accumulator scratch / init / guards)
# gk>1   -> classic K-last reduction grid with f32 VMEM accumulator
# --------------------------------------------------------------------------

def dense(x, w, b, activation=None, out_dtype=None, tm=128, tn=None, tk=None):
    M, K = x.shape
    Kw, N = w.shape
    assert K == Kw
    out_dtype = out_dtype or x.dtype
    tm = min(tm, M)
    tn = N if tn is None else min(tn, N)
    tk = K if tk is None else min(tk, K)
    assert M % tm == 0 and N % tn == 0 and K % tk == 0
    gm, gn, gk = M // tm, N // tn, K // tk

    def _epilogue(y):
        if activation == "gelu":
            # TODO(synk): HF BERT "gelu" is exact erf-GELU; tanh approximation kept
            # here for Mosaic-safe EUP lowering (tiny numerical divergence).
            y = jax.nn.gelu(y)
        return y

    if gk == 1:
        # single reduction step: no accumulator round-trip through VMEM
        def kernel(x_ref, w_ref, b_ref, o_ref):
            y = jnp.dot(x_ref[...], w_ref[...],
                        preferred_element_type=jnp.float32)
            y = _epilogue(y + b_ref[...])
            o_ref[...] = y.astype(o_ref.dtype)

        return pl.pallas_call(
            kernel,
            grid=(gm, gn),
            in_specs=[
                pl.BlockSpec((tm, tk), lambda i, j: (i, 0)),
                pl.BlockSpec((tk, tn), lambda i, j: (0, j)),
                pl.BlockSpec((1, tn), lambda i, j: (0, j)),
            ],
            out_specs=pl.BlockSpec((tm, tn), lambda i, j: (i, j)),
            out_shape=jax.ShapeDtypeStruct((M, N), out_dtype),
            compiler_params=_mosaic_params(("parallel", "parallel")),
        )(x, w, b.reshape(1, N))

    def kernel(x_ref, w_ref, b_ref, o_ref, acc_ref):
        @pl.when(pl.program_id(2) == 0)
        def _():
            acc_ref[...] = jnp.zeros_like(acc_ref)

        acc_ref[...] += jnp.dot(x_ref[...], w_ref[...],
                                preferred_element_type=jnp.float32)

        @pl.when(pl.program_id(2) == gk - 1)
        def _():
            o_ref[...] = _epilogue(acc_ref[...] + b_ref[...]).astype(o_ref.dtype)

    return pl.pallas_call(
        kernel,
        grid=(gm, gn, gk),
        in_specs=[
            pl.BlockSpec((tm, tk), lambda i, j, k: (i, k)),
            pl.BlockSpec((tk, tn), lambda i, j, k: (k, j)),
            pl.BlockSpec((1, tn), lambda i, j, k: (0, j)),
        ],
        out_specs=pl.BlockSpec((tm, tn), lambda i, j, k: (i, j)),
        out_shape=jax.ShapeDtypeStruct((M, N), out_dtype),
        scratch_shapes=[pltpu.VMEM((tm, tn), jnp.float32)],
        compiler_params=_mosaic_params(("parallel", "parallel", "arbitrary")),
    )(x, w, b.reshape(1, N))


# --------------------------------------------------------------------------
# Dense with fused residual-add + LayerNorm epilogue (tn == N).
#   out = LayerNorm(x @ w + b + residual) * gamma + beta
# --------------------------------------------------------------------------

def dense_add_ln(x, w, b, residual, gamma, beta, eps=1e-12, out_dtype=None,
                 tm=128, tk=None):
    M, K = x.shape
    _, N = w.shape
    out_dtype = out_dtype or residual.dtype
    tm = min(tm, M)
    tk = K if tk is None else min(tk, K)
    assert M % tm == 0 and K % tk == 0
    gm, gk = M // tm, K // tk

    def _ln_epilogue(y, r, g, bt, o_dtype):
        y = y + r.astype(jnp.float32)
        mu = jnp.mean(y, axis=-1, keepdims=True)
        var = jnp.mean(jnp.square(y - mu), axis=-1, keepdims=True)
        y = (y - mu) * jax.lax.rsqrt(var + eps)
        return (y * g + bt).astype(o_dtype)

    if gk == 1:
        def kernel(x_ref, w_ref, b_ref, r_ref, g_ref, bt_ref, o_ref):
            y = jnp.dot(x_ref[...], w_ref[...],
                        preferred_element_type=jnp.float32) + b_ref[...]
            o_ref[...] = _ln_epilogue(y, r_ref[...], g_ref[...], bt_ref[...],
                                      o_ref.dtype)

        return pl.pallas_call(
            kernel,
            grid=(gm,),
            in_specs=[
                pl.BlockSpec((tm, K), lambda i: (i, 0)),
                pl.BlockSpec((K, N), lambda i: (0, 0)),
                pl.BlockSpec((1, N), lambda i: (0, 0)),
                pl.BlockSpec((tm, N), lambda i: (i, 0)),
                pl.BlockSpec((1, N), lambda i: (0, 0)),
                pl.BlockSpec((1, N), lambda i: (0, 0)),
            ],
            out_specs=pl.BlockSpec((tm, N), lambda i: (i, 0)),
            out_shape=jax.ShapeDtypeStruct((M, N), out_dtype),
            compiler_params=_mosaic_params(("parallel",)),
        )(x, w, b.reshape(1, N), residual, gamma.reshape(1, N),
          beta.reshape(1, N))

    def kernel(x_ref, w_ref, b_ref, r_ref, g_ref, bt_ref, o_ref, acc_ref):
        @pl.when(pl.program_id(1) == 0)
        def _():
            acc_ref[...] = jnp.zeros_like(acc_ref)

        acc_ref[...] += jnp.dot(x_ref[...], w_ref[...],
                                preferred_element_type=jnp.float32)

        @pl.when(pl.program_id(1) == gk - 1)
        def _():
            o_ref[...] = _ln_epilogue(acc_ref[...] + b_ref[...], r_ref[...],
                                      g_ref[...], bt_ref[...], o_ref.dtype)

    return pl.pallas_call(
        kernel,
        grid=(gm, gk),
        in_specs=[
            pl.BlockSpec((tm, tk), lambda i, k: (i, k)),
            pl.BlockSpec((tk, N), lambda i, k: (k, 0)),
            pl.BlockSpec((1, N), lambda i, k: (0, 0)),
            pl.BlockSpec((tm, N), lambda i, k: (i, 0)),
            pl.BlockSpec((1, N), lambda i, k: (0, 0)),
            pl.BlockSpec((1, N), lambda i, k: (0, 0)),
        ],
        out_specs=pl.BlockSpec((tm, N), lambda i, k: (i, 0)),
        out_shape=jax.ShapeDtypeStruct((M, N), out_dtype),
        scratch_shapes=[pltpu.VMEM((tm, N), jnp.float32)],
        compiler_params=_mosaic_params(("parallel", "arbitrary")),
    )(x, w, b.reshape(1, N), residual, gamma.reshape(1, N), beta.reshape(1, N))


# --------------------------------------------------------------------------
# Embedding-sum + LayerNorm fused kernel.
#   we:       (B, S, H) bf16  (gathered word embeddings)
#   pos_type: (S, H)    f32   (position + token-type embeddings, precomputed)
#   out:      LayerNorm(we + pos_type) * gamma + beta   -> (B, S, H) bf16
# --------------------------------------------------------------------------

def emb_layernorm(we, pos_type, gamma, beta, eps=1e-12, out_dtype=jnp.bfloat16,
                  ts=128):
    B, S, H = we.shape
    ts = min(ts, S)
    assert S % ts == 0

    def kernel(we_ref, pt_ref, g_ref, b_ref, o_ref):
        x = we_ref[0].astype(jnp.float32) + pt_ref[...]
        mu = jnp.mean(x, axis=-1, keepdims=True)
        var = jnp.mean(jnp.square(x - mu), axis=-1, keepdims=True)
        y = (x - mu) * jax.lax.rsqrt(var + eps)
        o_ref[0] = (y * g_ref[...] + b_ref[...]).astype(o_ref.dtype)

    return pl.pallas_call(
        kernel,
        grid=(B, S // ts),
        in_specs=[
            pl.BlockSpec((1, ts, H), lambda b, i: (b, i, 0)),
            pl.BlockSpec((ts, H), lambda b, i: (i, 0)),
            pl.BlockSpec((1, H), lambda b, i: (0, 0)),
            pl.BlockSpec((1, H), lambda b, i: (0, 0)),
        ],
        out_specs=pl.BlockSpec((1, ts, H), lambda b, i: (b, i, 0)),
        out_shape=jax.ShapeDtypeStruct((B, S, H), out_dtype),
        compiler_params=_mosaic_params(("parallel", "parallel")),
    )(we, pos_type, gamma.reshape(1, H), beta.reshape(1, H))


# --------------------------------------------------------------------------
# Multi-head attention over a fused QKV slab, all heads processed per grid step.
#   qkv:  (B, S, 3H) bf16; head h of Q/K/V at columns h*dh / H+h*dh / 2H+h*dh
#   bias: (B, 1, S)  f32 additive key-padding bias ((1-mask)*-1e9), precomputed
#   out:  (B, S, H)  bf16, merged-head layout
# gk==1 -> plain in-register softmax (no scratch); gk>1 -> online softmax with
# per-head scratch and scalar-prefetch skipping of fully-padded KV tiles.
# --------------------------------------------------------------------------

def flash_attention(qkv, bias, kv_len, n_heads, head_dim, tq=128, tk=128):
    B, S, H3 = qkv.shape
    H = H3 // 3
    nH, dh = n_heads, head_dim
    assert nH * dh == H
    tq, tk = min(tq, S), min(tk, S)
    assert S % tq == 0 and S % tk == 0
    gq, gk = S // tq, S // tk
    scale = 1.0 / float(dh) ** 0.5

    if gk == 1:
        # whole KV fits one block: direct softmax, zero scratch, one step per (b, qi)
        def kernel(q_ref, k_ref, v_ref, b_ref, o_ref):
            q_all = q_ref[0]                    # (tq, H) bf16
            k_all = k_ref[0]                    # (S,  H) bf16
            v_all = v_ref[0]                    # (S,  H) bf16
            bias_row = b_ref[0]                 # (1,  S) f32
            outs = []
            for h in range(nH):                 # static unroll over heads
                sl = slice(h * dh, (h + 1) * dh)
                s = jax.lax.dot_general(q_all[:, sl], k_all[:, sl],
                                        (((1,), (1,)), ((), ())),
                                        preferred_element_type=jnp.float32)
                s = s * scale + bias_row        # scale on f32 scores
                m = jnp.max(s, axis=-1, keepdims=True)
                p = jnp.exp(s - m)
                l = jnp.sum(p, axis=-1, keepdims=True)
                ctx = jnp.dot(p.astype(v_all.dtype), v_all[:, sl],
                              preferred_element_type=jnp.float32)
                outs.append(ctx * _fast_reciprocal(l))
            # single lane-dense full-width store
            o_ref[0] = jnp.concatenate(outs, axis=-1).astype(o_ref.dtype)

        return pl.pallas_call(
            kernel,
            grid=(B, gq),
            in_specs=[
                pl.BlockSpec((1, tq, H), lambda b, qi: (b, qi, 0)),   # Q
                pl.BlockSpec((1, S, H), lambda b, qi: (b, 0, 1)),     # K
                pl.BlockSpec((1, S, H), lambda b, qi: (b, 0, 2)),     # V
                pl.BlockSpec((1, 1, S), lambda b, qi: (b, 0, 0)),     # bias
            ],
            out_specs=pl.BlockSpec((1, tq, H), lambda b, qi: (b, qi, 0)),
            out_shape=jax.ShapeDtypeStruct((B, S, H), qkv.dtype),
            compiler_params=_mosaic_params(("parallel", "parallel")),
        )(qkv, qkv, qkv, bias)

    # ------- general online-softmax path (longer sequences, gk > 1) ----------
    kv_tiles = jnp.clip((kv_len + tk - 1) // tk, 1, gk).astype(jnp.int32)  # (B,)

    def kernel(kvt_ref, q_ref, k_ref, v_ref, b_ref, o_ref, m_sc, l_sc, acc_sc):
        b = pl.program_id(0)
        ki = pl.program_id(2)

        @pl.when(ki == 0)
        def _():
            m_sc[...] = jnp.full_like(m_sc, -1e30)
            l_sc[...] = jnp.zeros_like(l_sc)
            acc_sc[...] = jnp.zeros_like(acc_sc)

        @pl.when(ki < kvt_ref[b])               # skip fully-padded KV tiles
        def _():
            q_all = q_ref[0]
            k_all = k_ref[0]
            v_all = v_ref[0]
            bias_row = b_ref[0]
            for h in range(nH):
                sl = slice(h * dh, (h + 1) * dh)
                s = jax.lax.dot_general(q_all[:, sl], k_all[:, sl],
                                        (((1,), (1,)), ((), ())),
                                        preferred_element_type=jnp.float32)
                s = s * scale + bias_row
                m_prev = m_sc[h]
                m_new = jnp.maximum(m_prev, jnp.max(s, axis=-1, keepdims=True))
                alpha = jnp.exp(m_prev - m_new)
                p = jnp.exp(s - m_new)
                l_sc[h] = alpha * l_sc[h] + jnp.sum(p, axis=-1, keepdims=True)
                acc_sc[h] = alpha * acc_sc[h] + jnp.dot(
                    p.astype(v_all.dtype), v_all[:, sl],
                    preferred_element_type=jnp.float32)
                m_sc[h] = m_new

        @pl.when(ki == pl.num_programs(2) - 1)
        def _():
            outs = [acc_sc[h] * _fast_reciprocal(l_sc[h]) for h in range(nH)]
            o_ref[0] = jnp.concatenate(outs, axis=-1).astype(o_ref.dtype)

    grid_spec = pltpu.PrefetchScalarGridSpec(
        num_scalar_prefetch=1,
        grid=(B, gq, gk),
        in_specs=[
            pl.BlockSpec((1, tq, H), lambda b, qi, ki, kvt: (b, qi, 0)),
            pl.BlockSpec((1, tk, H), lambda b, qi, ki, kvt: (b, ki, 1)),
            pl.BlockSpec((1, tk, H), lambda b, qi, ki, kvt: (b, ki, 2)),
            pl.BlockSpec((1, 1, tk), lambda b, qi, ki, kvt: (b, 0, ki)),
        ],
        out_specs=pl.BlockSpec((1, tq, H), lambda b, qi, ki, kvt: (b, qi, 0)),
        scratch_shapes=[
            pltpu.VMEM((nH, tq, 1), jnp.float32),
            pltpu.VMEM((nH, tq, 1), jnp.float32),
            pltpu.VMEM((nH, tq, dh), jnp.float32),
        ],
    )
    return pl.pallas_call(
        kernel,
        grid_spec=grid_spec,
        out_shape=jax.ShapeDtypeStruct((B, S, H), qkv.dtype),
        compiler_params=_mosaic_params(("parallel", "parallel", "arbitrary")),
    )(kv_tiles, qkv, qkv, qkv, bias)


# --------------------------------------------------------------------------
# Parameter init (deterministic, BERT-style). Matmul weights + word table bf16;
# bias/LN f32.
# --------------------------------------------------------------------------

def init_params(key, cfg):
    H, I = cfg["hidden"], cfg["intermediate"]
    V, P = cfg["vocab"], cfg["max_pos"]
    L, C, Cp = cfg["layers"], cfg["n_classes"], cfg["n_classes_padded"]

    keys = iter(jax.random.split(key, 8 + 8 * L))

    def nrm(shape, dtype=jnp.float32):
        return (0.02 * jax.random.normal(next(keys), shape)).astype(dtype)

    zeros = lambda n: jnp.zeros((n,), jnp.float32)
    ones = lambda n: jnp.ones((n,), jnp.float32)

    # classifier weight padded to a lane-dense 128-wide output; sliced in wrapper
    w_cls = jnp.zeros((H, Cp), jnp.bfloat16).at[:, :C].set(nrm((H, C), jnp.bfloat16))

    params = {
        "word_emb": nrm((V, H), jnp.bfloat16),   # bf16 gather (half HBM traffic)
        "pos_emb": nrm((P, H)),
        "type_emb": nrm((2, H)),
        "emb_ln_g": ones(H), "emb_ln_b": zeros(H),
        "layers": [],
        "w_cls": w_cls,
        "b_cls": zeros(Cp),
    }
    for _ in range(L):
        params["layers"].append({
            "w_qkv": nrm((H, 3 * H), jnp.bfloat16), "b_qkv": zeros(3 * H),
            "w_o": nrm((H, H), jnp.bfloat16), "b_o": zeros(H),
            "ln1_g": ones(H), "ln1_b": zeros(H),
            "w1": nrm((H, I), jnp.bfloat16), "b1": zeros(I),
            "w2": nrm((I, H), jnp.bfloat16), "b2": zeros(H),
            "ln2_g": ones(H), "ln2_b": zeros(H),
        })
    return params


# --------------------------------------------------------------------------
# Forward pass (== Classifier.forward, eval mode)
# --------------------------------------------------------------------------

def classifier_forward(params, input_ids, attention_mask, cfg):
    B, S = input_ids.shape
    H, nH = cfg["hidden"], cfg["heads"]
    dh = H // nH

    # --- embeddings: bf16 gather, pos+type precomputed, sum fused into LN ---
    we = params["word_emb"][input_ids]                             # (B,S,H) bf16
    pos_type = params["pos_emb"][:S] + params["type_emb"][0][None, :]   # (S,H) f32
    h = emb_layernorm(we, pos_type, params["emb_ln_g"], params["emb_ln_b"])
    h = h.reshape(B * S, H)                                        # (B*S,H) bf16
    # embedding dropout (p=0.1) is identity in eval mode

    # key-padding bias and valid lengths computed once for all layers
    mask_f = attention_mask.astype(jnp.float32).reshape(B, 1, S)
    attn_bias = (1.0 - mask_f) * -1e9                              # (B,1,S) f32
    kv_len = jnp.sum(attention_mask, axis=-1).astype(jnp.int32)    # (B,)

    # --- transformer encoder layers ---
    for layer in params["layers"]:
        qkv = dense(h, layer["w_qkv"], layer["b_qkv"])             # (B*S,3H) bf16
        ctx = flash_attention(qkv.reshape(B, S, 3 * H), attn_bias, kv_len, nH, dh)
        h = dense_add_ln(ctx.reshape(B * S, H), layer["w_o"], layer["b_o"],
                         residual=h, gamma=layer["ln1_g"], beta=layer["ln1_b"])
        ff = dense(h, layer["w1"], layer["b1"], activation="gelu")
        h = dense_add_ln(ff, layer["w2"], layer["b2"],
                         residual=h, gamma=layer["ln2_g"], beta=layer["ln2_b"])

    last_hidden_state = h.reshape(B, S, H)

    # --- Classifier head ---
    # Reference module uses last_hidden_state[:, 0] directly (no HF tanh pooler).
    pooled_output = last_hidden_state[:, 0]                        # (B, H) bf16
    # self.dropout(pooled_output): identity in eval mode
    # TODO(synk): training-mode dropout would need pltpu.prng_seed / prng_random_bits
    logits_pad = dense(pooled_output, params["w_cls"], params["b_cls"],
                       out_dtype=jnp.float32)                      # (B, 128) lane-dense
    return logits_pad[:, :cfg["n_classes"]]


# --------------------------------------------------------------------------

if __name__ == "__main__":
    cfg = dict(vocab=512, max_pos=128, hidden=256, heads=2, intermediate=512,
               layers=2, n_classes=4, n_classes_padded=128)

    key = jax.random.PRNGKey(0)
    pkey, ikey = jax.random.split(key)
    params = init_params(pkey, cfg)

    B, S = 2, 128
    input_ids = jax.random.randint(ikey, (B, S), 0, cfg["vocab"], dtype=jnp.int32)
    attention_mask = jnp.ones((B, S), dtype=jnp.int32).at[1, 100:].set(0)  # ragged

    fwd = jax.jit(functools.partial(classifier_forward, cfg=cfg))
    logits = fwd(params, input_ids, attention_mask)
    logits = jax.block_until_ready(logits)

    assert logits.shape == (B, cfg["n_classes"])
    assert bool(jnp.all(jnp.isfinite(logits)))
    print("KERNEL_OK")
</pallas_src>

<mosaic_0001>
module attributes {stable_mosaic.version = 11 : i64} {
  func.func @kernel(%arg0: i32, %arg1: i32, %arg2: memref<1x128x256xbf16, #tpu.memory_space<vmem>>, %arg3: memref<1x128x256xbf16, #tpu.memory_space<vmem>>, %arg4: memref<1x128x256xbf16, #tpu.memory_space<vmem>>, %arg5: memref<1x1x128xf32, #tpu.memory_space<vmem>>, %arg6: memref<1x128x256xbf16, #tpu.memory_space<vmem>>) attributes {dimension_semantics = [#tpu.dimension_semantics<parallel>, #tpu.dimension_semantics<parallel>], iteration_bounds = array<i64: 2, 1>, scalar_prefetch = 0 : i64, scratch_operands = 0 : i64, tpu.core_type = #tpu.core_type<tc>, window_params = [{transform_indices = @transform_0, window_bounds = array<i64: 1, 128, 256>}, {transform_indices = @transform_1, window_bounds = array<i64: 1, 128, 256>}, {transform_indices = @transform_2, window_bounds = array<i64: 1, 128, 256>}, {transform_indices = @transform_3, window_bounds = array<i64: 1, 1, 128>}, {transform_indices = @transform_4, window_bounds = array<i64: 1, 128, 256>}]} {
    %c0 = arith.constant 0 : index
    %c0_0 = arith.constant 0 : index
    %c0_1 = arith.constant 0 : index
    %0 = vector.load %arg2[%c0, %c0_0, %c0_1] : memref<1x128x256xbf16, #tpu.memory_space<vmem>>, vector<1x128x256xbf16>
    %1 = vector.shape_cast %0 : vector<1x128x256xbf16> to vector<128x256xbf16>
    %c0_2 = arith.constant 0 : index
    %c0_3 = arith.constant 0 : index
    %c0_4 = arith.constant 0 : index
    %2 = vector.load %arg3[%c0_2, %c0_3, %c0_4] : memref<1x128x256xbf16, #tpu.memory_space<vmem>>, vector<1x128x256xbf16>
    %3 = vector.shape_cast %2 : vector<1x128x256xbf16> to vector<128x256xbf16>
    %c0_5 = arith.constant 0 : index
    %c0_6 = arith.constant 0 : index
    %c0_7 = arith.constant 0 : index
    %4 = vector.load %arg4[%c0_5, %c0_6, %c0_7] : memref<1x128x256xbf16, #tpu.memory_space<vmem>>, vector<1x128x256xbf16>
    %5 = vector.shape_cast %4 : vector<1x128x256xbf16> to vector<128x256xbf16>
    %c0_8 = arith.constant 0 : index
    %c0_9 = arith.constant 0 : index
    %c0_10 = arith.constant 0 : index
    %6 = vector.load %arg5[%c0_8, %c0_9, %c0_10] : memref<1x1x128xf32, #tpu.memory_space<vmem>>, vector<1x1x128xf32>
    %7 = vector.shape_cast %6 : vector<1x1x128xf32> to vector<1x128xf32>
    %8 = vector.extract_strided_slice %1 {offsets = [0, 0], sizes = [128, 128], strides = [1, 1]} : vector<128x256xbf16> to vector<128x128xbf16>
    %9 = vector.extract_strided_slice %3 {offsets = [0, 0], sizes = [128, 128], strides = [1, 1]} : vector<128x256xbf16> to vector<128x128xbf16>
    %cst = arith.constant dense<0.000000e+00> : vector<128x128xf32>
    %10 = tpu.matmul %8, %9, %cst {dimension_numbers = #tpu.dot_dimension_numbers<[1], [1], [0], [0], [0, 0, 1, 0], [], []>} : vector<128x128xbf16>, vector<128x128xbf16>, vector<128x128xf32> -> vector<128x128xf32>
    %cst_11 = arith.constant 0.0883883461 : f32
    %11 = vector.broadcast %cst_11 : f32 to vector<128x128xf32>
    %12 = arith.mulf %10, %11 : vector<128x128xf32>
    %13 = vector.broadcast %7 : vector<1x128xf32> to vector<128x128xf32>
    %14 = arith.addf %12, %13 : vector<128x128xf32>
    %cst_12 = arith.constant dense<0xFF800000> : vector<128xf32>
    %15 = vector.multi_reduction <maximumf>, %14, %cst_12 [1] : vector<128x128xf32> to vector<128xf32>
    %16 = vector.shape_cast %15 : vector<128xf32> to vector<128x1xf32>
    %17 = vector.broadcast %16 : vector<128x1xf32> to vector<128x128xf32>
    %18 = arith.subf %14, %17 : vector<128x128xf32>
    %19 = math.exp %18 : vector<128x128xf32>
    %cst_13 = arith.constant dense<0.000000e+00> : vector<128xf32>
    %20 = vector.multi_reduction <add>, %19, %cst_13 [1] : vector<128x128xf32> to vector<128xf32>
    %21 = vector.shape_cast %20 : vector<128xf32> to vector<128x1xf32>
    %22 = arith.truncf %19 : vector<128x128xf32> to vector<128x128xbf16>
    %23 = vector.extract_strided_slice %5 {offsets = [0, 0], sizes = [128, 128], strides = [1, 1]} : vector<128x256xbf16> to vector<128x128xbf16>
    %cst_14 = arith.constant dense<0.000000e+00> : vector<128x128xf32>
    %24 = tpu.matmul %22, %23, %cst_14 {dimension_numbers = #tpu.dot_dimension_numbers<[1], [0], [0], [1], [0, 0, 1, 1], [], []>} : vector<128x128xbf16>, vector<128x128xbf16>, vector<128x128xf32> -> vector<128x128xf32>
    %25 = tpu.reciprocal %21 {approx = true} : vector<128x1xf32> -> vector<128x1xf32>
    %26 = vector.broadcast %25 : vector<128x1xf32> to vector<128x128xf32>
    %27 = arith.mulf %24, %26 : vector<128x128xf32>
    %28 = vector.extract_strided_slice %1 {offsets = [0, 128], sizes = [128, 128], strides = [1, 1]} : vector<128x256xbf16> to vector<128x128xbf16>
    %29 = vector.extract_strided_slice %3 {offsets = [0, 128], sizes = [128, 128], strides = [1, 1]} : vector<128x256xbf16> to vector<128x128xbf16>
    %cst_15 = arith.constant dense<0.000000e+00> : vector<128x128xf32>
    %30 = tpu.matmul %28, %29, %cst_15 {dimension_numbers = #tpu.dot_dimension_numbers<[1], [1], [0], [0], [0, 0, 1, 0], [], []>} : vector<128x128xbf16>, vector<128x128xbf16>, vector<128x128xf32> -> vector<128x128xf32>
    %cst_16 = arith.constant 0.0883883461 : f32
    %31 = vector.broadcast %cst_16 : f32 to vector<128x128xf32>
    %32 = arith.mulf %30, %31 : vector<128x128xf32>
    %33 = vector.broadcast %7 : vector<1x128xf32> to vector<128x128xf32>
    %34 = arith.addf %32, %33 : vector<128x128xf32>
    %cst_17 = arith.constant dense<0xFF800000> : vector<128xf32>
    %35 = vector.multi_reduction <maximumf>, %34, %cst_17 [1] : vector<128x128xf32> to vector<128xf32>
    %36 = vector.shape_cast %35 : vector<128xf32> to vector<128x1xf32>
    %37 = vector.broadcast %36 : vector<128x1xf32> to vector<128x128xf32>
    %38 = arith.subf %34, %37 : vector<128x128xf32>
    %39 = math.exp %38 : vector<128x128xf32>
    %cst_18 = arith.constant dense<0.000000e+00> : vector<128xf32>
    %40 = vector.multi_reduction <add>, %39, %cst_18 [1] : vector<128x128xf32> to vector<128xf32>
    %41 = vector.shape_cast %40 : vector<128xf32> to vector<128x1xf32>
    %42 = arith.truncf %39 : vector<128x128xf32> to vector<128x128xbf16>
    %43 = vector.extract_strided_slice %5 {offsets = [0, 128], sizes = [128, 128], strides = [1, 1]} : vector<128x256xbf16> to vector<128x128xbf16>
    %cst_19 = arith.constant dense<0.000000e+00> : vector<128x128xf32>
    %44 = tpu.matmul %42, %43, %cst_19 {dimension_numbers = #tpu.dot_dimension_numbers<[1], [0], [0], [1], [0, 0, 1, 1], [], []>} : vector<128x128xbf16>, vector<128x128xbf16>, vector<128x128xf32> -> vector<128x128xf32>
    %45 = tpu.reciprocal %41 {approx = true} : vector<128x1xf32> -> vector<128x1xf32>
    %46 = vector.broadcast %45 : vector<128x1xf32> to vector<128x128xf32>
    %47 = arith.mulf %44, %46 : vector<128x128xf32>
    %48 = tpu.concatenate %27, %47 in 1 : vector<128x128xf32>, vector<128x128xf32> -> vector<128x256xf32>
    %49 = arith.truncf %48 : vector<128x256xf32> to vector<128x256xbf16>
    %c0_20 = arith.constant 0 : index
    %c0_21 = arith.constant 0 : index
    %c0_22 = arith.constant 0 : index
    %50 = vector.load %arg6[%c0_20, %c0_21, %c0_22] : memref<1x128x256xbf16, #tpu.memory_space<vmem>>, vector<1x128x256xbf16>
    %51 = vector.shape_cast %50 : vector<1x128x256xbf16> to vector<128x256xbf16>
    %52 = vector.shape_cast %49 : vector<128x256xbf16> to vector<1x128x256xbf16>
    tpu.vector_store %arg6[%c0_20, %c0_21, %c0_22], %52 {strides = array<i32>} : memref<1x128x256xbf16, #tpu.memory_space<vmem>>, vector<1x128x256xbf16>,
    return
  }
  func.func @transform_0(%arg0: i32, %arg1: i32) -> (i32, i32, i32) {
    %c0_i32 = arith.constant 0 : i32
    %c0_i32_0 = arith.constant 0 : i32
    return %arg0, %arg1, %c0_i32 : i32, i32, i32
  }
  func.func @transform_1(%arg0: i32, %arg1: i32) -> (i32, i32, i32) {
    %c0_i32 = arith.constant 0 : i32
    %c1_i32 = arith.constant 1 : i32
    %c0_i32_0 = arith.constant 0 : i32
    return %arg0, %c0_i32, %c1_i32 : i32, i32, i32
  }
  func.func @transform_2(%arg0: i32, %arg1: i32) -> (i32, i32, i32) {
    %c0_i32 = arith.constant 0 : i32
    %c2_i32 = arith.constant 2 : i32
    %c0_i32_0 = arith.constant 0 : i32
    return %arg0, %c0_i32, %c2_i32 : i32, i32, i32
  }
  func.func @transform_3(%arg0: i32, %arg1: i32) -> (i32, i32, i32) {
    %c0_i32 = arith.constant 0 : i32
    %c0_i32_0 = arith.constant 0 : i32
    %c0_i32_1 = arith.constant 0 : i32
    return %arg0, %c0_i32, %c0_i32_0 : i32, i32, i32
  }
  func.func @transform_4(%arg0: i32, %arg1: i32) -> (i32, i32, i32) {
    %c0_i32 = arith.constant 0 : i32
    %c0_i32_0 = arith.constant 0 : i32
    return %arg0, %arg1, %c0_i32 : i32, i32, i32
  }
}

module attributes {stable_mosaic.version = 11 : i64} {
  func.func @kernel(%arg0: i32, %arg1: i32, %arg2: memref<1x128x256xbf16, #tpu.memory_space<vmem>>, %arg3: memref<128x256xf32, #tpu.memory_space<vmem>>, %arg4: memref<1x256xf32, #tpu.memory_space<vmem>>, %arg5: memref<1x256xf32, #tpu.memory_space<vmem>>, %arg6: memref<1x128x256xbf16, #tpu.memory_space<vmem>>) attributes {dimension_semantics = [#tpu.dimension_semantics<parallel>, #tpu.dimension_semantics<parallel>], iteration_bounds = array<i64: 2, 1>, scalar_prefetch = 0 : i64, scratch_operands = 0 : i64, tpu.core_type = #tpu.core_type<tc>, window_params = [{transform_indices = @transform_0, window_bounds = array<i64: 1, 128, 256>}, {transform_indices = @transform_1, window_bounds = array<i64: 128, 256>}, {pipeline_mode = #tpu.pipeline_mode<synchronous>, transform_indices = @transform_2, window_bounds = array<i64: 1, 256>}, {pipeline_mode = #tpu.pipeline_mode<synchronous>, transform_indices = @transform_3, window_bounds = array<i64: 1, 256>}, {transform_indices = @transform_4, window_bounds = array<i64: 1, 128, 256>}]} {
    %c0 = arith.constant 0 : index
    %c0_0 = arith.constant 0 : index
    %c0_1 = arith.constant 0 : index
    %0 = vector.load %arg2[%c0, %c0_0, %c0_1] : memref<1x128x256xbf16, #tpu.memory_space<vmem>>, vector<1x128x256xbf16>
    %1 = vector.shape_cast %0 : vector<1x128x256xbf16> to vector<128x256xbf16>
    %2 = arith.extf %1 : vector<128x256xbf16> to vector<128x256xf32>
    %c0_2 = arith.constant 0 : index
    %c0_3 = arith.constant 0 : index
    %3 = vector.load %arg3[%c0_2, %c0_3] : memref<128x256xf32, #tpu.memory_space<vmem>>, vector<128x256xf32>
    %4 = arith.addf %2, %3 : vector<128x256xf32>
    %cst = arith.constant dense<0.000000e+00> : vector<128xf32>
    %5 = vector.multi_reduction <add>, %4, %cst [1] : vector<128x256xf32> to vector<128xf32>
    %6 = vector.shape_cast %5 : vector<128xf32> to vector<128x1xf32>
    %cst_4 = arith.constant 2.560000e+02 : f32
    %7 = vector.broadcast %cst_4 : f32 to vector<128x1xf32>
    %8 = arith.divf %6, %7 : vector<128x1xf32>
    %9 = vector.broadcast %8 : vector<128x1xf32> to vector<128x256xf32>
    %10 = arith.subf %4, %9 : vector<128x256xf32>
    %11 = arith.mulf %10, %10 : vector<128x256xf32>
    %cst_5 = arith.constant dense<0.000000e+00> : vector<128xf32>
    %12 = vector.multi_reduction <add>, %11, %cst_5 [1] : vector<128x256xf32> to vector<128xf32>
    %13 = vector.shape_cast %12 : vector<128xf32> to vector<128x1xf32>
    %cst_6 = arith.constant 2.560000e+02 : f32
    %14 = vector.broadcast %cst_6 : f32 to vector<128x1xf32>
    %15 = arith.divf %13, %14 : vector<128x1xf32>
    %16 = vector.broadcast %8 : vector<128x1xf32> to vector<128x256xf32>
    %17 = arith.subf %4, %16 : vector<128x256xf32>
    %cst_7 = arith.constant 9.99999996E-13 : f32
    %18 = vector.broadcast %cst_7 : f32 to vector<128x1xf32>
    %19 = arith.addf %15, %18 : vector<128x1xf32>
    %20 = math.rsqrt %19 : vector<128x1xf32>
    %21 = vector.broadcast %20 : vector<128x1xf32> to vector<128x256xf32>
    %22 = arith.mulf %17, %21 : vector<128x256xf32>
    %c0_8 = arith.constant 0 : index
    %c0_9 = arith.constant 0 : index
    %23 = vector.load %arg4[%c0_8, %c0_9] : memref<1x256xf32, #tpu.memory_space<vmem>>, vector<1x256xf32>
    %24 = vector.broadcast %23 : vector<1x256xf32> to vector<128x256xf32>
    %25 = arith.mulf %22, %24 : vector<128x256xf32>
    %c0_10 = arith.constant 0 : index
    %c0_11 = arith.constant 0 : index
    %26 = vector.load %arg5[%c0_10, %c0_11] : memref<1x256xf32, #tpu.memory_space<vmem>>, vector<1x256xf32>
    %27 = vector.broadcast %26 : vector<1x256xf32> to vector<128x256xf32>
    %28 = arith.addf %25, %27 : vector<128x256xf32>
    %29 = arith.truncf %28 : vector<128x256xf32> to vector<128x256xbf16>
    %c0_12 = arith.constant 0 : index
    %c0_13 = arith.constant 0 : index
    %c0_14 = arith.constant 0 : index
    %30 = vector.load %arg6[%c0_12, %c0_13, %c0_14] : memref<1x128x256xbf16, #tpu.memory_space<vmem>>, vector<1x128x256xbf16>
    %31 = vector.shape_cast %30 : vector<1x128x256xbf16> to vector<128x256xbf16>
    %32 = vector.shape_cast %29 : vector<128x256xbf16> to vector<1x128x256xbf16>
    tpu.vector_store %arg6[%c0_12, %c0_13, %c0_14], %32 {strides = array<i32>} : memref<1x128x256xbf16, #tpu.memory_space<vmem>>, vector<1x128x256xbf16>,
    return
  }
  func.func @transform_0(%arg0: i32, %arg1: i32) -> (i32, i32, i32) {
    %c0_i32 = arith.constant 0 : i32
    %c0_i32_0 = arith.constant 0 : i32
    return %arg0, %arg1, %c0_i32 : i32, i32, i32
  }
  func.func @transform_1(%arg0: i32, %arg1: i32) -> (i32, i32) {
    %c0_i32 = arith.constant 0 : i32
    %c0_i32_0 = arith.constant 0 : i32
    return %arg1, %c0_i32 : i32, i32
  }
  func.func @transform_2(%arg0: i32, %arg1: i32) -> (i32, i32) {
    %c0_i32 = arith.constant 0 : i32
    %c0_i32_0 = arith.constant 0 : i32
    %c0_i32_1 = arith.constant 0 : i32
    return %c0_i32, %c0_i32_0 : i32, i32
  }
  func.func @transform_3(%arg0: i32, %arg1: i32) -> (i32, i32) {
    %c0_i32 = arith.constant 0 : i32
    %c0_i32_0 = arith.constant 0 : i32
    %c0_i32_1 = arith.constant 0 : i32
    return %c0_i32, %c0_i32_0 : i32, i32
  }
  func.func @transform_4(%arg0: i32, %arg1: i32) -> (i32, i32, i32) {
    %c0_i32 = arith.constant 0 : i32
    %c0_i32_0 = arith.constant 0 : i32
    return %arg0, %arg1, %c0_i32 : i32, i32, i32
  }
}

module attributes {stable_mosaic.version = 11 : i64} {
  func.func @kernel(%arg0: i32, %arg1: i32, %arg2: memref<128x256xbf16, #tpu.memory_space<vmem>>, %arg3: memref<256x768xbf16, #tpu.memory_space<vmem>>, %arg4: memref<1x768xf32, #tpu.memory_space<vmem>>, %arg5: memref<128x768xbf16, #tpu.memory_space<vmem>>) attributes {dimension_semantics = [#tpu.dimension_semantics<parallel>, #tpu.dimension_semantics<parallel>], iteration_bounds = array<i64: 2, 1>, scalar_prefetch = 0 : i64, scratch_operands = 0 : i64, tpu.core_type = #tpu.core_type<tc>, window_params = [{transform_indices = @transform_0, window_bounds = array<i64: 128, 256>}, {transform_indices = @transform_1, window_bounds = array<i64: 256, 768>}, {transform_indices = @transform_2, window_bounds = array<i64: 1, 768>}, {transform_indices = @transform_3, window_bounds = array<i64: 128, 768>}]} {
    %c0 = arith.constant 0 : index
    %c0_0 = arith.constant 0 : index
    %0 = vector.load %arg2[%c0, %c0_0] : memref<128x256xbf16, #tpu.memory_space<vmem>>, vector<128x256xbf16>
    %c0_1 = arith.constant 0 : index
    %c0_2 = arith.constant 0 : index
    %1 = vector.load %arg3[%c0_1, %c0_2] : memref<256x768xbf16, #tpu.memory_space<vmem>>, vector<256x768xbf16>
    %cst = arith.constant dense<0.000000e+00> : vector<128x768xf32>
    %2 = tpu.matmul %0, %1, %cst {dimension_numbers = #tpu.dot_dimension_numbers<[1], [0], [0], [1], [0, 0, 1, 1], [], []>} : vector<128x256xbf16>, vector<256x768xbf16>, vector<128x768xf32> -> vector<128x768xf32>
    %c0_3 = arith.constant 0 : index
    %c0_4 = arith.constant 0 : index
    %3 = vector.load %arg4[%c0_3, %c0_4] : memref<1x768xf32, #tpu.memory_space<vmem>>, vector<1x768xf32>
    %4 = vector.broadcast %3 : vector<1x768xf32> to vector<128x768xf32>
    %5 = arith.addf %2, %4 : vector<128x768xf32>
    %6 = arith.truncf %5 : vector<128x768xf32> to vector<128x768xbf16>
    %c0_5 = arith.constant 0 : index
    %c0_6 = arith.constant 0 : index
    %7 = vector.load %arg5[%c0_5, %c0_6] : memref<128x768xbf16, #tpu.memory_space<vmem>>, vector<128x768xbf16>
    tpu.vector_store %arg5[%c0_5, %c0_6], %6 {strides = array<i32>} : memref<128x768xbf16, #tpu.memory_space<vmem>>, vector<128x768xbf16>,
    return
  }
  func.func @transform_0(%arg0: i32, %arg1: i32) -> (i32, i32) {
    %c0_i32 = arith.constant 0 : i32
    %c0_i32_0 = arith.constant 0 : i32
    return %arg0, %c0_i32 : i32, i32
  }
  func.func @transform_1(%arg0: i32, %arg1: i32) -> (i32, i32) {
    %c0_i32 = arith.constant 0 : i32
    %c0_i32_0 = arith.constant 0 : i32
    return %c0_i32, %arg1 : i32, i32
  }
  func.func @transform_2(%arg0: i32, %arg1: i32) -> (i32, i32) {
    %c0_i32 = arith.constant 0 : i32
    %c0_i32_0 = arith.constant 0 : i32
    return %c0_i32, %arg1 : i32, i32
  }
  func.func @transform_3(%arg0: i32, %arg1: i32) -> (i32, i32) {
    %c0_i32 = arith.constant 0 : i32
    return %arg0, %arg1 : i32, i32
  }
}

module attributes {stable_mosaic.version = 11 : i64} {
  func.func @kernel(%arg0: i32, %arg1: memref<128x256xbf16, #tpu.memory_space<vmem>>, %arg2: memref<256x256xbf16, #tpu.memory_space<vmem>>, %arg3: memref<1x256xf32, #tpu.memory_space<vmem>>, %arg4: memref<128x256xbf16, #tpu.memory_space<vmem>>, %arg5: memref<1x256xf32, #tpu.memory_space<vmem>>, %arg6: memref<1x256xf32, #tpu.memory_space<vmem>>, %arg7: memref<128x256xbf16, #tpu.memory_space<vmem>>) attributes {dimension_semantics = [#tpu.dimension_semantics<parallel>], iteration_bounds = array<i64: 2>, scalar_prefetch = 0 : i64, scratch_operands = 0 : i64, tpu.core_type = #tpu.core_type<tc>, window_params = [{transform_indices = @transform_0, window_bounds = array<i64: 128, 256>}, {pipeline_mode = #tpu.pipeline_mode<synchronous>, transform_indices = @transform_1, window_bounds = array<i64: 256, 256>}, {pipeline_mode = #tpu.pipeline_mode<synchronous>, transform_indices = @transform_2, window_bounds = array<i64: 1, 256>}, {transform_indices = @transform_3, window_bounds = array<i64: 128, 256>}, {pipeline_mode = #tpu.pipeline_mode<synchronous>, transform_indices = @transform_4, window_bounds = array<i64: 1, 256>}, {pipeline_mode = #tpu.pipeline_mode<synchronous>, transform_indices = @transform_5, window_bounds = array<i64: 1, 256>}, {transform_indices = @transform_6, window_bounds = array<i64: 128, 256>}]} {
    %c0 = arith.constant 0 : index
    %c0_0 = arith.constant 0 : index
    %0 = vector.load %arg1[%c0, %c0_0] : memref<128x256xbf16, #tpu.memory_space<vmem>>, vector<128x256xbf16>
    %c0_1 = arith.constant 0 : index
    %c0_2 = arith.constant 0 : index
    %1 = vector.load %arg2[%c0_1, %c0_2] : memref<256x256xbf16, #tpu.memory_space<vmem>>, vector<256x256xbf16>
    %cst = arith.constant dense<0.000000e+00> : vector<128x256xf32>
    %2 = tpu.matmul %0, %1, %cst {dimension_numbers = #tpu.dot_dimension_numbers<[1], [0], [0], [1], [0, 0, 1, 1], [], []>} : vector<128x256xbf16>, vector<256x256xbf16>, vector<128x256xf32> -> vector<128x256xf32>
    %c0_3 = arith.constant 0 : index
    %c0_4 = arith.constant 0 : index
    %3 = vector.load %arg3[%c0_3, %c0_4] : memref<1x256xf32, #tpu.memory_space<vmem>>, vector<1x256xf32>
    %4 = vector.broadcast %3 : vector<1x256xf32> to vector<128x256xf32>
    %5 = arith.addf %2, %4 : vector<128x256xf32>
    %c0_5 = arith.constant 0 : index
    %c0_6 = arith.constant 0 : index
    %6 = vector.load %arg4[%c0_5, %c0_6] : memref<128x256xbf16, #tpu.memory_space<vmem>>, vector<128x256xbf16>
    %c0_7 = arith.constant 0 : index
    %c0_8 = arith.constant 0 : index
    %7 = vector.load %arg5[%c0_7, %c0_8] : memref<1x256xf32, #tpu.memory_space<vmem>>, vector<1x256xf32>
    %c0_9 = arith.constant 0 : index
    %c0_10 = arith.constant 0 : index
    %8 = vector.load %arg6[%c0_9, %c0_10] : memref<1x256xf32, #tpu.memory_space<vmem>>, vector<1x256xf32>
    %9 = arith.extf %6 : vector<128x256xbf16> to vector<128x256xf32>
    %10 = arith.addf %5, %9 : vector<128x256xf32>
    %cst_11 = arith.constant dense<0.000000e+00> : vector<128xf32>
    %11 = vector.multi_reduction <add>, %10, %cst_11 [1] : vector<128x256xf32> to vector<128xf32>
    %12 = vector.shape_cast %11 : vector<128xf32> to vector<128x1xf32>
    %cst_12 = arith.constant 2.560000e+02 : f32
    %13 = vector.broadcast %cst_12 : f32 to vector<128x1xf32>
    %14 = arith.divf %12, %13 : vector<128x1xf32>
    %15 = vector.broadcast %14 : vector<128x1xf32> to vector<128x256xf32>
    %16 = arith.subf %10, %15 : vector<128x256xf32>
    %17 = arith.mulf %16, %16 : vector<128x256xf32>
    %cst_13 = arith.constant dense<0.000000e+00> : vector<128xf32>
    %18 = vector.multi_reduction <add>, %17, %cst_13 [1] : vector<128x256xf32> to vector<128xf32>
    %19 = vector.shape_cast %18 : vector<128xf32> to vector<128x1xf32>
    %cst_14 = arith.constant 2.560000e+02 : f32
    %20 = vector.broadcast %cst_14 : f32 to vector<128x1xf32>
    %21 = arith.divf %19, %20 : vector<128x1xf32>
    %22 = vector.broadcast %14 : vector<128x1xf32> to vector<128x256xf32>
    %23 = arith.subf %10, %22 : vector<128x256xf32>
    %cst_15 = arith.constant 9.99999996E-13 : f32
    %24 = vector.broadcast %cst_15 : f32 to vector<128x1xf32>
    %25 = arith.addf %21, %24 : vector<128x1xf32>
    %26 = math.rsqrt %25 : vector<128x1xf32>
    %27 = vector.broadcast %26 : vector<128x1xf32> to vector<128x256xf32>
    %28 = arith.mulf %23, %27 : vector<128x256xf32>
    %29 = vector.broadcast %7 : vector<1x256xf32> to vector<128x256xf32>
    %30 = arith.mulf %28, %29 : vector<128x256xf32>
    %31 = vector.broadcast %8 : vector<1x256xf32> to vector<128x256xf32>
    %32 = arith.addf %30, %31 : vector<128x256xf32>
    %33 = arith.truncf %32 : vector<128x256xf32> to vector<128x256xbf16>
    %c0_16 = arith.constant 0 : index
    %c0_17 = arith.constant 0 : index
    %34 = vector.load %arg7[%c0_16, %c0_17] : memref<128x256xbf16, #tpu.memory_space<vmem>>, vector<128x256xbf16>
    tpu.vector_store %arg7[%c0_16, %c0_17], %33 {strides = array<i32>} : memref<128x256xbf16, #tpu.memory_space<vmem>>, vector<128x256xbf16>,
    return
  }
  func.func @transform_0(%arg0: i32) -> (i32, i32) {
    %c0_i32 = arith.constant 0 : i32
    %c0_i32_0 = arith.constant 0 : i32
    return %arg0, %c0_i32 : i32, i32
  }
  func.func @transform_1(%arg0: i32) -> (i32, i32) {
    %c0_i32 = arith.constant 0 : i32
    %c0_i32_0 = arith.constant 0 : i32
    %c0_i32_1 = arith.constant 0 : i32
    return %c0_i32, %c0_i32_0 : i32, i32
  }
  func.func @transform_2(%arg0: i32) -> (i32, i32) {
    %c0_i32 = arith.constant 0 : i32
    %c0_i32_0 = arith.constant 0 : i32
    %c0_i32_1 = arith.constant 0 : i32
    return %c0_i32, %c0_i32_0 : i32, i32
  }
  func.func @transform_3(%arg0: i32) -> (i32, i32) {
    %c0_i32 = arith.constant 0 : i32
    %c0_i32_0 = arith.constant 0 : i32
    return %arg0, %c0_i32 : i32, i32
  }
  func.func @transform_4(%arg0: i32) -> (i32, i32) {
    %c0_i32 = arith.constant 0 : i32
    %c0_i32_0 = arith.constant 0 : i32
    %c0_i32_1 = arith.constant 0 : i32
    return %c0_i32, %c0_i32_0 : i32, i32
  }
  func.func @transform_5(%arg0: i32) -> (i32, i32) {
    %c0_i32 = arith.constant 0 : i32
    %c0_i32_0 = arith.constant 0 : i32
    %c0_i32_1 = arith.constant 0 : i32
    return %c0_i32, %c0_i32_0 : i32, i32
  }
  func.func @transform_6(%arg0: i32) -> (i32, i32) {
    %c0_i32 = arith.constant 0 : i32
    %c0_i32_0 = arith.constant 0 : i32
    return %arg0, %c0_i32 : i32, i32
  }
}

module attributes {stable_mosaic.version = 11 : i64} {
  func.func @kernel(%arg0: i32, %arg1: i32, %arg2: memref<128x256xbf16, #tpu.memory_space<vmem>>, %arg3: memref<256x512xbf16, #tpu.memory_space<vmem>>, %arg4: memref<1x512xf32, #tpu.memory_space<vmem>>, %arg5: memref<128x512xbf16, #tpu.memory_space<vmem>>) attributes {dimension_semantics = [#tpu.dimension_semantics<parallel>, #tpu.dimension_semantics<parallel>], iteration_bounds = array<i64: 2, 1>, scalar_prefetch = 0 : i64, scratch_operands = 0 : i64, tpu.core_type = #tpu.core_type<tc>, window_params = [{transform_indices = @transform_0, window_bounds = array<i64: 128, 256>}, {transform_indices = @transform_1, window_bounds = array<i64: 256, 512>}, {transform_indices = @transform_2, window_bounds = array<i64: 1, 512>}, {transform_indices = @transform_3, window_bounds = array<i64: 128, 512>}]} {
    %c0 = arith.constant 0 : index
    %c0_0 = arith.constant 0 : index
    %0 = vector.load %arg2[%c0, %c0_0] : memref<128x256xbf16, #tpu.memory_space<vmem>>, vector<128x256xbf16>
    %c0_1 = arith.constant 0 : index
    %c0_2 = arith.constant 0 : index
    %1 = vector.load %arg3[%c0_1, %c0_2] : memref<256x512xbf16, #tpu.memory_space<vmem>>, vector<256x512xbf16>
    %cst = arith.constant dense<0.000000e+00> : vector<128x512xf32>
    %2 = tpu.matmul %0, %1, %cst {dimension_numbers = #tpu.dot_dimension_numbers<[1], [0], [0], [1], [0, 0, 1, 1], [], []>} : vector<128x256xbf16>, vector<256x512xbf16>, vector<128x512xf32> -> vector<128x512xf32>
    %c0_3 = arith.constant 0 : index
    %c0_4 = arith.constant 0 : index
    %3 = vector.load %arg4[%c0_3, %c0_4] : memref<1x512xf32, #tpu.memory_space<vmem>>, vector<1x512xf32>
    %4 = vector.broadcast %3 : vector<1x512xf32> to vector<128x512xf32>
    %5 = arith.addf %2, %4 : vector<128x512xf32>
    %6 = arith.mulf %5, %5 : vector<128x512xf32>
    %7 = arith.mulf %5, %6 : vector<128x512xf32>
    %cst_5 = arith.constant 4.471500e-02 : f32
    %8 = vector.broadcast %cst_5 : f32 to vector<128x512xf32>
    %9 = arith.mulf %8, %7 : vector<128x512xf32>
    %10 = arith.addf %5, %9 : vector<128x512xf32>
    %cst_6 = arith.constant 0.797884583 : f32
    %11 = vector.broadcast %cst_6 : f32 to vector<128x512xf32>
    %12 = arith.mulf %11, %10 : vector<128x512xf32>
    %13 = math.tanh %12 : vector<128x512xf32>
    %cst_7 = arith.constant 1.000000e+00 : f32
    %14 = vector.broadcast %cst_7 : f32 to vector<128x512xf32>
    %15 = arith.addf %14, %13 : vector<128x512xf32>
    %cst_8 = arith.constant 5.000000e-01 : f32
    %16 = vector.broadcast %cst_8 : f32 to vector<128x512xf32>
    %17 = arith.mulf %16, %15 : vector<128x512xf32>
    %18 = arith.mulf %5, %17 : vector<128x512xf32>
    %19 = arith.truncf %18 : vector<128x512xf32> to vector<128x512xbf16>
    %c0_9 = arith.constant 0 : index
    %c0_10 = arith.constant 0 : index
    %20 = vector.load %arg5[%c0_9, %c0_10] : memref<128x512xbf16, #tpu.memory_space<vmem>>, vector<128x512xbf16>
    tpu.vector_store %arg5[%c0_9, %c0_10], %19 {strides = array<i32>} : memref<128x512xbf16, #tpu.memory_space<vmem>>, vector<128x512xbf16>,
    return
  }
  func.func @transform_0(%arg0: i32, %arg1: i32) -> (i32, i32) {
    %c0_i32 = arith.constant 0 : i32
    %c0_i32_0 = arith.constant 0 : i32
    return %arg0, %c0_i32 : i32, i32
  }
  func.func @transform_1(%arg0: i32, %arg1: i32) -> (i32, i32) {
    %c0_i32 = arith.constant 0 : i32
    %c0_i32_0 = arith.constant 0 : i32
    return %c0_i32, %arg1 : i32, i32
  }
  func.func @transform_2(%arg0: i32, %arg1: i32) -> (i32, i32) {
    %c0_i32 = arith.constant 0 : i32
    %c0_i32_0 = arith.constant 0 : i32
    return %c0_i32, %arg1 : i32, i32
  }
  func.func @transform_3(%arg0: i32, %arg1: i32) -> (i32, i32) {
    %c0_i32 = arith.constant 0 : i32
    return %arg0, %arg1 : i32, i32
  }
}

module attributes {stable_mosaic.version = 11 : i64} {
  func.func @kernel(%arg0: i32, %arg1: memref<128x512xbf16, #tpu.memory_space<vmem>>, %arg2: memref<512x256xbf16, #tpu.memory_space<vmem>>, %arg3: memref<1x256xf32, #tpu.memory_space<vmem>>, %arg4: memref<128x256xbf16, #tpu.memory_space<vmem>>, %arg5: memref<1x256xf32, #tpu.memory_space<vmem>>, %arg6: memref<1x256xf32, #tpu.memory_space<vmem>>, %arg7: memref<128x256xbf16, #tpu.memory_space<vmem>>) attributes {dimension_semantics = [#tpu.dimension_semantics<parallel>], iteration_bounds = array<i64: 2>, scalar_prefetch = 0 : i64, scratch_operands = 0 : i64, tpu.core_type = #tpu.core_type<tc>, window_params = [{transform_indices = @transform_0, window_bounds = array<i64: 128, 512>}, {pipeline_mode = #tpu.pipeline_mode<synchronous>, transform_indices = @transform_1, window_bounds = array<i64: 512, 256>}, {pipeline_mode = #tpu.pipeline_mode<synchronous>, transform_indices = @transform_2, window_bounds = array<i64: 1, 256>}, {transform_indices = @transform_3, window_bounds = array<i64: 128, 256>}, {pipeline_mode = #tpu.pipeline_mode<synchronous>, transform_indices = @transform_4, window_bounds = array<i64: 1, 256>}, {pipeline_mode = #tpu.pipeline_mode<synchronous>, transform_indices = @transform_5, window_bounds = array<i64: 1, 256>}, {transform_indices = @transform_6, window_bounds = array<i64: 128, 256>}]} {
    %c0 = arith.constant 0 : index
    %c0_0 = arith.constant 0 : index
    %0 = vector.load %arg1[%c0, %c0_0] : memref<128x512xbf16, #tpu.memory_space<vmem>>, vector<128x512xbf16>
    %c0_1 = arith.constant 0 : index
    %c0_2 = arith.constant 0 : index
    %1 = vector.load %arg2[%c0_1, %c0_2] : memref<512x256xbf16, #tpu.memory_space<vmem>>, vector<512x256xbf16>
    %cst = arith.constant dense<0.000000e+00> : vector<128x256xf32>
    %2 = tpu.matmul %0, %1, %cst {dimension_numbers = #tpu.dot_dimension_numbers<[1], [0], [0], [1], [0, 0, 1, 1], [], []>} : vector<128x512xbf16>, vector<512x256xbf16>, vector<128x256xf32> -> vector<128x256xf32>
    %c0_3 = arith.constant 0 : index
    %c0_4 = arith.constant 0 : index
    %3 = vector.load %arg3[%c0_3, %c0_4] : memref<1x256xf32, #tpu.memory_space<vmem>>, vector<1x256xf32>
    %4 = vector.broadcast %3 : vector<1x256xf32> to vector<128x256xf32>
    %5 = arith.addf %2, %4 : vector<128x256xf32>
    %c0_5 = arith.constant 0 : index
    %c0_6 = arith.constant 0 : index
    %6 = vector.load %arg4[%c0_5, %c0_6] : memref<128x256xbf16, #tpu.memory_space<vmem>>, vector<128x256xbf16>
    %c0_7 = arith.constant 0 : index
    %c0_8 = arith.constant 0 : index
    %7 = vector.load %arg5[%c0_7, %c0_8] : memref<1x256xf32, #tpu.memory_space<vmem>>, vector<1x256xf32>
    %c0_9 = arith.constant 0 : index
    %c0_10 = arith.constant 0 : index
    %8 = vector.load %arg6[%c0_9, %c0_10] : memref<1x256xf32, #tpu.memory_space<vmem>>, vector<1x256xf32>
    %9 = arith.extf %6 : vector<128x256xbf16> to vector<128x256xf32>
    %10 = arith.addf %5, %9 : vector<128x256xf32>
    %cst_11 = arith.constant dense<0.000000e+00> : vector<128xf32>
    %11 = vector.multi_reduction <add>, %10, %cst_11 [1] : vector<128x256xf32> to vector<128xf32>
    %12 = vector.shape_cast %11 : vector<128xf32> to vector<128x1xf32>
    %cst_12 = arith.constant 2.560000e+02 : f32
    %13 = vector.broadcast %cst_12 : f32 to vector<128x1xf32>
    %14 = arith.divf %12, %13 : vector<128x1xf32>
    %15 = vector.broadcast %14 : vector<128x1xf32> to vector<128x256xf32>
    %16 = arith.subf %10, %15 : vector<128x256xf32>
    %17 = arith.mulf %16, %16 : vector<128x256xf32>
    %cst_13 = arith.constant dense<0.000000e+00> : vector<128xf32>
    %18 = vector.multi_reduction <add>, %17, %cst_13 [1] : vector<128x256xf32> to vector<128xf32>
    %19 = vector.shape_cast %18 : vector<128xf32> to vector<128x1xf32>
    %cst_14 = arith.constant 2.560000e+02 : f32
    %20 = vector.broadcast %cst_14 : f32 to vector<128x1xf32>
    %21 = arith.divf %19, %20 : vector<128x1xf32>
    %22 = vector.broadcast %14 : vector<128x1xf32> to vector<128x256xf32>
    %23 = arith.subf %10, %22 : vector<128x256xf32>
    %cst_15 = arith.constant 9.99999996E-13 : f32
    %24 = vector.broadcast %cst_15 : f32 to vector<128x1xf32>
    %25 = arith.addf %21, %24 : vector<128x1xf32>
    %26 = math.rsqrt %25 : vector<128x1xf32>
    %27 = vector.broadcast %26 : vector<128x1xf32> to vector<128x256xf32>
    %28 = arith.mulf %23, %27 : vector<128x256xf32>
    %29 = vector.broadcast %7 : vector<1x256xf32> to vector<128x256xf32>
    %30 = arith.mulf %28, %29 : vector<128x256xf32>
    %31 = vector.broadcast %8 : vector<1x256xf32> to vector<128x256xf32>
    %32 = arith.addf %30, %31 : vector<128x256xf32>
    %33 = arith.truncf %32 : vector<128x256xf32> to vector<128x256xbf16>
    %c0_16 = arith.constant 0 : index
    %c0_17 = arith.constant 0 : index
    %34 = vector.load %arg7[%c0_16, %c0_17] : memref<128x256xbf16, #tpu.memory_space<vmem>>, vector<128x256xbf16>
    tpu.vector_store %arg7[%c0_16, %c0_17], %33 {strides = array<i32>} : memref<128x256xbf16, #tpu.memory_space<vmem>>, vector<128x256xbf16>,
    return
  }
  func.func @transform_0(%arg0: i32) -> (i32, i32) {
    %c0_i32 = arith.constant 0 : i32
    %c0_i32_0 = arith.constant 0 : i32
    return %arg0, %c0_i32 : i32, i32
  }
  func.func @transform_1(%arg0: i32) -> (i32, i32) {
    %c0_i32 = arith.constant 0 : i32
    %c0_i32_0 = arith.constant 0 : i32
    %c0_i32_1 = arith.constant 0 : i32
    return %c0_i32, %c0_i32_0 : i32, i32
  }
  func.func @transform_2(%arg0: i32) -> (i32, i32) {
    %c0_i32 = arith.constant 0 : i32
    %c0_i32_0 = arith.constant 0 : i32
    %c0_i32_1 = arith.constant 0 : i32
    return %c0_i32, %c0_i32_0 : i32, i32
  }
  func.func @transform_3(%arg0: i32) -> (i32, i32) {
    %c0_i32 = arith.constant 0 : i32
    %c0_i32_0 = arith.constant 0 : i32
    return %arg0, %c0_i32 : i32, i32
  }
  func.func @transform_4(%arg0: i32) -> (i32, i32) {
    %c0_i32 = arith.constant 0 : i32
    %c0_i32_0 = arith.constant 0 : i32
    %c0_i32_1 = arith.constant 0 : i32
    return %c0_i32, %c0_i32_0 : i32, i32
  }
  func.func @transform_5(%arg0: i32) -> (i32, i32) {
    %c0_i32 = arith.constant 0 : i32
    %c0_i32_0 = arith.constant 0 : i32
    %c0_i32_1 = arith.constant 0 : i32
    return %c0_i32, %c0_i32_0 : i32, i32
  }
  func.func @transform_6(%arg0: i32) -> (i32, i32) {
    %c0_i32 = arith.constant 0 : i32
    %c0_i32_0 = arith.constant 0 : i32
    return %arg0, %c0_i32 : i32, i32
  }
}

module attributes {stable_mosaic.version = 11 : i64} {
  func.func @kernel(%arg0: i32, %arg1: i32, %arg2: memref<2x256xbf16, #tpu.memory_space<vmem>>, %arg3: memref<256x128xbf16, #tpu.memory_space<vmem>>, %arg4: memref<1x128xf32, #tpu.memory_space<vmem>>, %arg5: memref<2x128xf32, #tpu.memory_space<vmem>>) attributes {dimension_semantics = [#tpu.dimension_semantics<parallel>, #tpu.dimension_semantics<parallel>], iteration_bounds = array<i64: 1, 1>, scalar_prefetch = 0 : i64, scratch_operands = 0 : i64, tpu.core_type = #tpu.core_type<tc>, window_params = [{transform_indices = @transform_0, window_bounds = array<i64: 2, 256>}, {transform_indices = @transform_1, window_bounds = array<i64: 256, 128>}, {transform_indices = @transform_2, window_bounds = array<i64: 1, 128>}, {transform_indices = @transform_3, window_bounds = array<i64: 2, 128>}]} {
    %c0 = arith.constant 0 : index
    %c0_0 = arith.constant 0 : index
    %0 = vector.load %arg2[%c0, %c0_0] : memref<2x256xbf16, #tpu.memory_space<vmem>>, vector<2x256xbf16>
    %c0_1 = arith.constant 0 : index
    %c0_2 = arith.constant 0 : index
    %1 = vector.load %arg3[%c0_1, %c0_2] : memref<256x128xbf16, #tpu.memory_space<vmem>>, vector<256x128xbf16>
    %cst = arith.constant dense<0.000000e+00> : vector<2x128xf32>
    %2 = tpu.matmul %0, %1, %cst {dimension_numbers = #tpu.dot_dimension_numbers<[1], [0], [0], [1], [0, 0, 1, 1], [], []>} : vector<2x256xbf16>, vector<256x128xbf16>, vector<2x128xf32> -> vector<2x128xf32>
    %c0_3 = arith.constant 0 : index
    %c0_4 = arith.constant 0 : index
    %3 = vector.load %arg4[%c0_3, %c0_4] : memref<1x128xf32, #tpu.memory_space<vmem>>, vector<1x128xf32>
    %4 = vector.broadcast %3 : vector<1x128xf32> to vector<2x128xf32>
    %5 = arith.addf %2, %4 : vector<2x128xf32>
    %c0_5 = arith.constant 0 : index
    %c0_6 = arith.constant 0 : index
    %6 = vector.load %arg5[%c0_5, %c0_6] : memref<2x128xf32, #tpu.memory_space<vmem>>, vector<2x128xf32>
    tpu.vector_store %arg5[%c0_5, %c0_6], %5 {strides = array<i32>} : memref<2x128xf32, #tpu.memory_space<vmem>>, vector<2x128xf32>,
    return
  }
  func.func @transform_0(%arg0: i32, %arg1: i32) -> (i32, i32) {
    %c0_i32 = arith.constant 0 : i32
    %c0_i32_0 = arith.constant 0 : i32
    return %arg0, %c0_i32 : i32, i32
  }
  func.func @transform_1(%arg0: i32, %arg1: i32) -> (i32, i32) {
    %c0_i32 = arith.constant 0 : i32
    %c0_i32_0 = arith.constant 0 : i32
    return %c0_i32, %arg1 : i32, i32
  }
  func.func @transform_2(%arg0: i32, %arg1: i32) -> (i32, i32) {
    %c0_i32 = arith.constant 0 : i32
    %c0_i32_0 = arith.constant 0 : i32
    return %c0_i32, %arg1 : i32, i32
  }
  func.func @transform_3(%arg0: i32, %arg1: i32) -> (i32, i32) {
    %c0_i32 = arith.constant 0 : i32
    return %arg0, %arg1 : i32, i32
  }
}

</mosaic_0001>

<bundles_post_ra>
// kernel: classifier_forward.12
= control target key start
LH: loop header
LB: loop body
LE: loop exit
PB: predicated region body
PF: predicated region fallthrough
CT: control target
= control target key end

     0   :  { %s1098_s15 = smov 0   ;;  %s1100_s16 = smov 0   ;;  %s1636_s0 = inlined_call_operand.vmem [shape: bf16[2,128,256], index: 0, kind: input, shape index: {}]   ;;  %s1637_s1 = inlined_call_operand.vmem [shape: f32[128,256], index: 1, kind: input, shape index: {}]   ;;  %s1638_s2 = inlined_call_operand.vmem [shape: f32[1,256], index: 2, kind: input, shape index: {}]   ;;  %s1639_s3 = inlined_call_operand.vmem [shape: f32[1,256], index: 3, kind: input, shape index: {}]   ;;  %s1640_s4 = inlined_call_operand.vmem [shape: bf16[2,128,256], index: 4, kind: output, shape index: {}]  }
   0x1   :  { %s1102_s17 = smov 0  }
   0x2 LB: > { %s26_s18 = sadd.s32 1, %s1067_s16  ;;  %p952_p0 = scmp.ge.s32.totalorder %s1071_s17, 1  ;;  %s1071_s17 = sphi %s1102_s17, %s14_s17   ;;  %s1067_s16 = sphi %s1100_s16, %s1642_s16   ;;  %s1063_s15 = sphi %s1098_s15, %s1641_s15  }
   0x3   : > { %p28_p1 = scmp.ge.s32.totalorder %s26_s18, 2  ;;  %p196_p2 = scmp.lt.s32.totalorder %s1071_s17, 3 }
   0x5   : > { %s1644_s18 = smov (%p28_p1, %s26_s18), 0  ;;  %p197_p3 = pnand %p952_p0, %p196_p2 }
   0x6   : > { %p239_p4 = scmp.lt.s32.totalorder (!%p197_p3), %s1063_s15, 1 }
   0x7   : > { %200 = sbr.rel (%p197_p3) target bundleno = 374 (0x176), region = 36 }
   0xc   : > { %s1646_s15 = smov (!%p239_p4, %s1063_s15), 1  ;;  %v315_v0 = vld [vmem:[%s1637_s1] sm:$0xff]  ;;  %v316_v1 = vld [vmem:[%s1637_s1 + $0x8] sm:$0xff]  ;;  %v317_v4 = vld [vmem:[%s1637_s1 + $0x10] sm:$0xff] }
   0xd   : > { %s975_s19 = sshll.u32 %s1646_s15, 7  ;;  %v319_v2 = vld [vmem:[%s1637_s1 + $0x20] sm:$0xff]  ;;  %v320_v3 = vld [vmem:[%s1637_s1 + $0x28] sm:$0xff]  ;;  %v318_v5 = vld [vmem:[%s1637_s1 + $0x18] sm:$0xff] }
   0xe   : > { %s1133_s28 = scalar_lea.vmem %s1636_s0, %s975_s19  ;;  %v321_v14 = vld [vmem:[%s1637_s1 + $0x30] sm:$0xff]  ;;  %v322_v15 = vld [vmem:[%s1637_s1 + $0x38] sm:$0xff]  ;;  %v323_v30 = vld [vmem:[%s1637_s1 + $0x40] sm:$0xff]  ;;  %s1521_s6 = scalar_lea.vmem %s1640_s4, %s975_s19 }
   0xf   : > { %v267_v6 = vld [vmem:[%s1133_s28] sm:$0xff]  ;;  %v269_v7 = vld [vmem:[%s1133_s28 + $0x10] sm:$0xff]  ;;  %v268_v8 = vld [vmem:[%s1133_s28 + $0x8] sm:$0xff] }
  0x10   : > { %v283_v9 = vunpack.c.l.bf16 %v267_v6  ;;  %v284_v10 = vunpack.c.h.bf16 %v267_v6  ;;  %v287_v11 = vunpack.c.l.bf16 %v269_v7  ;;  %v288_v12 = vunpack.c.h.bf16 %v269_v7  ;;  %v270_v13 = vld [vmem:[%s1133_s28 + $0x18] sm:$0xff]  ;;  %v271_v20 = vld [vmem:[%s1133_s28 + $0x20] sm:$0xff]  ;;  %v272_v25 = vld [vmem:[%s1133_s28 + $0x28] sm:$0xff] }
  0x11   : > { %v285_v16 = vunpack.c.l.bf16 %v268_v8  ;;  %v286_v17 = vunpack.c.h.bf16 %v268_v8  ;;  %v289_v18 = vunpack.c.l.bf16 %v270_v13  ;;  %v290_v19 = vunpack.c.h.bf16 %v270_v13  ;;  %v324_v31 = vld [vmem:[%s1637_s1 + $0x48] sm:$0xff]  ;;  %v273_v32 = vld [vmem:[%s1133_s28 + $0x30] sm:$0xff]  ;;  %v326_v38 = vld [vmem:[%s1637_s1 + $0x58] sm:$0xff] }
  0x12   : > { %v1155_v21 = vadd.f32 %v315_v0, %v283_v9  ;;  %v1157_v22 = vadd.f32 %v316_v1, %v284_v10  ;;  %v1159_v23 = vadd.f32 %v319_v2, %v287_v11  ;;  %v1161_v24 = vadd.f32 %v320_v3, %v288_v12  ;;  %v325_v37 = vld [vmem:[%s1637_s1 + $0x50] sm:$0xff]  ;;  %v274_v39 = vld [vmem:[%s1133_s28 + $0x38] sm:$0xff]  ;;  %v327_v44 = vld [vmem:[%s1637_s1 + $0x60] sm:$0xff] }
  0x13   : > { %v1164_v26 = vadd.f32 %v317_v4, %v285_v16  ;;  %v1166_v27 = vadd.f32 %v318_v5, %v286_v17  ;;  %v1168_v28 = vadd.f32 %v321_v14, %v289_v18  ;;  %v1170_v29 = vadd.f32 %v322_v15, %v290_v19  ;;  %v328_v45 = vld [vmem:[%s1637_s1 + $0x68] sm:$0xff]  ;;  %v329_v50 = vld [vmem:[%s1637_s1 + $0x70] sm:$0xff]  ;;  %v330_v51 = vld [vmem:[%s1637_s1 + $0x78] sm:$0xff] }
  0x14   : > { %v379_v33 = vadd.f32 %v1157_v22, %v1155_v21  ;;  %v385_v34 = vadd.f32 %v1161_v24, %v1159_v23  ;;  %v291_v35 = vunpack.c.l.bf16 %v271_v20  ;;  %v292_v36 = vunpack.c.h.bf16 %v271_v20  ;;  %v275_v52 = vld [vmem:[%s1133_s28 + $0x40] sm:$0xff]  ;;  %v276_v57 = vld [vmem:[%s1133_s28 + $0x48] sm:$0xff]  ;;  %v277_v0 = vld [vmem:[%s1133_s28 + $0x50] sm:$0xff] }
  0x15   : > { %v382_v40 = vadd.f32 %v1166_v27, %v1164_v26  ;;  %v388_v41 = vadd.f32 %v1170_v29, %v1168_v28  ;;  %v293_v42 = vunpack.c.l.bf16 %v272_v25  ;;  %v294_v43 = vunpack.c.h.bf16 %v272_v25  ;;  %v331_v3 = vld [vmem:[%s1637_s1 + $0x80] sm:$0xff]  ;;  %v278_v6 = vld [vmem:[%s1133_s28 + $0x58] sm:$0xff]  ;;  %v332_v7 = vld [vmem:[%s1637_s1 + $0x88] sm:$0xff] }
  0x16   : > { %380 = vadd.xlane.f32.xlu0 %v379_v33  ;;  %386 = vadd.xlane.f32.xlu1 %v385_v34  ;;  %v1200_v46 = vadd.f32 %v323_v30, %v291_v35  ;;  %v1202_v47 = vadd.f32 %v324_v31, %v292_v36  ;;  %v295_v48 = vunpack.c.l.bf16 %v273_v32  ;;  %v296_v49 = vunpack.c.h.bf16 %v273_v32  ;;  %v333_v8 = vld [vmem:[%s1637_s1 + $0x90] sm:$0xff]  ;;  %v334_v9 = vld [vmem:[%s1637_s1 + $0x98] sm:$0xff]  ;;  %v335_v15 = vld [vmem:[%s1637_s1 + $0xa0] sm:$0xff] }
  0x17   : > { %v1211_v53 = vadd.f32 %v325_v37, %v293_v42  ;;  %v1213_v54 = vadd.f32 %v326_v38, %v294_v43  ;;  %v297_v55 = vunpack.c.l.bf16 %v274_v39  ;;  %v298_v56 = vunpack.c.h.bf16 %v274_v39  ;;  %v336_v16 = vld [vmem:[%s1637_s1 + $0xa8] sm:$0xff]  ;;  %v279_v19 = vld [vmem:[%s1133_s28 + $0x60] sm:$0xff]  ;;  %v337_v31 = vld [vmem:[%s1637_s1 + $0xb0] sm:$0xff] }
  0x18   : > { %v1216_v58 = vadd.f32 %v327_v44, %v295_v48  ;;  %v1218_v59 = vadd.f32 %v328_v45, %v296_v49  ;;  %v391_v60 = vadd.f32 %v1202_v47, %v1200_v46  ;;  %v299_v63 = vunpack.c.l.bf16 %v275_v52  ;;  %v338_v32 = vld [vmem:[%s1637_s1 + $0xb8] sm:$0xff]  ;;  %v280_v33 = vld [vmem:[%s1133_s28 + $0x68] sm:$0xff]  ;;  %v281_v48 = vld [vmem:[%s1133_s28 + $0x70] sm:$0xff] }
  0x19   : > { %v1222_v61 = vadd.f32 %v329_v50, %v297_v55  ;;  %v1224_v62 = vadd.f32 %v330_v51, %v298_v56  ;;  %v394_v1 = vadd.f32 %v1213_v54, %v1211_v53  ;;  %v300_v2 = vunpack.c.h.bf16 %v275_v52  ;;  %v340_v43 = vld [vmem:[%s1637_s1 + $0xc8] sm:$0xff]  ;;  %v341_v49 = vld [vmem:[%s1637_s1 + $0xd0] sm:$0xff]  ;;  %v342_v50 = vld [vmem:[%s1637_s1 + $0xd8] sm:$0xff] }
  0x1a   : > { %383 = vadd.xlane.f32.xlu0 %v382_v40  ;;  %389 = vadd.xlane.f32.xlu1 %v388_v41  ;;  %v301_v4 = vunpack.c.l.bf16 %v276_v57  ;;  %v302_v5 = vunpack.c.h.bf16 %v276_v57  ;;  %v397_v10 = vadd.f32 %v1218_v59, %v1216_v58  ;;  %v303_v11 = vunpack.c.l.bf16 %v277_v0  ;;  %v339_v40 = vld [vmem:[%s1637_s1 + $0xc0] sm:$0xff]  ;;  %v282_v51 = vld [vmem:[%s1133_s28 + $0x78] sm:$0xff] }
  0x1b   : > { %v304_v12 = vunpack.c.h.bf16 %v277_v0  ;;  %v400_v13 = vadd.f32 %v1224_v62, %v1222_v61  ;;  %v1246_v14 = vadd.f32 %v331_v3, %v299_v63  ;;  %v305_v17 = vunpack.c.l.bf16 %v278_v6  ;;  %v344_v3 = vld [vmem:[%s1637_s1 + $0xe8] sm:$0xff] }
  0x1c   : > { %v306_v18 = vunpack.c.h.bf16 %v278_v6  ;;  %v1255_v20 = vadd.f32 %v332_v7, %v300_v2  ;;  %v1257_v25 = vadd.f32 %v333_v8, %v301_v4  ;;  %v1259_v30 = vadd.f32 %v334_v9, %v302_v5  ;;  %v343_v2 = vld [vmem:[%s1637_s1 + $0xe0] sm:$0xff]  ;;  %v345_v6 = vld [vmem:[%s1637_s1 + $0xf0] sm:$0xff]  ;;  %v346_v7 = vld [vmem:[%s1637_s1 + $0xf8] sm:$0xff] }
  0x1d   : > { %v1268_v34 = vadd.f32 %v335_v15, %v303_v11  ;;  %v1270_v35 = vadd.f32 %v336_v16, %v304_v12  ;;  %v307_v36 = vunpack.c.l.bf16 %v279_v19  ;;  %v1272_v37 = vadd.f32 %v337_v31, %v305_v17 }
  0x1e   : > { %392 = vadd.xlane.f32.xlu0 %v391_v60  ;;  %395 = vadd.xlane.f32.xlu1 %v394_v1  ;;  %v1274_v38 = vadd.f32 %v338_v32, %v306_v18  ;;  %v308_v39 = vunpack.c.h.bf16 %v279_v19  ;;  %v403_v41 = vadd.f32 %v1255_v20, %v1246_v14  ;;  %v406_v42 = vadd.f32 %v1259_v30, %v1257_v25 }
  0x1f   : > { %v309_v44 = vunpack.c.l.bf16 %v280_v33  ;;  %v310_v45 = vunpack.c.h.bf16 %v280_v33  ;;  %v409_v52 = vadd.f32 %v1270_v35, %v1268_v34  ;;  %v1296_v55 = vadd.f32 %v339_v40, %v307_v36 }
  0x20   : > { %v412_v56 = vadd.f32 %v1274_v38, %v1272_v37  ;;  %v1300_v57 = vadd.f32 %v340_v43, %v308_v39  ;;  %v311_v60 = vunpack.c.l.bf16 %v281_v48  ;;  %v312_v63 = vunpack.c.h.bf16 %v281_v48 }
  0x21   : > { %v1302_v0 = vadd.f32 %v341_v49, %v309_v44  ;;  %v1304_v1 = vadd.f32 %v342_v50, %v310_v45  ;;  %v313_v4 = vunpack.c.l.bf16 %v282_v51  ;;  %v314_v5 = vunpack.c.h.bf16 %v282_v51 }
  0x22   : > { %398 = vadd.xlane.f32.xlu0 %v397_v10  ;;  %401 = vadd.xlane.f32.xlu1 %v400_v13  ;;  %v415_v8 = vadd.f32 %v1300_v57, %v1296_v55  ;;  %v1320_v9 = vadd.f32 %v343_v2, %v311_v60  ;;  %v1322_v10 = vadd.f32 %v344_v3, %v312_v63 }
  0x23   : > { %v418_v11 = vadd.f32 %v1304_v1, %v1302_v0  ;;  %v1326_v12 = vadd.f32 %v345_v6, %v313_v4  ;;  %v1328_v13 = vadd.f32 %v346_v7, %v314_v5 }
  0x24   : > { %v421_v15 = vadd.f32 %v1322_v10, %v1320_v9 }
  0x25   : > { %v424_v16 = vadd.f32 %v1328_v13, %v1326_v12 }
  0x26   : > { %404 = vadd.xlane.f32.xlu0 %v403_v41  ;;  %407 = vadd.xlane.f32.xlu1 %v406_v42 }
  0x2a   : > { %410 = vadd.xlane.f32.xlu0 %v409_v52  ;;  %413 = vadd.xlane.f32.xlu1 %v412_v56 }
  0x2e   : > { %416 = vadd.xlane.f32.xlu0 %v415_v8  ;;  %419 = vadd.xlane.f32.xlu1 %v418_v11 }
  0x32   : > { %422 = vadd.xlane.f32.xlu0 %v421_v15  ;;  %425 = vadd.xlane.f32.xlu1 %v424_v16 }
  0x9f   : > { %v381_v17 = vpop.xlane.xlu0 %380  ;;  %v387_v18 = vpop.xlane.xlu1 %386 }
  0xa0   : > { %v428_v19 = vmul.f32 0.00390625, %v381_v17  ;;  %v430_v31 = vmul.f32 0.00390625, %v387_v18 }
  0xa2   : > { %v1335_v32 = vsub.f32 %v1155_v21, %v428_v19  ;;  %v1338_v33 = vsub.f32 %v1157_v22, %v428_v19  ;;  %v1341_v36 = vsub.f32 %v1159_v23, %v430_v31  ;;  %v1344_v39 = vsub.f32 %v1161_v24, %v430_v31 }
  0xa3   : > { %v384_v40 = vpop.xlane.xlu0 %383  ;;  %v390_v41 = vpop.xlane.xlu1 %389 }
  0xa4   : > { %v429_v42 = vmul.f32 0.00390625, %v384_v40  ;;  %v431_v43 = vmul.f32 0.00390625, %v390_v41  ;;  %v476_v44 = vmul.f32 %v1335_v32, %v1335_v32  ;;  %v477_v21 = vmul.f32 %v1338_v33, %v1338_v33 }
  0xa5   : > { %v480_v22 = vmul.f32 %v1341_v36, %v1341_v36  ;;  %v481_v23 = vmul.f32 %v1344_v39, %v1344_v39 }
  0xa6   : > { %v1355_v45 = vsub.f32 %v1164_v26, %v429_v42  ;;  %v1358_v24 = vsub.f32 %v1166_v27, %v429_v42  ;;  %v1361_v48 = vsub.f32 %v1168_v28, %v431_v43  ;;  %v1364_v49 = vsub.f32 %v1170_v29, %v431_v43 }
  0xa7   : > { %v393_v50 = vpop.xlane.xlu0 %392  ;;  %v508_v51 = vadd.f32 %v477_v21, %v476_v44  ;;  %v396_v52 = vpop.xlane.xlu1 %395  ;;  %v514_v27 = vadd.f32 %v481_v23, %v480_v22 }
  0xa8   : > { %v432_v56 = vmul.f32 0.00390625, %v393_v50  ;;  %v433_v60 = vmul.f32 0.00390625, %v396_v52  ;;  %v478_v63 = vmul.f32 %v1355_v45, %v1355_v45  ;;  %v479_v26 = vmul.f32 %v1358_v24, %v1358_v24 }
  0xa9   : > { %509 = vadd.xlane.f32.xlu0 %v508_v51  ;;  %v482_v28 = vmul.f32 %v1361_v48, %v1361_v48  ;;  %v483_v29 = vmul.f32 %v1364_v49, %v1364_v49 }
  0xaa   : > { %v1375_v2 = vsub.f32 %v1200_v46, %v432_v56  ;;  %v1378_v3 = vsub.f32 %v1202_v47, %v432_v56  ;;  %v1381_v4 = vsub.f32 %v1211_v53, %v433_v60  ;;  %v1384_v5 = vsub.f32 %v1213_v54, %v433_v60 }
  0xab   : > { %v399_v6 = vpop.xlane.xlu0 %398  ;;  %v511_v7 = vadd.f32 %v479_v26, %v478_v63  ;;  %v402_v8 = vpop.xlane.xlu1 %401  ;;  %v517_v47 = vadd.f32 %v483_v29, %v482_v28 }
  0xac   : > { %v434_v11 = vmul.f32 0.00390625, %v399_v6  ;;  %v435_v15 = vmul.f32 0.00390625, %v402_v8  ;;  %v484_v16 = vmul.f32 %v1375_v2, %v1375_v2  ;;  %v485_v46 = vmul.f32 %v1378_v3, %v1378_v3 }
  0xad   : > { %515 = vadd.xlane.f32.xlu0 %v514_v27  ;;  %512 = vadd.xlane.f32.xlu1 %v511_v7  ;;  %v486_v53 = vmul.f32 %v1381_v4, %v1381_v4  ;;  %v487_v54 = vmul.f32 %v1384_v5, %v1384_v5 }
  0xae   : > { %v1395_v17 = vsub.f32 %v1216_v58, %v434_v11  ;;  %v1398_v18 = vsub.f32 %v1218_v59, %v434_v11  ;;  %v1401_v19 = vsub.f32 %v1222_v61, %v435_v15  ;;  %v1404_v31 = vsub.f32 %v1224_v62, %v435_v15 }
  0xaf   : > { %v405_v40 = vpop.xlane.xlu0 %404  ;;  %v520_v41 = vadd.f32 %v485_v46, %v484_v16  ;;  %v408_v42 = vpop.xlane.xlu1 %407  ;;  %v523_v59 = vadd.f32 %v487_v54, %v486_v53 }
  0xb0   : > { %v436_v43 = vmul.f32 0.00390625, %v405_v40  ;;  %v437_v44 = vmul.f32 0.00390625, %v408_v42  ;;  %v488_v21 = vmul.f32 %v1395_v17, %v1395_v17  ;;  %v489_v58 = vmul.f32 %v1398_v18, %v1398_v18 }
  0xb1   : > { %518 = vadd.xlane.f32.xlu1 %v517_v47  ;;  %521 = vadd.xlane.f32.xlu0 %v520_v41  ;;  %v490_v61 = vmul.f32 %v1401_v19, %v1401_v19  ;;  %v491_v62 = vmul.f32 %v1404_v31, %v1404_v31 }
  0xb2   : > { %v1415_v22 = vsub.f32 %v1246_v14, %v436_v43  ;;  %v1418_v23 = vsub.f32 %v1255_v20, %v436_v43  ;;  %v1421_v50 = vsub.f32 %v1257_v25, %v437_v44  ;;  %v1424_v51 = vsub.f32 %v1259_v30, %v437_v44 }
  0xb3   : > { %v411_v52 = vpop.xlane.xlu0 %410  ;;  %v526_v56 = vadd.f32 %v489_v58, %v488_v21  ;;  %v414_v60 = vpop.xlane.xlu1 %413  ;;  %v529_v20 = vadd.f32 %v491_v62, %v490_v61 }
  0xb4   : > { %v438_v63 = vmul.f32 0.00390625, %v411_v52  ;;  %v439_v26 = vmul.f32 0.00390625, %v414_v60  ;;  %v492_v27 = vmul.f32 %v1415_v22, %v1415_v22  ;;  %v493_v14 = vmul.f32 %v1418_v23, %v1418_v23 }
  0xb5   : > { %524 = vadd.xlane.f32.xlu1 %v523_v59  ;;  %527 = vadd.xlane.f32.xlu0 %v526_v56  ;;  %v494_v25 = vmul.f32 %v1421_v50, %v1421_v50  ;;  %v495_v30 = vmul.f32 %v1424_v51, %v1424_v51 }
  0xb6   : > { %v1435_v28 = vsub.f32 %v1268_v34, %v438_v63  ;;  %v1438_v29 = vsub.f32 %v1270_v35, %v438_v63  ;;  %v1441_v6 = vsub.f32 %v1272_v37, %v439_v26  ;;  %v1444_v7 = vsub.f32 %v1274_v38, %v439_v26 }
  0xb7   : > { %v417_v8 = vpop.xlane.xlu0 %416  ;;  %v532_v11 = vadd.f32 %v493_v14, %v492_v27  ;;  %v420_v15 = vpop.xlane.xlu1 %419  ;;  %v535_v35 = vadd.f32 %v495_v30, %v494_v25  ;;  %v638_v30 = vlaneseq }
  0xb8   : > { %v440_v16 = vmul.f32 0.00390625, %v417_v8  ;;  %v441_v46 = vmul.f32 0.00390625, %v420_v15  ;;  %v496_v47 = vmul.f32 %v1435_v28, %v1435_v28  ;;  %v497_v34 = vmul.f32 %v1438_v29, %v1438_v29 }
  0xb9   : > { %530 = vadd.xlane.f32.xlu1 %v529_v20  ;;  %533 = vadd.xlane.f32.xlu0 %v532_v11  ;;  %v498_v37 = vmul.f32 %v1441_v6, %v1441_v6  ;;  %v499_v38 = vmul.f32 %v1444_v7, %v1444_v7 }
  0xba   : > { %v1455_v53 = vsub.f32 %v1296_v55, %v440_v16  ;;  %v1458_v54 = vsub.f32 %v1300_v57, %v440_v16  ;;  %v1461_v40 = vsub.f32 %v1302_v0, %v441_v46  ;;  %v1464_v41 = vsub.f32 %v1304_v1, %v441_v46 }
  0xbb   : > { %v423_v42 = vpop.xlane.xlu0 %422  ;;  %v538_v43 = vadd.f32 %v497_v34, %v496_v47  ;;  %v426_v44 = vpop.xlane.xlu1 %425  ;;  %v541_v57 = vadd.f32 %v499_v38, %v498_v37  ;;  %v639_v34 = vshrl.u32 %v638_v30, 7 }
  0xbc   : > { %v442_v21 = vmul.f32 0.00390625, %v423_v42  ;;  %v443_v58 = vmul.f32 0.00390625, %v426_v44  ;;  %v500_v59 = vmul.f32 %v1455_v53, %v1455_v53  ;;  %v501_v55 = vmul.f32 %v1458_v54, %v1458_v54 }
  0xbd   : > { %536 = vadd.xlane.f32.xlu1 %v535_v35  ;;  %539 = vadd.xlane.f32.xlu0 %v538_v43  ;;  %v502_v0 = vmul.f32 %v1461_v40, %v1461_v40  ;;  %v503_v1 = vmul.f32 %v1464_v41, %v1464_v41 }
  0xbe   : > { %v1475_v61 = vsub.f32 %v1320_v9, %v442_v21  ;;  %v1478_v62 = vsub.f32 %v1322_v10, %v442_v21  ;;  %v1481_v52 = vsub.f32 %v1326_v12, %v443_v58  ;;  %v1484_v56 = vsub.f32 %v1328_v13, %v443_v58 }
  0xbf   : > { %v544_v60 = vadd.f32 %v501_v55, %v500_v59  ;;  %v547_v9 = vadd.f32 %v503_v1, %v502_v0  ;;  %v640_v21 = vsub.s32 0, %v639_v34  ;;  %v636_v55 = vld [vmem:[%s1638_s2] sm:$0x3] }
  0xc0   : > { %v504_v63 = vmul.f32 %v1475_v61, %v1475_v61  ;;  %v505_v26 = vmul.f32 %v1478_v62, %v1478_v62  ;;  %v506_v10 = vmul.f32 %v1481_v52, %v1481_v52  ;;  %v507_v12 = vmul.f32 %v1484_v56, %v1484_v56 }
  0xc1   : > { %542 = vadd.xlane.f32.xlu1 %v541_v57  ;;  %545 = vadd.xlane.f32.xlu0 %v544_v60  ;;  %v644_v57 = vsub.s32 1, %v639_v34  ;;  %v680_v60 = vld [vmem:[%s1639_s3] sm:$0x3] }
  0xc2   : > { %v550_v27 = vadd.f32 %v505_v26, %v504_v63  ;;  %v553_v13 = vadd.f32 %v507_v12, %v506_v10 }
  0xc3   : > { %v1506_v30 = vrot.slane %v680_v60, %v644_v57 }
  0xc5   : > { %548 = vadd.xlane.f32.xlu1 %v547_v9  ;;  %551 = vadd.xlane.f32.xlu0 %v550_v27  ;;  %v1500_v9 = vrot.slane %v636_v55, %v640_v21  ;;  %v1502_v27 = vrot.slane %v636_v55, %v644_v57 }
  0xc9   : > { %554 = vadd.xlane.f32.xlu1 %v553_v13 }
 0x132   : > { %v510_v14 = vpop.xlane.xlu0 %509 }
 0x133   : > { %v556_v20 = vmul.f32 0.00390625, %v510_v14 }
 0x135   : > { %v572_v25 = vadd.f32 1e-12, %v556_v20 }
 0x136   : > { %v513_v8 = vpop.xlane.xlu1 %512  ;;  %v516_v11 = vpop.xlane.xlu0 %515 }
 0x137   : > { %1017 = vrsqrt.f32 %v572_v25  ;;  %v557_v15 = vmul.f32 0.00390625, %v513_v8  ;;  %v558_v16 = vmul.f32 0.00390625, %v516_v11  ;;  %v1504_v25 = vrot.slane %v680_v60, %v640_v21 }
 0x139   : > { %v573_v46 = vadd.f32 1e-12, %v557_v15  ;;  %v574_v47 = vadd.f32 1e-12, %v558_v16 }
 0x13a   : > { %v519_v35 = vpop.xlane.xlu1 %518  ;;  %v522_v37 = vpop.xlane.xlu0 %521 }
 0x13b   : > { %1019 = vrsqrt.f32 %v573_v46  ;;  %v559_v38 = vmul.f32 0.00390625, %v519_v35  ;;  %v560_v42 = vmul.f32 0.00390625, %v522_v37 }
 0x13c   : > { %1021 = vrsqrt.f32 %v574_v47 }
 0x13d   : > { %v575_v43 = vadd.f32 1e-12, %v559_v38  ;;  %v576_v44 = vadd.f32 1e-12, %v560_v42 }
 0x13e   : > { %v525_v58 = vpop.xlane.xlu1 %524  ;;  %v528_v59 = vpop.xlane.xlu0 %527 }
 0x13f   : > { %1023 = vrsqrt.f32 %v575_v43  ;;  %v561_v0 = vmul.f32 0.00390625, %v525_v58  ;;  %v562_v1 = vmul.f32 0.00390625, %v528_v59 }
 0x140   : > { %1025 = vrsqrt.f32 %v576_v44 }
 0x141   : > { %v577_v63 = vadd.f32 1e-12, %v561_v0  ;;  %v578_v26 = vadd.f32 1e-12, %v562_v1 }
 0x142   : > { %v531_v10 = vpop.xlane.xlu1 %530  ;;  %v534_v12 = vpop.xlane.xlu0 %533 }
 0x143   : > { %1027 = vrsqrt.f32 %v577_v63  ;;  %v563_v13 = vmul.f32 0.00390625, %v531_v10  ;;  %v564_v14 = vmul.f32 0.00390625, %v534_v12 }
 0x144   : > { %v1018_v20 = vpop.eup %1017  ;;  %1029 = vrsqrt.f32 %v578_v26 }
 0x145   : > { %v604_v8 = vmul.f32 %v1018_v20, %v1335_v32  ;;  %v605_v11 = vmul.f32 %v1018_v20, %v1338_v33  ;;  %v579_v15 = vadd.f32 1e-12, %v563_v13  ;;  %v580_v16 = vadd.f32 1e-12, %v564_v14 }
 0x146   : > { %v537_v46 = vpop.xlane.xlu1 %536  ;;  %v540_v47 = vpop.xlane.xlu0 %539 }
 0x147   : > { %v648_v34 = vmul.f32 %v1500_v9, %v604_v8  ;;  %v649_v35 = vmul.f32 %v1502_v27, %v605_v11  ;;  %1031 = vrsqrt.f32 %v579_v15  ;;  %v565_v37 = vmul.f32 0.00390625, %v537_v46 }
 0x148   : > { %v1020_v38 = vpop.eup %1019  ;;  %1033 = vrsqrt.f32 %v580_v16  ;;  %v566_v42 = vmul.f32 0.00390625, %v540_v47 }
 0x149   : > { %v1022_v43 = vpop.eup %1021  ;;  %v692_v44 = vadd.f32 %v1504_v25, %v648_v34  ;;  %v693_v32 = vadd.f32 %v1506_v30, %v649_v35  ;;  %v606_v33 = vmul.f32 %v1020_v38, %v1355_v45  ;;  %v607_v21 = vmul.f32 %v1020_v38, %v1358_v24 }
 0x14a   : > { %v608_v58 = vmul.f32 %v1022_v43, %v1341_v36  ;;  %v609_v59 = vmul.f32 %v1022_v43, %v1344_v39  ;;  %v581_v55 = vadd.f32 1e-12, %v565_v37  ;;  %v582_v57 = vadd.f32 1e-12, %v566_v42  ;;  %v543_v0 = vpop.xlane.xlu1 %542  ;;  %v546_v1 = vpop.xlane.xlu0 %545 }
 0x14b   : > { %v977_v60 = vpack.c.bf16 %v693_v32, %v692_v44  ;;  %v650_v45 = vmul.f32 %v1500_v9, %v606_v33  ;;  %v651_v24 = vmul.f32 %v1502_v27, %v607_v21  ;;  %v567_v63 = vmul.f32 0.00390625, %v543_v0 }
 0x14c   : > { %v1024_v26 = vpop.eup %1023  ;;  %v652_v10 = vmul.f32 %v1500_v9, %v608_v58  ;;  %v653_v12 = vmul.f32 %v1502_v27, %v609_v59  ;;  %1035 = vrsqrt.f32 %v581_v55  ;;  %v568_v36 = vmul.f32 0.00390625, %v546_v1 }
 0x14d   : > { %v1026_v13 = vpop.eup %1025  ;;  %820 = vst [vmem:[%s1521_s6] sm:$0xff] %v977_v60  ;;  %v694_v39 = vadd.f32 %v1504_v25, %v650_v45  ;;  %v695_v14 = vadd.f32 %v1506_v30, %v651_v24  ;;  %v610_v20 = vmul.f32 %v1024_v26, %v1361_v48  ;;  %v611_v8 = vmul.f32 %v1024_v26, %v1364_v49 }
 0x14e   : > { %v696_v11 = vadd.f32 %v1504_v25, %v652_v10  ;;  %v697_v15 = vadd.f32 %v1506_v30, %v653_v12  ;;  %v612_v16 = vmul.f32 %v1026_v13, %v1375_v2  ;;  %v613_v46 = vmul.f32 %v1026_v13, %v1378_v3  ;;  %v549_v43 = vpop.xlane.xlu1 %548 }
 0x14f   : > { %v978_v47 = vpack.c.bf16 %v695_v14, %v694_v39  ;;  %v654_v34 = vmul.f32 %v1500_v9, %v610_v20  ;;  %v655_v35 = vmul.f32 %v1502_v27, %v611_v8  ;;  %1037 = vrsqrt.f32 %v582_v57  ;;  %v552_v14 = vpop.xlane.xlu0 %551 }
 0x150   : > { %v1028_v37 = vpop.eup %1027  ;;  %v979_v48 = vpack.c.bf16 %v697_v15, %v696_v11  ;;  %v656_v49 = vmul.f32 %v1500_v9, %v612_v16  ;;  %v657_v38 = vmul.f32 %v1502_v27, %v613_v46  ;;  %v583_v42 = vadd.f32 1e-12, %v567_v63 }
 0x151   : > { %v1030_v44 = vpop.eup %1029  ;;  %821 = vst [vmem:[%s1521_s6 + $0x8] sm:$0xff] %v978_v47  ;;  %v698_v2 = vadd.f32 %v1504_v25, %v654_v34  ;;  %v699_v3 = vadd.f32 %v1506_v30, %v655_v35  ;;  %v614_v32 = vmul.f32 %v1028_v37, %v1381_v4  ;;  %v615_v33 = vmul.f32 %v1028_v37, %v1384_v5 }
 0x152   : > { %822 = vst [vmem:[%s1521_s6 + $0x10] sm:$0xff] %v979_v48  ;;  %v700_v21 = vadd.f32 %v1504_v25, %v656_v49  ;;  %v701_v58 = vadd.f32 %v1506_v30, %v657_v38  ;;  %v616_v59 = vmul.f32 %v1030_v44, %v1395_v17  ;;  %v617_v55 = vmul.f32 %v1030_v44, %v1398_v18  ;;  %v555_v20 = vpop.xlane.xlu1 %554 }
 0x153   : > { %v980_v57 = vpack.c.bf16 %v699_v3, %v698_v2  ;;  %v658_v0 = vmul.f32 %v1500_v9, %v614_v32  ;;  %v659_v1 = vmul.f32 %v1502_v27, %v615_v33  ;;  %1039 = vrsqrt.f32 %v583_v42 }
 0x154   : > { %v1032_v4 = vpop.eup %1031  ;;  %v981_v60 = vpack.c.bf16 %v701_v58, %v700_v21  ;;  %v660_v5 = vmul.f32 %v1500_v9, %v616_v59  ;;  %v661_v45 = vmul.f32 %v1502_v27, %v617_v55  ;;  %v584_v24 = vadd.f32 1e-12, %v568_v36 }
 0x155   : > { %v1034_v63 = vpop.eup %1033  ;;  %823 = vst [vmem:[%s1521_s6 + $0x18] sm:$0xff] %v980_v57  ;;  %v702_v17 = vadd.f32 %v1504_v25, %v658_v0  ;;  %v703_v18 = vadd.f32 %v1506_v30, %v659_v1  ;;  %v618_v26 = vmul.f32 %v1032_v4, %v1401_v19  ;;  %v619_v10 = vmul.f32 %v1032_v4, %v1404_v31 }
 0x156   : > { %824 = vst [vmem:[%s1521_s6 + $0x20] sm:$0xff] %v981_v60  ;;  %v704_v12 = vadd.f32 %v1504_v25, %v660_v5  ;;  %v705_v13 = vadd.f32 %v1506_v30, %v661_v45  ;;  %v620_v39 = vmul.f32 %v1034_v63, %v1415_v22  ;;  %v621_v36 = vmul.f32 %v1034_v63, %v1418_v23 }
 0x157   : > { %v982_v8 = vpack.c.bf16 %v703_v18, %v702_v17  ;;  %v662_v11 = vmul.f32 %v1500_v9, %v618_v26  ;;  %v663_v19 = vmul.f32 %v1502_v27, %v619_v10  ;;  %1041 = vrsqrt.f32 %v584_v24 }
 0x158   : > { %v983_v31 = vpack.c.bf16 %v705_v13, %v704_v12  ;;  %v664_v15 = vmul.f32 %v1500_v9, %v620_v39  ;;  %v665_v16 = vmul.f32 %v1502_v27, %v621_v36  ;;  %v569_v46 = vmul.f32 0.00390625, %v549_v43 }
 0x159   : > { %v1036_v47 = vpop.eup %1035  ;;  %825 = vst [vmem:[%s1521_s6 + $0x28] sm:$0xff] %v982_v8  ;;  %v706_v22 = vadd.f32 %v1504_v25, %v662_v11  ;;  %v707_v23 = vadd.f32 %v1506_v30, %v663_v19  ;;  %v570_v34 = vmul.f32 0.00390625, %v552_v14  ;;  %v571_v35 = vmul.f32 0.00390625, %v555_v20 }
 0x15a   : > { %826 = vst [vmem:[%s1521_s6 + $0x30] sm:$0xff] %v983_v31  ;;  %v708_v37 = vadd.f32 %v1504_v25, %v664_v15  ;;  %v709_v48 = vadd.f32 %v1506_v30, %v665_v16  ;;  %v622_v49 = vmul.f32 %v1036_v47, %v1421_v50  ;;  %v623_v38 = vmul.f32 %v1036_v47, %v1424_v51 }
 0x15b   : > { %v984_v42 = vpack.c.bf16 %v707_v23, %v706_v22  ;;  %v585_v43 = vadd.f32 1e-12, %v569_v46  ;;  %v586_v44 = vadd.f32 1e-12, %v570_v34  ;;  %v587_v2 = vadd.f32 1e-12, %v571_v35 }
 0x15c   : > { %v1038_v3 = vpop.eup %1037  ;;  %v985_v32 = vpack.c.bf16 %v709_v48, %v708_v37  ;;  %v666_v33 = vmul.f32 %v1500_v9, %v622_v49  ;;  %v667_v21 = vmul.f32 %v1502_v27, %v623_v38 }
 0x15d   : > { %827 = vst [vmem:[%s1521_s6 + $0x38] sm:$0xff] %v984_v42  ;;  %v624_v58 = vmul.f32 %v1038_v3, %v1435_v28  ;;  %v625_v59 = vmul.f32 %v1038_v3, %v1438_v29  ;;  %1043 = vrsqrt.f32 %v585_v43 }
 0x15e   : > { %828 = vst [vmem:[%s1521_s6 + $0x40] sm:$0xff] %v985_v32  ;;  %v710_v50 = vadd.f32 %v1504_v25, %v666_v33  ;;  %v711_v51 = vadd.f32 %v1506_v30, %v667_v21  ;;  %1045 = vrsqrt.f32 %v586_v44 }
 0x15f   : > { %v668_v55 = vmul.f32 %v1500_v9, %v624_v58  ;;  %v669_v57 = vmul.f32 %v1502_v27, %v625_v59  ;;  %1047 = vrsqrt.f32 %v587_v2 }
 0x160   : > { %v1040_v0 = vpop.eup %1039  ;;  %v986_v1 = vpack.c.bf16 %v711_v51, %v710_v50 }
 0x161   : > { %v712_v28 = vadd.f32 %v1504_v25, %v668_v55  ;;  %v713_v4 = vadd.f32 %v1506_v30, %v669_v57  ;;  %v626_v29 = vmul.f32 %v1040_v0, %v1441_v6  ;;  %v627_v60 = vmul.f32 %v1040_v0, %v1444_v7 }
 0x162   : > { %829 = vst [vmem:[%s1521_s6 + $0x48] sm:$0xff] %v986_v1 }
 0x163   : > { %v987_v5 = vpack.c.bf16 %v713_v4, %v712_v28  ;;  %v670_v45 = vmul.f32 %v1500_v9, %v626_v29  ;;  %v671_v24 = vmul.f32 %v1502_v27, %v627_v60 }
 0x164   : > { %v1042_v63 = vpop.eup %1041 }
 0x165   : > { %830 = vst [vmem:[%s1521_s6 + $0x50] sm:$0xff] %v987_v5  ;;  %v714_v17 = vadd.f32 %v1504_v25, %v670_v45  ;;  %v715_v18 = vadd.f32 %v1506_v30, %v671_v24  ;;  %v628_v26 = vmul.f32 %v1042_v63, %v1455_v53  ;;  %v629_v10 = vmul.f32 %v1042_v63, %v1458_v54 }
 0x167   : > { %v988_v6 = vpack.c.bf16 %v715_v18, %v714_v17  ;;  %v672_v7 = vmul.f32 %v1500_v9, %v628_v26  ;;  %v673_v12 = vmul.f32 %v1502_v27, %v629_v10 }
 0x169   : > { %831 = vst [vmem:[%s1521_s6 + $0x58] sm:$0xff] %v988_v6  ;;  %v716_v13 = vadd.f32 %v1504_v25, %v672_v7  ;;  %v717_v39 = vadd.f32 %v1506_v30, %v673_v12 }
 0x16a   : > { %v1044_v36 = vpop.eup %1043 }
 0x16b   : > { %v1046_v14 = vpop.eup %1045  ;;  %v989_v20 = vpack.c.bf16 %v717_v39, %v716_v13  ;;  %v630_v8 = vmul.f32 %v1044_v36, %v1461_v40  ;;  %v631_v53 = vmul.f32 %v1044_v36, %v1464_v41 }
 0x16c   : > { %v1048_v11 = vpop.eup %1047  ;;  %v632_v54 = vmul.f32 %v1046_v14, %v1475_v61  ;;  %v633_v19 = vmul.f32 %v1046_v14, %v1478_v62 }
 0x16d   : > { %832 = vst [vmem:[%s1521_s6 + $0x60] sm:$0xff] %v989_v20  ;;  %v674_v31 = vmul.f32 %v1500_v9, %v630_v8  ;;  %v675_v15 = vmul.f32 %v1502_v27, %v631_v53  ;;  %v634_v16 = vmul.f32 %v1048_v11, %v1481_v52  ;;  %v635_v46 = vmul.f32 %v1048_v11, %v1484_v56 }
 0x16e   : > { %v676_v40 = vmul.f32 %v1500_v9, %v632_v54  ;;  %v677_v41 = vmul.f32 %v1502_v27, %v633_v19 }
 0x16f   : > { %v718_v61 = vadd.f32 %v1504_v25, %v674_v31  ;;  %v719_v62 = vadd.f32 %v1506_v30, %v675_v15  ;;  %v678_v47 = vmul.f32 %v1500_v9, %v634_v16  ;;  %v679_v22 = vmul.f32 %v1502_v27, %v635_v46 }
 0x170   : > { %v720_v23 = vadd.f32 %v1504_v25, %v676_v40  ;;  %v721_v52 = vadd.f32 %v1506_v30, %v677_v41 }
 0x171   : > { %v990_v34 = vpack.c.bf16 %v719_v62, %v718_v61  ;;  %v722_v56 = vadd.f32 %v1504_v25, %v678_v47  ;;  %v723_v35 = vadd.f32 %v1506_v30, %v679_v22 }
 0x172   : > { %v991_v37 = vpack.c.bf16 %v721_v52, %v720_v23 }
 0x173   : > { %833 = vst [vmem:[%s1521_s6 + $0x68] sm:$0xff] %v990_v34  ;;  %v992_v48 = vpack.c.bf16 %v723_v35, %v722_v56 }
 0x174   : > { %834 = vst [vmem:[%s1521_s6 + $0x70] sm:$0xff] %v991_v37 }
 0x175   : > { %835 = vst [vmem:[%s1521_s6 + $0x78] sm:$0xff] %v992_v48 }
 0x176 PF: > { %s14_s17 = sadd.s32 1, %s1071_s17   ;;  %s1641_s15 = smov %s1067_s16 }
 0x177   : > { %p11_p5 = scmp.ge.s32.totalorder %s14_s17, 4   ;;  %s1642_s16 = smov %s1644_s18 }
 0x179   :  { %13 = sbr.rel (!%p11_p5) target bundleno = 2 (0x2), region = 69 }

// kernel: classifier_forward.14
= control target key start
LH: loop header
LB: loop body
LE: loop exit
PB: predicated region body
PF: predicated region fallthrough
CT: control target
= control target key end

     0   :  { %s2512_s15 = smov 0   ;;  %s2514_s16 = smov 0   ;;  %s3025_s0 = inlined_call_operand.vmem [shape: bf16[2,128,768], index: 0, kind: input, shape index: {}, may-alias: {0,1,2}]   ;;  %s3026_s1 = inlined_call_operand.vmem [shape: bf16[2,128,768], index: 1, kind: input, shape index: {}, may-alias: {0,1,2}]   ;;  %s3027_s2 = inlined_call_operand.vmem [shape: bf16[2,128,768], index: 2, kind: input, shape index: {}, may-alias: {0,1,2}]   ;;  %s3028_s3 = inlined_call_operand.vmem [shape: f32[2,1,128], index: 3, kind: input, shape index: {}]   ;;  %s3029_s4 = inlined_call_operand.vmem [shape: bf16[2,128,256], index: 4, kind: output, shape index: {}]  }
   0x1   :  { %s2516_s17 = smov 0   ;;  %s2518_s18 = smov 0  }
   0x2   :  { %s2520_s19 = smov 0  }
   0x3 LB: > { %s26_s20 = sadd.s32 1, %s2481_s18  ;;  %p42_p1 = scmp.ne.s32.totalorder %s2473_s16, %s2469_s15  ;;  %s2485_s19 = sphi %s2520_s19, %s14_s19   ;;  %s2481_s18 = sphi %s2518_s18, %s3034_s18   ;;  %s2477_s17 = sphi %s2516_s17, %s3033_s17   ;;  %s2473_s16 = sphi %s2514_s16, %s3032_s16   ;;  %s2469_s15 = sphi %s2512_s15, %s3031_s15  }
   0x4   : > { %p28_p0 = scmp.ge.s32.totalorder %s26_s20, 2  ;;  %p43_p2 = scmp.eq.s32.totalorder %s2485_s19, 0 }
   0x5   : > { %s35_s23 = sadd.s32 1, %s2473_s16  ;;  %p1885_p5 = scmp.ge.s32.totalorder %s2485_s19, 2 }
   0x6   : > { %s3036_s20 = smov (%p28_p0, %s26_s20), 0  ;;  %p2543_p3 = por %p43_p2, %p42_p1 }
   0x7   : > { %s30_s22 = ssub.s32 %s2481_s18, %s3036_s20  ;;  %174 = sbr.rel (%p1885_p5) target bundleno = 51 (0x33), region = 16 }
   0x8   : > { %p33_p4 = scmp.eq.s32.totalorder %s30_s22, 0 }
   0xa   : > { %s2551_s24 = scalar_select %p33_p4, %s2473_s16, %s35_s23  }
   0xc   : > { %177 = sbr.rel (!%p2543_p3) target bundleno = 25 (0x19), region = 20  ;;  %s179_s25 = sand.u32 (%p2543_p3), 1, %s2473_s16  }
   0xd   : > { %s2206_s26 = smul.u32 (%p2543_p3), 384, %s2481_s18  ;;  %s1886_s27 = sshll.u32 (%p2543_p3), %s179_s25, 7 }
   0xe   : > { %s181_s5 = scalar_lea.vmem (%p2543_p3), [#allocation2], %s1886_s27 }
   0xf   : > { %s2561_s30 = scalar_lea.vmem (%p2543_p3), %s3025_s0, %s2206_s26 }
  0x10   : > { %v246_v0 = vld [vmem:[%s2561_s30] sm:$0xff] (%p2543_p3)  ;;  %v248_v1 = vld [vmem:[%s2561_s30 + $0x18] sm:$0xff] (%p2543_p3)  ;;  %v250_v2 = vld [vmem:[%s2561_s30 + $0x30] sm:$0xff] (%p2543_p3) }
  0x11   : > { %247 = vst [vmem:[%s181_s5] sm:$0xff] %v246_v0  ;;  %249 = vst [vmem:[%s181_s5 + $0x8] sm:$0xff] %v248_v1  ;;  %v252_v3 = vld [vmem:[%s2561_s30 + $0x48] sm:$0xff]  ;;  %v254_v4 = vld [vmem:[%s2561_s30 + $0x60] sm:$0xff] }
  0x12   : > { %251 = vst [vmem:[%s181_s5 + $0x10] sm:$0xff] %v250_v2  ;;  %v256_v5 = vld [vmem:[%s2561_s30 + $0x78] sm:$0xff]  ;;  %253 = vst [vmem:[%s181_s5 + $0x18] sm:$0xff] %v252_v3  ;;  %v258_v6 = vld [vmem:[%s2561_s30 + $0x90] sm:$0xff] }
  0x13   : > { %255 = vst [vmem:[%s181_s5 + $0x20] sm:$0xff] %v254_v4  ;;  %257 = vst [vmem:[%s181_s5 + $0x28] sm:$0xff] %v256_v5  ;;  %v260_v7 = vld [vmem:[%s2561_s30 + $0xa8] sm:$0xff]  ;;  %v262_v8 = vld [vmem:[%s2561_s30 + $0xc0] sm:$0xff] }
  0x14   : > { %259 = vst [vmem:[%s181_s5 + $0x30] sm:$0xff] %v258_v6  ;;  %261 = vst [vmem:[%s181_s5 + $0x38] sm:$0xff] %v260_v7  ;;  %v264_v9 = vld [vmem:[%s2561_s30 + $0xd8] sm:$0xff]  ;;  %v266_v10 = vld [vmem:[%s2561_s30 + $0xf0] sm:$0xff] }
  0x15   : > { %263 = vst [vmem:[%s181_s5 + $0x40] sm:$0xff] %v262_v8  ;;  %v268_v11 = vld [vmem:[%s2561_s30 + $0x108] sm:$0xff]  ;;  %265 = vst [vmem:[%s181_s5 + $0x48] sm:$0xff] %v264_v9  ;;  %v270_v12 = vld [vmem:[%s2561_s30 + $0x120] sm:$0xff] }
  0x16   : > { %267 = vst [vmem:[%s181_s5 + $0x50] sm:$0xff] %v266_v10  ;;  %269 = vst [vmem:[%s181_s5 + $0x58] sm:$0xff] %v268_v11  ;;  %v272_v13 = vld [vmem:[%s2561_s30 + $0x138] sm:$0xff]  ;;  %v274_v14 = vld [vmem:[%s2561_s30 + $0x150] sm:$0xff] }
  0x17   : > { %271 = vst [vmem:[%s181_s5 + $0x60] sm:$0xff] %v270_v12  ;;  %273 = vst [vmem:[%s181_s5 + $0x68] sm:$0xff] %v272_v13  ;;  %v276_v15 = vld [vmem:[%s2561_s30 + $0x168] sm:$0xff] }
  0x18   : > { %275 = vst [vmem:[%s181_s5 + $0x70] sm:$0xff] %v274_v14  ;;  %277 = vst [vmem:[%s181_s5 + $0x78] sm:$0xff] %v276_v15 }
  0x19 PF: > { %283 = sbr.rel (!%p2543_p3) target bundleno = 38 (0x26), region = 58  ;;  %s285_s6 = sand.u32 (%p2543_p3), 1, %s2473_s16  }
  0x1a   : > { %s1889_s7 = smul.u32 (%p2543_p3), 384, %s2481_s18  ;;  %s1888_s8 = sshll.u32 (%p2543_p3), %s285_s6, 7 }
  0x1b   : > { %s287_s12 = scalar_lea.vmem (%p2543_p3), [#allocation3], %s1888_s8 }
  0x1c   : > { %s2586_s11 = scalar_lea.vmem (%p2543_p3), %s3026_s1, %s1889_s7 }
  0x1d   : > { %v1890_v16 = vld [vmem:[%s2586_s11 + $0x8] sm:$0xff] (%p2543_p3)  ;;  %v1891_v17 = vld [vmem:[%s2586_s11 + $0x20] sm:$0xff] (%p2543_p3)  ;;  %v1892_v18 = vld [vmem:[%s2586_s11 + $0x38] sm:$0xff] (%p2543_p3) }
  0x1e   : > { %351 = vst [vmem:[%s287_s12] sm:$0xff] %v1890_v16  ;;  %353 = vst [vmem:[%s287_s12 + $0x8] sm:$0xff] %v1891_v17  ;;  %v1893_v19 = vld [vmem:[%s2586_s11 + $0x50] sm:$0xff]  ;;  %v1894_v20 = vld [vmem:[%s2586_s11 + $0x68] sm:$0xff] }
  0x1f   : > { %355 = vst [vmem:[%s287_s12 + $0x10] sm:$0xff] %v1892_v18  ;;  %v1895_v21 = vld [vmem:[%s2586_s11 + $0x80] sm:$0xff]  ;;  %357 = vst [vmem:[%s287_s12 + $0x18] sm:$0xff] %v1893_v19  ;;  %v1896_v22 = vld [vmem:[%s2586_s11 + $0x98] sm:$0xff] }
  0x20   : > { %359 = vst [vmem:[%s287_s12 + $0x20] sm:$0xff] %v1894_v20  ;;  %361 = vst [vmem:[%s287_s12 + $0x28] sm:$0xff] %v1895_v21  ;;  %v1897_v23 = vld [vmem:[%s2586_s11 + $0xb0] sm:$0xff]  ;;  %v1898_v24 = vld [vmem:[%s2586_s11 + $0xc8] sm:$0xff] }
  0x21   : > { %363 = vst [vmem:[%s287_s12 + $0x30] sm:$0xff] %v1896_v22  ;;  %365 = vst [vmem:[%s287_s12 + $0x38] sm:$0xff] %v1897_v23  ;;  %v1899_v25 = vld [vmem:[%s2586_s11 + $0xe0] sm:$0xff]  ;;  %v1900_v26 = vld [vmem:[%s2586_s11 + $0xf8] sm:$0xff] }
  0x22   : > { %367 = vst [vmem:[%s287_s12 + $0x40] sm:$0xff] %v1898_v24  ;;  %v1901_v27 = vld [vmem:[%s2586_s11 + $0x110] sm:$0xff]  ;;  %369 = vst [vmem:[%s287_s12 + $0x48] sm:$0xff] %v1899_v25  ;;  %v1902_v28 = vld [vmem:[%s2586_s11 + $0x128] sm:$0xff] }
  0x23   : > { %371 = vst [vmem:[%s287_s12 + $0x50] sm:$0xff] %v1900_v26  ;;  %373 = vst [vmem:[%s287_s12 + $0x58] sm:$0xff] %v1901_v27  ;;  %v1903_v29 = vld [vmem:[%s2586_s11 + $0x140] sm:$0xff]  ;;  %v1904_v30 = vld [vmem:[%s2586_s11 + $0x158] sm:$0xff] }
  0x24   : > { %375 = vst [vmem:[%s287_s12 + $0x60] sm:$0xff] %v1902_v28  ;;  %377 = vst [vmem:[%s287_s12 + $0x68] sm:$0xff] %v1903_v29  ;;  %v1905_v31 = vld [vmem:[%s2586_s11 + $0x170] sm:$0xff] }
  0x25   : > { %379 = vst [vmem:[%s287_s12 + $0x70] sm:$0xff] %v1904_v30  ;;  %381 = vst [vmem:[%s287_s12 + $0x78] sm:$0xff] %v1905_v31 }
  0x26 PF: > { %387 = sbr.rel (!%p2543_p3) target bundleno = 51 (0x33), region = 96  ;;  %s389_s13 = sand.u32 (%p2543_p3), 1, %s2473_s16  }
  0x27   : > { %s1907_s14 = smul.u32 (%p2543_p3), 384, %s2481_s18  ;;  %s1906_s22 = sshll.u32 (%p2543_p3), %s389_s13, 7 }
  0x28   : > { %s391_s21 = scalar_lea.vmem (%p2543_p3), [#allocation4], %s1906_s22 }
  0x29   : > { %s2611_s26 = scalar_lea.vmem (%p2543_p3), %s3027_s2, %s1907_s14 }
  0x2a   : > { %v1908_v32 = vld [vmem:[%s2611_s26 + $0x10] sm:$0xff] (%p2543_p3)  ;;  %v1909_v33 = vld [vmem:[%s2611_s26 + $0x28] sm:$0xff] (%p2543_p3)  ;;  %v1910_v34 = vld [vmem:[%s2611_s26 + $0x40] sm:$0xff] (%p2543_p3) }
  0x2b   : > { %455 = vst [vmem:[%s391_s21] sm:$0xff] %v1908_v32  ;;  %457 = vst [vmem:[%s391_s21 + $0x8] sm:$0xff] %v1909_v33  ;;  %v1911_v35 = vld [vmem:[%s2611_s26 + $0x58] sm:$0xff]  ;;  %v1912_v36 = vld [vmem:[%s2611_s26 + $0x70] sm:$0xff] }
  0x2c   : > { %459 = vst [vmem:[%s391_s21 + $0x10] sm:$0xff] %v1910_v34  ;;  %v1913_v37 = vld [vmem:[%s2611_s26 + $0x88] sm:$0xff]  ;;  %461 = vst [vmem:[%s391_s21 + $0x18] sm:$0xff] %v1911_v35  ;;  %v1914_v38 = vld [vmem:[%s2611_s26 + $0xa0] sm:$0xff] }
  0x2d   : > { %463 = vst [vmem:[%s391_s21 + $0x20] sm:$0xff] %v1912_v36  ;;  %465 = vst [vmem:[%s391_s21 + $0x28] sm:$0xff] %v1913_v37  ;;  %v1915_v39 = vld [vmem:[%s2611_s26 + $0xb8] sm:$0xff]  ;;  %v1916_v40 = vld [vmem:[%s2611_s26 + $0xd0] sm:$0xff] }
  0x2e   : > { %467 = vst [vmem:[%s391_s21 + $0x30] sm:$0xff] %v1914_v38  ;;  %469 = vst [vmem:[%s391_s21 + $0x38] sm:$0xff] %v1915_v39  ;;  %v1917_v41 = vld [vmem:[%s2611_s26 + $0xe8] sm:$0xff]  ;;  %v1918_v42 = vld [vmem:[%s2611_s26 + $0x100] sm:$0xff] }
  0x2f   : > { %471 = vst [vmem:[%s391_s21 + $0x40] sm:$0xff] %v1916_v40  ;;  %v1919_v43 = vld [vmem:[%s2611_s26 + $0x118] sm:$0xff]  ;;  %473 = vst [vmem:[%s391_s21 + $0x48] sm:$0xff] %v1917_v41  ;;  %v1920_v44 = vld [vmem:[%s2611_s26 + $0x130] sm:$0xff] }
  0x30   : > { %475 = vst [vmem:[%s391_s21 + $0x50] sm:$0xff] %v1918_v42  ;;  %477 = vst [vmem:[%s391_s21 + $0x58] sm:$0xff] %v1919_v43  ;;  %v1921_v45 = vld [vmem:[%s2611_s26 + $0x148] sm:$0xff]  ;;  %v1922_v46 = vld [vmem:[%s2611_s26 + $0x160] sm:$0xff] }
  0x31   : > { %479 = vst [vmem:[%s391_s21 + $0x60] sm:$0xff] %v1920_v44  ;;  %481 = vst [vmem:[%s391_s21 + $0x68] sm:$0xff] %v1921_v45  ;;  %v1923_v47 = vld [vmem:[%s2611_s26 + $0x178] sm:$0xff] }
  0x32   : > { %483 = vst [vmem:[%s391_s21 + $0x70] sm:$0xff] %v1922_v46  ;;  %485 = vst [vmem:[%s391_s21 + $0x78] sm:$0xff] %v1923_v47 }
  0x33 PF: > { %p1924_p6 = scmp.ge.s32.totalorder %s2485_s19, 1  ;;  %p496_p7 = scmp.lt.s32.totalorder %s2485_s19, 3 }
  0x35   : > { %p497_p8 = pnand %p1924_p6, %p496_p7 }
  0x36   : > { %s503_s27 = sand.u32 (!%p497_p8), 1, %s2469_s15   ;;  %p559_p9 = scmp.lt.s32.totalorder (!%p497_p8), %s2477_s17, 1 }
  0x37   : > { %500 = sbr.rel (%p497_p8) target bundleno = 1144 (0x478), region = 138  ;;  %s2632_s28 = sshll.u32 (!%p497_p8), %s503_s27, 7 }
  0x38   : > { %s2635_s29 = scalar_lea.vmem (!%p497_p8), [#allocation3], %s2632_s28  ;;  %s2641_s15 = scalar_lea.vmem (!%p497_p8), [#allocation2], %s2632_s28 }
  0x39   : > { %s2657_s30 = scalar_lea.vmem (!%p497_p8), [#allocation4], %s2632_s28 }
  0x3c   : > { %v2247_v48 = vld [vmem:[%s2635_s29 + $0x70] ss:$8 sps:$4 sm:$0xff]   ;;  %v2250_v49 = vld [vmem:[%s2635_s29 + $0x60] ss:$8 sps:$4 sm:$0xff]   ;;  %v2284_v1 = vld [vmem:[%s2657_s30 + $0x74] ss:$8 sps:$4 sm:$0xff]  }
  0x3d   : > { %2078 = vmatprep.subr.bf16.mxu0 %v2247_v48  ;;  %v2252_v50 = vld [vmem:[%s2635_s29 + $0x50] ss:$8 sps:$4 sm:$0xff]   ;;  %v2264_v51 = vld [vmem:[%s2641_s15] ss:$8 sps:$4 sm:$0xff]   ;;  %s3038_s17 = smov (!%p559_p9, %s2477_s17), 1 }
  0x3e   : > { %2079 = vmatpush3.bf16.xpose.msra.mxu0 %v2247_v48  ;;  %2094 = vmatprep.mubr.bf16.mxu0 %v2264_v51  ;;  %v2254_v52 = vld [vmem:[%s2635_s29 + $0x40] ss:$8 sps:$4 sm:$0xff]   ;;  %v2256_v53 = vld [vmem:[%s2635_s29 + $0x30] ss:$8 sps:$4 sm:$0xff]   ;;  %s561_s7 = scalar_lea.vmem %s3028_s3, %s3038_s17  ;;  %s1997_s8 = sshll.u32 %s3038_s17, 7 }
  0x3f   : > { %2080 = vmatprep.subr.bf16.mxu0 %v2250_v49  ;;  %v2258_v54 = vld [vmem:[%s2635_s29 + $0x20] ss:$8 sps:$4 sm:$0xff]   ;;  %v2260_v55 = vld [vmem:[%s2635_s29 + $0x10] ss:$8 sps:$4 sm:$0xff]   ;;  %s2972_s11 = scalar_lea.vmem %s3029_s4, %s1997_s8 }
  0x40   : > { %v2262_v56 = vld [vmem:[%s2635_s29] ss:$8 sps:$4 sm:$0xff]   ;;  %v2267_v57 = vld [vmem:[%s2641_s15 + $0x10] ss:$8 sps:$4 sm:$0xff]  }
  0x41   : > { %v2270_v58 = vld [vmem:[%s2641_s15 + $0x20] ss:$8 sps:$4 sm:$0xff]   ;;  %v2272_v59 = vld [vmem:[%s2641_s15 + $0x30] ss:$8 sps:$4 sm:$0xff]  }
  0x42   : > { %v2274_v60 = vld [vmem:[%s2641_s15 + $0x40] ss:$8 sps:$4 sm:$0xff]   ;;  %v2276_v61 = vld [vmem:[%s2641_s15 + $0x50] ss:$8 sps:$4 sm:$0xff]  }
  0x43   : > { %v2278_v62 = vld [vmem:[%s2641_s15 + $0x60] ss:$8 sps:$4 sm:$0xff]   ;;  %v2280_v63 = vld [vmem:[%s2641_s15 + $0x70] ss:$8 sps:$4 sm:$0xff]  }
  0x44   : > { %v2282_v0 = vld [vmem:[%s2657_s30 + $0x70] ss:$8 sps:$4 sm:$0xff]   ;;  %v2285_v2 = vld [vmem:[%s2657_s30 + $0x60] ss:$8 sps:$4 sm:$0xff]  }
  0x45   : > { %2110 = vmatprep.subr.bf16.mxu1 %v2282_v0  ;;  %v2670_v4 = vld [vmem:[%s561_s7] ss:$0 sm:$0xff]  ;;  %v2287_v26 = vld [vmem:[%s2657_s30 + $0x50] ss:$8 sps:$4 sm:$0xff]  }
  0x46   : > { %2081 = vmatpush3.bf16.xpose.msra.mxu0 %v2250_v49  ;;  %2111 = vmatpush3.bf16.msra.mxu1 %v2282_v0  ;;  %v2289_v33 = vld [vmem:[%s2657_s30 + $0x40] ss:$8 sps:$4 sm:$0xff]   ;;  %v2291_v40 = vld [vmem:[%s2657_s30 + $0x30] ss:$8 sps:$4 sm:$0xff]  }
  0x47   : > { %2082 = vmatprep.subr.bf16.mxu0 %v2252_v50  ;;  %2112 = vmatprep.subr.bf16.mxu1 %v2285_v2  ;;  %v2293_v48 = vld [vmem:[%s2657_s30 + $0x20] ss:$8 sps:$4 sm:$0xff]  }
  0x4a   : > { %2113 = vmatpush3.bf16.msra.mxu1 %v2285_v2 }
  0x4b   : > { %2114 = vmatprep.subr.bf16.mxu1 %v2287_v26 }
  0x4e   : > { %2083 = vmatpush3.bf16.xpose.msra.mxu0 %v2252_v50  ;;  %2115 = vmatpush3.bf16.msra.mxu1 %v2287_v26 }
  0x4f   : > { %2084 = vmatprep.subr.bf16.mxu0 %v2254_v52  ;;  %2116 = vmatprep.subr.bf16.mxu1 %v2289_v33 }
  0x52   : > { %2117 = vmatpush3.bf16.msra.mxu1 %v2289_v33 }
  0x53   : > { %2118 = vmatprep.subr.bf16.mxu1 %v2291_v40 }
  0x56   : > { %2085 = vmatpush3.bf16.xpose.msra.mxu0 %v2254_v52  ;;  %2119 = vmatpush3.bf16.msra.mxu1 %v2291_v40 }
  0x57   : > { %2086 = vmatprep.subr.bf16.mxu0 %v2256_v53  ;;  %2120 = vmatprep.subr.bf16.mxu1 %v2293_v48 }
  0x5a   : > { %2121 = vmatpush3.bf16.msra.mxu1 %v2293_v48 }
  0x5e   : > { %2087 = vmatpush3.bf16.xpose.msra.mxu0 %v2256_v53 }
  0x5f   : > { %2088 = vmatprep.subr.bf16.mxu0 %v2258_v54 }
  0x66   : > { %2089 = vmatpush3.bf16.xpose.msra.mxu0 %v2258_v54  ;;  %v2295_v54 = vld [vmem:[%s2657_s30 + $0x10] ss:$8 sps:$4 sm:$0xff]  }
  0x67   : > { %2090 = vmatprep.subr.bf16.mxu0 %v2260_v55  ;;  %2122 = vmatprep.subr.bf16.mxu1 %v2295_v54 }
  0x68   : > { %2123 = vmatpush3.bf16.msra.mxu1 %v2295_v54 }
  0x6e   : > { %2091 = vmatpush3.bf16.xpose.msra.mxu0 %v2260_v55 }
  0x6f   : > { %2092 = vmatprep.subr.bf16.mxu0 %v2262_v56 }
  0x76   : > { %2093 = vmatpush3.bf16.xpose.msra.mxu0 %v2262_v56 }
  0x77   : > { %2174 = vmatprep.subr.bf16.mxu0 %v2284_v1 }
  0x7d   : > { %2095 = vmatmul.mubr.bf16.vlgmr.msra.gmra.mxu0 %v2267_v57  ;;  %v2297_v57 = vld [vmem:[%s2657_s30] ss:$8 sps:$4 sm:$0xff]  }
  0x7e   : > { %2098 = vmatprep.mubr.bf16.mxu0 %v2270_v58  ;;  %2175 = vmatpush3.bf16.msra.mxu0 %v2284_v1  ;;  %v2249_v58 = vld [vmem:[%s2635_s29 + $0x74] ss:$8 sps:$4 sm:$0xff]  }
  0x7f   : > { %2124 = vmatprep.subr.bf16.mxu1 %v2297_v57 }
  0x80   : > { %2125 = vmatpush3.bf16.msra.mxu1 %v2297_v57 }
  0x81   : > { %2142 = vmatprep.subr.bf16.mxu1 %v2249_v58 }
  0x85   : > { %2099 = vmatmul.mubr.bf16.gmra.mxu0 %v2272_v59 }
  0x86   : > { %2102 = vmatprep.mubr.bf16.mxu0 %v2274_v60 }
  0x8d   : > { %2103 = vmatmul.mubr.bf16.gmra.mxu0 %v2276_v61 }
  0x8e   : > { %2106 = vmatprep.mubr.bf16.mxu0 %v2278_v62 }
  0x95   : > { %2107 = vmatmul.mubr.bf16.gmra.mxu0 %v2280_v63 }
 0x13d   : > { %v2096_v3 = vpop.f32.mrf.mxu0 }
 0x13e   : > { %v818_v5 = vmul.f32 0.088388346, %v2096_v3 }
 0x13f   : > { %v753_v6 = vpop.f32.mrf.mxu0 }
 0x140   : > { %v816_v7 = vmul.f32 0.088388346, %v753_v6  ;;  %v2673_v8 = vadd.f32 %v2670_v4, %v818_v5 }
 0x141   : > { %v2097_v9 = vpop.f32.mrf.mxu0 }
 0x142   : > { %v819_v10 = vmul.f32 0.088388346, %v2097_v9  ;;  %858 = vmax.xlane.f32.xlu1 %v2673_v8  ;;  %v2677_v11 = vadd.f32 %v2670_v4, %v816_v7 }
 0x143   : > { %v756_v12 = vpop.f32.mrf.mxu0 }
 0x144   : > { %v817_v13 = vmul.f32 0.088388346, %v756_v12  ;;  %854 = vmax.xlane.f32.xlu0 %v2677_v11  ;;  %v2681_v14 = vadd.f32 %v2670_v4, %v819_v10 }
 0x145   : > { %v2100_v15 = vpop.f32.mrf.mxu0 }
 0x146   : > { %860 = vmax.xlane.f32.xlu1 %v2681_v14  ;;  %v2685_v16 = vadd.f32 %v2670_v4, %v817_v13  ;;  %v822_v18 = vmul.f32 0.088388346, %v2100_v15 }
 0x147   : > { %v769_v17 = vpop.f32.mrf.mxu0 }
 0x148   : > { %v820_v19 = vmul.f32 0.088388346, %v769_v17  ;;  %856 = vmax.xlane.f32.xlu0 %v2685_v16  ;;  %v2693_v25 = vadd.f32 %v2670_v4, %v822_v18 }
 0x149   : > { %v2101_v20 = vpop.f32.mrf.mxu0 }
 0x14a   : > { %v2689_v21 = vadd.f32 %v2670_v4, %v820_v19  ;;  %v823_v23 = vmul.f32 0.088388346, %v2101_v20 }
 0x14b   : > { %v772_v22 = vpop.f32.mrf.mxu0 }
 0x14c   : > { %v821_v24 = vmul.f32 0.088388346, %v772_v22  ;;  %862 = vmax.xlane.f32.xlu0 %v2689_v21  ;;  %v2702_v32 = vadd.f32 %v2670_v4, %v823_v23 }
 0x14d   : > { %v2104_v27 = vpop.f32.mrf.mxu0 }
 0x14e   : > { %v2697_v28 = vadd.f32 %v2670_v4, %v821_v24  ;;  %v826_v30 = vmul.f32 0.088388346, %v2104_v27 }
 0x14f   : > { %v785_v29 = vpop.f32.mrf.mxu0 }
 0x150   : > { %v824_v31 = vmul.f32 0.088388346, %v785_v29  ;;  %866 = vmax.xlane.f32.xlu0 %v2693_v25  ;;  %864 = vmax.xlane.f32.xlu1 %v2697_v28  ;;  %v2711_v39 = vadd.f32 %v2670_v4, %v826_v30 }
 0x151   : > { %v2105_v34 = vpop.f32.mrf.mxu0 }
 0x152   : > { %v2706_v35 = vadd.f32 %v2670_v4, %v824_v31  ;;  %v827_v37 = vmul.f32 0.088388346, %v2105_v34 }
 0x153   : > { %v788_v36 = vpop.f32.mrf.mxu0 }
 0x154   : > { %v825_v38 = vmul.f32 0.088388346, %v788_v36  ;;  %868 = vmax.xlane.f32.xlu1 %v2702_v32  ;;  %870 = vmax.xlane.f32.xlu0 %v2706_v35  ;;  %v2720_v46 = vadd.f32 %v2670_v4, %v827_v37  ;;  %v2299_v37 = vld [vmem:[%s2635_s29 + $0x64] ss:$8 sps:$4 sm:$0xff]  }
 0x155   : > { %v2108_v41 = vpop.f32.mrf.mxu0 }
 0x156   : > { %v2715_v42 = vadd.f32 %v2670_v4, %v825_v38  ;;  %v830_v44 = vmul.f32 0.088388346, %v2108_v41 }
 0x157   : > { %v801_v43 = vpop.f32.mrf.mxu0 }
 0x158   : > { %v828_v45 = vmul.f32 0.088388346, %v801_v43  ;;  %874 = vmax.xlane.f32.xlu0 %v2711_v39  ;;  %872 = vmax.xlane.f32.xlu1 %v2715_v42  ;;  %v2729_v53 = vadd.f32 %v2670_v4, %v830_v44 }
 0x159   : > { %v2109_v47 = vpop.f32.mrf.mxu0 }
 0x15a   : > { %v2724_v49 = vadd.f32 %v2670_v4, %v828_v45  ;;  %v831_v51 = vmul.f32 0.088388346, %v2109_v47 }
 0x15b   : > { %v804_v50 = vpop.f32.mrf.mxu0 }
 0x15c   : > { %v829_v52 = vmul.f32 0.088388346, %v804_v50  ;;  %876 = vmax.xlane.f32.xlu1 %v2720_v46  ;;  %878 = vmax.xlane.f32.xlu0 %v2724_v49  ;;  %v2738_v56 = vadd.f32 %v2670_v4, %v831_v51 }
 0x15e   : > { %v2733_v55 = vadd.f32 %v2670_v4, %v829_v52  ;;  %v2300_v52 = vld [vmem:[%s2635_s29 + $0x54] ss:$8 sps:$4 sm:$0xff]  }
 0x160   : > { %882 = vmax.xlane.f32.xlu0 %v2729_v53  ;;  %880 = vmax.xlane.f32.xlu1 %v2733_v55 }
 0x164   : > { %884 = vmax.xlane.f32.xlu1 %v2738_v56 }
 0x1cb   : > { %v859_v59 = vpop.xlane.xlu1 %858 }
 0x1cc   : > { %v888_v62 = vsub.f32 %v2673_v8, %v859_v59 }
 0x1cd   : > { %v855_v60 = vpop.xlane.xlu0 %854 }
 0x1ce   : > { %v886_v61 = vsub.f32 %v2677_v11, %v855_v60  ;;  %v906_v6 = vmul.f32 1.442695, %v888_v62 }
 0x1cf   : > { %v861_v63 = vpop.xlane.xlu1 %860 }
 0x1d0   : > { %v902_v0 = vmul.f32 1.442695, %v886_v61  ;;  %v889_v1 = vsub.f32 %v2681_v14, %v861_v63  ;;  %v2301_v61 = vld [vmem:[%s2635_s29 + $0x44] ss:$8 sps:$4 sm:$0xff]  }
 0x1d1   : > { %v857_v2 = vpop.xlane.xlu0 %856 }
 0x1d2   : > { %v908_v3 = vmul.f32 1.442695, %v889_v1  ;;  %v887_v5 = vsub.f32 %v2685_v16, %v857_v2  ;;  %2319 = vpow2.f32 %v902_v0 }
 0x1d4   : > { %v904_v7 = vmul.f32 1.442695, %v887_v5  ;;  %2321 = vpow2.f32 %v908_v3  ;;  %v2302_v5 = vld [vmem:[%s2635_s29 + $0x34] ss:$8 sps:$4 sm:$0xff]  }
 0x1d5   : > { %v863_v9 = vpop.xlane.xlu0 %862 }
 0x1d6   : > { %2323 = vpow2.f32 %v904_v7  ;;  %v890_v10 = vsub.f32 %v2689_v21, %v863_v9  ;;  %v2266_v9 = vld [vmem:[%s2641_s15 + $0x4] ss:$8 sps:$4 sm:$0xff]  }
 0x1d7   : > { %2325 = vpow2.f32 %v906_v6 }
 0x1d8   : > { %v910_v8 = vmul.f32 1.442695, %v890_v10 }
 0x1d9   : > { %v867_v11 = vpop.xlane.xlu0 %866  ;;  %v865_v12 = vpop.xlane.xlu1 %864 }
 0x1da   : > { %v892_v13 = vsub.f32 %v2693_v25, %v867_v11  ;;  %v891_v14 = vsub.f32 %v2697_v28, %v865_v12  ;;  %2327 = vpow2.f32 %v910_v8  ;;  %v2303_v11 = vld [vmem:[%s2635_s29 + $0x24] ss:$8 sps:$4 sm:$0xff]   ;;  %v2304_v12 = vld [vmem:[%s2635_s29 + $0x14] ss:$8 sps:$4 sm:$0xff]  }
 0x1db   : > { %v2305_v8 = vld [vmem:[%s2635_s29 + $0x4] ss:$8 sps:$4 sm:$0xff]  }
 0x1dc   : > { %v912_v15 = vmul.f32 1.442695, %v891_v14  ;;  %v914_v17 = vmul.f32 1.442695, %v892_v13  ;;  %v2269_v13 = vld [vmem:[%s2641_s15 + $0x14] ss:$8 sps:$4 sm:$0xff]  }
 0x1dd   : > { %v869_v18 = vpop.xlane.xlu1 %868  ;;  %v871_v16 = vpop.xlane.xlu0 %870  ;;  %v2306_v14 = vld [vmem:[%s2641_s15 + $0x24] ss:$8 sps:$4 sm:$0xff]  }
 0x1de   : > { %v893_v19 = vsub.f32 %v2702_v32, %v869_v18  ;;  %v894_v20 = vsub.f32 %v2706_v35, %v871_v16  ;;  %2329 = vpow2.f32 %v912_v15  ;;  %v2307_v15 = vld [vmem:[%s2641_s15 + $0x34] ss:$8 sps:$4 sm:$0xff]   ;;  %v2310_v16 = vld [vmem:[%s2641_s15 + $0x64] ss:$8 sps:$4 sm:$0xff]  }
 0x1df   : > { %v2752_v21 = vpop.eup %2319  ;;  %2331 = vpow2.f32 %v914_v17  ;;  %v2308_v17 = vld [vmem:[%s2641_s15 + $0x44] ss:$8 sps:$4 sm:$0xff]   ;;  %v2309_v18 = vld [vmem:[%s2641_s15 + $0x54] ss:$8 sps:$4 sm:$0xff]  }
 0x1e0   : > { %v916_v22 = vmul.f32 1.442695, %v893_v19  ;;  %v918_v26 = vmul.f32 1.442695, %v894_v20  ;;  %v2311_v19 = vld [vmem:[%s2641_s15 + $0x74] ss:$8 sps:$4 sm:$0xff]  }
 0x1e1   : > { %v875_v23 = vpop.xlane.xlu0 %874  ;;  %v873_v24 = vpop.xlane.xlu1 %872 }
 0x1e2   : > { %v2754_v25 = vpop.eup %2321  ;;  %2333 = vpow2.f32 %v916_v22  ;;  %v896_v27 = vsub.f32 %v2711_v39, %v875_v23  ;;  %v895_v28 = vsub.f32 %v2715_v42, %v873_v24  ;;  %v2312_v22 = vld [vmem:[%s2657_s30 + $0x64] ss:$8 sps:$4 sm:$0xff]  }
 0x1e3   : > { %v2758_v29 = vpop.eup %2323  ;;  %2335 = vpow2.f32 %v918_v26  ;;  %2176 = vmatprep.subr.bf16.mxu0 %v2312_v22 }
 0x1e4   : > { %v2760_v30 = vpop.eup %2325  ;;  %v920_v31 = vmul.f32 1.442695, %v895_v28  ;;  %v966_v32 = vpack.c.bf16 %v2758_v29, %v2752_v21  ;;  %v922_v33 = vmul.f32 1.442695, %v896_v27  ;;  %2177 = vmatpush3.bf16.msra.mxu0 %v2312_v22 }
 0x1e5   : > { %v877_v34 = vpop.xlane.xlu1 %876  ;;  %v879_v35 = vpop.xlane.xlu0 %878  ;;  %v967_v36 = vpack.c.bf16 %v2754_v25, %v2760_v30 }
 0x1e6   : > { %v897_v38 = vsub.f32 %v2720_v46, %v877_v34  ;;  %v898_v39 = vsub.f32 %v2724_v49, %v879_v35  ;;  %2126 = vmatprep.mubr.bf16.mxu1 %v966_v32  ;;  %2337 = vpow2.f32 %v920_v31 }
 0x1e7   : > { %2127 = vmatmul.mubr.bf16.vlgmr.msra.gmra.mxu1 %v967_v36  ;;  %2339 = vpow2.f32 %v922_v33  ;;  %v2771_v47 = vpop.eup %2327 }
 0x1e8   : > { %v924_v40 = vmul.f32 1.442695, %v897_v38  ;;  %2143 = vmatpush3.bf16.xpose.msra.mxu1 %v2249_v58  ;;  %v926_v43 = vmul.f32 1.442695, %v898_v39 }
 0x1e9   : > { %v883_v41 = vpop.xlane.xlu0 %882  ;;  %v881_v42 = vpop.xlane.xlu1 %880  ;;  %2144 = vmatprep.subr.bf16.mxu1 %v2299_v37 }
 0x1ea   : > { %2341 = vpow2.f32 %v924_v40  ;;  %v900_v44 = vsub.f32 %v2729_v53, %v883_v41  ;;  %v899_v45 = vsub.f32 %v2733_v55, %v881_v42 }
 0x1eb   : > { %v2773_v46 = vpop.eup %2329  ;;  %2343 = vpow2.f32 %v926_v43 }
 0x1ec   : > { %v928_v48 = vmul.f32 1.442695, %v899_v45  ;;  %v930_v49 = vmul.f32 1.442695, %v900_v44  ;;  %v968_v51 = vpack.c.bf16 %v2773_v46, %v2771_v47  ;;  %v2778_v54 = vpop.eup %2331 }
 0x1ed   : > { %v885_v50 = vpop.xlane.xlu1 %884 }
 0x1ee   : > { %v901_v57 = vsub.f32 %v2738_v56, %v885_v50  ;;  %2345 = vpow2.f32 %v928_v48  ;;  %2130 = vmatprep.mubr.bf16.mxu1 %v968_v51 }
 0x1ef   : > { %v2781_v53 = vpop.eup %2333  ;;  %2347 = vpow2.f32 %v930_v49 }
 0x1f0   : > { %v932_v55 = vmul.f32 1.442695, %v901_v57  ;;  %2145 = vmatpush3.bf16.xpose.msra.mxu1 %v2299_v37  ;;  %v969_v58 = vpack.c.bf16 %v2781_v53, %v2778_v54  ;;  %v2785_v59 = vpop.eup %2335 }
 0x1f1   : > { %2146 = vmatprep.subr.bf16.mxu1 %v2300_v52 }
 0x1f2   : > { %2349 = vpow2.f32 %v932_v55  ;;  %2131 = vmatmul.mubr.bf16.gmra.mxu1 %v969_v58 }
 0x1f3   : > { %v2787_v60 = vpop.eup %2337 }
 0x1f4   : > { %v970_v56 = vpack.c.bf16 %v2787_v60, %v2785_v59  ;;  %v2792_v62 = vpop.eup %2339 }
 0x1f6   : > { %2134 = vmatprep.mubr.bf16.mxu1 %v970_v56 }
 0x1f7   : > { %v2794_v63 = vpop.eup %2341 }
 0x1f8   : > { %2147 = vmatpush3.bf16.xpose.msra.mxu1 %v2300_v52  ;;  %v971_v0 = vpack.c.bf16 %v2794_v63, %v2792_v62  ;;  %v2798_v1 = vpop.eup %2343 }
 0x1f9   : > { %2148 = vmatprep.subr.bf16.mxu1 %v2301_v61 }
 0x1fa   : > { %2135 = vmatmul.mubr.bf16.gmra.mxu1 %v971_v0 }
 0x1fb   : > { %v2800_v2 = vpop.eup %2345 }
 0x1fc   : > { %v972_v3 = vpack.c.bf16 %v2800_v2, %v2798_v1  ;;  %v2805_v6 = vpop.eup %2347 }
 0x1fe   : > { %2138 = vmatprep.mubr.bf16.mxu1 %v972_v3 }
 0x1ff   : > { %v2807_v7 = vpop.eup %2349 }
 0x200   : > { %2149 = vmatpush3.bf16.xpose.msra.mxu1 %v2301_v61  ;;  %v973_v10 = vpack.c.bf16 %v2807_v7, %v2805_v6 }
 0x201   : > { %2150 = vmatprep.subr.bf16.mxu1 %v2302_v5 }
 0x202   : > { %2139 = vmatmul.mubr.bf16.gmra.mxu1 %v973_v10 }
 0x203   : > { %2158 = vmatprep.mubr.bf16.mxu1 %v2266_v9 }
 0x208   : > { %2151 = vmatpush3.bf16.xpose.msra.mxu1 %v2302_v5 }
 0x209   : > { %2152 = vmatprep.subr.bf16.mxu1 %v2303_v11 }
 0x210   : > { %2153 = vmatpush3.bf16.xpose.msra.mxu1 %v2303_v11 }
 0x211   : > { %2154 = vmatprep.subr.bf16.mxu1 %v2304_v12 }
 0x218   : > { %2155 = vmatpush3.bf16.xpose.msra.mxu1 %v2304_v12 }
 0x219   : > { %2156 = vmatprep.subr.bf16.mxu1 %v2305_v8 }
 0x220   : > { %2157 = vmatpush3.bf16.xpose.msra.mxu1 %v2305_v8 }
 0x227   : > { %2159 = vmatmul.mubr.bf16.vlgmr.msra.gmra.mxu1 %v2269_v13 }
 0x228   : > { %2162 = vmatprep.mubr.bf16.mxu1 %v2306_v14 }
 0x22f   : > { %2163 = vmatmul.mubr.bf16.gmra.mxu1 %v2307_v15 }
 0x230   : > { %2166 = vmatprep.mubr.bf16.mxu1 %v2308_v17  ;;  %v2313_v17 = vld [vmem:[%s2657_s30 + $0x54] ss:$8 sps:$4 sm:$0xff]  }
 0x231   : > { %2178 = vmatprep.subr.bf16.mxu0 %v2313_v17 }
 0x232   : > { %2179 = vmatpush3.bf16.msra.mxu0 %v2313_v17 }
 0x237   : > { %2167 = vmatmul.mubr.bf16.gmra.mxu1 %v2309_v18 }
 0x238   : > { %2170 = vmatprep.mubr.bf16.mxu1 %v2310_v16 }
 0x23f   : > { %2171 = vmatmul.mubr.bf16.gmra.mxu1 %v2311_v19 }
 0x2a7   : > { %v2822_v20 = vpop.f32.mrf.mxu1 }
 0x2a9   : > { %v2825_v23 = vpop.f32.mrf.mxu1 }
 0x2ab   : > { %v2827_v24 = vpop.f32.mrf.mxu1 }
 0x2ad   : > { %v2829_v26 = vpop.f32.mrf.mxu1 }
 0x2b2   : > { %v2831_v27 = vpop.f32.mrf.mxu1 }
 0x2b4   : > { %v2833_v28 = vpop.f32.mrf.mxu1 }
 0x2b6   : > { %v2835_v31 = vpop.f32.mrf.mxu1 }
 0x2b8   : > { %v2837_v32 = vpop.f32.mrf.mxu1 }
 0x2ba   : > { %v2839_v33 = vpop.f32.mrf.mxu1 }
 0x2bc   : > { %v2841_v34 = vpop.f32.mrf.mxu1 }
 0x2be   : > { %v2843_v35 = vpop.f32.mrf.mxu1 }
 0x2c0   : > { %v2845_v36 = vpop.f32.mrf.mxu1 }
 0x2c2   : > { %v2847_v37 = vpop.f32.mrf.mxu1 }
 0x2c4   : > { %v2849_v38 = vpop.f32.mrf.mxu1 }
 0x2c6   : > { %v2851_v39 = vpop.f32.mrf.mxu1 }
 0x2c8   : > { %v2853_v40 = vpop.f32.mrf.mxu1 }
 0x2e7   : > { %v2160_v41 = vpop.f32.mrf.mxu1 }
 0x2e8   : > { %v1314_v45 = vmul.f32 0.088388346, %v2160_v41 }
 0x2e9   : > { %v1249_v42 = vpop.f32.mrf.mxu1 }
 0x2ea   : > { %v1312_v43 = vmul.f32 0.088388346, %v1249_v42  ;;  %v2860_v57 = vadd.f32 %v2670_v4, %v1314_v45 }
 0x2eb   : > { %v2161_v44 = vpop.f32.mrf.mxu1 }
 0x2ec   : > { %v2856_v48 = vadd.f32 %v2670_v4, %v1312_v43  ;;  %v1315_v52 = vmul.f32 0.088388346, %v2161_v44  ;;  %v2314_v44 = vld [vmem:[%s2657_s30 + $0x44] ss:$8 sps:$4 sm:$0xff]  }
 0x2ed   : > { %v1252_v49 = vpop.f32.mrf.mxu1  ;;  %2180 = vmatprep.subr.bf16.mxu0 %v2314_v44 }
 0x2ee   : > { %v1313_v50 = vmul.f32 0.088388346, %v1252_v49  ;;  %1344 = vmax.xlane.f32.xlu0 %v2856_v48  ;;  %v2868_v3 = vadd.f32 %v2670_v4, %v1315_v52  ;;  %2181 = vmatpush3.bf16.msra.mxu0 %v2314_v44 }
 0x2ef   : > { %v2164_v51 = vpop.f32.mrf.mxu1 }
 0x2f0   : > { %v2863_v55 = vadd.f32 %v2670_v4, %v1313_v50  ;;  %v1318_v0 = vmul.f32 0.088388346, %v2164_v51 }
 0x2f1   : > { %v1265_v58 = vpop.f32.mrf.mxu1 }
 0x2f2   : > { %v1316_v56 = vmul.f32 0.088388346, %v1265_v58  ;;  %1348 = vmax.xlane.f32.xlu0 %v2860_v57  ;;  %1346 = vmax.xlane.f32.xlu1 %v2863_v55  ;;  %v2876_v8 = vadd.f32 %v2670_v4, %v1318_v0 }
 0x2f3   : > { %v2165_v61 = vpop.f32.mrf.mxu1 }
 0x2f4   : > { %v2871_v5 = vadd.f32 %v2670_v4, %v1316_v56  ;;  %v1319_v12 = vmul.f32 0.088388346, %v2165_v61  ;;  %v2315_v56 = vld [vmem:[%s2657_s30 + $0x34] ss:$8 sps:$4 sm:$0xff]  }
 0x2f5   : > { %v1268_v9 = vpop.f32.mrf.mxu1  ;;  %2182 = vmatprep.subr.bf16.mxu0 %v2315_v56 }
 0x2f6   : > { %v1317_v10 = vmul.f32 0.088388346, %v1268_v9  ;;  %1350 = vmax.xlane.f32.xlu1 %v2868_v3  ;;  %1352 = vmax.xlane.f32.xlu0 %v2871_v5  ;;  %v2885_v19 = vadd.f32 %v2670_v4, %v1319_v12  ;;  %v2316_v12 = vld [vmem:[%s2657_s30 + $0x24] ss:$8 sps:$4 sm:$0xff]  }
 0x2f7   : > { %v2168_v11 = vpop.f32.mrf.mxu1  ;;  %2183 = vmatpush3.bf16.msra.mxu0 %v2315_v56 }
 0x2f8   : > { %v2879_v13 = vadd.f32 %v2670_v4, %v1317_v10  ;;  %v1322_v16 = vmul.f32 0.088388346, %v2168_v11  ;;  %2184 = vmatprep.subr.bf16.mxu0 %v2316_v12 }
 0x2f9   : > { %v1281_v14 = vpop.f32.mrf.mxu1 }
 0x2fa   : > { %v1320_v15 = vmul.f32 0.088388346, %v1281_v14  ;;  %1356 = vmax.xlane.f32.xlu0 %v2876_v8  ;;  %1354 = vmax.xlane.f32.xlu1 %v2879_v13  ;;  %v2894_v49 = vadd.f32 %v2670_v4, %v1322_v16 }
 0x2fb   : > { %v2169_v18 = vpop.f32.mrf.mxu1  ;;  %2185 = vmatpush3.bf16.msra.mxu0 %v2316_v12 }
 0x2fc   : > { %v2888_v22 = vadd.f32 %v2670_v4, %v1320_v15  ;;  %v1323_v45 = vmul.f32 0.088388346, %v2169_v18  ;;  %v2317_v18 = vld [vmem:[%s2657_s30 + $0x14] ss:$8 sps:$4 sm:$0xff]  }
 0x2fd   : > { %v1284_v41 = vpop.f32.mrf.mxu1  ;;  %2186 = vmatprep.subr.bf16.mxu0 %v2317_v18 }
 0x2fe   : > { %v1321_v42 = vmul.f32 0.088388346, %v1284_v41  ;;  %1358 = vmax.xlane.f32.xlu1 %v2885_v19  ;;  %1360 = vmax.xlane.f32.xlu0 %v2888_v22  ;;  %v2903_v0 = vadd.f32 %v2670_v4, %v1323_v45  ;;  %v2318_v41 = vld [vmem:[%s2657_s30 + $0x4] ss:$8 sps:$4 sm:$0xff]  }
 0x2ff   : > { %v2172_v43 = vpop.f32.mrf.mxu1  ;;  %2187 = vmatpush3.bf16.msra.mxu0 %v2317_v18 }
 0x300   : > { %v2897_v50 = vadd.f32 %v2670_v4, %v1321_v42  ;;  %v1326_v61 = vmul.f32 0.088388346, %v2172_v43  ;;  %2188 = vmatprep.subr.bf16.mxu0 %v2318_v41 }
 0x301   : > { %v1297_v51 = vpop.f32.mrf.mxu1 }
 0x302   : > { %v1324_v52 = vmul.f32 0.088388346, %v1297_v51  ;;  %1364 = vmax.xlane.f32.xlu0 %v2894_v49  ;;  %1362 = vmax.xlane.f32.xlu1 %v2897_v50  ;;  %v2912_v15 = vadd.f32 %v2670_v4, %v1326_v61 }
 0x303   : > { %v2173_v58 = vpop.f32.mrf.mxu1  ;;  %2189 = vmatpush3.bf16.msra.mxu0 %v2318_v41 }
 0x304   : > { %v2906_v9 = vadd.f32 %v2670_v4, %v1324_v52  ;;  %v1327_v14 = vmul.f32 0.088388346, %v2173_v58 }
 0x305   : > { %v1300_v10 = vpop.f32.mrf.mxu1 }
 0x306   : > { %v1325_v11 = vmul.f32 0.088388346, %v1300_v10  ;;  %1366 = vmax.xlane.f32.xlu1 %v2903_v0  ;;  %1368 = vmax.xlane.f32.xlu0 %v2906_v9  ;;  %v2921_v16 = vadd.f32 %v2670_v4, %v1327_v14 }
 0x308   : > { %v2915_v17 = vadd.f32 %v2670_v4, %v1325_v11 }
 0x30a   : > { %1372 = vmax.xlane.f32.xlu0 %v2912_v15  ;;  %1370 = vmax.xlane.f32.xlu1 %v2915_v17 }
 0x30e   : > { %934 = vadd.xlane.f32.xlu0 %v2752_v21  ;;  %1374 = vmax.xlane.f32.xlu1 %v2921_v16 }
 0x312   : > { %938 = vadd.xlane.f32.xlu0 %v2760_v30  ;;  %936 = vadd.xlane.f32.xlu1 %v2758_v29 }
 0x316   : > { %942 = vadd.xlane.f32.xlu0 %v2771_v47  ;;  %940 = vadd.xlane.f32.xlu1 %v2754_v25 }
 0x31a   : > { %946 = vadd.xlane.f32.xlu0 %v2778_v54  ;;  %944 = vadd.xlane.f32.xlu1 %v2773_v46 }
 0x31e   : > { %950 = vadd.xlane.f32.xlu0 %v2785_v59  ;;  %948 = vadd.xlane.f32.xlu1 %v2781_v53 }
 0x322   : > { %954 = vadd.xlane.f32.xlu0 %v2792_v62  ;;  %952 = vadd.xlane.f32.xlu1 %v2787_v60 }
 0x326   : > { %958 = vadd.xlane.f32.xlu0 %v2798_v1  ;;  %956 = vadd.xlane.f32.xlu1 %v2794_v63 }
 0x32a   : > { %962 = vadd.xlane.f32.xlu0 %v2805_v6  ;;  %960 = vadd.xlane.f32.xlu1 %v2800_v2 }
 0x32e   : > { %964 = vadd.xlane.f32.xlu1 %v2807_v7 }
 0x377   : > { %v1345_v4 = vpop.xlane.xlu0 %1344 }
 0x378   : > { %v1376_v21 = vsub.f32 %v2856_v48, %v1345_v4 }
 0x37a   : > { %v1392_v25 = vmul.f32 1.442695, %v1376_v21 }
 0x37b   : > { %v1349_v29 = vpop.xlane.xlu0 %1348  ;;  %v1347_v30 = vpop.xlane.xlu1 %1346 }
 0x37c   : > { %v1378_v47 = vsub.f32 %v2860_v57, %v1349_v29  ;;  %v1377_v46 = vsub.f32 %v2863_v55, %v1347_v30  ;;  %2351 = vpow2.f32 %v1392_v25 }
 0x37e   : > { %v1396_v54 = vmul.f32 1.442695, %v1378_v47  ;;  %v1394_v53 = vmul.f32 1.442695, %v1377_v46 }
 0x37f   : > { %v1351_v59 = vpop.xlane.xlu1 %1350  ;;  %v1353_v60 = vpop.xlane.xlu0 %1352 }
 0x380   : > { %2353 = vpow2.f32 %v1396_v54  ;;  %v1379_v62 = vsub.f32 %v2868_v3, %v1351_v59  ;;  %v1380_v63 = vsub.f32 %v2871_v5, %v1353_v60 }
 0x381   : > { %2355 = vpow2.f32 %v1394_v53 }
 0x382   : > { %v1398_v1 = vmul.f32 1.442695, %v1379_v62  ;;  %v1400_v2 = vmul.f32 1.442695, %v1380_v63 }
 0x383   : > { %v1357_v6 = vpop.xlane.xlu0 %1356  ;;  %v1355_v7 = vpop.xlane.xlu1 %1354 }
 0x384   : > { %2357 = vpow2.f32 %v1398_v1  ;;  %v1382_v48 = vsub.f32 %v2876_v8, %v1357_v6  ;;  %v1381_v57 = vsub.f32 %v2879_v13, %v1355_v7 }
 0x385   : > { %2359 = vpow2.f32 %v1400_v2 }
 0x386   : > { %v1404_v55 = vmul.f32 1.442695, %v1382_v48  ;;  %v1402_v42 = vmul.f32 1.442695, %v1381_v57 }
 0x387   : > { %v1359_v43 = vpop.xlane.xlu1 %1358  ;;  %v1361_v44 = vpop.xlane.xlu0 %1360 }
 0x388   : > { %2361 = vpow2.f32 %v1404_v55  ;;  %v1383_v3 = vsub.f32 %v2885_v19, %v1359_v43  ;;  %v1384_v5 = vsub.f32 %v2888_v22, %v1361_v44 }
 0x389   : > { %2363 = vpow2.f32 %v1402_v42  ;;  %v2352_v56 = vpop.eup %2351 }
 0x38a   : > { %v1406_v45 = vmul.f32 1.442695, %v1383_v3  ;;  %v1408_v51 = vmul.f32 1.442695, %v1384_v5 }
 0x38b   : > { %v1365_v52 = vpop.xlane.xlu0 %1364  ;;  %v1363_v58 = vpop.xlane.xlu1 %1362 }
 0x38c   : > { %2365 = vpow2.f32 %v1406_v45  ;;  %v1386_v8 = vsub.f32 %v2894_v49, %v1365_v52  ;;  %v1385_v13 = vsub.f32 %v2897_v50, %v1363_v58 }
 0x38d   : > { %v2354_v61 = vpop.eup %2353  ;;  %2367 = vpow2.f32 %v1408_v51 }
 0x38e   : > { %v2356_v10 = vpop.eup %2355  ;;  %v1412_v11 = vmul.f32 1.442695, %v1386_v8  ;;  %v1410_v12 = vmul.f32 1.442695, %v1385_v13  ;;  %1428 = vadd.xlane.f32.xlu0 %v2354_v61 }
 0x38f   : > { %v1367_v19 = vpop.xlane.xlu1 %1366  ;;  %v1369_v14 = vpop.xlane.xlu0 %1368  ;;  %v1456_v22 = vpack.c.bf16 %v2356_v10, %v2352_v56 }
 0x390   : > { %2369 = vpow2.f32 %v1412_v11  ;;  %v1387_v18 = vsub.f32 %v2903_v0, %v1367_v19  ;;  %v1388_v41 = vsub.f32 %v2906_v9, %v1369_v14 }
 0x391   : > { %v2358_v4 = vpop.eup %2357  ;;  %2371 = vpow2.f32 %v1410_v12  ;;  %2190 = vmatprep.mubr.bf16.mxu0 %v1456_v22 }
 0x392   : > { %v1414_v49 = vmul.f32 1.442695, %v1387_v18  ;;  %1424 = vadd.xlane.f32.xlu0 %v2352_v56  ;;  %1430 = vadd.xlane.f32.xlu1 %v2358_v4  ;;  %v1457_v50 = vpack.c.bf16 %v2358_v4, %v2354_v61  ;;  %v2360_v29 = vpop.eup %2359  ;;  %v1416_v30 = vmul.f32 1.442695, %v1388_v41 }
 0x393   : > { %v1373_v21 = vpop.xlane.xlu0 %1372  ;;  %v1371_v25 = vpop.xlane.xlu1 %1370 }
 0x394   : > { %2373 = vpow2.f32 %v1414_v49  ;;  %v1390_v47 = vsub.f32 %v2912_v15, %v1373_v21  ;;  %v1389_v46 = vsub.f32 %v2915_v17, %v1371_v25  ;;  %2191 = vmatmul.mubr.bf16.vlgmr.msra.gmra.mxu0 %v1457_v50 }
 0x395   : > { %v2362_v0 = vpop.eup %2361  ;;  %2375 = vpow2.f32 %v1416_v30 }
 0x396   : > { %v2364_v54 = vpop.eup %2363  ;;  %v1418_v9 = vmul.f32 1.442695, %v1389_v46  ;;  %1436 = vadd.xlane.f32.xlu0 %v2362_v0  ;;  %1426 = vadd.xlane.f32.xlu1 %v2356_v10  ;;  %v1420_v53 = vmul.f32 1.442695, %v1390_v47 }
 0x397   : > { %v1375_v59 = vpop.xlane.xlu1 %1374  ;;  %v1458_v60 = vpack.c.bf16 %v2364_v54, %v2360_v29  ;;  %v935_v5 = vpop.xlane.xlu0 %934 }
 0x398   : > { %v1391_v62 = vsub.f32 %v2921_v16, %v1375_v59  ;;  %2377 = vpow2.f32 %v1418_v9 }
 0x399   : > { %v2366_v63 = vpop.eup %2365  ;;  %2194 = vmatprep.mubr.bf16.mxu0 %v1458_v60  ;;  %2379 = vpow2.f32 %v1420_v53 }
 0x39a   : > { %v1422_v1 = vmul.f32 1.442695, %v1391_v62  ;;  %1432 = vadd.xlane.f32.xlu0 %v2360_v29  ;;  %1438 = vadd.xlane.f32.xlu1 %v2366_v63  ;;  %v1459_v15 = vpack.c.bf16 %v2366_v63, %v2362_v0  ;;  %v2368_v17 = vpop.eup %2367 }
 0x39b   : > { %v937_v45 = vpop.xlane.xlu1 %936  ;;  %v939_v51 = vpop.xlane.xlu0 %938 }
 0x39c   : > { %2381 = vpow2.f32 %v1422_v1  ;;  %2195 = vmatmul.mubr.bf16.gmra.mxu0 %v1459_v15 }
 0x39d   : > { %v2370_v2 = vpop.eup %2369  ;;  %2383 = vrcp.f32 %v939_v51 }
 0x39e   : > { %v2372_v6 = vpop.eup %2371  ;;  %1444 = vadd.xlane.f32.xlu0 %v2370_v2  ;;  %1434 = vadd.xlane.f32.xlu1 %v2364_v54  ;;  %2385 = vrcp.f32 %v935_v5 }
 0x39f   : > { %v1460_v7 = vpack.c.bf16 %v2372_v6, %v2368_v17  ;;  %v941_v52 = vpop.xlane.xlu1 %940  ;;  %v943_v58 = vpop.xlane.xlu0 %942 }
 0x3a1   : > { %v2374_v48 = vpop.eup %2373  ;;  %2198 = vmatprep.mubr.bf16.mxu0 %v1460_v7 }
 0x3a2   : > { %1440 = vadd.xlane.f32.xlu0 %v2368_v17  ;;  %1446 = vadd.xlane.f32.xlu1 %v2374_v48  ;;  %v1461_v16 = vpack.c.bf16 %v2374_v48, %v2370_v2  ;;  %v2376_v57 = vpop.eup %2375 }
 0x3a3   : > { %v945_v56 = vpop.xlane.xlu1 %944  ;;  %v947_v8 = vpop.xlane.xlu0 %946 }
 0x3a4   : > { %2199 = vmatmul.mubr.bf16.gmra.mxu0 %v1461_v16 }
 0x3a5   : > { %v2378_v55 = vpop.eup %2377 }
 0x3a6   : > { %1448 = vadd.xlane.f32.xlu0 %v2376_v57  ;;  %1442 = vadd.xlane.f32.xlu1 %v2372_v6  ;;  %v1462_v42 = vpack.c.bf16 %v2378_v55, %v2376_v57  ;;  %v2380_v43 = vpop.eup %2379 }
 0x3a7   : > { %v949_v13 = vpop.xlane.xlu1 %948  ;;  %v951_v61 = vpop.xlane.xlu0 %950 }
 0x3a8   : > { %2202 = vmatprep.mubr.bf16.mxu0 %v1462_v42 }
 0x3a9   : > { %v2382_v44 = vpop.eup %2381 }
 0x3aa   : > { %1452 = vadd.xlane.f32.xlu0 %v2380_v43  ;;  %1450 = vadd.xlane.f32.xlu1 %v2378_v55  ;;  %v1463_v3 = vpack.c.bf16 %v2382_v44, %v2380_v43  ;;  %v2384_v54 = vpop.eup %2383 }
 0x3ab   : > { %v2957_v10 = vpop.xlane.xlu1 %952  ;;  %v955_v11 = vpop.xlane.xlu0 %954  ;;  %v1137_v63 = vmul.f32 %v2384_v54, %v2822_v20 }
 0x3ac   : > { %2203 = vmatmul.mubr.bf16.gmra.mxu0 %v1463_v3  ;;  %v2386_v9 = vpop.eup %2385 }
 0x3ad   : > { %v1135_v48 = vmul.f32 %v2386_v9, %v2825_v23 }
 0x3ae   : > { %1454 = vadd.xlane.f32.xlu1 %v2382_v44 }
 0x3af   : > { %v957_v12 = vpop.xlane.xlu1 %956  ;;  %v2959_v19 = vpop.xlane.xlu0 %958 }
 0x3b3   : > { %v2961_v14 = vpop.xlane.xlu1 %960  ;;  %v2963_v22 = vpop.xlane.xlu0 %962 }
 0x3b7   : > { %v2965_v18 = vpop.xlane.xlu1 %964 }
 0x417   : > { %v1429_v41 = vpop.xlane.xlu0 %1428 }
 0x418   : > { %2387 = vrcp.f32 %v1429_v41 }
 0x419   : > { %2389 = vrcp.f32 %v941_v52 }
 0x41b   : > { %v1431_v4 = vpop.xlane.xlu1 %1430  ;;  %v1425_v49 = vpop.xlane.xlu0 %1424 }
 0x41c   : > { %2391 = vrcp.f32 %v1425_v49 }
 0x41d   : > { %2393 = vrcp.f32 %v937_v45 }
 0x41e   : > { %2395 = vrcp.f32 %v1431_v4 }
 0x41f   : > { %v1427_v50 = vpop.xlane.xlu1 %1426  ;;  %v1437_v21 = vpop.xlane.xlu0 %1436  ;;  %2397 = vrcp.f32 %v947_v8 }
 0x420   : > { %2399 = vrcp.f32 %v1427_v50 }
 0x421   : > { %2401 = vrcp.f32 %v943_v58 }
 0x422   : > { %2403 = vrcp.f32 %v1437_v21 }
 0x423   : > { %v1439_v25 = vpop.xlane.xlu1 %1438  ;;  %v1433_v29 = vpop.xlane.xlu0 %1432  ;;  %2405 = vrcp.f32 %v949_v13 }
 0x424   : > { %2407 = vrcp.f32 %v1433_v29 }
 0x425   : > { %2409 = vrcp.f32 %v945_v56  ;;  %v2388_v53 = vpop.eup %2387 }
 0x426   : > { %2411 = vrcp.f32 %v1439_v25  ;;  %v2390_v62 = vpop.eup %2389 }
 0x427   : > { %v1435_v30 = vpop.xlane.xlu1 %1434  ;;  %v1445_v47 = vpop.xlane.xlu0 %1444  ;;  %2413 = vrcp.f32 %v955_v11  ;;  %v1138_v43 = vmul.f32 %v2390_v62, %v2827_v24 }
 0x428   : > { %2415 = vrcp.f32 %v1435_v30 }
 0x429   : > { %v2392_v15 = vpop.eup %2391  ;;  %2417 = vrcp.f32 %v951_v61 }
 0x42a   : > { %v2394_v6 = vpop.eup %2393  ;;  %2419 = vrcp.f32 %v1445_v47 }
 0x42b   : > { %v1447_v46 = vpop.xlane.xlu1 %1446  ;;  %v1441_v0 = vpop.xlane.xlu0 %1440  ;;  %2421 = vrcp.f32 %v957_v12  ;;  %v1136_v52 = vmul.f32 %v2394_v6, %v2829_v26 }
 0x42c   : > { %v2396_v57 = vpop.eup %2395  ;;  %2423 = vrcp.f32 %v1441_v0 }
 0x42d   : > { %v2398_v55 = vpop.eup %2397  ;;  %2425 = vrcp.f32 %v2957_v10 }
 0x42e   : > { %v2400_v3 = vpop.eup %2399  ;;  %2427 = vrcp.f32 %v1447_v46  ;;  %v1141_v10 = vmul.f32 %v2398_v55, %v2831_v27 }
 0x42f   : > { %v1443_v59 = vpop.xlane.xlu1 %1442  ;;  %v1449_v17 = vpop.xlane.xlu0 %1448  ;;  %2429 = vrcp.f32 %v2963_v22 }
 0x430   : > { %v2402_v51 = vpop.eup %2401  ;;  %2431 = vrcp.f32 %v1443_v59 }
 0x431   : > { %v2404_v56 = vpop.eup %2403  ;;  %2433 = vrcp.f32 %v2959_v19  ;;  %v1139_v22 = vmul.f32 %v2402_v51, %v2833_v28 }
 0x432   : > { %v2406_v13 = vpop.eup %2405 }
 0x433   : > { %v1451_v5 = vpop.xlane.xlu1 %1450  ;;  %v1453_v8 = vpop.xlane.xlu0 %1452  ;;  %v1142_v19 = vmul.f32 %v2406_v13, %v2835_v31 }
 0x434   : > { %v2408_v12 = vpop.eup %2407  ;;  %2435 = vrcp.f32 %v1453_v8 }
 0x435   : > { %v2410_v26 = vpop.eup %2409  ;;  %2437 = vrcp.f32 %v2965_v18 }
 0x436   : > { %v2412_v50 = vpop.eup %2411  ;;  %2439 = vrcp.f32 %v1449_v17  ;;  %v1140_v18 = vmul.f32 %v2410_v26, %v2837_v32 }
 0x437   : > { %v1455_v21 = vpop.xlane.xlu1 %1454  ;;  %v2414_v27 = vpop.eup %2413  ;;  %2441 = vrcp.f32 %v2961_v14 }
 0x438   : > { %v2416_v47 = vpop.eup %2415  ;;  %2443 = vrcp.f32 %v1455_v21 }
 0x439   : > { %v2418_v28 = vpop.eup %2417  ;;  %2445 = vrcp.f32 %v1451_v5 }
 0x43a   : > { %v2420_v9 = vpop.eup %2419  ;;  %v1143_v17 = vmul.f32 %v2418_v28, %v2841_v34 }
 0x43b   : > { %v2422_v59 = vpop.eup %2421 }
 0x43c   : > { %v2424_v14 = vpop.eup %2423 }
 0x454   : > { %v2192_v60 = vpop.f32.mrf.mxu0 }
 0x455   : > { %v1611_v1 = vmul.f32 %v2388_v53, %v2192_v60  ;;  %v1145_v60 = vmul.f32 %v2414_v27, %v2839_v33 }
 0x456   : > { %v1530_v2 = vpop.f32.mrf.mxu0 }
 0x457   : > { %v2000_v7 = vpack.c.bf16 %v1611_v1, %v1137_v63  ;;  %v1609_v16 = vmul.f32 %v2392_v15, %v1530_v2  ;;  %v2426_v1 = vpop.eup %2425 }
 0x458   : > { %v2193_v20 = vpop.f32.mrf.mxu0  ;;  %v2428_v2 = vpop.eup %2427 }
 0x459   : > { %1723 = vst [vmem:[%s2972_s11 + $0x10] sm:$0xff] %v2000_v7  ;;  %v1998_v42 = vpack.c.bf16 %v1609_v16, %v1135_v48  ;;  %v1612_v44 = vmul.f32 %v2396_v57, %v2193_v20  ;;  %v2430_v7 = vpop.eup %2429  ;;  %v1146_v16 = vmul.f32 %v2422_v59, %v2843_v35 }
 0x45a   : > { %v1533_v45 = vpop.f32.mrf.mxu0  ;;  %v2432_v33 = vpop.eup %2431  ;;  %v1149_v51 = vmul.f32 %v2430_v7, %v2847_v37 }
 0x45b   : > { %1721 = vst [vmem:[%s2972_s11] sm:$0xff] %v1998_v42  ;;  %v2001_v23 = vpack.c.bf16 %v1612_v44, %v1138_v43  ;;  %v1610_v58 = vmul.f32 %v2400_v3, %v1533_v45  ;;  %v2434_v55 = vpop.eup %2433  ;;  %v1144_v43 = vmul.f32 %v2426_v1, %v2845_v36 }
 0x45c   : > { %v2196_v24 = vpop.f32.mrf.mxu0  ;;  %v2436_v34 = vpop.eup %2435  ;;  %v1147_v8 = vmul.f32 %v2434_v55, %v2849_v38 }
 0x45d   : > { %1724 = vst [vmem:[%s2972_s11 + $0x18] sm:$0xff] %v2001_v23  ;;  %v1999_v61 = vpack.c.bf16 %v1610_v58, %v1136_v52  ;;  %v1615_v11 = vmul.f32 %v2404_v56, %v2196_v24  ;;  %v2438_v5 = vpop.eup %2437 }
 0x45e   : > { %v1546_v41 = vpop.f32.mrf.mxu0  ;;  %v2440_v35 = vpop.eup %2439 }
 0x45f   : > { %1722 = vst [vmem:[%s2972_s11 + $0x8] sm:$0xff] %v1999_v61  ;;  %v2004_v4 = vpack.c.bf16 %v1615_v11, %v1141_v10  ;;  %v1613_v49 = vmul.f32 %v2408_v12, %v1546_v41  ;;  %v2442_v58 = vpop.eup %2441  ;;  %v1150_v10 = vmul.f32 %v2438_v5, %v2851_v39 }
 0x460   : > { %v2197_v25 = vpop.f32.mrf.mxu0  ;;  %v2444_v24 = vpop.eup %2443  ;;  %v1148_v26 = vmul.f32 %v2442_v58, %v2853_v40 }
 0x461   : > { %1727 = vst [vmem:[%s2972_s11 + $0x30] sm:$0xff] %v2004_v4  ;;  %v2002_v29 = vpack.c.bf16 %v1613_v49, %v1139_v22  ;;  %v1616_v30 = vmul.f32 %v2412_v50, %v2197_v25  ;;  %v2446_v37 = vpop.eup %2445 }
 0x462   : > { %v1549_v46 = vpop.f32.mrf.mxu0 }
 0x463   : > { %1725 = vst [vmem:[%s2972_s11 + $0x20] sm:$0xff] %v2002_v29  ;;  %v2005_v0 = vpack.c.bf16 %v1616_v30, %v1142_v19  ;;  %v1614_v54 = vmul.f32 %v2416_v47, %v1549_v46 }
 0x464   : > { %v2200_v53 = vpop.f32.mrf.mxu0 }
 0x465   : > { %1728 = vst [vmem:[%s2972_s11 + $0x38] sm:$0xff] %v2005_v0  ;;  %v2003_v31 = vpack.c.bf16 %v1614_v54, %v1140_v18  ;;  %v1619_v62 = vmul.f32 %v2420_v9, %v2200_v53 }
 0x466   : > { %v1562_v63 = vpop.f32.mrf.mxu0 }
 0x467   : > { %1726 = vst [vmem:[%s2972_s11 + $0x28] sm:$0xff] %v2003_v31  ;;  %v2008_v15 = vpack.c.bf16 %v1619_v62, %v1145_v60  ;;  %v1617_v32 = vmul.f32 %v2424_v14, %v1562_v63 }
 0x468   : > { %v2201_v6 = vpop.f32.mrf.mxu0 }
 0x469   : > { %1731 = vst [vmem:[%s2972_s11 + $0x50] sm:$0xff] %v2008_v15  ;;  %v2006_v48 = vpack.c.bf16 %v1617_v32, %v1143_v17  ;;  %v1620_v57 = vmul.f32 %v2428_v2, %v2201_v6 }
 0x46a   : > { %v1565_v20 = vpop.f32.mrf.mxu0 }
 0x46b   : > { %1729 = vst [vmem:[%s2972_s11 + $0x40] sm:$0xff] %v2006_v48  ;;  %v2009_v42 = vpack.c.bf16 %v1620_v57, %v1146_v16  ;;  %v1618_v44 = vmul.f32 %v2432_v33, %v1565_v20 }
 0x46c   : > { %v2204_v3 = vpop.f32.mrf.mxu0 }
 0x46d   : > { %1732 = vst [vmem:[%s2972_s11 + $0x58] sm:$0xff] %v2009_v42  ;;  %v2007_v45 = vpack.c.bf16 %v1618_v44, %v1144_v43  ;;  %v1623_v23 = vmul.f32 %v2436_v34, %v2204_v3 }
 0x46e   : > { %v1578_v52 = vpop.f32.mrf.mxu0 }
 0x46f   : > { %1730 = vst [vmem:[%s2972_s11 + $0x48] sm:$0xff] %v2007_v45  ;;  %v2012_v56 = vpack.c.bf16 %v1623_v23, %v1149_v51  ;;  %v1621_v36 = vmul.f32 %v2440_v35, %v1578_v52 }
 0x470   : > { %v2205_v13 = vpop.f32.mrf.mxu0 }
 0x471   : > { %1735 = vst [vmem:[%s2972_s11 + $0x70] sm:$0xff] %v2012_v56  ;;  %v2010_v61 = vpack.c.bf16 %v1621_v36, %v1147_v8  ;;  %v1624_v11 = vmul.f32 %v2444_v24, %v2205_v13 }
 0x472   : > { %v1581_v12 = vpop.f32.mrf.mxu0 }
 0x473   : > { %1733 = vst [vmem:[%s2972_s11 + $0x60] sm:$0xff] %v2010_v61  ;;  %v2013_v41 = vpack.c.bf16 %v1624_v11, %v1150_v10  ;;  %v1622_v4 = vmul.f32 %v2446_v37, %v1581_v12 }
 0x475   : > { %1736 = vst [vmem:[%s2972_s11 + $0x78] sm:$0xff] %v2013_v41  ;;  %v2011_v22 = vpack.c.bf16 %v1622_v4, %v1148_v26 }
 0x477   : > { %1734 = vst [vmem:[%s2972_s11 + $0x68] sm:$0xff] %v2011_v22 }
 0x478 PF: > { %s14_s19 = sadd.s32 1, %s2485_s19   ;;  %s3031_s15 = smov %s2473_s16 }
 0x479   : > { %p11_p10 = scmp.ge.s32.totalorder %s14_s19, 4   ;;  %s3032_s16 = smov %s2551_s24 }
 0x47a   : > { %s3033_s17 = smov %s2481_s18  ;;  %s3034_s18 = smov %s3036_s20 }
 0x47b   :  { %13 = sbr.rel (!%p11_p10) target bundleno = 3 (0x3), region = 204 }

// kernel: classifier_forward.13
= control target key start
LH: loop header
LB: loop body
LE: loop exit
PB: predicated region body
PF: predicated region fallthrough
CT: control target
= control target key end

     0   :  { %s2225_s12 = smov 0   ;;  %s2227_s13 = smov 0   ;;  %s2787_s0 = inlined_call_operand.vmem [shape: bf16[256,256], index: 0, kind: input, shape index: {}]   ;;  %s2788_s1 = inlined_call_operand.vmem [shape: bf16[256,768], index: 1, kind: input, shape index: {}]   ;;  %s2789_s2 = inlined_call_operand.vmem [shape: f32[1,768], index: 2, kind: input, shape index: {}]   ;;  %s2790_s3 = inlined_call_operand.vmem [shape: bf16[256,768], index: 3, kind: output, shape index: {}]  }
   0x1   :  { %s2229_s14 = smov 0  }
   0x2 LB: > { %s25_s15 = sadd.s32 1, %s2199_s13  ;;  %p1739_p0 = scmp.ge.s32.totalorder %s2203_s14, 1  ;;  %s2203_s14 = sphi %s2229_s14, %s13_s14   ;;  %s2199_s13 = sphi %s2227_s13, %s2792_s13   ;;  %s2195_s12 = sphi %s2225_s12, %s2791_s12  }
   0x3   : > { %p27_p1 = scmp.ge.s32.totalorder %s25_s15, 2  ;;  %p174_p2 = scmp.lt.s32.totalorder %s2203_s14, 3 }
   0x5   : > { %s2794_s15 = smov (%p27_p1, %s25_s15), 0  ;;  %p175_p3 = pnand %p1739_p0, %p174_p2 }
   0x6   : > { %s1740_s30 = sshll.u32 (!%p175_p3), %s2195_s12, 4 }
   0x7   : > { %178 = sbr.rel (%p175_p3) target bundleno = 370 (0x172), region = 32  ;;  %p214_p4 = scmp.lt.s32.totalorder (!%p175_p3), %s1740_s30, 31 }
   0xc   : > { %v2013_v0 = vld [vmem:[%s2788_s1 + $0x154] ss:$24 sps:$4 sm:$0xff]   ;;  %v2017_v2 = vld [vmem:[%s2788_s1 + $0x150] ss:$24 sps:$4 sm:$0xff]   ;;  %v2019_v4 = vld [vmem:[%s2788_s1 + $0x124] ss:$24 sps:$4 sm:$0xff]  }
   0xd   : > { %v2015_v1 = vld [vmem:[%s2788_s1 + $0x15c] ss:$24 sps:$4 sm:$0xff]   ;;  %947 = vmatprep.subr.bf16.mxu0 %v2013_v0  ;;  %v2018_v3 = vld [vmem:[%s2788_s1 + $0x158] ss:$24 sps:$4 sm:$0xff]   ;;  %v2021_v5 = vld [vmem:[%s2788_s1 + $0x12c] ss:$24 sps:$4 sm:$0xff]  }
   0xe   : > { %1060 = vmatprep.subr.bf16.mxu1 %v2015_v1  ;;  %948 = vmatpush1.bf16.msra.mxu0 %v2017_v2  ;;  %v2023_v6 = vld [vmem:[%s2788_s1 + $0x120] ss:$24 sps:$4 sm:$0xff]   ;;  %v2025_v8 = vld [vmem:[%s2788_s1 + $0xf4] ss:$24 sps:$4 sm:$0xff]   ;;  %v2029_v10 = vld [vmem:[%s2788_s1 + $0xf0] ss:$24 sps:$4 sm:$0xff]  }
   0xf   : > { %1061 = vmatpush1.bf16.msra.mxu1 %v2018_v3  ;;  %949 = vmatprep.subr.bf16.mxu0 %v2019_v4  ;;  %v2024_v7 = vld [vmem:[%s2788_s1 + $0x128] ss:$24 sps:$4 sm:$0xff]   ;;  %v2027_v9 = vld [vmem:[%s2788_s1 + $0xfc] ss:$24 sps:$4 sm:$0xff]   ;;  %v2030_v11 = vld [vmem:[%s2788_s1 + $0xf8] ss:$24 sps:$4 sm:$0xff]  }
  0x10   : > { %1062 = vmatprep.subr.bf16.mxu1 %v2021_v5  ;;  %v2031_v12 = vld [vmem:[%s2788_s1 + $0xc4] ss:$24 sps:$4 sm:$0xff]   ;;  %v2035_v14 = vld [vmem:[%s2788_s1 + $0xc0] ss:$24 sps:$4 sm:$0xff]   ;;  %v2037_v16 = vld [vmem:[%s2788_s1 + $0x94] ss:$24 sps:$4 sm:$0xff]  }
  0x11   : > { %v2033_v13 = vld [vmem:[%s2788_s1 + $0xcc] ss:$24 sps:$4 sm:$0xff]   ;;  %v2036_v15 = vld [vmem:[%s2788_s1 + $0xc8] ss:$24 sps:$4 sm:$0xff]   ;;  %v2039_v17 = vld [vmem:[%s2788_s1 + $0x9c] ss:$24 sps:$4 sm:$0xff]  }
  0x12   : > { %950 = vmatpush1.bf16.msra.mxu0 %v2023_v6  ;;  %v2041_v18 = vld [vmem:[%s2788_s1 + $0x90] ss:$24 sps:$4 sm:$0xff]   ;;  %v2043_v20 = vld [vmem:[%s2788_s1 + $0x64] ss:$24 sps:$4 sm:$0xff]   ;;  %v2047_v22 = vld [vmem:[%s2788_s1 + $0x60] ss:$24 sps:$4 sm:$0xff]  }
  0x13   : > { %1063 = vmatpush1.bf16.msra.mxu1 %v2024_v7  ;;  %951 = vmatprep.subr.bf16.mxu0 %v2025_v8  ;;  %v2042_v19 = vld [vmem:[%s2788_s1 + $0x98] ss:$24 sps:$4 sm:$0xff]   ;;  %v2045_v21 = vld [vmem:[%s2788_s1 + $0x6c] ss:$24 sps:$4 sm:$0xff]   ;;  %v2048_v23 = vld [vmem:[%s2788_s1 + $0x68] ss:$24 sps:$4 sm:$0xff]  }
  0x14   : > { %1064 = vmatprep.subr.bf16.mxu1 %v2027_v9  ;;  %v2049_v24 = vld [vmem:[%s2788_s1 + $0x34] ss:$24 sps:$4 sm:$0xff]   ;;  %v2053_v26 = vld [vmem:[%s2788_s1 + $0x30] ss:$24 sps:$4 sm:$0xff]   ;;  %v2055_v28 = vld [vmem:[%s2788_s1 + $0x4] ss:$24 sps:$4 sm:$0xff]  }
  0x15   : > { %v2051_v25 = vld [vmem:[%s2788_s1 + $0x3c] ss:$24 sps:$4 sm:$0xff]   ;;  %v2054_v27 = vld [vmem:[%s2788_s1 + $0x38] ss:$24 sps:$4 sm:$0xff]   ;;  %v2057_v29 = vld [vmem:[%s2788_s1 + $0xc] ss:$24 sps:$4 sm:$0xff]  }
  0x16   : > { %952 = vmatpush1.bf16.msra.mxu0 %v2029_v10  ;;  %v2059_v30 = vld [vmem:[%s2788_s1] ss:$24 sps:$4 sm:$0xff]   ;;  %v2061_v32 = vld [vmem:[%s2788_s1 + $0x2d4] ss:$24 sps:$4 sm:$0xff]   ;;  %v2065_v34 = vld [vmem:[%s2788_s1 + $0x2d0] ss:$24 sps:$4 sm:$0xff]  }
  0x17   : > { %1065 = vmatpush1.bf16.msra.mxu1 %v2030_v11  ;;  %953 = vmatprep.subr.bf16.mxu0 %v2031_v12  ;;  %v2060_v31 = vld [vmem:[%s2788_s1 + $0x8] ss:$24 sps:$4 sm:$0xff]   ;;  %v2063_v33 = vld [vmem:[%s2788_s1 + $0x2dc] ss:$24 sps:$4 sm:$0xff]   ;;  %v2066_v35 = vld [vmem:[%s2788_s1 + $0x2d8] ss:$24 sps:$4 sm:$0xff]  }
  0x18   : > { %1066 = vmatprep.subr.bf16.mxu1 %v2033_v13  ;;  %v2067_v36 = vld [vmem:[%s2788_s1 + $0x2a4] ss:$24 sps:$4 sm:$0xff]   ;;  %s2796_s30 = smov (!%p214_p4, %s1740_s30), 31  ;;  %v2071_v38 = vld [vmem:[%s2788_s1 + $0x2a0] ss:$24 sps:$4 sm:$0xff]  }
  0x19   : > { %v2069_v37 = vld [vmem:[%s2788_s1 + $0x2ac] ss:$24 sps:$4 sm:$0xff]   ;;  %v2072_v39 = vld [vmem:[%s2788_s1 + $0x2a8] ss:$24 sps:$4 sm:$0xff]   ;;  %v2075_v41 = vld [vmem:[%s2788_s1 + $0x27c] ss:$24 sps:$4 sm:$0xff]  }
  0x1a   : > { %954 = vmatpush1.bf16.msra.mxu0 %v2035_v14  ;;  %v2073_v40 = vld [vmem:[%s2788_s1 + $0x274] ss:$24 sps:$4 sm:$0xff]   ;;  %s1907_s5 = sshll.u32 %s2796_s30, 3  ;;  %v2077_v42 = vld [vmem:[%s2788_s1 + $0x270] ss:$24 sps:$4 sm:$0xff]   ;;  %s1988_s7 = smul.u32 24, %s2796_s30 }
  0x1b   : > { %1067 = vmatpush1.bf16.msra.mxu1 %v2036_v15  ;;  %955 = vmatprep.subr.bf16.mxu0 %v2037_v16  ;;  %v2078_v43 = vld [vmem:[%s2788_s1 + $0x278] ss:$24 sps:$4 sm:$0xff]   ;;  %v2079_v44 = vld [vmem:[%s2788_s1 + $0x244] ss:$24 sps:$4 sm:$0xff]   ;;  %s2387_s17 = scalar_lea.vmem %s2787_s0, %s1907_s5  ;;  %v2084_v47 = vld [vmem:[%s2788_s1 + $0x248] ss:$24 sps:$4 sm:$0xff]  }
  0x1c   : > { %1068 = vmatprep.subr.bf16.mxu1 %v2039_v17  ;;  %v2081_v45 = vld [vmem:[%s2788_s1 + $0x24c] ss:$24 sps:$4 sm:$0xff]   ;;  %v2083_v46 = vld [vmem:[%s2788_s1 + $0x240] ss:$24 sps:$4 sm:$0xff]   ;;  %v2087_v50 = vld [vmem:[%s2788_s1 + $0x21c] ss:$24 sps:$4 sm:$0xff]   ;;  %s2636_s10 = scalar_lea.vmem %s2790_s3, %s1988_s7 }
  0x1d   : > { %v2399_v48 = vld [vmem:[%s2387_s17 + $0x4] ss:$8 sps:$4 sm:$0xff]   ;;  %v2089_v51 = vld [vmem:[%s2788_s1 + $0x210] ss:$24 sps:$4 sm:$0xff]   ;;  %v2095_v55 = vld [vmem:[%s2788_s1 + $0x1e0] ss:$24 sps:$4 sm:$0xff]  }
  0x1e   : > { %956 = vmatpush1.bf16.msra.mxu0 %v2041_v18  ;;  %v2085_v49 = vld [vmem:[%s2788_s1 + $0x214] ss:$24 sps:$4 sm:$0xff]   ;;  %979 = vmatprep.mubr.bf16.mxu0 %v2399_v48  ;;  %v2090_v52 = vld [vmem:[%s2788_s1 + $0x218] ss:$24 sps:$4 sm:$0xff]   ;;  %v2091_v53 = vld [vmem:[%s2788_s1 + $0x1e4] ss:$24 sps:$4 sm:$0xff]  }
  0x1f   : > { %1069 = vmatpush1.bf16.msra.mxu1 %v2042_v19  ;;  %957 = vmatprep.subr.bf16.mxu0 %v2043_v20  ;;  %v2093_v54 = vld [vmem:[%s2788_s1 + $0x1ec] ss:$24 sps:$4 sm:$0xff]   ;;  %v2096_v56 = vld [vmem:[%s2788_s1 + $0x1e8] ss:$24 sps:$4 sm:$0xff]   ;;  %v2099_v58 = vld [vmem:[%s2788_s1 + $0x1bc] ss:$24 sps:$4 sm:$0xff]  }
  0x20   : > { %1070 = vmatprep.subr.bf16.mxu1 %v2045_v21  ;;  %1092 = vmatprep.mubr.bf16.mxu1 %v2399_v48  ;;  %v2097_v57 = vld [vmem:[%s2788_s1 + $0x1b4] ss:$24 sps:$4 sm:$0xff]   ;;  %v2101_v59 = vld [vmem:[%s2788_s1 + $0x1b0] ss:$24 sps:$4 sm:$0xff]   ;;  %v2103_v61 = vld [vmem:[%s2788_s1 + $0x184] ss:$24 sps:$4 sm:$0xff]  }
  0x21   : > { %v2102_v60 = vld [vmem:[%s2788_s1 + $0x1b8] ss:$24 sps:$4 sm:$0xff]   ;;  %v2105_v62 = vld [vmem:[%s2788_s1 + $0x18c] ss:$24 sps:$4 sm:$0xff]   ;;  %v2108_v0 = vld [vmem:[%s2788_s1 + $0x188] ss:$24 sps:$4 sm:$0xff]  }
  0x22   : > { %958 = vmatpush1.bf16.msra.mxu0 %v2047_v22  ;;  %v2107_v63 = vld [vmem:[%s2788_s1 + $0x180] ss:$24 sps:$4 sm:$0xff]   ;;  %v2114_v1 = vld [vmem:[%s2788_s1 + $0x164] ss:$24 sps:$4 sm:$0xff]   ;;  %v2117_v4 = vld [vmem:[%s2788_s1 + $0x134] ss:$24 sps:$4 sm:$0xff]  }
  0x23   : > { %1071 = vmatpush1.bf16.msra.mxu1 %v2048_v23  ;;  %959 = vmatprep.subr.bf16.mxu0 %v2049_v24  ;;  %v2455_v2 = vld [vmem:[%s2387_s17] ss:$8 sps:$4 sm:$0xff]   ;;  %v2464_v5 = vld [vmem:[%s2387_s17 + $0x14] ss:$8 sps:$4 sm:$0xff]   ;;  %v2477_v8 = vld [vmem:[%s2387_s17 + $0x10] ss:$8 sps:$4 sm:$0xff]  }
  0x24   : > { %1072 = vmatprep.subr.bf16.mxu1 %v2051_v25  ;;  %v2112_v3 = vld [vmem:[%s2788_s1 + $0x160] ss:$24 sps:$4 sm:$0xff]   ;;  %v2115_v6 = vld [vmem:[%s2788_s1 + $0x130] ss:$24 sps:$4 sm:$0xff]   ;;  %v2123_v7 = vld [vmem:[%s2788_s1 + $0x104] ss:$24 sps:$4 sm:$0xff]  }
  0x25   : > { %v2121_v9 = vld [vmem:[%s2788_s1 + $0x100] ss:$24 sps:$4 sm:$0xff]   ;;  %v2126_v10 = vld [vmem:[%s2788_s1 + $0xd4] ss:$24 sps:$4 sm:$0xff]   ;;  %v2124_v12 = vld [vmem:[%s2788_s1 + $0xd0] ss:$24 sps:$4 sm:$0xff]  }
  0x26   : > { %960 = vmatpush1.bf16.msra.mxu0 %v2053_v26  ;;  %v2486_v11 = vld [vmem:[%s2387_s17 + $0x24] ss:$8 sps:$4 sm:$0xff]   ;;  %v2499_v14 = vld [vmem:[%s2387_s17 + $0x20] ss:$8 sps:$4 sm:$0xff]   ;;  %v2508_v17 = vld [vmem:[%s2387_s17 + $0x34] ss:$8 sps:$4 sm:$0xff]  }
  0x27   : > { %1073 = vmatpush1.bf16.msra.mxu1 %v2054_v27  ;;  %961 = vmatprep.subr.bf16.mxu0 %v2055_v28  ;;  %v2132_v13 = vld [vmem:[%s2788_s1 + $0xa4] ss:$24 sps:$4 sm:$0xff]   ;;  %v2130_v15 = vld [vmem:[%s2788_s1 + $0xa0] ss:$24 sps:$4 sm:$0xff]   ;;  %v2135_v16 = vld [vmem:[%s2788_s1 + $0x74] ss:$24 sps:$4 sm:$0xff]  }
  0x28   : > { %1074 = vmatprep.subr.bf16.mxu1 %v2057_v29  ;;  %v2133_v18 = vld [vmem:[%s2788_s1 + $0x70] ss:$24 sps:$4 sm:$0xff]   ;;  %v2141_v19 = vld [vmem:[%s2788_s1 + $0x44] ss:$24 sps:$4 sm:$0xff]   ;;  %v2139_v21 = vld [vmem:[%s2788_s1 + $0x40] ss:$24 sps:$4 sm:$0xff]  }
  0x29   : > { %v2521_v20 = vld [vmem:[%s2387_s17 + $0x30] ss:$8 sps:$4 sm:$0xff]   ;;  %v2144_v22 = vld [vmem:[%s2788_s1 + $0x14] ss:$24 sps:$4 sm:$0xff]   ;;  %v2150_v25 = vld [vmem:[%s2788_s1 + $0x2e4] ss:$24 sps:$4 sm:$0xff]  }
  0x2a   : > { %962 = vmatpush1.bf16.msra.mxu0 %v2059_v30  ;;  %v2530_v23 = vld [vmem:[%s2387_s17 + $0x44] ss:$8 sps:$4 sm:$0xff]   ;;  %v2142_v24 = vld [vmem:[%s2788_s1 + $0x10] ss:$24 sps:$4 sm:$0xff]   ;;  %v2148_v27 = vld [vmem:[%s2788_s1 + $0x2e0] ss:$24 sps:$4 sm:$0xff]  }
  0x2b   : > { %1075 = vmatpush1.bf16.msra.mxu1 %v2060_v31  ;;  %963 = vmatprep.subr.bf16.mxu0 %v2061_v32  ;;  %v2543_v26 = vld [vmem:[%s2387_s17 + $0x40] ss:$8 sps:$4 sm:$0xff]   ;;  %v2153_v28 = vld [vmem:[%s2788_s1 + $0x2b4] ss:$24 sps:$4 sm:$0xff]   ;;  %v2159_v31 = vld [vmem:[%s2788_s1 + $0x284] ss:$24 sps:$4 sm:$0xff]  }
  0x2c   : > { %1076 = vmatprep.subr.bf16.mxu1 %v2063_v33  ;;  %v2552_v29 = vld [vmem:[%s2387_s17 + $0x54] ss:$8 sps:$4 sm:$0xff]   ;;  %v2151_v30 = vld [vmem:[%s2788_s1 + $0x2b0] ss:$24 sps:$4 sm:$0xff]   ;;  %v2157_v33 = vld [vmem:[%s2788_s1 + $0x280] ss:$24 sps:$4 sm:$0xff]  }
  0x2d   : > { %v2156_v32 = vld [vmem:[%s2387_s17 + $0x50] ss:$8 sps:$4 sm:$0xff]  }
  0x2e   : > { %964 = vmatpush2.bf16.msra.mxu0 %v2065_v34  ;;  %v2162_v34 = vld [vmem:[%s2788_s1 + $0x254] ss:$24 sps:$4 sm:$0xff]  }
  0x2f   : > { %1077 = vmatpush2.bf16.msra.mxu1 %v2066_v35  ;;  %965 = vmatprep.subr.bf16.mxu0 %v2067_v36  ;;  %v2163_v35 = vld [vmem:[%s2387_s17 + $0x64] ss:$8 sps:$4 sm:$0xff]   ;;  %v2160_v36 = vld [vmem:[%s2788_s1 + $0x250] ss:$24 sps:$4 sm:$0xff]  }
  0x30   : > { %1078 = vmatprep.subr.bf16.mxu1 %v2069_v37  ;;  %v2168_v37 = vld [vmem:[%s2788_s1 + $0x224] ss:$24 sps:$4 sm:$0xff]  }
  0x32   : > { %966 = vmatpush2.bf16.msra.mxu0 %v2071_v38  ;;  %v2165_v38 = vld [vmem:[%s2387_s17 + $0x60] ss:$8 sps:$4 sm:$0xff]  }
  0x33   : > { %1079 = vmatpush2.bf16.msra.mxu1 %v2072_v39  ;;  %967 = vmatprep.subr.bf16.mxu0 %v2073_v40  ;;  %v2166_v39 = vld [vmem:[%s2788_s1 + $0x220] ss:$24 sps:$4 sm:$0xff]   ;;  %v2171_v40 = vld [vmem:[%s2788_s1 + $0x1f4] ss:$24 sps:$4 sm:$0xff]  }
  0x34   : > { %1080 = vmatprep.subr.bf16.mxu1 %v2075_v41  ;;  %v2172_v41 = vld [vmem:[%s2387_s17 + $0x74] ss:$8 sps:$4 sm:$0xff]  }
  0x36   : > { %968 = vmatpush2.bf16.msra.mxu0 %v2077_v42  ;;  %v2169_v42 = vld [vmem:[%s2788_s1 + $0x1f0] ss:$24 sps:$4 sm:$0xff]  }
  0x37   : > { %1081 = vmatpush2.bf16.msra.mxu1 %v2078_v43  ;;  %969 = vmatprep.subr.bf16.mxu0 %v2079_v44  ;;  %v2177_v43 = vld [vmem:[%s2788_s1 + $0x1c4] ss:$24 sps:$4 sm:$0xff]   ;;  %v2174_v44 = vld [vmem:[%s2387_s17 + $0x70] ss:$8 sps:$4 sm:$0xff]  }
  0x38   : > { %1082 = vmatprep.subr.bf16.mxu1 %v2081_v45  ;;  %v2175_v45 = vld [vmem:[%s2788_s1 + $0x1c0] ss:$24 sps:$4 sm:$0xff]  }
  0x3a   : > { %970 = vmatpush2.bf16.msra.mxu0 %v2083_v46  ;;  %v2180_v46 = vld [vmem:[%s2788_s1 + $0x194] ss:$24 sps:$4 sm:$0xff]  }
  0x3b   : > { %1083 = vmatpush2.bf16.msra.mxu1 %v2084_v47  ;;  %971 = vmatprep.subr.bf16.mxu0 %v2085_v49  ;;  %v2178_v47 = vld [vmem:[%s2788_s1 + $0x190] ss:$24 sps:$4 sm:$0xff]  }
  0x3c   : > { %1084 = vmatprep.subr.bf16.mxu1 %v2087_v50 }
  0x3e   : > { %972 = vmatpush2.bf16.msra.mxu0 %v2089_v51  ;;  %v355_v51 = vld [vmem:[%s2789_s2] sm:$0x3f] }
  0x3f   : > { %1085 = vmatpush2.bf16.msra.mxu1 %v2090_v52  ;;  %973 = vmatprep.subr.bf16.mxu0 %v2091_v53 }
  0x40   : > { %1086 = vmatprep.subr.bf16.mxu1 %v2093_v54 }
  0x42   : > { %974 = vmatpush2.bf16.msra.mxu0 %v2095_v55 }
  0x43   : > { %1087 = vmatpush2.bf16.msra.mxu1 %v2096_v56  ;;  %975 = vmatprep.subr.bf16.mxu0 %v2097_v57 }
  0x44   : > { %1088 = vmatprep.subr.bf16.mxu1 %v2099_v58 }
  0x46   : > { %976 = vmatpush2.bf16.msra.mxu0 %v2101_v59 }
  0x47   : > { %1089 = vmatpush2.bf16.msra.mxu1 %v2102_v60  ;;  %977 = vmatprep.subr.bf16.mxu0 %v2103_v61 }
  0x48   : > { %1090 = vmatprep.subr.bf16.mxu1 %v2105_v62 }
  0x4a   : > { %978 = vmatpush2.bf16.msra.mxu0 %v2107_v63 }
  0x4b   : > { %1091 = vmatpush2.bf16.msra.mxu1 %v2108_v0  ;;  %1173 = vmatprep.subr.bf16.mxu0 %v2114_v1 }
  0x4c   : > { %1956 = vmatprep.subr.bf16.mxu1 %v2114_v1 }
  0x4d   : > { %980 = vmatmul.mubr.bf16.vlgmr.msra.gmra.mxu0 %v2455_v2 }
  0x4e   : > { %1093 = vmatmul.mubr.bf16.vlgmr.msra.gmra.mxu1 %v2455_v2  ;;  %1174 = vmatpush1.bf16.msra.mxu0 %v2112_v3 }
  0x4f   : > { %1972 = vmatpush1.bf16.msra.mxu1 %v2112_v3  ;;  %1175 = vmatprep.subr.bf16.mxu0 %v2117_v4 }
  0x50   : > { %1957 = vmatprep.subr.bf16.mxu1 %v2117_v4  ;;  %989 = vmatprep.mubr.bf16.mxu0 %v2464_v5 }
  0x51   : > { %1102 = vmatprep.mubr.bf16.mxu1 %v2464_v5 }
  0x52   : > { %1176 = vmatpush1.bf16.msra.mxu0 %v2115_v6 }
  0x53   : > { %1973 = vmatpush1.bf16.msra.mxu1 %v2115_v6  ;;  %1177 = vmatprep.subr.bf16.mxu0 %v2123_v7 }
  0x54   : > { %1958 = vmatprep.subr.bf16.mxu1 %v2123_v7 }
  0x55   : > { %990 = vmatmul.mubr.bf16.gmra.mxu0 %v2477_v8 }
  0x56   : > { %1103 = vmatmul.mubr.bf16.gmra.mxu1 %v2477_v8  ;;  %1178 = vmatpush1.bf16.msra.mxu0 %v2121_v9 }
  0x57   : > { %1974 = vmatpush1.bf16.msra.mxu1 %v2121_v9  ;;  %1179 = vmatprep.subr.bf16.mxu0 %v2126_v10 }
  0x58   : > { %1959 = vmatprep.subr.bf16.mxu1 %v2126_v10  ;;  %999 = vmatprep.mubr.bf16.mxu0 %v2486_v11 }
  0x59   : > { %1112 = vmatprep.mubr.bf16.mxu1 %v2486_v11 }
  0x5a   : > { %1180 = vmatpush1.bf16.msra.mxu0 %v2124_v12 }
  0x5b   : > { %1975 = vmatpush1.bf16.msra.mxu1 %v2124_v12  ;;  %1181 = vmatprep.subr.bf16.mxu0 %v2132_v13 }
  0x5c   : > { %1960 = vmatprep.subr.bf16.mxu1 %v2132_v13 }
  0x5d   : > { %1000 = vmatmul.mubr.bf16.gmra.mxu0 %v2499_v14 }
  0x5e   : > { %1113 = vmatmul.mubr.bf16.gmra.mxu1 %v2499_v14  ;;  %1182 = vmatpush1.bf16.msra.mxu0 %v2130_v15 }
  0x5f   : > { %1976 = vmatpush1.bf16.msra.mxu1 %v2130_v15  ;;  %1183 = vmatprep.subr.bf16.mxu0 %v2135_v16 }
  0x60   : > { %1961 = vmatprep.subr.bf16.mxu1 %v2135_v16  ;;  %1009 = vmatprep.mubr.bf16.mxu0 %v2508_v17 }
  0x61   : > { %1122 = vmatprep.mubr.bf16.mxu1 %v2508_v17 }
  0x62   : > { %1184 = vmatpush1.bf16.msra.mxu0 %v2133_v18 }
  0x63   : > { %1977 = vmatpush1.bf16.msra.mxu1 %v2133_v18  ;;  %1185 = vmatprep.subr.bf16.mxu0 %v2141_v19 }
  0x64   : > { %1962 = vmatprep.subr.bf16.mxu1 %v2141_v19 }
  0x65   : > { %1010 = vmatmul.mubr.bf16.gmra.mxu0 %v2521_v20 }
  0x66   : > { %1123 = vmatmul.mubr.bf16.gmra.mxu1 %v2521_v20  ;;  %1186 = vmatpush1.bf16.msra.mxu0 %v2139_v21 }
  0x67   : > { %1978 = vmatpush1.bf16.msra.mxu1 %v2139_v21  ;;  %1187 = vmatprep.subr.bf16.mxu0 %v2144_v22 }
  0x68   : > { %1963 = vmatprep.subr.bf16.mxu1 %v2144_v22  ;;  %1019 = vmatprep.mubr.bf16.mxu0 %v2530_v23 }
  0x69   : > { %1132 = vmatprep.mubr.bf16.mxu1 %v2530_v23 }
  0x6a   : > { %1188 = vmatpush1.bf16.msra.mxu0 %v2142_v24 }
  0x6b   : > { %1979 = vmatpush1.bf16.msra.mxu1 %v2142_v24  ;;  %1189 = vmatprep.subr.bf16.mxu0 %v2150_v25 }
  0x6c   : > { %1964 = vmatprep.subr.bf16.mxu1 %v2150_v25 }
  0x6d   : > { %1020 = vmatmul.mubr.bf16.gmra.mxu0 %v2543_v26 }
  0x6e   : > { %1133 = vmatmul.mubr.bf16.gmra.mxu1 %v2543_v26  ;;  %1190 = vmatpush2.bf16.msra.mxu0 %v2148_v27 }
  0x6f   : > { %1980 = vmatpush2.bf16.msra.mxu1 %v2148_v27  ;;  %1191 = vmatprep.subr.bf16.mxu0 %v2153_v28 }
  0x70   : > { %1965 = vmatprep.subr.bf16.mxu1 %v2153_v28  ;;  %1029 = vmatprep.mubr.bf16.mxu0 %v2552_v29 }
  0x71   : > { %1142 = vmatprep.mubr.bf16.mxu1 %v2552_v29 }
  0x72   : > { %1192 = vmatpush2.bf16.msra.mxu0 %v2151_v30 }
  0x73   : > { %1981 = vmatpush2.bf16.msra.mxu1 %v2151_v30  ;;  %1193 = vmatprep.subr.bf16.mxu0 %v2159_v31 }
  0x74   : > { %1966 = vmatprep.subr.bf16.mxu1 %v2159_v31 }
  0x75   : > { %1030 = vmatmul.mubr.bf16.gmra.mxu0 %v2156_v32 }
  0x76   : > { %1143 = vmatmul.mubr.bf16.gmra.mxu1 %v2156_v32  ;;  %1194 = vmatpush2.bf16.msra.mxu0 %v2157_v33 }
  0x77   : > { %1982 = vmatpush2.bf16.msra.mxu1 %v2157_v33  ;;  %1195 = vmatprep.subr.bf16.mxu0 %v2162_v34 }
  0x78   : > { %1967 = vmatprep.subr.bf16.mxu1 %v2162_v34  ;;  %1039 = vmatprep.mubr.bf16.mxu0 %v2163_v35 }
  0x79   : > { %1152 = vmatprep.mubr.bf16.mxu1 %v2163_v35 }
  0x7a   : > { %1196 = vmatpush2.bf16.msra.mxu0 %v2160_v36 }
  0x7b   : > { %1983 = vmatpush2.bf16.msra.mxu1 %v2160_v36  ;;  %1197 = vmatprep.subr.bf16.mxu0 %v2168_v37 }
  0x7c   : > { %1968 = vmatprep.subr.bf16.mxu1 %v2168_v37 }
  0x7d   : > { %1040 = vmatmul.mubr.bf16.gmra.mxu0 %v2165_v38 }
  0x7e   : > { %1153 = vmatmul.mubr.bf16.gmra.mxu1 %v2165_v38  ;;  %1198 = vmatpush2.bf16.msra.mxu0 %v2166_v39 }
  0x7f   : > { %1984 = vmatpush2.bf16.msra.mxu1 %v2166_v39  ;;  %1199 = vmatprep.subr.bf16.mxu0 %v2171_v40 }
  0x80   : > { %1969 = vmatprep.subr.bf16.mxu1 %v2171_v40  ;;  %1049 = vmatprep.mubr.bf16.mxu0 %v2172_v41 }
  0x81   : > { %1162 = vmatprep.mubr.bf16.mxu1 %v2172_v41 }
  0x82   : > { %1200 = vmatpush2.bf16.msra.mxu0 %v2169_v42 }
  0x83   : > { %1985 = vmatpush2.bf16.msra.mxu1 %v2169_v42  ;;  %1201 = vmatprep.subr.bf16.mxu0 %v2177_v43 }
  0x84   : > { %1970 = vmatprep.subr.bf16.mxu1 %v2177_v43 }
  0x85   : > { %1050 = vmatmul.mubr.bf16.gmra.mxu0 %v2174_v44 }
  0x86   : > { %1163 = vmatmul.mubr.bf16.gmra.mxu1 %v2174_v44  ;;  %1202 = vmatpush2.bf16.msra.mxu0 %v2175_v45 }
  0x87   : > { %1986 = vmatpush2.bf16.msra.mxu1 %v2175_v45  ;;  %1203 = vmatprep.subr.bf16.mxu0 %v2180_v46 }
  0x88   : > { %1971 = vmatprep.subr.bf16.mxu1 %v2180_v46  ;;  %1205 = vmatprep.mubr.bf16.mxu0 %v2399_v48  ;;  %v357_v48 = vlaneseq }
  0x89   : > { %1245 = vmatprep.mubr.bf16.mxu1 %v2530_v23 }
  0x8a   : > { %1204 = vmatpush2.bf16.msra.mxu0 %v2178_v47  ;;  %v358_v49 = vshrl.u32 %v357_v48, 7 }
  0x8b   : > { %1987 = vmatpush2.bf16.msra.mxu1 %v2178_v47 }
  0x8c   : > { %v375_v50 = vsub.s32 4, %v358_v49  ;;  %v379_v53 = vsub.s32 5, %v358_v49  ;;  %v359_v55 = vsub.s32 0, %v358_v49  ;;  %v367_v56 = vsub.s32 2, %v358_v49 }
  0x8d   : > { %1206 = vmatmul.mubr.bf16.vlgmr.msra.gmra.mxu0 %v2455_v2  ;;  %v363_v57 = vsub.s32 1, %v358_v49  ;;  %v371_v58 = vsub.s32 3, %v358_v49 }
  0x8e   : > { %1246 = vmatmul.mubr.bf16.vlgmr.msra.gmra.mxu1 %v2543_v26  ;;  %1215 = vmatprep.mubr.bf16.mxu0 %v2464_v5  ;;  %v2616_v52 = vrot.slane %v355_v51, %v375_v50  ;;  %v2618_v54 = vrot.slane %v355_v51, %v379_v53  ;;  %v2620_v59 = vrot.slane %v355_v51, %v359_v55 }
  0x8f   : > { %1255 = vmatprep.mubr.bf16.mxu1 %v2552_v29  ;;  %v2622_v60 = vrot.slane %v355_v51, %v367_v56  ;;  %v2624_v61 = vrot.slane %v355_v51, %v363_v57  ;;  %v2626_v62 = vrot.slane %v355_v51, %v371_v58 }
  0x95   : > { %1216 = vmatmul.mubr.bf16.gmra.mxu0 %v2477_v8 }
  0x96   : > { %1256 = vmatmul.mubr.bf16.gmra.mxu1 %v2156_v32  ;;  %1225 = vmatprep.mubr.bf16.mxu0 %v2486_v11 }
  0x97   : > { %1265 = vmatprep.mubr.bf16.mxu1 %v2163_v35 }
  0x9d   : > { %1226 = vmatmul.mubr.bf16.gmra.mxu0 %v2499_v14 }
  0x9e   : > { %1266 = vmatmul.mubr.bf16.gmra.mxu1 %v2165_v38  ;;  %1235 = vmatprep.mubr.bf16.mxu0 %v2508_v17 }
  0x9f   : > { %1275 = vmatprep.mubr.bf16.mxu1 %v2172_v41 }
  0xa5   : > { %1236 = vmatmul.mubr.bf16.gmra.mxu0 %v2521_v20 }
  0xa6   : > { %1276 = vmatmul.mubr.bf16.gmra.mxu1 %v2174_v44 }
 0x10d   : > { %v981_v63 = vpop.f32.mrf.mxu0 }
 0x10e   : > { %v1094_v0 = vpop.f32.mrf.mxu1  ;;  %v982_v3 = vadd.f32 %v981_v63, %v2620_v59 }
 0x10f   : > { %v983_v1 = vpop.f32.mrf.mxu0  ;;  %v1095_v4 = vadd.f32 %v1094_v0, %v2622_v60 }
 0x110   : > { %v1096_v2 = vpop.f32.mrf.mxu1  ;;  %v984_v5 = vadd.f32 %v983_v1, %v2624_v61 }
 0x111   : > { %v1097_v6 = vadd.f32 %v1096_v2, %v2626_v62  ;;  %v985_v7 = vpop.f32.mrf.mxu0 }
 0x112   : > { %v1098_v8 = vpop.f32.mrf.mxu1  ;;  %v1908_v9 = vpack.c.bf16 %v984_v5, %v982_v3  ;;  %v986_v13 = vadd.f32 %v985_v7, %v2620_v59 }
 0x113   : > { %v1909_v10 = vpack.c.bf16 %v1097_v6, %v1095_v4  ;;  %v987_v11 = vpop.f32.mrf.mxu0  ;;  %v1099_v14 = vadd.f32 %v1098_v8, %v2622_v60 }
 0x114   : > { %v1100_v12 = vpop.f32.mrf.mxu1  ;;  %1574 = vst [vmem:[%s2636_s10] sm:$0xff] %v1908_v9  ;;  %v988_v15 = vadd.f32 %v987_v11, %v2624_v61 }
 0x115   : > { %1575 = vst [vmem:[%s2636_s10 + $0x8] sm:$0xff] %v1909_v10  ;;  %v1101_v16 = vadd.f32 %v1100_v12, %v2626_v62  ;;  %v991_v17 = vpop.f32.mrf.mxu0 }
 0x116   : > { %v1104_v18 = vpop.f32.mrf.mxu1  ;;  %v1911_v19 = vpack.c.bf16 %v988_v15, %v986_v13  ;;  %v992_v23 = vadd.f32 %v991_v17, %v2620_v59 }
 0x117   : > { %v1912_v20 = vpack.c.bf16 %v1101_v16, %v1099_v14  ;;  %v993_v21 = vpop.f32.mrf.mxu0  ;;  %v1105_v24 = vadd.f32 %v1104_v18, %v2622_v60 }
 0x118   : > { %v1106_v22 = vpop.f32.mrf.mxu1  ;;  %1577 = vst [vmem:[%s2636_s10 + $0x18] sm:$0xff] %v1911_v19  ;;  %v994_v25 = vadd.f32 %v993_v21, %v2624_v61 }
 0x119   : > { %1578 = vst [vmem:[%s2636_s10 + $0x20] sm:$0xff] %v1912_v20  ;;  %v1107_v26 = vadd.f32 %v1106_v22, %v2626_v62  ;;  %v995_v27 = vpop.f32.mrf.mxu0 }
 0x11a   : > { %v1108_v28 = vpop.f32.mrf.mxu1  ;;  %v1914_v29 = vpack.c.bf16 %v994_v25, %v992_v23  ;;  %v996_v33 = vadd.f32 %v995_v27, %v2620_v59 }
 0x11b   : > { %v1915_v30 = vpack.c.bf16 %v1107_v26, %v1105_v24  ;;  %v997_v31 = vpop.f32.mrf.mxu0  ;;  %v1109_v34 = vadd.f32 %v1108_v28, %v2622_v60 }
 0x11c   : > { %v1110_v32 = vpop.f32.mrf.mxu1  ;;  %1580 = vst [vmem:[%s2636_s10 + $0x30] sm:$0xff] %v1914_v29  ;;  %v998_v35 = vadd.f32 %v997_v31, %v2624_v61 }
 0x11d   : > { %1581 = vst [vmem:[%s2636_s10 + $0x38] sm:$0xff] %v1915_v30  ;;  %v1111_v36 = vadd.f32 %v1110_v32, %v2626_v62  ;;  %v1001_v37 = vpop.f32.mrf.mxu0 }
 0x11e   : > { %v1114_v38 = vpop.f32.mrf.mxu1  ;;  %v1917_v39 = vpack.c.bf16 %v998_v35, %v996_v33  ;;  %v1002_v43 = vadd.f32 %v1001_v37, %v2620_v59 }
 0x11f   : > { %v1918_v40 = vpack.c.bf16 %v1111_v36, %v1109_v34  ;;  %v1003_v41 = vpop.f32.mrf.mxu0  ;;  %v1115_v44 = vadd.f32 %v1114_v38, %v2622_v60 }
 0x120   : > { %v1116_v42 = vpop.f32.mrf.mxu1  ;;  %1583 = vst [vmem:[%s2636_s10 + $0x48] sm:$0xff] %v1917_v39  ;;  %v1004_v45 = vadd.f32 %v1003_v41, %v2624_v61 }
 0x121   : > { %1584 = vst [vmem:[%s2636_s10 + $0x50] sm:$0xff] %v1918_v40  ;;  %v1117_v46 = vadd.f32 %v1116_v42, %v2626_v62  ;;  %v1005_v47 = vpop.f32.mrf.mxu0 }
 0x122   : > { %v1118_v48 = vpop.f32.mrf.mxu1  ;;  %v1920_v49 = vpack.c.bf16 %v1004_v45, %v1002_v43  ;;  %v1006_v55 = vadd.f32 %v1005_v47, %v2620_v59 }
 0x123   : > { %v1921_v50 = vpack.c.bf16 %v1117_v46, %v1115_v44  ;;  %v1007_v51 = vpop.f32.mrf.mxu0  ;;  %v1119_v56 = vadd.f32 %v1118_v48, %v2622_v60 }
 0x124   : > { %v1120_v53 = vpop.f32.mrf.mxu1  ;;  %1586 = vst [vmem:[%s2636_s10 + $0x60] sm:$0xff] %v1920_v49  ;;  %v1008_v57 = vadd.f32 %v1007_v51, %v2624_v61 }
 0x125   : > { %1587 = vst [vmem:[%s2636_s10 + $0x68] sm:$0xff] %v1921_v50  ;;  %v1121_v58 = vadd.f32 %v1120_v53, %v2626_v62  ;;  %v1011_v63 = vpop.f32.mrf.mxu0 }
 0x126   : > { %v1124_v0 = vpop.f32.mrf.mxu1  ;;  %v1923_v1 = vpack.c.bf16 %v1008_v57, %v1006_v55  ;;  %v1012_v5 = vadd.f32 %v1011_v63, %v2620_v59 }
 0x127   : > { %v1924_v2 = vpack.c.bf16 %v1121_v58, %v1119_v56  ;;  %v1013_v3 = vpop.f32.mrf.mxu0  ;;  %v1125_v6 = vadd.f32 %v1124_v0, %v2622_v60 }
 0x128   : > { %v1126_v4 = vpop.f32.mrf.mxu1  ;;  %1589 = vst [vmem:[%s2636_s10 + $0x78] sm:$0xff] %v1923_v1  ;;  %v1014_v7 = vadd.f32 %v1013_v3, %v2624_v61 }
 0x129   : > { %1590 = vst [vmem:[%s2636_s10 + $0x80] sm:$0xff] %v1924_v2  ;;  %v1127_v8 = vadd.f32 %v1126_v4, %v2626_v62  ;;  %v1015_v9 = vpop.f32.mrf.mxu0 }
 0x12a   : > { %v1128_v10 = vpop.f32.mrf.mxu1  ;;  %v1926_v11 = vpack.c.bf16 %v1014_v7, %v1012_v5  ;;  %v1016_v15 = vadd.f32 %v1015_v9, %v2620_v59 }
 0x12b   : > { %v1927_v12 = vpack.c.bf16 %v1127_v8, %v1125_v6  ;;  %v1017_v13 = vpop.f32.mrf.mxu0  ;;  %v1129_v16 = vadd.f32 %v1128_v10, %v2622_v60 }
 0x12c   : > { %v1130_v14 = vpop.f32.mrf.mxu1  ;;  %1592 = vst [vmem:[%s2636_s10 + $0x90] sm:$0xff] %v1926_v11  ;;  %v1018_v17 = vadd.f32 %v1017_v13, %v2624_v61 }
 0x12d   : > { %1593 = vst [vmem:[%s2636_s10 + $0x98] sm:$0xff] %v1927_v12  ;;  %v1131_v18 = vadd.f32 %v1130_v14, %v2626_v62  ;;  %v1021_v19 = vpop.f32.mrf.mxu0 }
 0x12e   : > { %v1134_v20 = vpop.f32.mrf.mxu1  ;;  %v1929_v21 = vpack.c.bf16 %v1018_v17, %v1016_v15  ;;  %v1022_v25 = vadd.f32 %v1021_v19, %v2620_v59 }
 0x12f   : > { %v1930_v22 = vpack.c.bf16 %v1131_v18, %v1129_v16  ;;  %v1023_v23 = vpop.f32.mrf.mxu0  ;;  %v1135_v26 = vadd.f32 %v1134_v20, %v2622_v60 }
 0x130   : > { %v1136_v24 = vpop.f32.mrf.mxu1  ;;  %1595 = vst [vmem:[%s2636_s10 + $0xa8] sm:$0xff] %v1929_v21  ;;  %v1024_v27 = vadd.f32 %v1023_v23, %v2624_v61 }
 0x131   : > { %1596 = vst [vmem:[%s2636_s10 + $0xb0] sm:$0xff] %v1930_v22  ;;  %v1137_v28 = vadd.f32 %v1136_v24, %v2626_v62  ;;  %v1025_v29 = vpop.f32.mrf.mxu0 }
 0x132   : > { %v1138_v30 = vpop.f32.mrf.mxu1  ;;  %v1932_v31 = vpack.c.bf16 %v1024_v27, %v1022_v25  ;;  %v1026_v35 = vadd.f32 %v1025_v29, %v2620_v59 }
 0x133   : > { %v1933_v32 = vpack.c.bf16 %v1137_v28, %v1135_v26  ;;  %v1027_v33 = vpop.f32.mrf.mxu0  ;;  %v1139_v36 = vadd.f32 %v1138_v30, %v2622_v60 }
 0x134   : > { %v1140_v34 = vpop.f32.mrf.mxu1  ;;  %1598 = vst [vmem:[%s2636_s10 + $0xc0] sm:$0xff] %v1932_v31  ;;  %v1028_v37 = vadd.f32 %v1027_v33, %v2624_v61 }
 0x135   : > { %1599 = vst [vmem:[%s2636_s10 + $0xc8] sm:$0xff] %v1933_v32  ;;  %v1141_v38 = vadd.f32 %v1140_v34, %v2626_v62  ;;  %v1031_v39 = vpop.f32.mrf.mxu0 }
 0x136   : > { %v1144_v40 = vpop.f32.mrf.mxu1  ;;  %v1935_v41 = vpack.c.bf16 %v1028_v37, %v1026_v35  ;;  %v1032_v45 = vadd.f32 %v1031_v39, %v2620_v59 }
 0x137   : > { %v1936_v42 = vpack.c.bf16 %v1141_v38, %v1139_v36  ;;  %v1033_v43 = vpop.f32.mrf.mxu0  ;;  %v1145_v46 = vadd.f32 %v1144_v40, %v2622_v60 }
 0x138   : > { %v1146_v44 = vpop.f32.mrf.mxu1  ;;  %1601 = vst [vmem:[%s2636_s10 + $0xd8] sm:$0xff] %v1935_v41  ;;  %v1034_v47 = vadd.f32 %v1033_v43, %v2624_v61 }
 0x139   : > { %1602 = vst [vmem:[%s2636_s10 + $0xe0] sm:$0xff] %v1936_v42  ;;  %v1147_v48 = vadd.f32 %v1146_v44, %v2626_v62  ;;  %v1035_v49 = vpop.f32.mrf.mxu0 }
 0x13a   : > { %v1148_v50 = vpop.f32.mrf.mxu1  ;;  %v1938_v51 = vpack.c.bf16 %v1034_v47, %v1032_v45  ;;  %v1036_v57 = vadd.f32 %v1035_v49, %v2620_v59 }
 0x13b   : > { %v1939_v53 = vpack.c.bf16 %v1147_v48, %v1145_v46  ;;  %v1037_v55 = vpop.f32.mrf.mxu0  ;;  %v1149_v58 = vadd.f32 %v1148_v50, %v2622_v60 }
 0x13c   : > { %v1150_v56 = vpop.f32.mrf.mxu1  ;;  %1604 = vst [vmem:[%s2636_s10 + $0xf0] sm:$0xff] %v1938_v51  ;;  %v1038_v63 = vadd.f32 %v1037_v55, %v2624_v61 }
 0x13d   : > { %1605 = vst [vmem:[%s2636_s10 + $0xf8] sm:$0xff] %v1939_v53  ;;  %v1151_v0 = vadd.f32 %v1150_v56, %v2626_v62  ;;  %v1041_v1 = vpop.f32.mrf.mxu0 }
 0x13e   : > { %v1154_v2 = vpop.f32.mrf.mxu1  ;;  %v1941_v3 = vpack.c.bf16 %v1038_v63, %v1036_v57  ;;  %v1042_v7 = vadd.f32 %v1041_v1, %v2620_v59 }
 0x13f   : > { %v1942_v4 = vpack.c.bf16 %v1151_v0, %v1149_v58  ;;  %v1043_v5 = vpop.f32.mrf.mxu0  ;;  %v1155_v8 = vadd.f32 %v1154_v2, %v2622_v60 }
 0x140   : > { %v1156_v6 = vpop.f32.mrf.mxu1  ;;  %1607 = vst [vmem:[%s2636_s10 + $0x108] sm:$0xff] %v1941_v3  ;;  %v1044_v9 = vadd.f32 %v1043_v5, %v2624_v61 }
 0x141   : > { %1608 = vst [vmem:[%s2636_s10 + $0x110] sm:$0xff] %v1942_v4  ;;  %v1157_v10 = vadd.f32 %v1156_v6, %v2626_v62  ;;  %v1045_v11 = vpop.f32.mrf.mxu0 }
 0x142   : > { %v1158_v12 = vpop.f32.mrf.mxu1  ;;  %v1944_v13 = vpack.c.bf16 %v1044_v9, %v1042_v7  ;;  %v1046_v17 = vadd.f32 %v1045_v11, %v2620_v59 }
 0x143   : > { %v1945_v14 = vpack.c.bf16 %v1157_v10, %v1155_v8  ;;  %v1047_v15 = vpop.f32.mrf.mxu0  ;;  %v1159_v18 = vadd.f32 %v1158_v12, %v2622_v60 }
 0x144   : > { %v1160_v16 = vpop.f32.mrf.mxu1  ;;  %1610 = vst [vmem:[%s2636_s10 + $0x120] sm:$0xff] %v1944_v13  ;;  %v1048_v19 = vadd.f32 %v1047_v15, %v2624_v61 }
 0x145   : > { %1611 = vst [vmem:[%s2636_s10 + $0x128] sm:$0xff] %v1945_v14  ;;  %v1161_v20 = vadd.f32 %v1160_v16, %v2626_v62  ;;  %v1051_v21 = vpop.f32.mrf.mxu0 }
 0x146   : > { %v1164_v22 = vpop.f32.mrf.mxu1  ;;  %v1947_v23 = vpack.c.bf16 %v1048_v19, %v1046_v17  ;;  %v1052_v27 = vadd.f32 %v1051_v21, %v2620_v59 }
 0x147   : > { %v1948_v24 = vpack.c.bf16 %v1161_v20, %v1159_v18  ;;  %v1053_v25 = vpop.f32.mrf.mxu0  ;;  %v1165_v28 = vadd.f32 %v1164_v22, %v2622_v60 }
 0x148   : > { %v1166_v26 = vpop.f32.mrf.mxu1  ;;  %1613 = vst [vmem:[%s2636_s10 + $0x138] sm:$0xff] %v1947_v23  ;;  %v1054_v29 = vadd.f32 %v1053_v25, %v2624_v61 }
 0x149   : > { %1614 = vst [vmem:[%s2636_s10 + $0x140] sm:$0xff] %v1948_v24  ;;  %v1167_v30 = vadd.f32 %v1166_v26, %v2626_v62  ;;  %v1055_v31 = vpop.f32.mrf.mxu0 }
 0x14a   : > { %v1168_v32 = vpop.f32.mrf.mxu1  ;;  %v1950_v33 = vpack.c.bf16 %v1054_v29, %v1052_v27  ;;  %v1056_v37 = vadd.f32 %v1055_v31, %v2620_v59 }
 0x14b   : > { %v1951_v34 = vpack.c.bf16 %v1167_v30, %v1165_v28  ;;  %v1057_v35 = vpop.f32.mrf.mxu0  ;;  %v1169_v38 = vadd.f32 %v1168_v32, %v2622_v60 }
 0x14c   : > { %v1170_v36 = vpop.f32.mrf.mxu1  ;;  %1616 = vst [vmem:[%s2636_s10 + $0x150] sm:$0xff] %v1950_v33  ;;  %v1058_v39 = vadd.f32 %v1057_v35, %v2624_v61 }
 0x14d   : > { %1617 = vst [vmem:[%s2636_s10 + $0x158] sm:$0xff] %v1951_v34  ;;  %v1171_v40 = vadd.f32 %v1170_v36, %v2626_v62  ;;  %v1207_v41 = vpop.f32.mrf.mxu0 }
 0x14e   : > { %v1247_v42 = vpop.f32.mrf.mxu1  ;;  %v1953_v43 = vpack.c.bf16 %v1058_v39, %v1056_v37  ;;  %v1208_v47 = vadd.f32 %v1207_v41, %v2616_v52 }
 0x14f   : > { %v1954_v44 = vpack.c.bf16 %v1171_v40, %v1169_v38  ;;  %v1209_v45 = vpop.f32.mrf.mxu0  ;;  %v1248_v59 = vadd.f32 %v1247_v42, %v2616_v52 }
 0x150   : > { %v1249_v46 = vpop.f32.mrf.mxu1  ;;  %1619 = vst [vmem:[%s2636_s10 + $0x168] sm:$0xff] %v1953_v43  ;;  %v1210_v60 = vadd.f32 %v1209_v45, %v2618_v54 }
 0x151   : > { %1620 = vst [vmem:[%s2636_s10 + $0x170] sm:$0xff] %v1954_v44  ;;  %v1250_v61 = vadd.f32 %v1249_v46, %v2618_v54  ;;  %v1211_v48 = vpop.f32.mrf.mxu0 }
 0x152   : > { %v1251_v62 = vpop.f32.mrf.mxu1  ;;  %v1910_v49 = vpack.c.bf16 %v1210_v60, %v1208_v47  ;;  %v1212_v55 = vadd.f32 %v1211_v48, %v2616_v52 }
 0x153   : > { %v1934_v50 = vpack.c.bf16 %v1250_v61, %v1248_v59  ;;  %v1213_v51 = vpop.f32.mrf.mxu0  ;;  %v1252_v56 = vadd.f32 %v1251_v62, %v2616_v52 }
 0x154   : > { %v1253_v53 = vpop.f32.mrf.mxu1  ;;  %1576 = vst [vmem:[%s2636_s10 + $0x10] sm:$0xff] %v1910_v49  ;;  %v1214_v57 = vadd.f32 %v1213_v51, %v2618_v54 }
 0x155   : > { %1600 = vst [vmem:[%s2636_s10 + $0xd0] sm:$0xff] %v1934_v50  ;;  %v1254_v58 = vadd.f32 %v1253_v53, %v2618_v54  ;;  %v1217_v63 = vpop.f32.mrf.mxu0 }
 0x156   : > { %v1257_v0 = vpop.f32.mrf.mxu1  ;;  %v1913_v1 = vpack.c.bf16 %v1214_v57, %v1212_v55  ;;  %v1218_v5 = vadd.f32 %v1217_v63, %v2616_v52 }
 0x157   : > { %v1937_v2 = vpack.c.bf16 %v1254_v58, %v1252_v56  ;;  %v1219_v3 = vpop.f32.mrf.mxu0  ;;  %v1258_v6 = vadd.f32 %v1257_v0, %v2616_v52 }
 0x158   : > { %v1259_v4 = vpop.f32.mrf.mxu1  ;;  %1579 = vst [vmem:[%s2636_s10 + $0x28] sm:$0xff] %v1913_v1  ;;  %v1220_v7 = vadd.f32 %v1219_v3, %v2618_v54 }
 0x159   : > { %1603 = vst [vmem:[%s2636_s10 + $0xe8] sm:$0xff] %v1937_v2  ;;  %v1260_v8 = vadd.f32 %v1259_v4, %v2618_v54  ;;  %v1221_v9 = vpop.f32.mrf.mxu0 }
 0x15a   : > { %v1261_v10 = vpop.f32.mrf.mxu1  ;;  %v1916_v11 = vpack.c.bf16 %v1220_v7, %v1218_v5  ;;  %v1222_v15 = vadd.f32 %v1221_v9, %v2616_v52 }
 0x15b   : > { %v1940_v12 = vpack.c.bf16 %v1260_v8, %v1258_v6  ;;  %v1223_v13 = vpop.f32.mrf.mxu0  ;;  %v1262_v16 = vadd.f32 %v1261_v10, %v2616_v52 }
 0x15c   : > { %v1263_v14 = vpop.f32.mrf.mxu1  ;;  %1582 = vst [vmem:[%s2636_s10 + $0x40] sm:$0xff] %v1916_v11  ;;  %v1224_v17 = vadd.f32 %v1223_v13, %v2618_v54 }
 0x15d   : > { %1606 = vst [vmem:[%s2636_s10 + $0x100] sm:$0xff] %v1940_v12  ;;  %v1264_v18 = vadd.f32 %v1263_v14, %v2618_v54  ;;  %v1227_v19 = vpop.f32.mrf.mxu0 }
 0x15e   : > { %v1267_v20 = vpop.f32.mrf.mxu1  ;;  %v1919_v21 = vpack.c.bf16 %v1224_v17, %v1222_v15  ;;  %v1228_v25 = vadd.f32 %v1227_v19, %v2616_v52 }
 0x15f   : > { %v1943_v22 = vpack.c.bf16 %v1264_v18, %v1262_v16  ;;  %v1229_v23 = vpop.f32.mrf.mxu0  ;;  %v1268_v26 = vadd.f32 %v1267_v20, %v2616_v52 }
 0x160   : > { %v1269_v24 = vpop.f32.mrf.mxu1  ;;  %1585 = vst [vmem:[%s2636_s10 + $0x58] sm:$0xff] %v1919_v21  ;;  %v1230_v27 = vadd.f32 %v1229_v23, %v2618_v54 }
 0x161   : > { %1609 = vst [vmem:[%s2636_s10 + $0x118] sm:$0xff] %v1943_v22  ;;  %v1270_v28 = vadd.f32 %v1269_v24, %v2618_v54  ;;  %v1231_v29 = vpop.f32.mrf.mxu0 }
 0x162   : > { %v1271_v30 = vpop.f32.mrf.mxu1  ;;  %v1922_v31 = vpack.c.bf16 %v1230_v27, %v1228_v25  ;;  %v1232_v35 = vadd.f32 %v1231_v29, %v2616_v52 }
 0x163   : > { %v1946_v32 = vpack.c.bf16 %v1270_v28, %v1268_v26  ;;  %v1233_v33 = vpop.f32.mrf.mxu0  ;;  %v1272_v36 = vadd.f32 %v1271_v30, %v2616_v52 }
 0x164   : > { %v1273_v34 = vpop.f32.mrf.mxu1  ;;  %1588 = vst [vmem:[%s2636_s10 + $0x70] sm:$0xff] %v1922_v31  ;;  %v1234_v37 = vadd.f32 %v1233_v33, %v2618_v54 }
 0x165   : > { %1612 = vst [vmem:[%s2636_s10 + $0x130] sm:$0xff] %v1946_v32  ;;  %v1274_v38 = vadd.f32 %v1273_v34, %v2618_v54  ;;  %v1237_v39 = vpop.f32.mrf.mxu0 }
 0x166   : > { %v1277_v40 = vpop.f32.mrf.mxu1  ;;  %v1925_v41 = vpack.c.bf16 %v1234_v37, %v1232_v35  ;;  %v1238_v45 = vadd.f32 %v1237_v39, %v2616_v52 }
 0x167   : > { %v1949_v42 = vpack.c.bf16 %v1274_v38, %v1272_v36  ;;  %v1239_v43 = vpop.f32.mrf.mxu0  ;;  %v1278_v46 = vadd.f32 %v1277_v40, %v2616_v52 }
 0x168   : > { %v1279_v44 = vpop.f32.mrf.mxu1  ;;  %1591 = vst [vmem:[%s2636_s10 + $0x88] sm:$0xff] %v1925_v41  ;;  %v1240_v47 = vadd.f32 %v1239_v43, %v2618_v54 }
 0x169   : > { %1615 = vst [vmem:[%s2636_s10 + $0x148] sm:$0xff] %v1949_v42  ;;  %v1280_v59 = vadd.f32 %v1279_v44, %v2618_v54  ;;  %v1241_v60 = vpop.f32.mrf.mxu0 }
 0x16a   : > { %v1281_v61 = vpop.f32.mrf.mxu1  ;;  %v1928_v48 = vpack.c.bf16 %v1240_v47, %v1238_v45  ;;  %v1242_v51 = vadd.f32 %v1241_v60, %v2616_v52 }
 0x16b   : > { %v1952_v62 = vpack.c.bf16 %v1280_v59, %v1278_v46  ;;  %v1243_v49 = vpop.f32.mrf.mxu0  ;;  %v1282_v53 = vadd.f32 %v1281_v61, %v2616_v52 }
 0x16c   : > { %v1283_v50 = vpop.f32.mrf.mxu1  ;;  %1594 = vst [vmem:[%s2636_s10 + $0xa0] sm:$0xff] %v1928_v48  ;;  %v1244_v55 = vadd.f32 %v1243_v49, %v2618_v54 }
 0x16d   : > { %1618 = vst [vmem:[%s2636_s10 + $0x160] sm:$0xff] %v1952_v62  ;;  %v1284_v56 = vadd.f32 %v1283_v50, %v2618_v54 }
 0x16e   : > { %v1931_v57 = vpack.c.bf16 %v1244_v55, %v1242_v51 }
 0x16f   : > { %v1955_v58 = vpack.c.bf16 %v1284_v56, %v1282_v53 }
 0x170   : > { %1597 = vst [vmem:[%s2636_s10 + $0xb8] sm:$0xff] %v1931_v57 }
 0x171   : > { %1621 = vst [vmem:[%s2636_s10 + $0x178] sm:$0xff] %v1955_v58 }
 0x172 PF: > { %s13_s14 = sadd.s32 1, %s2203_s14   ;;  %s2791_s12 = smov %s2199_s13 }
 0x173   : > { %p10_p5 = scmp.ge.s32.totalorder %s13_s14, 4   ;;  %s2792_s13 = smov %s2794_s15 }
 0x175   :  { %12 = sbr.rel (!%p10_p5) target bundleno = 2 (0x2), region = 68 }

// kernel: classifier_forward.15
= control target key start
LH: loop header
LB: loop body
LE: loop exit
PB: predicated region body
PF: predicated region fallthrough
CT: control target
= control target key end

     0   :  { %s1591_s21 = smov 0   ;;  %s2181_s0 = inlined_call_operand.vmem [shape: bf16[256,256], index: 0, kind: input, shape index: {}]   ;;  %s2182_s1 = inlined_call_operand.vmem [shape: bf16[256,256], index: 1, kind: input, shape index: {}]   ;;  %s2183_s2 = inlined_call_operand.vmem [shape: f32[1,256], index: 2, kind: input, shape index: {}]   ;;  %s2184_s3 = inlined_call_operand.vmem [shape: bf16[256,256], index: 3, kind: input, shape index: {}]   ;;  %s2185_s4 = inlined_call_operand.vmem [shape: f32[1,256], index: 4, kind: input, shape index: {}]   ;;  %s2186_s5 = inlined_call_operand.vmem [shape: f32[1,256], index: 5, kind: input, shape index: {}]   ;;  %s2187_s6 = inlined_call_operand.vmem [shape: bf16[256,256], index: 6, kind: output, shape index: {}]  }
   0x1 LB: > { %s1305_s22 = sadd.s32 4294967295, %s1554_s21   ;;  %p1309_p0 = scmp.ge.s32.totalorder %s1554_s21, 1  ;;  %s1554_s21 = sphi %s1591_s21, %s16_s21  }
   0x2   : > { %p226_p1 = scmp.lt.s32.totalorder %s1554_s21, 3 }
   0x4   : > { %p227_p2 = pnand %p1309_p0, %p226_p1 }
   0x5   : > { %s1310_s9 = sshll.u32 (!%p227_p2), %s1305_s22, 4 }
   0x6   : > { %230 = sbr.rel (%p227_p2) target bundleno = 628 (0x274), region = 44  ;;  %p265_p3 = scmp.lt.s32.totalorder (!%p227_p2), %s1310_s9, 31 }
   0xb   : > { %v1444_v0 = vld [vmem:[%s2182_s1 + $0x74] ss:$8 sps:$4 sm:$0xff]   ;;  %v1446_v1 = vld [vmem:[%s2182_s1 + $0x70] ss:$8 sps:$4 sm:$0xff]   ;;  %v1447_v2 = vld [vmem:[%s2182_s1 + $0x64] ss:$8 sps:$4 sm:$0xff]   ;;  %v335_v48 = vlaneseq }
   0xc   : > { %585 = vmatprep.subr.bf16.mxu0 %v1444_v0  ;;  %1404 = vmatprep.subr.bf16.mxu1 %v1444_v0  ;;  %v1449_v3 = vld [vmem:[%s2182_s1 + $0x60] ss:$8 sps:$4 sm:$0xff]   ;;  %v1450_v4 = vld [vmem:[%s2182_s1 + $0x54] ss:$8 sps:$4 sm:$0xff]   ;;  %v1452_v5 = vld [vmem:[%s2182_s1 + $0x50] ss:$8 sps:$4 sm:$0xff]  }
   0xd   : > { %586 = vmatpush1.bf16.msra.mxu0 %v1446_v1  ;;  %1420 = vmatpush1.bf16.msra.mxu1 %v1446_v1  ;;  %v1453_v6 = vld [vmem:[%s2182_s1 + $0x44] ss:$8 sps:$4 sm:$0xff]   ;;  %v1455_v7 = vld [vmem:[%s2182_s1 + $0x40] ss:$8 sps:$4 sm:$0xff]   ;;  %v1456_v8 = vld [vmem:[%s2182_s1 + $0x34] ss:$8 sps:$4 sm:$0xff]  }
   0xe   : > { %587 = vmatprep.subr.bf16.mxu0 %v1447_v2  ;;  %1405 = vmatprep.subr.bf16.mxu1 %v1447_v2  ;;  %s2189_s9 = smov (!%p265_p3, %s1310_s9), 31  ;;  %v1458_v9 = vld [vmem:[%s2182_s1 + $0x30] ss:$8 sps:$4 sm:$0xff]   ;;  %v1459_v10 = vld [vmem:[%s2182_s1 + $0x24] ss:$8 sps:$4 sm:$0xff]   ;;  %v336_v49 = vshrl.u32 %v335_v48, 7 }
   0xf   : > { %s1632_s23 = sshll.u32 %s2189_s9, 3  ;;  %v1461_v11 = vld [vmem:[%s2182_s1 + $0x20] ss:$8 sps:$4 sm:$0xff]   ;;  %v1462_v12 = vld [vmem:[%s2182_s1 + $0x14] ss:$8 sps:$4 sm:$0xff]  }
  0x10   : > { %s1641_s28 = scalar_lea.vmem %s2181_s0, %s1632_s23  ;;  %v1464_v14 = vld [vmem:[%s2182_s1 + $0x10] ss:$8 sps:$4 sm:$0xff]   ;;  %v1465_v16 = vld [vmem:[%s2182_s1 + $0x4] ss:$8 sps:$4 sm:$0xff]   ;;  %v1467_v17 = vld [vmem:[%s2182_s1] ss:$8 sps:$4 sm:$0xff]   ;;  %s1728_s7 = scalar_lea.vmem %s2184_s3, %s1632_s23 }
  0x11   : > { %588 = vmatpush1.bf16.msra.mxu0 %v1449_v3  ;;  %1421 = vmatpush1.bf16.msra.mxu1 %v1449_v3  ;;  %v1494_v13 = vld [vmem:[%s1641_s28 + $0x4] ss:$8 sps:$4 sm:$0xff]   ;;  %v1468_v18 = vld [vmem:[%s2182_s1 + $0xf4] ss:$8 sps:$4 sm:$0xff]   ;;  %v1470_v19 = vld [vmem:[%s2182_s1 + $0xf0] ss:$8 sps:$4 sm:$0xff]   ;;  %s2072_s13 = scalar_lea.vmem %s2187_s6, %s1632_s23 }
  0x12   : > { %589 = vmatprep.subr.bf16.mxu0 %v1450_v4  ;;  %1406 = vmatprep.subr.bf16.mxu1 %v1450_v4  ;;  %v1497_v15 = vld [vmem:[%s1641_s28 + $0x44] ss:$8 sps:$4 sm:$0xff]   ;;  %v1473_v21 = vld [vmem:[%s2182_s1 + $0xe0] ss:$8 sps:$4 sm:$0xff]   ;;  %v1474_v22 = vld [vmem:[%s2182_s1 + $0xd4] ss:$8 sps:$4 sm:$0xff]  }
  0x13   : > { %617 = vmatprep.mubr.bf16.mxu0 %v1494_v13  ;;  %657 = vmatprep.mubr.bf16.mxu1 %v1497_v15  ;;  %v1471_v20 = vld [vmem:[%s2182_s1 + $0xe4] ss:$8 sps:$4 sm:$0xff]   ;;  %v1476_v23 = vld [vmem:[%s2182_s1 + $0xd0] ss:$8 sps:$4 sm:$0xff]   ;;  %v1479_v25 = vld [vmem:[%s2182_s1 + $0xc0] ss:$8 sps:$4 sm:$0xff]  }
  0x14   : > { %v1477_v24 = vld [vmem:[%s2182_s1 + $0xc4] ss:$8 sps:$4 sm:$0xff]   ;;  %v1480_v26 = vld [vmem:[%s2182_s1 + $0xb4] ss:$8 sps:$4 sm:$0xff]   ;;  %v1482_v27 = vld [vmem:[%s2182_s1 + $0xb0] ss:$8 sps:$4 sm:$0xff]  }
  0x15   : > { %590 = vmatpush1.bf16.msra.mxu0 %v1452_v5  ;;  %1422 = vmatpush1.bf16.msra.mxu1 %v1452_v5  ;;  %v1483_v28 = vld [vmem:[%s2182_s1 + $0xa4] ss:$8 sps:$4 sm:$0xff]   ;;  %v1485_v29 = vld [vmem:[%s2182_s1 + $0xa0] ss:$8 sps:$4 sm:$0xff]   ;;  %v1486_v30 = vld [vmem:[%s2182_s1 + $0x94] ss:$8 sps:$4 sm:$0xff]  }
  0x16   : > { %591 = vmatprep.subr.bf16.mxu0 %v1453_v6  ;;  %1407 = vmatprep.subr.bf16.mxu1 %v1453_v6  ;;  %v1488_v31 = vld [vmem:[%s2182_s1 + $0x90] ss:$8 sps:$4 sm:$0xff]   ;;  %v1489_v32 = vld [vmem:[%s2182_s1 + $0x84] ss:$8 sps:$4 sm:$0xff]   ;;  %v1491_v33 = vld [vmem:[%s2182_s1 + $0x80] ss:$8 sps:$4 sm:$0xff]  }
  0x17   : > { %v1492_v34 = vld [vmem:[%s1641_s28] ss:$8 sps:$4 sm:$0xff]   ;;  %v1498_v36 = vld [vmem:[%s1641_s28 + $0x14] ss:$8 sps:$4 sm:$0xff]   ;;  %v1500_v38 = vld [vmem:[%s1641_s28 + $0x10] ss:$8 sps:$4 sm:$0xff]  }
  0x18   : > { %v1495_v35 = vld [vmem:[%s1641_s28 + $0x40] ss:$8 sps:$4 sm:$0xff]   ;;  %v1501_v37 = vld [vmem:[%s1641_s28 + $0x54] ss:$8 sps:$4 sm:$0xff]   ;;  %v1503_v39 = vld [vmem:[%s1641_s28 + $0x50] ss:$8 sps:$4 sm:$0xff]  }
  0x19   : > { %592 = vmatpush1.bf16.msra.mxu0 %v1455_v7  ;;  %1423 = vmatpush1.bf16.msra.mxu1 %v1455_v7  ;;  %v1504_v40 = vld [vmem:[%s1641_s28 + $0x24] ss:$8 sps:$4 sm:$0xff]   ;;  %v1506_v42 = vld [vmem:[%s1641_s28 + $0x20] ss:$8 sps:$4 sm:$0xff]   ;;  %v1510_v44 = vld [vmem:[%s1641_s28 + $0x34] ss:$8 sps:$4 sm:$0xff]  }
  0x1a   : > { %593 = vmatprep.subr.bf16.mxu0 %v1456_v8  ;;  %1408 = vmatprep.subr.bf16.mxu1 %v1456_v8  ;;  %v1507_v41 = vld [vmem:[%s1641_s28 + $0x64] ss:$8 sps:$4 sm:$0xff]   ;;  %v1509_v43 = vld [vmem:[%s1641_s28 + $0x60] ss:$8 sps:$4 sm:$0xff]   ;;  %v1513_v45 = vld [vmem:[%s1641_s28 + $0x74] ss:$8 sps:$4 sm:$0xff]  }
  0x1b   : > { %v1512_v46 = vld [vmem:[%s1641_s28 + $0x30] ss:$8 sps:$4 sm:$0xff]   ;;  %v1719_v50 = vsub.s32 0, %v336_v49  ;;  %v333_v51 = vld [vmem:[%s2183_s2] sm:$0x3]  ;;  %v1730_v52 = vsub.s32 1, %v336_v49 }
  0x1c   : > { %v1515_v47 = vld [vmem:[%s1641_s28 + $0x70] ss:$8 sps:$4 sm:$0xff]   ;;  %v698_v54 = vld [vmem:[%s1728_s7] sm:$0xff]  ;;  %v699_v2 = vld [vmem:[%s1728_s7 + $0x8] sm:$0xff] }
  0x1d   : > { %594 = vmatpush1.bf16.msra.mxu0 %v1458_v9  ;;  %1424 = vmatpush1.bf16.msra.mxu1 %v1458_v9  ;;  %v1733_v53 = vrot.slane %v333_v51, %v1719_v50  ;;  %v706_v55 = vld [vmem:[%s1728_s7 + $0x40] sm:$0xff]  ;;  %v1738_v56 = vrot.slane %v333_v51, %v1730_v52  ;;  %v716_v60 = vunpack.c.l.bf16 %v698_v54  ;;  %v717_v61 = vunpack.c.h.bf16 %v698_v54  ;;  %v707_v6 = vld [vmem:[%s1728_s7 + $0x48] sm:$0xff]  ;;  %v708_v13 = vld [vmem:[%s1728_s7 + $0x50] sm:$0xff] }
  0x1e   : > { %595 = vmatprep.subr.bf16.mxu0 %v1459_v10  ;;  %1409 = vmatprep.subr.bf16.mxu1 %v1459_v10  ;;  %v732_v63 = vunpack.c.l.bf16 %v706_v55  ;;  %v733_v5 = vunpack.c.h.bf16 %v706_v55  ;;  %v718_v9 = vunpack.c.l.bf16 %v699_v2  ;;  %v700_v10 = vld [vmem:[%s1728_s7 + $0x10] sm:$0xff]  ;;  %v709_v48 = vld [vmem:[%s1728_s7 + $0x58] sm:$0xff]  ;;  %v702_v49 = vld [vmem:[%s1728_s7 + $0x20] sm:$0xff] }
  0x21   : > { %596 = vmatpush1.bf16.msra.mxu0 %v1461_v11  ;;  %1425 = vmatpush1.bf16.msra.mxu1 %v1461_v11 }
  0x22   : > { %597 = vmatprep.subr.bf16.mxu0 %v1462_v12  ;;  %1410 = vmatprep.subr.bf16.mxu1 %v1462_v12 }
  0x25   : > { %598 = vmatpush1.bf16.msra.mxu0 %v1464_v14  ;;  %1426 = vmatpush1.bf16.msra.mxu1 %v1464_v14  ;;  %v735_v14 = vunpack.c.h.bf16 %v707_v6 }
  0x26   : > { %599 = vmatprep.subr.bf16.mxu0 %v1465_v16  ;;  %1411 = vmatprep.subr.bf16.mxu1 %v1465_v16 }
  0x29   : > { %600 = vmatpush1.bf16.msra.mxu0 %v1467_v17  ;;  %1427 = vmatpush1.bf16.msra.mxu1 %v1467_v17 }
  0x2a   : > { %601 = vmatprep.subr.bf16.mxu0 %v1468_v18  ;;  %1412 = vmatprep.subr.bf16.mxu1 %v1468_v18  ;;  %v719_v18 = vunpack.c.h.bf16 %v699_v2  ;;  %v710_v2 = vld [vmem:[%s1728_s7 + $0x60] sm:$0xff] }
  0x2d   : > { %602 = vmatpush2.bf16.msra.mxu0 %v1470_v19  ;;  %1428 = vmatpush2.bf16.msra.mxu1 %v1470_v19 }
  0x2e   : > { %603 = vmatprep.subr.bf16.mxu0 %v1471_v20  ;;  %1413 = vmatprep.subr.bf16.mxu1 %v1471_v20  ;;  %v734_v20 = vunpack.c.l.bf16 %v707_v6  ;;  %v739_v6 = vunpack.c.h.bf16 %v709_v48 }
  0x31   : > { %604 = vmatpush2.bf16.msra.mxu0 %v1473_v21  ;;  %1429 = vmatpush2.bf16.msra.mxu1 %v1473_v21 }
  0x32   : > { %605 = vmatprep.subr.bf16.mxu0 %v1474_v22  ;;  %1414 = vmatprep.subr.bf16.mxu1 %v1474_v22 }
  0x35   : > { %606 = vmatpush2.bf16.msra.mxu0 %v1476_v23  ;;  %1430 = vmatpush2.bf16.msra.mxu1 %v1476_v23 }
  0x36   : > { %607 = vmatprep.subr.bf16.mxu0 %v1477_v24  ;;  %1415 = vmatprep.subr.bf16.mxu1 %v1477_v24 }
  0x39   : > { %608 = vmatpush2.bf16.msra.mxu0 %v1479_v25  ;;  %1431 = vmatpush2.bf16.msra.mxu1 %v1479_v25 }
  0x3a   : > { %609 = vmatprep.subr.bf16.mxu0 %v1480_v26  ;;  %1416 = vmatprep.subr.bf16.mxu1 %v1480_v26  ;;  %v720_v26 = vunpack.c.l.bf16 %v700_v10 }
  0x3d   : > { %610 = vmatpush2.bf16.msra.mxu0 %v1482_v27  ;;  %1432 = vmatpush2.bf16.msra.mxu1 %v1482_v27  ;;  %v721_v27 = vunpack.c.h.bf16 %v700_v10 }
  0x3e   : > { %611 = vmatprep.subr.bf16.mxu0 %v1483_v28  ;;  %1417 = vmatprep.subr.bf16.mxu1 %v1483_v28 }
  0x41   : > { %612 = vmatpush2.bf16.msra.mxu0 %v1485_v29  ;;  %1433 = vmatpush2.bf16.msra.mxu1 %v1485_v29  ;;  %v736_v29 = vunpack.c.l.bf16 %v708_v13 }
  0x42   : > { %613 = vmatprep.subr.bf16.mxu0 %v1486_v30  ;;  %1418 = vmatprep.subr.bf16.mxu1 %v1486_v30  ;;  %v737_v30 = vunpack.c.h.bf16 %v708_v13  ;;  %v725_v13 = vunpack.c.h.bf16 %v702_v49 }
  0x45   : > { %614 = vmatpush2.bf16.msra.mxu0 %v1488_v31  ;;  %1434 = vmatpush2.bf16.msra.mxu1 %v1488_v31 }
  0x46   : > { %615 = vmatprep.subr.bf16.mxu0 %v1489_v32  ;;  %1419 = vmatprep.subr.bf16.mxu1 %v1489_v32 }
  0x49   : > { %616 = vmatpush2.bf16.msra.mxu0 %v1491_v33  ;;  %1435 = vmatpush2.bf16.msra.mxu1 %v1491_v33 }
  0x4c   : > { %618 = vmatmul.mubr.bf16.vlgmr.msra.gmra.mxu0 %v1492_v34  ;;  %658 = vmatmul.mubr.bf16.vlgmr.msra.gmra.mxu1 %v1495_v35 }
  0x4d   : > { %627 = vmatprep.mubr.bf16.mxu0 %v1498_v36  ;;  %667 = vmatprep.mubr.bf16.mxu1 %v1501_v37 }
  0x54   : > { %628 = vmatmul.mubr.bf16.gmra.mxu0 %v1500_v38  ;;  %668 = vmatmul.mubr.bf16.gmra.mxu1 %v1503_v39 }
  0x55   : > { %637 = vmatprep.mubr.bf16.mxu0 %v1504_v40  ;;  %677 = vmatprep.mubr.bf16.mxu1 %v1507_v41  ;;  %v701_v40 = vld [vmem:[%s1728_s7 + $0x18] sm:$0xff] }
  0x5c   : > { %638 = vmatmul.mubr.bf16.gmra.mxu0 %v1506_v42  ;;  %678 = vmatmul.mubr.bf16.gmra.mxu1 %v1509_v43 }
  0x5d   : > { %647 = vmatprep.mubr.bf16.mxu0 %v1510_v44  ;;  %687 = vmatprep.mubr.bf16.mxu1 %v1513_v45 }
  0x64   : > { %648 = vmatmul.mubr.bf16.gmra.mxu0 %v1512_v46  ;;  %688 = vmatmul.mubr.bf16.gmra.mxu1 %v1515_v47  ;;  %v723_v46 = vunpack.c.h.bf16 %v701_v40 }
 0x10c   : > { %v619_v57 = vpop.f32.mrf.mxu0  ;;  %v659_v58 = vpop.f32.mrf.mxu1 }
 0x10d   : > { %v620_v59 = vadd.f32 %v619_v57, %v1733_v53  ;;  %v660_v62 = vadd.f32 %v659_v58, %v1733_v53 }
 0x10e   : > { %v621_v0 = vpop.f32.mrf.mxu0  ;;  %v661_v1 = vpop.f32.mrf.mxu1 }
 0x10f   : > { %v622_v3 = vadd.f32 %v621_v0, %v1738_v56  ;;  %v662_v4 = vadd.f32 %v661_v1, %v1738_v56  ;;  %v1747_v11 = vadd.f32 %v716_v60, %v620_v59  ;;  %v1752_v15 = vadd.f32 %v732_v63, %v660_v62 }
 0x110   : > { %v623_v7 = vpop.f32.mrf.mxu0  ;;  %v663_v8 = vpop.f32.mrf.mxu1  ;;  %v722_v59 = vunpack.c.l.bf16 %v701_v40  ;;  %v738_v63 = vunpack.c.l.bf16 %v709_v48  ;;  %v724_v0 = vunpack.c.l.bf16 %v702_v49 }
 0x111   : > { %v1749_v12 = vadd.f32 %v717_v61, %v622_v3  ;;  %v664_v16 = vadd.f32 %v663_v8, %v1733_v53  ;;  %v1755_v21 = vadd.f32 %v733_v5, %v662_v4  ;;  %v624_v31 = vadd.f32 %v623_v7, %v1733_v53 }
 0x112   : > { %v625_v17 = vpop.f32.mrf.mxu0  ;;  %v665_v19 = vpop.f32.mrf.mxu1 }
 0x113   : > { %v626_v22 = vadd.f32 %v625_v17, %v1738_v56  ;;  %v666_v23 = vadd.f32 %v665_v19, %v1738_v56  ;;  %v780_v24 = vadd.f32 %v1749_v12, %v1747_v11  ;;  %v1766_v37 = vadd.f32 %v734_v20, %v664_v16 }
 0x114   : > { %v629_v25 = vpop.f32.mrf.mxu0  ;;  %v669_v28 = vpop.f32.mrf.mxu1  ;;  %v804_v42 = vadd.f32 %v1755_v21, %v1752_v15  ;;  %v1781_v51 = vadd.f32 %v718_v9, %v624_v31  ;;  %v740_v19 = vunpack.c.l.bf16 %v710_v2 }
 0x115   : > { %v630_v32 = vadd.f32 %v629_v25, %v1733_v53  ;;  %781 = vadd.xlane.f32.xlu0 %v780_v24  ;;  %v670_v33 = vadd.f32 %v669_v28, %v1733_v53  ;;  %v1764_v34 = vadd.f32 %v735_v14, %v666_v23  ;;  %v1768_v38 = vadd.f32 %v719_v18, %v626_v22  ;;  %v703_v24 = vld [vmem:[%s1728_s7 + $0x28] sm:$0xff] }
 0x116   : > { %v631_v35 = vpop.f32.mrf.mxu0  ;;  %v671_v36 = vpop.f32.mrf.mxu1  ;;  %v741_v22 = vunpack.c.h.bf16 %v710_v2 }
 0x117   : > { %v632_v39 = vadd.f32 %v631_v35, %v1738_v56  ;;  %v672_v41 = vadd.f32 %v671_v36, %v1738_v56  ;;  %v1775_v43 = vadd.f32 %v720_v26, %v630_v32  ;;  %v807_v45 = vadd.f32 %v1764_v34, %v1766_v37  ;;  %v711_v32 = vld [vmem:[%s1728_s7 + $0x68] sm:$0xff] }
 0x118   : > { %v633_v44 = vpop.f32.mrf.mxu0  ;;  %v673_v47 = vpop.f32.mrf.mxu1  ;;  %v1785_v55 = vadd.f32 %v736_v29, %v670_v33  ;;  %v783_v1 = vadd.f32 %v1768_v38, %v1781_v51  ;;  %v704_v33 = vld [vmem:[%s1728_s7 + $0x30] sm:$0xff]  ;;  %v727_v36 = vunpack.c.h.bf16 %v703_v24  ;;  %v742_v48 = vunpack.c.l.bf16 %v711_v32 }
 0x119   : > { %v1783_v54 = vadd.f32 %v721_v27, %v632_v39  ;;  %v1787_v57 = vadd.f32 %v737_v30, %v672_v41  ;;  %805 = vadd.xlane.f32.xlu0 %v804_v42  ;;  %v634_v58 = vadd.f32 %v633_v44, %v1733_v53  ;;  %808 = vadd.xlane.f32.xlu1 %v807_v45  ;;  %v726_v41 = vunpack.c.l.bf16 %v703_v24 }
 0x11a   : > { %v635_v60 = vpop.f32.mrf.mxu0  ;;  %v675_v61 = vpop.f32.mrf.mxu1  ;;  %v674_v3 = vadd.f32 %v673_v47, %v1733_v53  ;;  %v728_v49 = vunpack.c.l.bf16 %v704_v33 }
 0x11b   : > { %v636_v62 = vadd.f32 %v635_v60, %v1738_v56  ;;  %v676_v5 = vadd.f32 %v675_v61, %v1738_v56  ;;  %v786_v7 = vadd.f32 %v1783_v54, %v1775_v43  ;;  %v810_v14 = vadd.f32 %v1787_v57, %v1785_v55 }
 0x11c   : > { %v639_v4 = vpop.f32.mrf.mxu0  ;;  %v679_v8 = vpop.f32.mrf.mxu1  ;;  %v1803_v16 = vadd.f32 %v722_v59, %v634_v58  ;;  %v1809_v26 = vadd.f32 %v738_v63, %v674_v3  ;;  %v743_v58 = vunpack.c.h.bf16 %v711_v32  ;;  %v729_v3 = vunpack.c.h.bf16 %v704_v33 }
 0x11d   : > { %v1798_v9 = vadd.f32 %v723_v46, %v636_v62  ;;  %v640_v10 = vadd.f32 %v639_v4, %v1733_v53  ;;  %784 = vadd.xlane.f32.xlu0 %v783_v1  ;;  %787 = vadd.xlane.f32.xlu1 %v786_v7  ;;  %v680_v18 = vadd.f32 %v679_v8, %v1733_v53  ;;  %v712_v46 = vld [vmem:[%s1728_s7 + $0x70] sm:$0xff]  ;;  %v705_v8 = vld [vmem:[%s1728_s7 + $0x38] sm:$0xff] }
 0x11e   : > { %v641_v17 = vpop.f32.mrf.mxu0  ;;  %v681_v20 = vpop.f32.mrf.mxu1  ;;  %v1813_v28 = vadd.f32 %v739_v6, %v676_v5  ;;  %v744_v4 = vunpack.c.l.bf16 %v712_v46  ;;  %v730_v32 = vunpack.c.l.bf16 %v705_v8  ;;  %v731_v33 = vunpack.c.h.bf16 %v705_v8 }
 0x11f   : > { %v642_v23 = vadd.f32 %v641_v17, %v1738_v56  ;;  %v682_v25 = vadd.f32 %v681_v20, %v1738_v56  ;;  %v1811_v27 = vadd.f32 %v724_v0, %v640_v10  ;;  %v789_v30 = vadd.f32 %v1798_v9, %v1803_v16 }
 0x120   : > { %v643_v29 = vpop.f32.mrf.mxu0  ;;  %v683_v31 = vpop.f32.mrf.mxu1  ;;  %v1821_v39 = vadd.f32 %v740_v19, %v680_v18  ;;  %v813_v62 = vadd.f32 %v1813_v28, %v1809_v26 }
 0x121   : > { %v1819_v35 = vadd.f32 %v725_v13, %v642_v23  ;;  %811 = vadd.xlane.f32.xlu0 %v810_v14  ;;  %v644_v40 = vadd.f32 %v643_v29, %v1733_v53  ;;  %v1824_v42 = vadd.f32 %v741_v22, %v682_v25  ;;  %790 = vadd.xlane.f32.xlu1 %v789_v30  ;;  %v745_v13 = vunpack.c.h.bf16 %v712_v46  ;;  %v713_v29 = vld [vmem:[%s1728_s7 + $0x78] sm:$0xff] }
 0x122   : > { %v645_v44 = vpop.f32.mrf.mxu0  ;;  %v685_v45 = vpop.f32.mrf.mxu1  ;;  %v684_v59 = vadd.f32 %v683_v31, %v1733_v53  ;;  %v746_v46 = vunpack.c.l.bf16 %v713_v29 }
 0x123   : > { %v646_v47 = vadd.f32 %v645_v44, %v1738_v56  ;;  %v686_v61 = vadd.f32 %v685_v45, %v1738_v56  ;;  %v792_v63 = vadd.f32 %v1819_v35, %v1811_v27  ;;  %v1837_v5 = vadd.f32 %v726_v41, %v644_v40 }
 0x124   : > { %v649_v60 = vpop.f32.mrf.mxu0  ;;  %v689_v0 = vpop.f32.mrf.mxu1  ;;  %v816_v14 = vadd.f32 %v1824_v42, %v1821_v39  ;;  %v1845_v19 = vadd.f32 %v742_v48, %v684_v59 }
 0x125   : > { %v1834_v1 = vadd.f32 %v727_v36, %v646_v47  ;;  %v650_v2 = vadd.f32 %v649_v60, %v1733_v53  ;;  %814 = vadd.xlane.f32.xlu1 %v813_v62  ;;  %793 = vadd.xlane.f32.xlu0 %v792_v63  ;;  %v690_v7 = vadd.f32 %v689_v0, %v1733_v53  ;;  %v747_v47 = vunpack.c.h.bf16 %v713_v29 }
 0x126   : > { %v651_v6 = vpop.f32.mrf.mxu0  ;;  %v691_v10 = vpop.f32.mrf.mxu1  ;;  %v1849_v22 = vadd.f32 %v743_v58, %v686_v61 }
 0x127   : > { %v652_v17 = vadd.f32 %v651_v6, %v1738_v56  ;;  %v692_v18 = vadd.f32 %v691_v10, %v1738_v56  ;;  %v1847_v20 = vadd.f32 %v728_v49, %v650_v2  ;;  %v795_v24 = vadd.f32 %v1834_v1, %v1837_v5 }
 0x128   : > { %v653_v23 = vpop.f32.mrf.mxu0  ;;  %v693_v25 = vpop.f32.mrf.mxu1  ;;  %v1857_v36 = vadd.f32 %v744_v4, %v690_v7  ;;  %v819_v58 = vadd.f32 %v1849_v22, %v1845_v19 }
 0x129   : > { %v1854_v30 = vadd.f32 %v729_v3, %v652_v17  ;;  %v654_v31 = vadd.f32 %v653_v23, %v1733_v53  ;;  %v1859_v40 = vadd.f32 %v745_v13, %v692_v18  ;;  %796 = vadd.xlane.f32.xlu1 %v795_v24  ;;  %817 = vadd.xlane.f32.xlu0 %v816_v14 }
 0x12a   : > { %v655_v41 = vpop.f32.mrf.mxu0  ;;  %v695_v44 = vpop.f32.mrf.mxu1  ;;  %v694_v48 = vadd.f32 %v693_v25, %v1733_v53 }
 0x12b   : > { %v656_v45 = vadd.f32 %v655_v41, %v1738_v56  ;;  %v696_v49 = vadd.f32 %v695_v44, %v1738_v56  ;;  %v798_v59 = vadd.f32 %v1854_v30, %v1847_v20  ;;  %v1868_v60 = vadd.f32 %v730_v32, %v654_v31 }
 0x12c   : > { %v822_v62 = vadd.f32 %v1859_v40, %v1857_v36  ;;  %v1876_v63 = vadd.f32 %v746_v46, %v694_v48 }
 0x12d   : > { %v1870_v61 = vadd.f32 %v731_v33, %v656_v45  ;;  %820 = vadd.xlane.f32.xlu1 %v819_v58  ;;  %799 = vadd.xlane.f32.xlu0 %v798_v59  ;;  %v1878_v56 = vadd.f32 %v747_v47, %v696_v49 }
 0x12f   : > { %v801_v53 = vadd.f32 %v1870_v61, %v1868_v60  ;;  %v825_v0 = vadd.f32 %v1878_v56, %v1876_v63 }
 0x131   : > { %802 = vadd.xlane.f32.xlu1 %v801_v53  ;;  %823 = vadd.xlane.f32.xlu0 %v822_v62 }
 0x135   : > { %826 = vadd.xlane.f32.xlu1 %v825_v0 }
 0x19e   : > { %v782_v2 = vpop.xlane.xlu0 %781 }
 0x19f   : > { %v829_v3 = vmul.f32 0.00390625, %v782_v2 }
 0x1a1   : > { %v1883_v4 = vsub.f32 %v1747_v11, %v829_v3  ;;  %v1886_v6 = vsub.f32 %v1749_v12, %v829_v3 }
 0x1a2   : > { %v806_v7 = vpop.xlane.xlu0 %805  ;;  %v809_v8 = vpop.xlane.xlu1 %808 }
 0x1a3   : > { %v837_v10 = vmul.f32 0.00390625, %v806_v7  ;;  %v877_v13 = vmul.f32 %v1883_v4, %v1883_v4  ;;  %v878_v14 = vmul.f32 %v1886_v6, %v1886_v6  ;;  %v838_v17 = vmul.f32 0.00390625, %v809_v8 }
 0x1a5   : > { %v1893_v18 = vsub.f32 %v1752_v15, %v837_v10  ;;  %v1896_v23 = vsub.f32 %v1755_v21, %v837_v10  ;;  %v909_v11 = vadd.f32 %v878_v14, %v877_v13  ;;  %v1903_v32 = vsub.f32 %v1766_v37, %v838_v17 }
 0x1a6   : > { %v785_v24 = vpop.xlane.xlu0 %784  ;;  %v788_v12 = vpop.xlane.xlu1 %787  ;;  %v1906_v15 = vsub.f32 %v1764_v34, %v838_v17 }
 0x1a7   : > { %v830_v25 = vmul.f32 0.00390625, %v785_v24  ;;  %910 = vadd.xlane.f32.xlu0 %v909_v11  ;;  %v893_v29 = vmul.f32 %v1893_v18, %v1893_v18  ;;  %v894_v31 = vmul.f32 %v1896_v23, %v1896_v23  ;;  %v831_v33 = vmul.f32 0.00390625, %v788_v12 }
 0x1a8   : > { %v896_v53 = vmul.f32 %v1906_v15, %v1906_v15 }
 0x1a9   : > { %v1909_v21 = vsub.f32 %v1781_v51, %v830_v25  ;;  %v1912_v41 = vsub.f32 %v1768_v38, %v830_v25  ;;  %v933_v44 = vadd.f32 %v894_v31, %v893_v29  ;;  %v1915_v45 = vsub.f32 %v1775_v43, %v831_v33 }
 0x1aa   : > { %v1918_v46 = vsub.f32 %v1783_v54, %v831_v33  ;;  %v812_v47 = vpop.xlane.xlu0 %811  ;;  %v791_v37 = vpop.xlane.xlu1 %790  ;;  %v895_v54 = vmul.f32 %v1903_v32, %v1903_v32 }
 0x1ab   : > { %v839_v48 = vmul.f32 0.00390625, %v812_v47  ;;  %934 = vadd.xlane.f32.xlu0 %v933_v44  ;;  %v879_v34 = vmul.f32 %v1909_v21, %v1909_v21  ;;  %v880_v51 = vmul.f32 %v1912_v41, %v1912_v41  ;;  %v832_v49 = vmul.f32 0.00390625, %v791_v37 }
 0x1ac   : > { %v881_v38 = vmul.f32 %v1915_v45, %v1915_v45  ;;  %v882_v43 = vmul.f32 %v1918_v46, %v1918_v46  ;;  %v936_v14 = vadd.f32 %v896_v53, %v895_v54 }
 0x1ad   : > { %v1931_v58 = vsub.f32 %v1785_v55, %v839_v48  ;;  %v1934_v59 = vsub.f32 %v1787_v57, %v839_v48  ;;  %v912_v62 = vadd.f32 %v880_v51, %v879_v34  ;;  %v1939_v0 = vsub.f32 %v1803_v16, %v832_v49 }
 0x1ae   : > { %v1942_v2 = vsub.f32 %v1798_v9, %v832_v49  ;;  %v915_v3 = vadd.f32 %v882_v43, %v881_v38  ;;  %v815_v7 = vpop.xlane.xlu1 %814  ;;  %v794_v8 = vpop.xlane.xlu0 %793 }
 0x1af   : > { %913 = vadd.xlane.f32.xlu1 %v912_v62  ;;  %v897_v55 = vmul.f32 %v1931_v58, %v1931_v58  ;;  %v898_v57 = vmul.f32 %v1934_v59, %v1934_v59  ;;  %v840_v10 = vmul.f32 0.00390625, %v815_v7  ;;  %v833_v13 = vmul.f32 0.00390625, %v794_v8 }
 0x1b0   : > { %916 = vadd.xlane.f32.xlu0 %v915_v3  ;;  %v883_v16 = vmul.f32 %v1939_v0, %v1939_v0  ;;  %v884_v9 = vmul.f32 %v1942_v2, %v1942_v2 }
 0x1b1   : > { %v939_v17 = vadd.f32 %v898_v57, %v897_v55  ;;  %v1953_v11 = vsub.f32 %v1809_v26, %v840_v10  ;;  %v1956_v24 = vsub.f32 %v1813_v28, %v840_v10  ;;  %v1959_v12 = vsub.f32 %v1811_v27, %v833_v13 }
 0x1b2   : > { %v1962_v25 = vsub.f32 %v1819_v35, %v833_v13  ;;  %v797_v29 = vpop.xlane.xlu1 %796  ;;  %v818_v31 = vpop.xlane.xlu0 %817  ;;  %v918_v28 = vadd.f32 %v884_v9, %v883_v16 }
 0x1b3   : > { %937 = vadd.xlane.f32.xlu1 %v936_v14  ;;  %v834_v33 = vmul.f32 0.00390625, %v797_v29  ;;  %v841_v44 = vmul.f32 0.00390625, %v818_v31  ;;  %v885_v47 = vmul.f32 %v1959_v12, %v1959_v12  ;;  %v899_v27 = vmul.f32 %v1953_v11, %v1953_v11 }
 0x1b4   : > { %940 = vadd.xlane.f32.xlu0 %v939_v17  ;;  %v886_v26 = vmul.f32 %v1962_v25, %v1962_v25  ;;  %v900_v35 = vmul.f32 %v1956_v24, %v1956_v24 }
 0x1b5   : > { %v1973_v37 = vsub.f32 %v1837_v5, %v834_v33  ;;  %v1976_v48 = vsub.f32 %v1834_v1, %v834_v33  ;;  %v1979_v34 = vsub.f32 %v1821_v39, %v841_v44  ;;  %v1982_v51 = vsub.f32 %v1824_v42, %v841_v44 }
 0x1b6   : > { %v821_v49 = vpop.xlane.xlu1 %820  ;;  %v800_v38 = vpop.xlane.xlu0 %799  ;;  %v921_v43 = vadd.f32 %v886_v26, %v885_v47  ;;  %v942_v1 = vadd.f32 %v900_v35, %v899_v27 }
 0x1b7   : > { %919 = vadd.xlane.f32.xlu1 %v918_v28  ;;  %v842_v54 = vmul.f32 0.00390625, %v821_v49  ;;  %v835_v62 = vmul.f32 0.00390625, %v800_v38  ;;  %v901_v53 = vmul.f32 %v1979_v34, %v1979_v34  ;;  %v902_v5 = vmul.f32 %v1982_v51, %v1982_v51 }
 0x1b8   : > { %922 = vadd.xlane.f32.xlu0 %v921_v43  ;;  %v887_v39 = vmul.f32 %v1973_v37, %v1973_v37  ;;  %v888_v42 = vmul.f32 %v1976_v48, %v1976_v48 }
 0x1b9   : > { %v1993_v3 = vsub.f32 %v1845_v19, %v842_v54  ;;  %v1996_v7 = vsub.f32 %v1849_v22, %v842_v54  ;;  %v1999_v8 = vsub.f32 %v1847_v20, %v835_v62  ;;  %v2002_v55 = vsub.f32 %v1854_v30, %v835_v62 }
 0x1ba   : > { %v803_v57 = vpop.xlane.xlu1 %802  ;;  %v824_v10 = vpop.xlane.xlu0 %823  ;;  %v945_v13 = vadd.f32 %v902_v5, %v901_v53  ;;  %v924_v22 = vadd.f32 %v888_v42, %v887_v39 }
 0x1bb   : > { %943 = vadd.xlane.f32.xlu1 %v942_v1  ;;  %v836_v14 = vmul.f32 0.00390625, %v803_v57  ;;  %v843_v17 = vmul.f32 0.00390625, %v824_v10  ;;  %v889_v16 = vmul.f32 %v1999_v8, %v1999_v8  ;;  %v890_v19 = vmul.f32 %v2002_v55, %v2002_v55 }
 0x1bc   : > { %946 = vadd.xlane.f32.xlu0 %v945_v13  ;;  %v903_v20 = vmul.f32 %v1993_v3, %v1993_v3  ;;  %v904_v30 = vmul.f32 %v1996_v7, %v1996_v7 }
 0x1bd   : > { %v2013_v9 = vsub.f32 %v1868_v60, %v836_v14  ;;  %v2016_v29 = vsub.f32 %v1870_v61, %v836_v14  ;;  %v2019_v31 = vsub.f32 %v1857_v36, %v843_v17  ;;  %v2022_v33 = vsub.f32 %v1859_v40, %v843_v17 }
 0x1be   : > { %v827_v44 = vpop.xlane.xlu1 %826  ;;  %v927_v47 = vadd.f32 %v890_v19, %v889_v16  ;;  %v948_v27 = vadd.f32 %v904_v30, %v903_v20  ;;  %v714_v20 = vld [vmem:[%s2185_s4] sm:$0x3] }
 0x1bf   : > { %925 = vadd.xlane.f32.xlu1 %v924_v22  ;;  %v844_v26 = vmul.f32 0.00390625, %v827_v44  ;;  %v905_v28 = vmul.f32 %v2019_v31, %v2019_v31  ;;  %v906_v60 = vmul.f32 %v2022_v33, %v2022_v33  ;;  %v891_v61 = vmul.f32 %v2013_v9, %v2013_v9  ;;  %v715_v44 = vld [vmem:[%s2186_s5] sm:$0x3] }
 0x1c0   : > { %928 = vadd.xlane.f32.xlu0 %v927_v47  ;;  %v892_v36 = vmul.f32 %v2016_v29, %v2016_v29 }
 0x1c1   : > { %v2033_v40 = vsub.f32 %v1876_v63, %v844_v26  ;;  %v2036_v35 = vsub.f32 %v1878_v56, %v844_v26  ;;  %v951_v49 = vadd.f32 %v906_v60, %v905_v28  ;;  %v2049_v60 = vrot.slane %v714_v20, %v1719_v50 }
 0x1c2   : > { %v930_v38 = vadd.f32 %v892_v36, %v891_v61 }
 0x1c3   : > { %949 = vadd.xlane.f32.xlu1 %v948_v27  ;;  %v907_v43 = vmul.f32 %v2033_v40, %v2033_v40  ;;  %v908_v54 = vmul.f32 %v2036_v35, %v2036_v35  ;;  %v2052_v27 = vrot.slane %v714_v20, %v1730_v52 }
 0x1c4   : > { %952 = vadd.xlane.f32.xlu0 %v951_v49  ;;  %v2055_v49 = vrot.slane %v715_v44, %v1719_v50 }
 0x1c5   : > { %v954_v62 = vadd.f32 %v908_v54, %v907_v43 }
 0x1c7   : > { %931 = vadd.xlane.f32.xlu1 %v930_v38  ;;  %v2058_v38 = vrot.slane %v715_v44, %v1730_v52 }
 0x1cb   : > { %955 = vadd.xlane.f32.xlu1 %v954_v62 }
 0x230   : > { %v911_v53 = vpop.xlane.xlu0 %910 }
 0x231   : > { %v957_v5 = vmul.f32 0.00390625, %v911_v53 }
 0x233   : > { %v973_v63 = vadd.f32 1e-12, %v957_v5 }
 0x234   : > { %v935_v1 = vpop.xlane.xlu0 %934 }
 0x235   : > { %1516 = vrsqrt.f32 %v973_v63  ;;  %v965_v56 = vmul.f32 0.00390625, %v935_v1 }
 0x237   : > { %v981_v39 = vadd.f32 1e-12, %v965_v56 }
 0x238   : > { %v914_v42 = vpop.xlane.xlu1 %913 }
 0x239   : > { %1518 = vrsqrt.f32 %v981_v39  ;;  %v958_v57 = vmul.f32 0.00390625, %v914_v42  ;;  %v917_v10 = vpop.xlane.xlu0 %916 }
 0x23a   : > { %v959_v13 = vmul.f32 0.00390625, %v917_v10 }
 0x23b   : > { %v974_v14 = vadd.f32 1e-12, %v958_v57 }
 0x23c   : > { %v975_v17 = vadd.f32 1e-12, %v959_v13  ;;  %v938_v16 = vpop.xlane.xlu1 %937 }
 0x23d   : > { %1520 = vrsqrt.f32 %v974_v14  ;;  %v966_v19 = vmul.f32 0.00390625, %v938_v16  ;;  %v941_v22 = vpop.xlane.xlu0 %940 }
 0x23e   : > { %1522 = vrsqrt.f32 %v975_v17  ;;  %v967_v30 = vmul.f32 0.00390625, %v941_v22 }
 0x23f   : > { %v982_v47 = vadd.f32 1e-12, %v966_v19 }
 0x240   : > { %v983_v26 = vadd.f32 1e-12, %v967_v30  ;;  %v920_v28 = vpop.xlane.xlu1 %919 }
 0x241   : > { %1524 = vrsqrt.f32 %v982_v47  ;;  %v960_v61 = vmul.f32 0.00390625, %v920_v28  ;;  %v923_v43 = vpop.xlane.xlu0 %922 }
 0x242   : > { %v1517_v36 = vpop.eup %1516  ;;  %1526 = vrsqrt.f32 %v983_v26  ;;  %v961_v5 = vmul.f32 0.00390625, %v923_v43 }
 0x243   : > { %v1005_v54 = vmul.f32 %v1517_v36, %v1883_v4  ;;  %v1006_v62 = vmul.f32 %v1517_v36, %v1886_v6  ;;  %v976_v53 = vadd.f32 1e-12, %v960_v61 }
 0x244   : > { %v944_v63 = vpop.xlane.xlu1 %943  ;;  %v977_v50 = vadd.f32 1e-12, %v961_v5 }
 0x245   : > { %v1048_v1 = vmul.f32 %v2049_v60, %v1005_v54  ;;  %v1049_v56 = vmul.f32 %v2052_v27, %v1006_v62  ;;  %1528 = vrsqrt.f32 %v976_v53  ;;  %v968_v42 = vmul.f32 0.00390625, %v944_v63  ;;  %v947_v52 = vpop.xlane.xlu0 %946 }
 0x246   : > { %v1519_v39 = vpop.eup %1518  ;;  %1530 = vrsqrt.f32 %v977_v50  ;;  %v969_v14 = vmul.f32 0.00390625, %v947_v52 }
 0x247   : > { %v1091_v57 = vadd.f32 %v2055_v49, %v1048_v1  ;;  %v1092_v10 = vadd.f32 %v2058_v38, %v1049_v56  ;;  %v1021_v4 = vmul.f32 %v1519_v39, %v1893_v18  ;;  %v1022_v6 = vmul.f32 %v1519_v39, %v1896_v23 }
 0x248   : > { %v984_v13 = vadd.f32 1e-12, %v968_v42  ;;  %v926_v17 = vpop.xlane.xlu1 %925  ;;  %v985_v18 = vadd.f32 1e-12, %v969_v14 }
 0x249   : > { %v1388_v16 = vpack.c.bf16 %v1092_v10, %v1091_v57  ;;  %v1064_v19 = vmul.f32 %v2049_v60, %v1021_v4  ;;  %v1065_v22 = vmul.f32 %v2052_v27, %v1022_v6  ;;  %v962_v20 = vmul.f32 0.00390625, %v926_v17  ;;  %v929_v23 = vpop.xlane.xlu0 %928 }
 0x24a   : > { %v1521_v30 = vpop.eup %1520  ;;  %1532 = vrsqrt.f32 %v984_v13  ;;  %v963_v1 = vmul.f32 0.00390625, %v929_v23 }
 0x24b   : > { %v1523_v44 = vpop.eup %1522  ;;  %1219 = vst [vmem:[%s2072_s13] sm:$0xff] %v1388_v16  ;;  %v1107_v47 = vadd.f32 %v2055_v49, %v1064_v19  ;;  %v1108_v26 = vadd.f32 %v2058_v38, %v1065_v22  ;;  %v1007_v28 = vmul.f32 %v1521_v30, %v1909_v21  ;;  %v1008_v61 = vmul.f32 %v1521_v30, %v1912_v41 }
 0x24c   : > { %v1009_v36 = vmul.f32 %v1523_v44, %v1915_v45  ;;  %v1010_v43 = vmul.f32 %v1523_v44, %v1918_v46  ;;  %1534 = vrsqrt.f32 %v985_v18  ;;  %v978_v54 = vadd.f32 1e-12, %v962_v20  ;;  %v950_v62 = vpop.xlane.xlu1 %949 }
 0x24d   : > { %v1396_v53 = vpack.c.bf16 %v1108_v26, %v1107_v47  ;;  %v1050_v5 = vmul.f32 %v2049_v60, %v1007_v28  ;;  %v1051_v63 = vmul.f32 %v2052_v27, %v1008_v61  ;;  %v970_v41 = vmul.f32 0.00390625, %v950_v62 }
 0x24e   : > { %v1525_v56 = vpop.eup %1524  ;;  %v1052_v50 = vmul.f32 %v2049_v60, %v1009_v36  ;;  %v1053_v21 = vmul.f32 %v2052_v27, %v1010_v43  ;;  %1536 = vrsqrt.f32 %v978_v54  ;;  %v979_v19 = vadd.f32 1e-12, %v963_v1 }
 0x24f   : > { %v1527_v39 = vpop.eup %1526  ;;  %1227 = vst [vmem:[%s2072_s13 + $0x40] sm:$0xff] %v1396_v53  ;;  %v1093_v45 = vadd.f32 %v2055_v49, %v1050_v5  ;;  %v1094_v46 = vadd.f32 %v2058_v38, %v1051_v63  ;;  %v1023_v42 = vmul.f32 %v1525_v56, %v1903_v32  ;;  %v1024_v52 = vmul.f32 %v1525_v56, %v1906_v15  ;;  %v953_v32 = vpop.xlane.xlu0 %952 }
 0x250   : > { %v1095_v57 = vadd.f32 %v2055_v49, %v1052_v50  ;;  %v1096_v10 = vadd.f32 %v2058_v38, %v1053_v21  ;;  %v1025_v4 = vmul.f32 %v1527_v39, %v1931_v58  ;;  %v1026_v6 = vmul.f32 %v1527_v39, %v1934_v59  ;;  %v932_v13 = vpop.xlane.xlu1 %931 }
 0x251   : > { %v1389_v14 = vpack.c.bf16 %v1094_v46, %v1093_v45  ;;  %v1066_v17 = vmul.f32 %v2049_v60, %v1023_v42  ;;  %v1067_v16 = vmul.f32 %v2052_v27, %v1024_v52  ;;  %v986_v18 = vadd.f32 1e-12, %v970_v41 }
 0x252   : > { %v1529_v22 = vpop.eup %1528  ;;  %v1390_v15 = vpack.c.bf16 %v1096_v10, %v1095_v57  ;;  %v1068_v20 = vmul.f32 %v2049_v60, %v1025_v4  ;;  %v1069_v30 = vmul.f32 %v2052_v27, %v1026_v6  ;;  %1538 = vrsqrt.f32 %v979_v19 }
 0x253   : > { %1220 = vst [vmem:[%s2072_s13 + $0x8] sm:$0xff] %v1389_v14  ;;  %v1109_v58 = vadd.f32 %v2055_v49, %v1066_v17  ;;  %v1110_v59 = vadd.f32 %v2058_v38, %v1067_v16  ;;  %v1011_v23 = vmul.f32 %v1529_v22, %v1939_v0  ;;  %v1012_v44 = vmul.f32 %v1529_v22, %v1942_v2  ;;  %v1531_v36 = vpop.eup %1530 }
 0x254   : > { %1221 = vst [vmem:[%s2072_s13 + $0x10] sm:$0xff] %v1390_v15  ;;  %v1111_v47 = vadd.f32 %v2055_v49, %v1068_v20  ;;  %v1112_v26 = vadd.f32 %v2058_v38, %v1069_v30  ;;  %v971_v28 = vmul.f32 0.00390625, %v953_v32  ;;  %v956_v61 = vpop.xlane.xlu1 %955  ;;  %1540 = vrsqrt.f32 %v986_v18 }
 0x255   : > { %v1397_v43 = vpack.c.bf16 %v1110_v59, %v1109_v58  ;;  %v1054_v54 = vmul.f32 %v2049_v60, %v1011_v23  ;;  %v1055_v62 = vmul.f32 %v2052_v27, %v1012_v44  ;;  %v1013_v2 = vmul.f32 %v1531_v36, %v1959_v12 }
 0x256   : > { %v1398_v0 = vpack.c.bf16 %v1112_v26, %v1111_v47  ;;  %v1014_v53 = vmul.f32 %v1531_v36, %v1962_v25  ;;  %v987_v5 = vadd.f32 1e-12, %v971_v28  ;;  %v964_v50 = vmul.f32 0.00390625, %v932_v13 }
 0x257   : > { %v1533_v63 = vpop.eup %1532  ;;  %1228 = vst [vmem:[%s2072_s13 + $0x48] sm:$0xff] %v1397_v43  ;;  %v1097_v1 = vadd.f32 %v2055_v49, %v1054_v54  ;;  %v1098_v56 = vadd.f32 %v2058_v38, %v1055_v62  ;;  %v972_v21 = vmul.f32 0.00390625, %v956_v61  ;;  %v1056_v41 = vmul.f32 %v2049_v60, %v1013_v2 }
 0x258   : > { %1229 = vst [vmem:[%s2072_s13 + $0x50] sm:$0xff] %v1398_v0  ;;  %v1057_v39 = vmul.f32 %v2052_v27, %v1014_v53  ;;  %v1027_v45 = vmul.f32 %v1533_v63, %v1953_v11  ;;  %v1028_v12 = vmul.f32 %v1533_v63, %v1956_v24  ;;  %1542 = vrsqrt.f32 %v987_v5 }
 0x259   : > { %v1535_v25 = vpop.eup %1534  ;;  %v1391_v46 = vpack.c.bf16 %v1098_v56, %v1097_v1  ;;  %v980_v42 = vadd.f32 1e-12, %v964_v50  ;;  %v988_v52 = vadd.f32 1e-12, %v972_v21  ;;  %v1099_v57 = vadd.f32 %v2055_v49, %v1056_v41 }
 0x25a   : > { %v1100_v10 = vadd.f32 %v2058_v38, %v1057_v39  ;;  %v1070_v4 = vmul.f32 %v2049_v60, %v1027_v45  ;;  %v1071_v6 = vmul.f32 %v2052_v27, %v1028_v12  ;;  %v1029_v11 = vmul.f32 %v1535_v25, %v1979_v34 }
 0x25b   : > { %v1537_v13 = vpop.eup %1536  ;;  %1222 = vst [vmem:[%s2072_s13 + $0x18] sm:$0xff] %v1391_v46  ;;  %v1030_v24 = vmul.f32 %v1535_v25, %v1982_v51  ;;  %1544 = vrsqrt.f32 %v980_v42 }
 0x25c   : > { %v1392_v14 = vpack.c.bf16 %v1100_v10, %v1099_v57  ;;  %v1113_v17 = vadd.f32 %v2055_v49, %v1070_v4  ;;  %v1114_v16 = vadd.f32 %v2058_v38, %v1071_v6  ;;  %v1015_v19 = vmul.f32 %v1537_v13, %v1973_v37 }
 0x25d   : > { %v1072_v32 = vmul.f32 %v2049_v60, %v1029_v11  ;;  %v1073_v22 = vmul.f32 %v2052_v27, %v1030_v24  ;;  %v1016_v15 = vmul.f32 %v1537_v13, %v1976_v48  ;;  %1546 = vrsqrt.f32 %v988_v52 }
 0x25e   : > { %1223 = vst [vmem:[%s2072_s13 + $0x20] sm:$0xff] %v1392_v14  ;;  %v1399_v34 = vpack.c.bf16 %v1114_v16, %v1113_v17  ;;  %v1058_v51 = vmul.f32 %v2049_v60, %v1015_v19 }
 0x25f   : > { %v1115_v20 = vadd.f32 %v2055_v49, %v1072_v32  ;;  %v1116_v30 = vadd.f32 %v2058_v38, %v1073_v22  ;;  %v1059_v18 = vmul.f32 %v2052_v27, %v1016_v15  ;;  %v1539_v58 = vpop.eup %1538 }
 0x260   : > { %1230 = vst [vmem:[%s2072_s13 + $0x58] sm:$0xff] %v1399_v34  ;;  %v1101_v37 = vadd.f32 %v2055_v49, %v1058_v51  ;;  %v1017_v44 = vmul.f32 %v1539_v58, %v1999_v8  ;;  %v1018_v47 = vmul.f32 %v1539_v58, %v2002_v55 }
 0x261   : > { %v1400_v59 = vpack.c.bf16 %v1116_v30, %v1115_v20  ;;  %v1102_v48 = vadd.f32 %v2058_v38, %v1059_v18  ;;  %v1541_v23 = vpop.eup %1540 }
 0x262   : > { %v1031_v28 = vmul.f32 %v1541_v23, %v1993_v3  ;;  %v1032_v61 = vmul.f32 %v1541_v23, %v1996_v7  ;;  %v1060_v36 = vmul.f32 %v2049_v60, %v1017_v44  ;;  %v1061_v43 = vmul.f32 %v2052_v27, %v1018_v47 }
 0x263   : > { %1231 = vst [vmem:[%s2072_s13 + $0x60] sm:$0xff] %v1400_v59  ;;  %v1393_v26 = vpack.c.bf16 %v1102_v48, %v1101_v37 }
 0x264   : > { %v1074_v54 = vmul.f32 %v2049_v60, %v1031_v28  ;;  %v1075_v62 = vmul.f32 %v2052_v27, %v1032_v61  ;;  %v1103_v8 = vadd.f32 %v2055_v49, %v1060_v36  ;;  %v1104_v55 = vadd.f32 %v2058_v38, %v1061_v43 }
 0x265   : > { %1224 = vst [vmem:[%s2072_s13 + $0x28] sm:$0xff] %v1393_v26  ;;  %v1543_v0 = vpop.eup %1542 }
 0x266   : > { %v1117_v3 = vadd.f32 %v2055_v49, %v1074_v54  ;;  %v1118_v7 = vadd.f32 %v2058_v38, %v1075_v62  ;;  %v1033_v2 = vmul.f32 %v1543_v0, %v2019_v31  ;;  %v1034_v53 = vmul.f32 %v1543_v0, %v2022_v33 }
 0x267   : > { %v1394_v63 = vpack.c.bf16 %v1104_v55, %v1103_v8 }
 0x268   : > { %v1545_v5 = vpop.eup %1544  ;;  %v1401_v1 = vpack.c.bf16 %v1118_v7, %v1117_v3  ;;  %v1076_v56 = vmul.f32 %v2049_v60, %v1033_v2  ;;  %v1077_v50 = vmul.f32 %v2052_v27, %v1034_v53 }
 0x269   : > { %v1019_v21 = vmul.f32 %v1545_v5, %v2013_v9  ;;  %1225 = vst [vmem:[%s2072_s13 + $0x30] sm:$0xff] %v1394_v63  ;;  %v1020_v39 = vmul.f32 %v1545_v5, %v2016_v29 }
 0x26a   : > { %v1547_v41 = vpop.eup %1546  ;;  %1232 = vst [vmem:[%s2072_s13 + $0x68] sm:$0xff] %v1401_v1  ;;  %v1119_v31 = vadd.f32 %v2055_v49, %v1076_v56  ;;  %v1120_v33 = vadd.f32 %v2058_v38, %v1077_v50 }
 0x26b   : > { %v1062_v45 = vmul.f32 %v2049_v60, %v1019_v21  ;;  %v1035_v12 = vmul.f32 %v1547_v41, %v2033_v40  ;;  %v1063_v25 = vmul.f32 %v2052_v27, %v1020_v39  ;;  %v1036_v9 = vmul.f32 %v1547_v41, %v2036_v35 }
 0x26c   : > { %v1402_v46 = vpack.c.bf16 %v1120_v33, %v1119_v31 }
 0x26d   : > { %v1105_v42 = vadd.f32 %v2055_v49, %v1062_v45  ;;  %v1078_v29 = vmul.f32 %v2049_v60, %v1035_v12  ;;  %v1106_v52 = vadd.f32 %v2058_v38, %v1063_v25  ;;  %v1079_v57 = vmul.f32 %v2052_v27, %v1036_v9 }
 0x26e   : > { %1233 = vst [vmem:[%s2072_s13 + $0x70] sm:$0xff] %v1402_v46 }
 0x26f   : > { %v1121_v10 = vadd.f32 %v2055_v49, %v1078_v29  ;;  %v1395_v4 = vpack.c.bf16 %v1106_v52, %v1105_v42  ;;  %v1122_v6 = vadd.f32 %v2058_v38, %v1079_v57 }
 0x271   : > { %1226 = vst [vmem:[%s2072_s13 + $0x38] sm:$0xff] %v1395_v4  ;;  %v1403_v40 = vpack.c.bf16 %v1122_v6, %v1121_v10 }
 0x273   : > { %1234 = vst [vmem:[%s2072_s13 + $0x78] sm:$0xff] %v1403_v40 }
 0x274 PF: > { %s16_s21 = sadd.s32 1, %s1554_s21  }
 0x275   : > { %p13_p4 = scmp.ge.s32.totalorder %s16_s21, 4  }
 0x277   :  { %15 = sbr.rel (!%p13_p4) target bundleno = 1 (0x1), region = 77 }

// kernel: classifier_forward.16
= control target key start
LH: loop header
LB: loop body
LE: loop exit
PB: predicated region body
PF: predicated region fallthrough
CT: control target
= control target key end

     0   :  { %s2359_s12 = smov 0   ;;  %s2361_s13 = smov 0   ;;  %s3166_s0 = inlined_call_operand.vmem [shape: bf16[256,256], index: 0, kind: input, shape index: {}]   ;;  %s3167_s1 = inlined_call_operand.vmem [shape: bf16[256,512], index: 1, kind: input, shape index: {}]   ;;  %s3168_s2 = inlined_call_operand.vmem [shape: f32[1,512], index: 2, kind: input, shape index: {}]   ;;  %s3169_s3 = inlined_call_operand.vmem [shape: bf16[256,512], index: 3, kind: output, shape index: {}]  }
   0x1   :  { %s2363_s14 = smov 0  }
   0x2 LB: > { %s25_s15 = sadd.s32 1, %s2333_s13  ;;  %p1888_p0 = scmp.ge.s32.totalorder %s2337_s14, 1  ;;  %s2337_s14 = sphi %s2363_s14, %s13_s14   ;;  %s2333_s13 = sphi %s2361_s13, %s3171_s13   ;;  %s2329_s12 = sphi %s2359_s12, %s3170_s12  }
   0x3   : > { %p27_p1 = scmp.ge.s32.totalorder %s25_s15, 2  ;;  %p174_p2 = scmp.lt.s32.totalorder %s2337_s14, 3 }
   0x5   : > { %s3173_s15 = smov (%p27_p1, %s25_s15), 0  ;;  %p175_p3 = pnand %p1888_p0, %p174_p2 }
   0x6   : > { %s1889_s30 = sshll.u32 (!%p175_p3), %s2329_s12, 4 }
   0x7   : > { %178 = sbr.rel (%p175_p3) target bundleno = 460 (0x1cc), region = 32  ;;  %p214_p4 = scmp.lt.s32.totalorder (!%p175_p3), %s1889_s30, 31 }
   0xc   : > { %v2067_v0 = vld [vmem:[%s3167_s1 + $0xe4] ss:$16 sps:$4 sm:$0xff]   ;;  %v2069_v1 = vld [vmem:[%s3167_s1 + $0xec] ss:$16 sps:$4 sm:$0xff]   ;;  %v2071_v2 = vld [vmem:[%s3167_s1 + $0xe0] ss:$16 sps:$4 sm:$0xff]  }
   0xd   : > { %745 = vmatprep.subr.bf16.mxu0 %v2067_v0  ;;  %v2072_v3 = vld [vmem:[%s3167_s1 + $0xe8] ss:$16 sps:$4 sm:$0xff]   ;;  %858 = vmatprep.subr.bf16.mxu1 %v2069_v1  ;;  %v2073_v4 = vld [vmem:[%s3167_s1 + $0xc4] ss:$16 sps:$4 sm:$0xff]   ;;  %v2075_v5 = vld [vmem:[%s3167_s1 + $0xcc] ss:$16 sps:$4 sm:$0xff]  }
   0xe   : > { %746 = vmatpush1.bf16.msra.mxu0 %v2071_v2  ;;  %859 = vmatpush1.bf16.msra.mxu1 %v2072_v3  ;;  %v2077_v6 = vld [vmem:[%s3167_s1 + $0xc0] ss:$16 sps:$4 sm:$0xff]   ;;  %v2078_v7 = vld [vmem:[%s3167_s1 + $0xc8] ss:$16 sps:$4 sm:$0xff]   ;;  %v2079_v8 = vld [vmem:[%s3167_s1 + $0xa4] ss:$16 sps:$4 sm:$0xff]  }
   0xf   : > { %747 = vmatprep.subr.bf16.mxu0 %v2073_v4  ;;  %860 = vmatprep.subr.bf16.mxu1 %v2075_v5  ;;  %v2081_v9 = vld [vmem:[%s3167_s1 + $0xac] ss:$16 sps:$4 sm:$0xff]   ;;  %v2083_v10 = vld [vmem:[%s3167_s1 + $0xa0] ss:$16 sps:$4 sm:$0xff]   ;;  %v2084_v11 = vld [vmem:[%s3167_s1 + $0xa8] ss:$16 sps:$4 sm:$0xff]  }
  0x10   : > { %v2085_v12 = vld [vmem:[%s3167_s1 + $0x84] ss:$16 sps:$4 sm:$0xff]   ;;  %v2087_v13 = vld [vmem:[%s3167_s1 + $0x8c] ss:$16 sps:$4 sm:$0xff]   ;;  %v2089_v14 = vld [vmem:[%s3167_s1 + $0x80] ss:$16 sps:$4 sm:$0xff]  }
  0x11   : > { %v2090_v15 = vld [vmem:[%s3167_s1 + $0x88] ss:$16 sps:$4 sm:$0xff]   ;;  %v2091_v16 = vld [vmem:[%s3167_s1 + $0x64] ss:$16 sps:$4 sm:$0xff]   ;;  %v2093_v17 = vld [vmem:[%s3167_s1 + $0x6c] ss:$16 sps:$4 sm:$0xff]  }
  0x12   : > { %748 = vmatpush1.bf16.msra.mxu0 %v2077_v6  ;;  %861 = vmatpush1.bf16.msra.mxu1 %v2078_v7  ;;  %v2095_v18 = vld [vmem:[%s3167_s1 + $0x60] ss:$16 sps:$4 sm:$0xff]   ;;  %v2096_v19 = vld [vmem:[%s3167_s1 + $0x68] ss:$16 sps:$4 sm:$0xff]   ;;  %v2097_v20 = vld [vmem:[%s3167_s1 + $0x44] ss:$16 sps:$4 sm:$0xff]  }
  0x13   : > { %749 = vmatprep.subr.bf16.mxu0 %v2079_v8  ;;  %862 = vmatprep.subr.bf16.mxu1 %v2081_v9  ;;  %v2099_v21 = vld [vmem:[%s3167_s1 + $0x4c] ss:$16 sps:$4 sm:$0xff]   ;;  %v2101_v22 = vld [vmem:[%s3167_s1 + $0x40] ss:$16 sps:$4 sm:$0xff]   ;;  %v2102_v23 = vld [vmem:[%s3167_s1 + $0x48] ss:$16 sps:$4 sm:$0xff]  }
  0x14   : > { %v2103_v24 = vld [vmem:[%s3167_s1 + $0x24] ss:$16 sps:$4 sm:$0xff]   ;;  %v2105_v25 = vld [vmem:[%s3167_s1 + $0x2c] ss:$16 sps:$4 sm:$0xff]   ;;  %v2107_v26 = vld [vmem:[%s3167_s1 + $0x20] ss:$16 sps:$4 sm:$0xff]  }
  0x15   : > { %v2108_v27 = vld [vmem:[%s3167_s1 + $0x28] ss:$16 sps:$4 sm:$0xff]   ;;  %v2109_v28 = vld [vmem:[%s3167_s1 + $0x4] ss:$16 sps:$4 sm:$0xff]   ;;  %v2111_v29 = vld [vmem:[%s3167_s1 + $0xc] ss:$16 sps:$4 sm:$0xff]  }
  0x16   : > { %750 = vmatpush1.bf16.msra.mxu0 %v2083_v10  ;;  %863 = vmatpush1.bf16.msra.mxu1 %v2084_v11  ;;  %v2113_v30 = vld [vmem:[%s3167_s1] ss:$16 sps:$4 sm:$0xff]   ;;  %v2114_v31 = vld [vmem:[%s3167_s1 + $0x8] ss:$16 sps:$4 sm:$0xff]   ;;  %v2115_v32 = vld [vmem:[%s3167_s1 + $0x1e4] ss:$16 sps:$4 sm:$0xff]  }
  0x17   : > { %751 = vmatprep.subr.bf16.mxu0 %v2085_v12  ;;  %864 = vmatprep.subr.bf16.mxu1 %v2087_v13  ;;  %v2117_v33 = vld [vmem:[%s3167_s1 + $0x1ec] ss:$16 sps:$4 sm:$0xff]   ;;  %v2119_v34 = vld [vmem:[%s3167_s1 + $0x1e0] ss:$16 sps:$4 sm:$0xff]   ;;  %v2120_v35 = vld [vmem:[%s3167_s1 + $0x1e8] ss:$16 sps:$4 sm:$0xff]  }
  0x18   : > { %v2121_v36 = vld [vmem:[%s3167_s1 + $0x1c4] ss:$16 sps:$4 sm:$0xff]   ;;  %v2123_v37 = vld [vmem:[%s3167_s1 + $0x1cc] ss:$16 sps:$4 sm:$0xff]   ;;  %s3175_s30 = smov (!%p214_p4, %s1889_s30), 31 }
  0x19   : > { %v2125_v38 = vld [vmem:[%s3167_s1 + $0x1c0] ss:$16 sps:$4 sm:$0xff]   ;;  %v2126_v39 = vld [vmem:[%s3167_s1 + $0x1c8] ss:$16 sps:$4 sm:$0xff]   ;;  %v2127_v40 = vld [vmem:[%s3167_s1 + $0x1a4] ss:$16 sps:$4 sm:$0xff]  }
  0x1a   : > { %752 = vmatpush1.bf16.msra.mxu0 %v2089_v14  ;;  %865 = vmatpush1.bf16.msra.mxu1 %v2090_v15  ;;  %v2129_v41 = vld [vmem:[%s3167_s1 + $0x1ac] ss:$16 sps:$4 sm:$0xff]   ;;  %s2009_s5 = sshll.u32 %s3175_s30, 3  ;;  %v2131_v42 = vld [vmem:[%s3167_s1 + $0x1a0] ss:$16 sps:$4 sm:$0xff]  }
  0x1b   : > { %753 = vmatprep.subr.bf16.mxu0 %v2091_v16  ;;  %866 = vmatprep.subr.bf16.mxu1 %v2093_v17  ;;  %v2132_v43 = vld [vmem:[%s3167_s1 + $0x1a8] ss:$16 sps:$4 sm:$0xff]   ;;  %v2133_v44 = vld [vmem:[%s3167_s1 + $0x184] ss:$16 sps:$4 sm:$0xff]   ;;  %s2521_s17 = scalar_lea.vmem %s3166_s0, %s2009_s5  ;;  %v2135_v45 = vld [vmem:[%s3167_s1 + $0x18c] ss:$16 sps:$4 sm:$0xff]   ;;  %v325_v16 = vlaneseq }
  0x1c   : > { %v2137_v46 = vld [vmem:[%s3167_s1 + $0x180] ss:$16 sps:$4 sm:$0xff]   ;;  %v2138_v47 = vld [vmem:[%s3167_s1 + $0x188] ss:$16 sps:$4 sm:$0xff]   ;;  %v2165_v48 = vld [vmem:[%s2521_s17 + $0x4] ss:$8 sps:$4 sm:$0xff]  }
  0x1d   : > { %v2139_v49 = vld [vmem:[%s3167_s1 + $0x164] ss:$16 sps:$4 sm:$0xff]   ;;  %v2141_v50 = vld [vmem:[%s3167_s1 + $0x16c] ss:$16 sps:$4 sm:$0xff]   ;;  %777 = vmatprep.mubr.bf16.mxu0 %v2165_v48  ;;  %890 = vmatprep.mubr.bf16.mxu1 %v2165_v48  ;;  %v2143_v51 = vld [vmem:[%s3167_s1 + $0x160] ss:$16 sps:$4 sm:$0xff]  }
  0x1e   : > { %754 = vmatpush1.bf16.msra.mxu0 %v2095_v18  ;;  %867 = vmatpush1.bf16.msra.mxu1 %v2096_v19  ;;  %v2144_v52 = vld [vmem:[%s3167_s1 + $0x168] ss:$16 sps:$4 sm:$0xff]   ;;  %v2145_v53 = vld [vmem:[%s3167_s1 + $0x144] ss:$16 sps:$4 sm:$0xff]   ;;  %v2147_v54 = vld [vmem:[%s3167_s1 + $0x14c] ss:$16 sps:$4 sm:$0xff]  }
  0x1f   : > { %755 = vmatprep.subr.bf16.mxu0 %v2097_v20  ;;  %868 = vmatprep.subr.bf16.mxu1 %v2099_v21  ;;  %v2149_v55 = vld [vmem:[%s3167_s1 + $0x140] ss:$16 sps:$4 sm:$0xff]   ;;  %v2150_v56 = vld [vmem:[%s3167_s1 + $0x148] ss:$16 sps:$4 sm:$0xff]   ;;  %v2151_v57 = vld [vmem:[%s3167_s1 + $0x124] ss:$16 sps:$4 sm:$0xff]  }
  0x20   : > { %v2153_v58 = vld [vmem:[%s3167_s1 + $0x12c] ss:$16 sps:$4 sm:$0xff]   ;;  %v2155_v59 = vld [vmem:[%s3167_s1 + $0x120] ss:$16 sps:$4 sm:$0xff]   ;;  %v2156_v60 = vld [vmem:[%s3167_s1 + $0x128] ss:$16 sps:$4 sm:$0xff]  }
  0x21   : > { %v2157_v61 = vld [vmem:[%s3167_s1 + $0x104] ss:$16 sps:$4 sm:$0xff]   ;;  %v2159_v62 = vld [vmem:[%s3167_s1 + $0x10c] ss:$16 sps:$4 sm:$0xff]   ;;  %v2161_v63 = vld [vmem:[%s3167_s1 + $0x100] ss:$16 sps:$4 sm:$0xff]  }
  0x22   : > { %756 = vmatpush1.bf16.msra.mxu0 %v2101_v22  ;;  %869 = vmatpush1.bf16.msra.mxu1 %v2102_v23  ;;  %v2162_v0 = vld [vmem:[%s3167_s1 + $0x108] ss:$16 sps:$4 sm:$0xff]   ;;  %v2166_v2 = vld [vmem:[%s2521_s17 + $0x14] ss:$8 sps:$4 sm:$0xff]   ;;  %v2169_v4 = vld [vmem:[%s2521_s17 + $0x24] ss:$8 sps:$4 sm:$0xff]  }
  0x23   : > { %757 = vmatprep.subr.bf16.mxu0 %v2103_v24  ;;  %870 = vmatprep.subr.bf16.mxu1 %v2105_v25  ;;  %v2163_v1 = vld [vmem:[%s2521_s17] ss:$8 sps:$4 sm:$0xff]   ;;  %v2168_v3 = vld [vmem:[%s2521_s17 + $0x10] ss:$8 sps:$4 sm:$0xff]   ;;  %v2172_v6 = vld [vmem:[%s2521_s17 + $0x34] ss:$8 sps:$4 sm:$0xff]  }
  0x24   : > { %v2171_v5 = vld [vmem:[%s2521_s17 + $0x20] ss:$8 sps:$4 sm:$0xff]   ;;  %v2174_v7 = vld [vmem:[%s2521_s17 + $0x30] ss:$8 sps:$4 sm:$0xff]   ;;  %v2175_v8 = vld [vmem:[%s2521_s17 + $0x44] ss:$8 sps:$4 sm:$0xff]  }
  0x25   : > { %v2177_v9 = vld [vmem:[%s2521_s17 + $0x40] ss:$8 sps:$4 sm:$0xff]   ;;  %v2178_v10 = vld [vmem:[%s2521_s17 + $0x54] ss:$8 sps:$4 sm:$0xff]   ;;  %v2180_v11 = vld [vmem:[%s2521_s17 + $0x50] ss:$8 sps:$4 sm:$0xff]  }
  0x26   : > { %758 = vmatpush1.bf16.msra.mxu0 %v2107_v26  ;;  %871 = vmatpush1.bf16.msra.mxu1 %v2108_v27  ;;  %v2181_v12 = vld [vmem:[%s2521_s17 + $0x64] ss:$8 sps:$4 sm:$0xff]   ;;  %v2183_v13 = vld [vmem:[%s2521_s17 + $0x60] ss:$8 sps:$4 sm:$0xff]   ;;  %v2184_v14 = vld [vmem:[%s2521_s17 + $0x74] ss:$8 sps:$4 sm:$0xff]  }
  0x27   : > { %759 = vmatprep.subr.bf16.mxu0 %v2109_v28  ;;  %872 = vmatprep.subr.bf16.mxu1 %v2111_v29  ;;  %v2186_v15 = vld [vmem:[%s2521_s17 + $0x70] ss:$8 sps:$4 sm:$0xff]   ;;  %v326_v17 = vshrl.u32 %v325_v16, 7  ;;  %v323_v20 = vld [vmem:[%s3168_s2] sm:$0xf]  ;;  %s2010_s17 = sshll.u32 %s3175_s30, 4 }
  0x28   : > { %s2728_s11 = scalar_lea.vmem %s3169_s3, %s2010_s17 }
  0x29   : > { %v327_v18 = vsub.s32 0, %v326_v17  ;;  %v335_v19 = vsub.s32 2, %v326_v17  ;;  %v331_v21 = vsub.s32 1, %v326_v17  ;;  %v339_v22 = vsub.s32 3, %v326_v17 }
  0x2a   : > { %760 = vmatpush1.bf16.msra.mxu0 %v2113_v30  ;;  %873 = vmatpush1.bf16.msra.mxu1 %v2114_v31 }
  0x2b   : > { %761 = vmatprep.subr.bf16.mxu0 %v2115_v32  ;;  %874 = vmatprep.subr.bf16.mxu1 %v2117_v33  ;;  %v2599_v23 = vrot.slane %v323_v20, %v327_v18  ;;  %v2601_v24 = vrot.slane %v323_v20, %v335_v19  ;;  %v2603_v25 = vrot.slane %v323_v20, %v331_v21 }
  0x2c   : > { %v2605_v26 = vrot.slane %v323_v20, %v339_v22 }
  0x2e   : > { %762 = vmatpush2.bf16.msra.mxu0 %v2119_v34  ;;  %875 = vmatpush2.bf16.msra.mxu1 %v2120_v35 }
  0x2f   : > { %763 = vmatprep.subr.bf16.mxu0 %v2121_v36  ;;  %876 = vmatprep.subr.bf16.mxu1 %v2123_v37 }
  0x32   : > { %764 = vmatpush2.bf16.msra.mxu0 %v2125_v38  ;;  %877 = vmatpush2.bf16.msra.mxu1 %v2126_v39 }
  0x33   : > { %765 = vmatprep.subr.bf16.mxu0 %v2127_v40  ;;  %878 = vmatprep.subr.bf16.mxu1 %v2129_v41 }
  0x36   : > { %766 = vmatpush2.bf16.msra.mxu0 %v2131_v42  ;;  %879 = vmatpush2.bf16.msra.mxu1 %v2132_v43 }
  0x37   : > { %767 = vmatprep.subr.bf16.mxu0 %v2133_v44  ;;  %880 = vmatprep.subr.bf16.mxu1 %v2135_v45 }
  0x3a   : > { %768 = vmatpush2.bf16.msra.mxu0 %v2137_v46  ;;  %881 = vmatpush2.bf16.msra.mxu1 %v2138_v47 }
  0x3b   : > { %769 = vmatprep.subr.bf16.mxu0 %v2139_v49  ;;  %882 = vmatprep.subr.bf16.mxu1 %v2141_v50 }
  0x3e   : > { %770 = vmatpush2.bf16.msra.mxu0 %v2143_v51  ;;  %883 = vmatpush2.bf16.msra.mxu1 %v2144_v52 }
  0x3f   : > { %771 = vmatprep.subr.bf16.mxu0 %v2145_v53  ;;  %884 = vmatprep.subr.bf16.mxu1 %v2147_v54 }
  0x42   : > { %772 = vmatpush2.bf16.msra.mxu0 %v2149_v55  ;;  %885 = vmatpush2.bf16.msra.mxu1 %v2150_v56 }
  0x43   : > { %773 = vmatprep.subr.bf16.mxu0 %v2151_v57  ;;  %886 = vmatprep.subr.bf16.mxu1 %v2153_v58 }
  0x46   : > { %774 = vmatpush2.bf16.msra.mxu0 %v2155_v59  ;;  %887 = vmatpush2.bf16.msra.mxu1 %v2156_v60 }
  0x47   : > { %775 = vmatprep.subr.bf16.mxu0 %v2157_v61  ;;  %888 = vmatprep.subr.bf16.mxu1 %v2159_v62 }
  0x4a   : > { %776 = vmatpush2.bf16.msra.mxu0 %v2161_v63  ;;  %889 = vmatpush2.bf16.msra.mxu1 %v2162_v0 }
  0x4d   : > { %778 = vmatmul.mubr.bf16.vlgmr.msra.gmra.mxu0 %v2163_v1  ;;  %891 = vmatmul.mubr.bf16.vlgmr.msra.gmra.mxu1 %v2163_v1 }
  0x4e   : > { %787 = vmatprep.mubr.bf16.mxu0 %v2166_v2  ;;  %900 = vmatprep.mubr.bf16.mxu1 %v2166_v2 }
  0x55   : > { %788 = vmatmul.mubr.bf16.gmra.mxu0 %v2168_v3  ;;  %901 = vmatmul.mubr.bf16.gmra.mxu1 %v2168_v3 }
  0x56   : > { %797 = vmatprep.mubr.bf16.mxu0 %v2169_v4  ;;  %910 = vmatprep.mubr.bf16.mxu1 %v2169_v4 }
  0x5d   : > { %798 = vmatmul.mubr.bf16.gmra.mxu0 %v2171_v5  ;;  %911 = vmatmul.mubr.bf16.gmra.mxu1 %v2171_v5 }
  0x5e   : > { %807 = vmatprep.mubr.bf16.mxu0 %v2172_v6  ;;  %920 = vmatprep.mubr.bf16.mxu1 %v2172_v6 }
  0x65   : > { %808 = vmatmul.mubr.bf16.gmra.mxu0 %v2174_v7  ;;  %921 = vmatmul.mubr.bf16.gmra.mxu1 %v2174_v7 }
  0x66   : > { %817 = vmatprep.mubr.bf16.mxu0 %v2175_v8  ;;  %930 = vmatprep.mubr.bf16.mxu1 %v2175_v8 }
  0x6d   : > { %818 = vmatmul.mubr.bf16.gmra.mxu0 %v2177_v9  ;;  %931 = vmatmul.mubr.bf16.gmra.mxu1 %v2177_v9 }
  0x6e   : > { %827 = vmatprep.mubr.bf16.mxu0 %v2178_v10  ;;  %940 = vmatprep.mubr.bf16.mxu1 %v2178_v10 }
  0x75   : > { %828 = vmatmul.mubr.bf16.gmra.mxu0 %v2180_v11  ;;  %941 = vmatmul.mubr.bf16.gmra.mxu1 %v2180_v11 }
  0x76   : > { %837 = vmatprep.mubr.bf16.mxu0 %v2181_v12  ;;  %950 = vmatprep.mubr.bf16.mxu1 %v2181_v12 }
  0x7d   : > { %838 = vmatmul.mubr.bf16.gmra.mxu0 %v2183_v13  ;;  %951 = vmatmul.mubr.bf16.gmra.mxu1 %v2183_v13 }
  0x7e   : > { %847 = vmatprep.mubr.bf16.mxu0 %v2184_v14  ;;  %960 = vmatprep.mubr.bf16.mxu1 %v2184_v14 }
  0x85   : > { %848 = vmatmul.mubr.bf16.gmra.mxu0 %v2186_v15  ;;  %961 = vmatmul.mubr.bf16.gmra.mxu1 %v2186_v15 }
 0x10d   : > { %v779_v27 = vpop.f32.mrf.mxu0  ;;  %v892_v28 = vpop.f32.mrf.mxu1 }
 0x10e   : > { %v2608_v29 = vadd.f32 %v779_v27, %v2599_v23  ;;  %v2611_v30 = vadd.f32 %v892_v28, %v2601_v24 }
 0x10f   : > { %v781_v31 = vpop.f32.mrf.mxu0  ;;  %v894_v32 = vpop.f32.mrf.mxu1 }
 0x110   : > { %v971_v33 = vmul.f32 %v2608_v29, %v2608_v29  ;;  %v973_v34 = vmul.f32 %v2611_v30, %v2611_v30  ;;  %v2618_v35 = vadd.f32 %v781_v31, %v2603_v25  ;;  %v2621_v36 = vadd.f32 %v894_v32, %v2605_v26 }
 0x111   : > { %v783_v37 = vpop.f32.mrf.mxu0  ;;  %v896_v38 = vpop.f32.mrf.mxu1 }
 0x112   : > { %v1035_v39 = vmul.f32 %v971_v33, %v2608_v29  ;;  %v1037_v40 = vmul.f32 %v973_v34, %v2611_v30  ;;  %v972_v41 = vmul.f32 %v2618_v35, %v2618_v35  ;;  %v974_v42 = vmul.f32 %v2621_v36, %v2621_v36 }
 0x113   : > { %v2630_v43 = vadd.f32 %v783_v37, %v2599_v23  ;;  %v2633_v44 = vadd.f32 %v896_v38, %v2601_v24  ;;  %v785_v45 = vpop.f32.mrf.mxu0  ;;  %v898_v46 = vpop.f32.mrf.mxu1 }
 0x114   : > { %v1099_v47 = vmul.f32 0.044715, %v1035_v39  ;;  %v1101_v48 = vmul.f32 0.044715, %v1037_v40  ;;  %v1036_v49 = vmul.f32 %v972_v41, %v2618_v35  ;;  %v1038_v50 = vmul.f32 %v974_v42, %v2621_v36 }
 0x115   : > { %v975_v51 = vmul.f32 %v2630_v43, %v2630_v43  ;;  %v977_v52 = vmul.f32 %v2633_v44, %v2633_v44  ;;  %v2642_v53 = vadd.f32 %v785_v45, %v2603_v25  ;;  %v2645_v54 = vadd.f32 %v898_v46, %v2605_v26  ;;  %v789_v55 = vpop.f32.mrf.mxu0  ;;  %v902_v56 = vpop.f32.mrf.mxu1 }
 0x116   : > { %v1163_v57 = vadd.f32 %v1099_v47, %v2608_v29  ;;  %v1165_v58 = vadd.f32 %v1101_v48, %v2611_v30  ;;  %v1100_v59 = vmul.f32 0.044715, %v1036_v49  ;;  %v1102_v60 = vmul.f32 0.044715, %v1038_v50 }
 0x117   : > { %v1039_v61 = vmul.f32 %v975_v51, %v2630_v43  ;;  %v1041_v62 = vmul.f32 %v977_v52, %v2633_v44  ;;  %v976_v63 = vmul.f32 %v2642_v53, %v2642_v53  ;;  %v978_v0 = vmul.f32 %v2645_v54, %v2645_v54  ;;  %v791_v5 = vpop.f32.mrf.mxu0  ;;  %v904_v10 = vpop.f32.mrf.mxu1 }
 0x118   : > { %v1227_v1 = vmul.f32 0.7978846, %v1163_v57  ;;  %v1229_v2 = vmul.f32 0.7978846, %v1165_v58  ;;  %v1164_v3 = vadd.f32 %v1100_v59, %v2618_v35  ;;  %v1166_v4 = vadd.f32 %v1102_v60, %v2621_v36 }
 0x119   : > { %v1103_v6 = vmul.f32 0.044715, %v1039_v61  ;;  %v1105_v7 = vmul.f32 0.044715, %v1041_v62  ;;  %v1040_v8 = vmul.f32 %v976_v63, %v2642_v53  ;;  %v1042_v9 = vmul.f32 %v978_v0, %v2645_v54  ;;  %v793_v20 = vpop.f32.mrf.mxu0  ;;  %v906_v28 = vpop.f32.mrf.mxu1 }
 0x11a   : > { %2187 = vtanh.f32 %v1227_v1  ;;  %v1228_v11 = vmul.f32 0.7978846, %v1164_v3  ;;  %v1230_v12 = vmul.f32 0.7978846, %v1166_v4  ;;  %v2660_v13 = vadd.f32 %v789_v55, %v2599_v23 }
 0x11b   : > { %2189 = vtanh.f32 %v1229_v2  ;;  %v1167_v14 = vadd.f32 %v1103_v6, %v2630_v43  ;;  %v1169_v15 = vadd.f32 %v1105_v7, %v2633_v44  ;;  %v1104_v16 = vmul.f32 0.044715, %v1040_v8  ;;  %v795_v45 = vpop.f32.mrf.mxu0  ;;  %v908_v49 = vpop.f32.mrf.mxu1 }
 0x11c   : > { %2191 = vtanh.f32 %v1228_v11  ;;  %v1106_v17 = vmul.f32 0.044715, %v1042_v9  ;;  %v979_v18 = vmul.f32 %v2660_v13, %v2660_v13  ;;  %v2667_v19 = vadd.f32 %v902_v56, %v2601_v24 }
 0x11d   : > { %2193 = vtanh.f32 %v1230_v12  ;;  %v1231_v21 = vmul.f32 0.7978846, %v1167_v14  ;;  %v1233_v22 = vmul.f32 0.7978846, %v1169_v15  ;;  %v1168_v27 = vadd.f32 %v1104_v16, %v2642_v53  ;;  %v799_v6 = vpop.f32.mrf.mxu0 }
 0x11e   : > { %v1170_v31 = vadd.f32 %v1106_v17, %v2645_v54  ;;  %v1043_v32 = vmul.f32 %v979_v18, %v2660_v13  ;;  %v981_v33 = vmul.f32 %v2667_v19, %v2667_v19  ;;  %v2675_v34 = vadd.f32 %v791_v5, %v2603_v25 }
 0x11f   : > { %2195 = vtanh.f32 %v1231_v21  ;;  %v1232_v37 = vmul.f32 0.7978846, %v1168_v27  ;;  %v2678_v38 = vadd.f32 %v904_v10, %v2605_v26  ;;  %v2681_v39 = vadd.f32 %v793_v20, %v2599_v23 }
 0x120   : > { %2197 = vtanh.f32 %v1233_v22  ;;  %v1234_v40 = vmul.f32 0.7978846, %v1170_v31  ;;  %v1107_v41 = vmul.f32 0.044715, %v1043_v32  ;;  %v1045_v42 = vmul.f32 %v981_v33, %v2667_v19 }
 0x121   : > { %2199 = vtanh.f32 %v1232_v37  ;;  %v980_v46 = vmul.f32 %v2675_v34, %v2675_v34  ;;  %v982_v47 = vmul.f32 %v2678_v38, %v2678_v38  ;;  %v983_v48 = vmul.f32 %v2681_v39, %v2681_v39 }
 0x122   : > { %2201 = vtanh.f32 %v1234_v40  ;;  %v1171_v50 = vadd.f32 %v1107_v41, %v2660_v13  ;;  %v1109_v51 = vmul.f32 0.044715, %v1045_v42  ;;  %v2692_v52 = vadd.f32 %v906_v28, %v2601_v24 }
 0x123   : > { %v1044_v55 = vmul.f32 %v980_v46, %v2675_v34  ;;  %v1046_v56 = vmul.f32 %v982_v47, %v2678_v38  ;;  %v1047_v57 = vmul.f32 %v983_v48, %v2681_v39  ;;  %v2698_v58 = vadd.f32 %v795_v45, %v2603_v25 }
 0x124   : > { %v1235_v59 = vmul.f32 0.7978846, %v1171_v50  ;;  %v1173_v60 = vadd.f32 %v1109_v51, %v2667_v19  ;;  %v985_v61 = vmul.f32 %v2692_v52, %v2692_v52  ;;  %v2704_v62 = vadd.f32 %v908_v49, %v2605_v26 }
 0x125   : > { %v1108_v63 = vmul.f32 0.044715, %v1044_v55  ;;  %v1110_v0 = vmul.f32 0.044715, %v1046_v56  ;;  %v1111_v1 = vmul.f32 0.044715, %v1047_v57  ;;  %v984_v2 = vmul.f32 %v2698_v58, %v2698_v58  ;;  %v912_v55 = vpop.f32.mrf.mxu1 }
 0x126   : > { %2203 = vtanh.f32 %v1235_v59  ;;  %v1237_v3 = vmul.f32 0.7978846, %v1173_v60  ;;  %v1049_v4 = vmul.f32 %v985_v61, %v2692_v52  ;;  %v986_v5 = vmul.f32 %v2704_v62, %v2704_v62 }
 0x127   : > { %v2188_v7 = vpop.eup %2187  ;;  %v1172_v8 = vadd.f32 %v1108_v63, %v2675_v34  ;;  %v1174_v9 = vadd.f32 %v1110_v0, %v2678_v38  ;;  %v1175_v10 = vadd.f32 %v1111_v1, %v2681_v39  ;;  %v1048_v11 = vmul.f32 %v984_v2, %v2698_v58 }
 0x128   : > { %v2190_v12 = vpop.eup %2189  ;;  %v1355_v14 = vadd.f32 1.0, %v2188_v7  ;;  %2205 = vtanh.f32 %v1237_v3  ;;  %v1113_v15 = vmul.f32 0.044715, %v1049_v4  ;;  %v1050_v16 = vmul.f32 %v986_v5, %v2704_v62  ;;  %v801_v4 = vpop.f32.mrf.mxu0 }
 0x129   : > { %v2192_v17 = vpop.eup %2191  ;;  %v1357_v18 = vadd.f32 1.0, %v2190_v12  ;;  %v1236_v20 = vmul.f32 0.7978846, %v1172_v8  ;;  %v1238_v21 = vmul.f32 0.7978846, %v1174_v9  ;;  %v2717_v22 = vadd.f32 %v799_v6, %v2599_v23  ;;  %v914_v9 = vpop.f32.mrf.mxu1 }
 0x12a   : > { %v2194_v27 = vpop.eup %2193  ;;  %v1419_v28 = vmul.f32 0.5, %v1355_v14  ;;  %v1356_v31 = vadd.f32 1.0, %v2192_v17  ;;  %v1239_v32 = vmul.f32 0.7978846, %v1175_v10  ;;  %v1177_v33 = vadd.f32 %v1113_v15, %v2692_v52 }
 0x12b   : > { %v1421_v37 = vmul.f32 0.5, %v1357_v18  ;;  %v1358_v40 = vadd.f32 1.0, %v2194_v27  ;;  %2207 = vtanh.f32 %v1236_v20  ;;  %v1112_v41 = vmul.f32 0.044715, %v1048_v11 }
 0x12c   : > { %v2196_v42 = vpop.eup %2195  ;;  %v1483_v45 = vmul.f32 %v1419_v28, %v2608_v29  ;;  %v1420_v46 = vmul.f32 0.5, %v1356_v31  ;;  %2209 = vtanh.f32 %v1238_v21  ;;  %v1241_v47 = vmul.f32 0.7978846, %v1177_v33  ;;  %v803_v21 = vpop.f32.mrf.mxu0 }
 0x12d   : > { %v2198_v48 = vpop.eup %2197  ;;  %v1485_v49 = vmul.f32 %v1421_v37, %v2611_v30  ;;  %v1422_v50 = vmul.f32 0.5, %v1358_v40  ;;  %v1359_v51 = vadd.f32 1.0, %v2196_v42  ;;  %2211 = vtanh.f32 %v1239_v32  ;;  %v916_v32 = vpop.f32.mrf.mxu1 }
 0x12e   : > { %v2200_v56 = vpop.eup %2199  ;;  %v1484_v57 = vmul.f32 %v1420_v46, %v2618_v35  ;;  %v1361_v59 = vadd.f32 1.0, %v2198_v48  ;;  %2213 = vtanh.f32 %v1241_v47  ;;  %v1176_v60 = vadd.f32 %v1112_v41, %v2698_v58 }
 0x12f   : > { %v2202_v61 = vpop.eup %2201  ;;  %v1486_v29 = vmul.f32 %v1422_v50, %v2621_v36  ;;  %v1423_v30 = vmul.f32 0.5, %v1359_v51  ;;  %v1360_v63 = vadd.f32 1.0, %v2200_v56  ;;  %v1114_v0 = vmul.f32 0.044715, %v1050_v16 }
 0x130   : > { %v2011_v1 = vpack.c.bf16 %v1484_v57, %v1483_v45  ;;  %v1425_v2 = vmul.f32 0.5, %v1361_v59  ;;  %v1362_v35 = vadd.f32 1.0, %v2202_v61  ;;  %v1240_v3 = vmul.f32 0.7978846, %v1176_v60 }
 0x131   : > { %v2012_v5 = vpack.c.bf16 %v1486_v29, %v1485_v49  ;;  %v1487_v6 = vmul.f32 %v1423_v30, %v2630_v43  ;;  %v1424_v7 = vmul.f32 0.5, %v1360_v63  ;;  %v1178_v8 = vadd.f32 %v1114_v0, %v2704_v62 }
 0x132   : > { %1739 = vst [vmem:[%s2728_s11] sm:$0xff] %v2011_v1  ;;  %v1489_v10 = vmul.f32 %v1425_v2, %v2633_v44  ;;  %v1426_v36 = vmul.f32 0.5, %v1362_v35  ;;  %2215 = vtanh.f32 %v1240_v3  ;;  %v987_v11 = vmul.f32 %v2717_v22, %v2717_v22 }
 0x133   : > { %v2204_v12 = vpop.eup %2203  ;;  %1740 = vst [vmem:[%s2728_s11 + $0x8] sm:$0xff] %v2012_v5  ;;  %v1488_v14 = vmul.f32 %v1424_v7, %v2642_v53  ;;  %v1242_v15 = vmul.f32 0.7978846, %v1178_v8  ;;  %v2740_v16 = vadd.f32 %v912_v55, %v2601_v24  ;;  %v2743_v43 = vadd.f32 %v801_v4, %v2603_v25  ;;  %v805_v4 = vpop.f32.mrf.mxu0 }
 0x134   : > { %v1490_v17 = vmul.f32 %v1426_v36, %v2645_v54  ;;  %v1363_v44 = vadd.f32 1.0, %v2204_v12  ;;  %v1051_v18 = vmul.f32 %v987_v11, %v2717_v22  ;;  %v2748_v20 = vadd.f32 %v914_v9, %v2605_v26  ;;  %v918_v5 = vpop.f32.mrf.mxu1 }
 0x135   : > { %v2206_v27 = vpop.eup %2205  ;;  %v2013_v53 = vpack.c.bf16 %v1488_v14, %v1487_v6  ;;  %2217 = vtanh.f32 %v1242_v15  ;;  %v989_v28 = vmul.f32 %v2740_v16, %v2740_v16  ;;  %v988_v31 = vmul.f32 %v2743_v43, %v2743_v43 }
 0x136   : > { %v2014_v33 = vpack.c.bf16 %v1490_v17, %v1489_v10  ;;  %v1427_v54 = vmul.f32 0.5, %v1363_v44  ;;  %v1365_v37 = vadd.f32 1.0, %v2206_v27  ;;  %v1115_v40 = vmul.f32 0.044715, %v1051_v18  ;;  %v922_v27 = vpop.f32.mrf.mxu1 }
 0x137   : > { %1741 = vst [vmem:[%s2728_s11 + $0x10] sm:$0xff] %v2013_v53  ;;  %v1053_v41 = vmul.f32 %v989_v28, %v2740_v16  ;;  %v1052_v42 = vmul.f32 %v988_v31, %v2743_v43  ;;  %v990_v45 = vmul.f32 %v2748_v20, %v2748_v20  ;;  %v2760_v46 = vadd.f32 %v803_v21, %v2599_v23  ;;  %v809_v21 = vpop.f32.mrf.mxu0 }
 0x138   : > { %v2208_v47 = vpop.eup %2207  ;;  %1742 = vst [vmem:[%s2728_s11 + $0x18] sm:$0xff] %v2014_v33  ;;  %v1491_v48 = vmul.f32 %v1427_v54, %v2660_v13  ;;  %v1429_v49 = vmul.f32 0.5, %v1365_v37  ;;  %v1179_v50 = vadd.f32 %v1115_v40, %v2717_v22  ;;  %v2766_v51 = vadd.f32 %v916_v32, %v2601_v24 }
 0x139   : > { %v2210_v55 = vpop.eup %2209  ;;  %v1364_v56 = vadd.f32 1.0, %v2208_v47  ;;  %v1117_v57 = vmul.f32 0.044715, %v1053_v41  ;;  %v1116_v59 = vmul.f32 0.044715, %v1052_v42  ;;  %v1054_v60 = vmul.f32 %v990_v45, %v2748_v20 }
 0x13a   : > { %v2212_v61 = vpop.eup %2211  ;;  %v1493_v29 = vmul.f32 %v1429_v49, %v2667_v19  ;;  %v1366_v30 = vadd.f32 1.0, %v2210_v55  ;;  %v1243_v63 = vmul.f32 0.7978846, %v1179_v50  ;;  %v991_v13 = vmul.f32 %v2760_v46, %v2760_v46 }
 0x13b   : > { %v2214_v0 = vpop.eup %2213  ;;  %v1428_v1 = vmul.f32 0.5, %v1364_v56  ;;  %v1367_v2 = vadd.f32 1.0, %v2212_v61  ;;  %v1181_v35 = vadd.f32 %v1117_v57, %v2740_v16  ;;  %v1180_v3 = vadd.f32 %v1116_v59, %v2743_v43  ;;  %v811_v56 = vpop.f32.mrf.mxu0 }
 0x13c   : > { %v1430_v6 = vmul.f32 0.5, %v1366_v30  ;;  %v1369_v7 = vadd.f32 1.0, %v2214_v0  ;;  %2219 = vtanh.f32 %v1243_v63  ;;  %v1118_v8 = vmul.f32 0.044715, %v1054_v60 }
 0x13d   : > { %v1492_v19 = vmul.f32 %v1428_v1, %v2675_v34  ;;  %v1431_v9 = vmul.f32 0.5, %v1367_v2  ;;  %v1245_v10 = vmul.f32 0.7978846, %v1181_v35  ;;  %v1244_v36 = vmul.f32 0.7978846, %v1180_v3 }
 0x13e   : > { %v1494_v11 = vmul.f32 %v1430_v6, %v2678_v38  ;;  %v1433_v12 = vmul.f32 0.5, %v1369_v7  ;;  %v1182_v14 = vadd.f32 %v1118_v8, %v2748_v20  ;;  %v1055_v15 = vmul.f32 %v991_v13, %v2760_v46  ;;  %v813_v6 = vpop.f32.mrf.mxu0 }
 0x13f   : > { %v2216_v17 = vpop.eup %2215  ;;  %v2015_v44 = vpack.c.bf16 %v1492_v19, %v1491_v48  ;;  %v1495_v18 = vmul.f32 %v1431_v9, %v2681_v39  ;;  %2221 = vtanh.f32 %v1245_v10  ;;  %v993_v34 = vmul.f32 %v2766_v51, %v2766_v51 }
 0x140   : > { %v2016_v53 = vpack.c.bf16 %v1494_v11, %v1493_v29  ;;  %v1497_v28 = vmul.f32 %v1433_v12, %v2692_v52  ;;  %v1368_v38 = vadd.f32 1.0, %v2216_v17  ;;  %2223 = vtanh.f32 %v1244_v36  ;;  %v924_v29 = vpop.f32.mrf.mxu1 }
 0x141   : > { %1743 = vst [vmem:[%s2728_s11 + $0x20] sm:$0xff] %v2015_v44  ;;  %v1246_v31 = vmul.f32 0.7978846, %v1182_v14  ;;  %v1119_v32 = vmul.f32 0.044715, %v1055_v15  ;;  %v1057_v33 = vmul.f32 %v993_v34, %v2766_v51  ;;  %v2785_v54 = vadd.f32 %v805_v4, %v2603_v25 }
 0x142   : > { %v2218_v39 = vpop.eup %2217  ;;  %1744 = vst [vmem:[%s2728_s11 + $0x28] sm:$0xff] %v2016_v53  ;;  %v1432_v37 = vmul.f32 0.5, %v1368_v38  ;;  %v2789_v40 = vadd.f32 %v918_v5, %v2605_v26  ;;  %v2792_v41 = vadd.f32 %v809_v21, %v2599_v23  ;;  %v2795_v52 = vadd.f32 %v922_v27, %v2601_v24 }
 0x143   : > { %v1370_v42 = vadd.f32 1.0, %v2218_v39  ;;  %2225 = vtanh.f32 %v1246_v31  ;;  %v1183_v45 = vadd.f32 %v1119_v32, %v2760_v46  ;;  %v1121_v47 = vmul.f32 0.044715, %v1057_v33 }
 0x144   : > { %v1496_v48 = vmul.f32 %v1432_v37, %v2698_v58  ;;  %v992_v49 = vmul.f32 %v2785_v54, %v2785_v54  ;;  %v994_v50 = vmul.f32 %v2789_v40, %v2789_v40  ;;  %v995_v55 = vmul.f32 %v2792_v41, %v2792_v41 }
 0x145   : > { %v1434_v57 = vmul.f32 0.5, %v1370_v42  ;;  %v1247_v59 = vmul.f32 0.7978846, %v1183_v45  ;;  %v1185_v60 = vadd.f32 %v1121_v47, %v2766_v51  ;;  %v997_v61 = vmul.f32 %v2795_v52, %v2795_v52 }
 0x146   : > { %v2017_v58 = vpack.c.bf16 %v1496_v48, %v1495_v18  ;;  %v1056_v30 = vmul.f32 %v992_v49, %v2785_v54  ;;  %v1058_v63 = vmul.f32 %v994_v50, %v2789_v40  ;;  %v1059_v13 = vmul.f32 %v995_v55, %v2792_v41  ;;  %v815_v49 = vpop.f32.mrf.mxu0 }
 0x147   : > { %v1498_v0 = vmul.f32 %v1434_v57, %v2704_v62  ;;  %2227 = vtanh.f32 %v1247_v59  ;;  %v1249_v1 = vmul.f32 0.7978846, %v1185_v60  ;;  %v1061_v2 = vmul.f32 %v997_v61, %v2795_v52  ;;  %v926_v62 = vpop.f32.mrf.mxu1 }
 0x148   : > { %1745 = vst [vmem:[%s2728_s11 + $0x30] sm:$0xff] %v2017_v58  ;;  %v1120_v35 = vmul.f32 0.044715, %v1056_v30  ;;  %v1122_v3 = vmul.f32 0.044715, %v1058_v63  ;;  %v2815_v5 = vadd.f32 %v811_v56, %v2603_v25  ;;  %v2818_v9 = vadd.f32 %v924_v29, %v2605_v26 }
 0x149   : > { %v1123_v4 = vmul.f32 0.044715, %v1059_v13  ;;  %v2220_v7 = vpop.eup %2219  ;;  %v2018_v8 = vpack.c.bf16 %v1498_v0, %v1497_v28  ;;  %2229 = vtanh.f32 %v1249_v1  ;;  %v1125_v19 = vmul.f32 0.044715, %v1061_v2  ;;  %v928_v59 = vpop.f32.mrf.mxu1 }
 0x14a   : > { %v1371_v10 = vadd.f32 1.0, %v2220_v7  ;;  %v1184_v36 = vadd.f32 %v1120_v35, %v2785_v54  ;;  %v1186_v11 = vadd.f32 %v1122_v3, %v2789_v40  ;;  %v996_v15 = vmul.f32 %v2815_v5, %v2815_v5  ;;  %v819_v2 = vpop.f32.mrf.mxu0 }
 0x14b   : > { %v1187_v12 = vadd.f32 %v1123_v4, %v2792_v41  ;;  %1746 = vst [vmem:[%s2728_s11 + $0x38] sm:$0xff] %v2018_v8  ;;  %v1189_v14 = vadd.f32 %v1125_v19, %v2795_v52  ;;  %v998_v17 = vmul.f32 %v2818_v9, %v2818_v9  ;;  %v2830_v44 = vadd.f32 %v813_v6, %v2599_v23 }
 0x14c   : > { %v2222_v18 = vpop.eup %2221  ;;  %v1435_v34 = vmul.f32 0.5, %v1371_v10  ;;  %v1248_v21 = vmul.f32 0.7978846, %v1184_v36  ;;  %v1250_v27 = vmul.f32 0.7978846, %v1186_v11  ;;  %v2833_v53 = vadd.f32 %v926_v62, %v2601_v24 }
 0x14d   : > { %v2224_v28 = vpop.eup %2223  ;;  %v1373_v38 = vadd.f32 1.0, %v2222_v18  ;;  %v1251_v31 = vmul.f32 0.7978846, %v1187_v12  ;;  %v1253_v32 = vmul.f32 0.7978846, %v1189_v14  ;;  %v1060_v33 = vmul.f32 %v996_v15, %v2815_v5  ;;  %v932_v12 = vpop.f32.mrf.mxu1 }
 0x14e   : > { %v1499_v39 = vmul.f32 %v1435_v34, %v2717_v22  ;;  %v1372_v37 = vadd.f32 1.0, %v2224_v28  ;;  %2231 = vtanh.f32 %v1248_v21  ;;  %v1062_v42 = vmul.f32 %v998_v17, %v2818_v9  ;;  %v821_v18 = vpop.f32.mrf.mxu0 }
 0x14f   : > { %v1437_v45 = vmul.f32 0.5, %v1373_v38  ;;  %2233 = vtanh.f32 %v1250_v27  ;;  %v1124_v47 = vmul.f32 0.044715, %v1060_v33  ;;  %v999_v48 = vmul.f32 %v2830_v44, %v2830_v44 }
 0x150   : > { %v2226_v50 = vpop.eup %2225  ;;  %v1436_v55 = vmul.f32 0.5, %v1372_v37  ;;  %2235 = vtanh.f32 %v1251_v31  ;;  %v1126_v56 = vmul.f32 0.044715, %v1062_v42  ;;  %v1001_v57 = vmul.f32 %v2833_v53, %v2833_v53 }
 0x151   : > { %v1501_v22 = vmul.f32 %v1437_v45, %v2740_v16  ;;  %v1374_v60 = vadd.f32 1.0, %v2226_v50  ;;  %2237 = vtanh.f32 %v1253_v32  ;;  %v1188_v61 = vadd.f32 %v1124_v47, %v2815_v5  ;;  %v934_v45 = vpop.f32.mrf.mxu1 }
 0x152   : > { %v1500_v29 = vmul.f32 %v1436_v55, %v2743_v43  ;;  %v1190_v58 = vadd.f32 %v1126_v56, %v2818_v9  ;;  %v1063_v30 = vmul.f32 %v999_v48, %v2830_v44  ;;  %v1065_v63 = vmul.f32 %v1001_v57, %v2833_v53 }
 0x153   : > { %v1438_v13 = vmul.f32 0.5, %v1374_v60  ;;  %v1252_v0 = vmul.f32 0.7978846, %v1188_v61  ;;  %v2849_v1 = vadd.f32 %v815_v49, %v2603_v25  ;;  %v2852_v16 = vadd.f32 %v928_v59, %v2605_v26 }
 0x154   : > { %v2228_v35 = vpop.eup %2227  ;;  %v2019_v3 = vpack.c.bf16 %v1500_v29, %v1499_v39  ;;  %v1254_v4 = vmul.f32 0.7978846, %v1190_v58  ;;  %v1127_v43 = vmul.f32 0.044715, %v1063_v30  ;;  %v1129_v6 = vmul.f32 0.044715, %v1065_v63 }
 0x155   : > { %v1502_v7 = vmul.f32 %v1438_v13, %v2748_v20  ;;  %v1375_v8 = vadd.f32 1.0, %v2228_v35  ;;  %2239 = vtanh.f32 %v1252_v0  ;;  %v1000_v19 = vmul.f32 %v2849_v1, %v2849_v1 }
 0x156   : > { %v2230_v62 = vpop.eup %2229  ;;  %1747 = vst [vmem:[%s2728_s11 + $0x40] sm:$0xff] %v2019_v3  ;;  %2241 = vtanh.f32 %v1254_v4  ;;  %v1191_v10 = vadd.f32 %v1127_v43, %v2830_v44  ;;  %v1193_v36 = vadd.f32 %v1129_v6, %v2833_v53  ;;  %v1002_v11 = vmul.f32 %v2852_v16, %v2852_v16  ;;  %v823_v4 = vpop.f32.mrf.mxu0 }
 0x157   : > { %v2020_v14 = vpack.c.bf16 %v1502_v7, %v1501_v22  ;;  %v1439_v15 = vmul.f32 0.5, %v1375_v8  ;;  %v1377_v20 = vadd.f32 1.0, %v2230_v62  ;;  %v1064_v17 = vmul.f32 %v1000_v19, %v2849_v1  ;;  %v936_v8 = vpop.f32.mrf.mxu1 }
 0x158   : > { %v1255_v34 = vmul.f32 0.7978846, %v1191_v10  ;;  %v1257_v21 = vmul.f32 0.7978846, %v1193_v36  ;;  %v1066_v27 = vmul.f32 %v1002_v11, %v2852_v16  ;;  %v2865_v28 = vadd.f32 %v819_v2, %v2599_v23 }
 0x159   : > { %1748 = vst [vmem:[%s2728_s11 + $0x48] sm:$0xff] %v2020_v14  ;;  %v1503_v38 = vmul.f32 %v1439_v15, %v2760_v46  ;;  %v1441_v31 = vmul.f32 0.5, %v1377_v20  ;;  %v1128_v32 = vmul.f32 0.044715, %v1064_v17  ;;  %v2870_v33 = vadd.f32 %v932_v12, %v2601_v24 }
 0x15a   : > { %2243 = vtanh.f32 %v1255_v34  ;;  %v1130_v39 = vmul.f32 0.044715, %v1066_v27  ;;  %v1003_v37 = vmul.f32 %v2865_v28, %v2865_v28  ;;  %v2875_v42 = vadd.f32 %v821_v18, %v2603_v25 }
 0x15b   : > { %v2232_v47 = vpop.eup %2231  ;;  %v1505_v48 = vmul.f32 %v1441_v31, %v2766_v51  ;;  %2245 = vtanh.f32 %v1257_v21  ;;  %v1192_v46 = vadd.f32 %v1128_v32, %v2849_v1  ;;  %v1005_v49 = vmul.f32 %v2870_v33, %v2870_v33  ;;  %v825_v21 = vpop.f32.mrf.mxu0 }
 0x15c   : > { %v2234_v50 = vpop.eup %2233  ;;  %v1376_v55 = vadd.f32 1.0, %v2232_v47  ;;  %v1194_v56 = vadd.f32 %v1130_v39, %v2852_v16  ;;  %v1067_v57 = vmul.f32 %v1003_v37, %v2865_v28  ;;  %v1004_v59 = vmul.f32 %v2875_v42, %v2875_v42  ;;  %v938_v32 = vpop.f32.mrf.mxu1 }
 0x15d   : > { %v2236_v22 = vpop.eup %2235  ;;  %v1378_v60 = vadd.f32 1.0, %v2234_v50  ;;  %v1256_v61 = vmul.f32 0.7978846, %v1192_v46  ;;  %v1069_v51 = vmul.f32 %v1005_v49, %v2870_v33  ;;  %v2887_v29 = vadd.f32 %v934_v45, %v2605_v26 }
 0x15e   : > { %v2238_v58 = vpop.eup %2237  ;;  %v1440_v30 = vmul.f32 0.5, %v1376_v55  ;;  %v1379_v63 = vadd.f32 1.0, %v2236_v22  ;;  %v1258_v13 = vmul.f32 0.7978846, %v1194_v56  ;;  %v1131_v0 = vmul.f32 0.044715, %v1067_v57 }
 0x15f   : > { %v1442_v2 = vmul.f32 0.5, %v1378_v60  ;;  %v1381_v35 = vadd.f32 1.0, %v2238_v58  ;;  %2247 = vtanh.f32 %v1256_v61  ;;  %v1133_v3 = vmul.f32 0.044715, %v1069_v51 }
 0x160   : > { %v1504_v43 = vmul.f32 %v1440_v30, %v2785_v54  ;;  %v1443_v6 = vmul.f32 0.5, %v1379_v63  ;;  %2249 = vtanh.f32 %v1258_v13  ;;  %v1195_v7 = vadd.f32 %v1131_v0, %v2865_v28  ;;  %v829_v63 = vpop.f32.mrf.mxu0 }
 0x161   : > { %v1506_v19 = vmul.f32 %v1442_v2, %v2789_v40  ;;  %v1445_v62 = vmul.f32 0.5, %v1381_v35  ;;  %v1197_v10 = vadd.f32 %v1133_v3, %v2870_v33  ;;  %v1068_v36 = vmul.f32 %v1004_v59, %v2875_v42 }
 0x162   : > { %v2240_v11 = vpop.eup %2239  ;;  %v2021_v12 = vpack.c.bf16 %v1504_v43, %v1503_v38  ;;  %v1507_v14 = vmul.f32 %v1443_v6, %v2792_v41  ;;  %v1259_v15 = vmul.f32 0.7978846, %v1195_v7  ;;  %v1006_v54 = vmul.f32 %v2887_v29, %v2887_v29 }
 0x163   : > { %v2242_v20 = vpop.eup %2241  ;;  %v2022_v17 = vpack.c.bf16 %v1506_v19, %v1505_v48  ;;  %v1509_v18 = vmul.f32 %v1445_v62, %v2795_v52  ;;  %v1380_v34 = vadd.f32 1.0, %v2240_v11  ;;  %v1261_v40 = vmul.f32 0.7978846, %v1197_v10  ;;  %v942_v19 = vpop.f32.mrf.mxu1 }
 0x164   : > { %1749 = vst [vmem:[%s2728_s11 + $0x50] sm:$0xff] %v2021_v12  ;;  %v1382_v27 = vadd.f32 1.0, %v2242_v20  ;;  %2251 = vtanh.f32 %v1259_v15  ;;  %v1132_v31 = vmul.f32 0.044715, %v1068_v36  ;;  %v1070_v38 = vmul.f32 %v1006_v54, %v2887_v29  ;;  %v831_v20 = vpop.f32.mrf.mxu0 }
 0x165   : > { %1750 = vst [vmem:[%s2728_s11 + $0x58] sm:$0xff] %v2022_v17  ;;  %v1444_v41 = vmul.f32 0.5, %v1380_v34  ;;  %2253 = vtanh.f32 %v1261_v40  ;;  %v2902_v39 = vadd.f32 %v823_v4, %v2599_v23  ;;  %v2905_v37 = vadd.f32 %v936_v8, %v2601_v24 }
 0x166   : > { %v1446_v52 = vmul.f32 0.5, %v1382_v27  ;;  %v1196_v45 = vadd.f32 %v1132_v31, %v2875_v42  ;;  %v1134_v47 = vmul.f32 0.044715, %v1070_v38  ;;  %v2909_v48 = vadd.f32 %v825_v21, %v2603_v25 }
 0x167   : > { %v2244_v46 = vpop.eup %2243  ;;  %v1508_v49 = vmul.f32 %v1444_v41, %v2815_v5  ;;  %v1007_v50 = vmul.f32 %v2902_v39, %v2902_v39  ;;  %v1009_v55 = vmul.f32 %v2905_v37, %v2905_v37  ;;  %v2917_v56 = vadd.f32 %v938_v32, %v2605_v26 }
 0x168   : > { %v2246_v57 = vpop.eup %2245  ;;  %v1510_v59 = vmul.f32 %v1446_v52, %v2818_v9  ;;  %v1383_v22 = vadd.f32 1.0, %v2244_v46  ;;  %v1260_v60 = vmul.f32 0.7978846, %v1196_v45  ;;  %v1198_v61 = vadd.f32 %v1134_v47, %v2887_v29 }
 0x169   : > { %v2023_v51 = vpack.c.bf16 %v1508_v49, %v1507_v14  ;;  %v1385_v5 = vadd.f32 1.0, %v2246_v57  ;;  %v1071_v58 = vmul.f32 %v1007_v50, %v2902_v39  ;;  %v1073_v30 = vmul.f32 %v1009_v55, %v2905_v37  ;;  %v944_v50 = vpop.f32.mrf.mxu1  ;;  %v833_v55 = vpop.f32.mrf.mxu0 }
 0x16a   : > { %v2024_v13 = vpack.c.bf16 %v1510_v59, %v1509_v18  ;;  %v1447_v0 = vmul.f32 0.5, %v1383_v22  ;;  %2255 = vtanh.f32 %v1260_v60  ;;  %v1262_v2 = vmul.f32 0.7978846, %v1198_v61 }
 0x16b   : > { %1751 = vst [vmem:[%s2728_s11 + $0x60] sm:$0xff] %v2023_v51  ;;  %v1449_v35 = vmul.f32 0.5, %v1385_v5  ;;  %v1135_v3 = vmul.f32 0.044715, %v1071_v58  ;;  %v1137_v9 = vmul.f32 0.044715, %v1073_v30  ;;  %v1008_v4 = vmul.f32 %v2909_v48, %v2909_v48 }
 0x16c   : > { %v2248_v43 = vpop.eup %2247  ;;  %1752 = vst [vmem:[%s2728_s11 + $0x68] sm:$0xff] %v2024_v13  ;;  %v1511_v6 = vmul.f32 %v1447_v0, %v2830_v44  ;;  %2257 = vtanh.f32 %v1262_v2  ;;  %v1010_v7 = vmul.f32 %v2917_v56, %v2917_v56  ;;  %v2931_v8 = vadd.f32 %v829_v63, %v2599_v23 }
 0x16d   : > { %v2250_v62 = vpop.eup %2249  ;;  %v1513_v10 = vmul.f32 %v1449_v35, %v2833_v53  ;;  %v1384_v36 = vadd.f32 1.0, %v2248_v43  ;;  %v1199_v11 = vadd.f32 %v1135_v3, %v2902_v39  ;;  %v1201_v12 = vadd.f32 %v1137_v9, %v2905_v37  ;;  %v946_v35 = vpop.f32.mrf.mxu1 }
 0x16e   : > { %v1386_v14 = vadd.f32 1.0, %v2250_v62  ;;  %v1072_v15 = vmul.f32 %v1008_v4, %v2909_v48  ;;  %v1074_v44 = vmul.f32 %v1010_v7, %v2917_v56  ;;  %v1011_v54 = vmul.f32 %v2931_v8, %v2931_v8  ;;  %v835_v3 = vpop.f32.mrf.mxu0 }
 0x16f   : > { %v1448_v17 = vmul.f32 0.5, %v1384_v36  ;;  %v1263_v18 = vmul.f32 0.7978846, %v1199_v11  ;;  %v1265_v34 = vmul.f32 0.7978846, %v1201_v12  ;;  %v2941_v40 = vadd.f32 %v942_v19, %v2601_v24 }
 0x170   : > { %v1450_v53 = vmul.f32 0.5, %v1386_v14  ;;  %v1136_v21 = vmul.f32 0.044715, %v1072_v15  ;;  %v1138_v27 = vmul.f32 0.044715, %v1074_v44  ;;  %v1075_v31 = vmul.f32 %v1011_v54, %v2931_v8 }
 0x171   : > { %v2252_v38 = vpop.eup %2251  ;;  %v1512_v32 = vmul.f32 %v1448_v17, %v2849_v1  ;;  %2259 = vtanh.f32 %v1263_v18  ;;  %v1013_v41 = vmul.f32 %v2941_v40, %v2941_v40  ;;  %v2948_v52 = vadd.f32 %v831_v20, %v2603_v25 }
 0x172   : > { %v2254_v45 = vpop.eup %2253  ;;  %v1514_v47 = vmul.f32 %v1450_v53, %v2852_v16  ;;  %v1387_v46 = vadd.f32 1.0, %v2252_v38  ;;  %2261 = vtanh.f32 %v1265_v34  ;;  %v1200_v49 = vadd.f32 %v1136_v21, %v2909_v48  ;;  %v948_v34 = vpop.f32.mrf.mxu1 }
 0x173   : > { %v2025_v57 = vpack.c.bf16 %v1512_v32, %v1511_v6  ;;  %v1389_v1 = vadd.f32 1.0, %v2254_v45  ;;  %v1202_v59 = vadd.f32 %v1138_v27, %v2917_v56  ;;  %v1139_v22 = vmul.f32 0.044715, %v1075_v31 }
 0x174   : > { %v2026_v60 = vpack.c.bf16 %v1514_v47, %v1513_v10  ;;  %v1451_v61 = vmul.f32 0.5, %v1387_v46  ;;  %v1264_v51 = vmul.f32 0.7978846, %v1200_v49  ;;  %v1077_v5 = vmul.f32 %v1013_v41, %v2941_v40 }
 0x175   : > { %1753 = vst [vmem:[%s2728_s11 + $0x70] sm:$0xff] %v2025_v57  ;;  %v1453_v58 = vmul.f32 0.5, %v1389_v1  ;;  %v1266_v16 = vmul.f32 0.7978846, %v1202_v59  ;;  %v1203_v30 = vadd.f32 %v1139_v22, %v2931_v8  ;;  %v1012_v63 = vmul.f32 %v2948_v52, %v2948_v52  ;;  %v839_v59 = vpop.f32.mrf.mxu0 }
 0x176   : > { %1754 = vst [vmem:[%s2728_s11 + $0x78] sm:$0xff] %v2026_v60  ;;  %v1515_v13 = vmul.f32 %v1451_v61, %v2865_v28  ;;  %2263 = vtanh.f32 %v1264_v51  ;;  %v1141_v0 = vmul.f32 0.044715, %v1077_v5  ;;  %v2961_v2 = vadd.f32 %v944_v50, %v2605_v26 }
 0x177   : > { %v2256_v9 = vpop.eup %2255  ;;  %v1517_v4 = vmul.f32 %v1453_v58, %v2870_v33  ;;  %2265 = vtanh.f32 %v1266_v16  ;;  %v1267_v43 = vmul.f32 0.7978846, %v1203_v30  ;;  %v1076_v6 = vmul.f32 %v1012_v63, %v2948_v52 }
 0x178   : > { %v1388_v7 = vadd.f32 1.0, %v2256_v9  ;;  %v1205_v19 = vadd.f32 %v1141_v0, %v2941_v40  ;;  %v1014_v28 = vmul.f32 %v2961_v2, %v2961_v2  ;;  %v2969_v62 = vadd.f32 %v833_v55, %v2599_v23  ;;  %v952_v0 = vpop.f32.mrf.mxu1 }
 0x179   : > { %v2258_v10 = vpop.eup %2257  ;;  %2267 = vtanh.f32 %v1267_v43  ;;  %v1140_v36 = vmul.f32 0.044715, %v1076_v6  ;;  %v2972_v11 = vadd.f32 %v946_v35, %v2601_v24  ;;  %v2975_v33 = vadd.f32 %v835_v3, %v2603_v25  ;;  %v841_v6 = vpop.f32.mrf.mxu0 }
 0x17a   : > { %v1452_v12 = vmul.f32 0.5, %v1388_v7  ;;  %v1390_v14 = vadd.f32 1.0, %v2258_v10  ;;  %v1269_v15 = vmul.f32 0.7978846, %v1205_v19  ;;  %v1078_v44 = vmul.f32 %v1014_v28, %v2961_v2 }
 0x17b   : > { %v1204_v54 = vadd.f32 %v1140_v36, %v2948_v52  ;;  %v1015_v20 = vmul.f32 %v2969_v62, %v2969_v62  ;;  %v1017_v17 = vmul.f32 %v2972_v11, %v2972_v11  ;;  %v1016_v18 = vmul.f32 %v2975_v33, %v2975_v33 }
 0x17c   : > { %v1516_v53 = vmul.f32 %v1452_v12, %v2875_v42  ;;  %v1454_v21 = vmul.f32 0.5, %v1390_v14  ;;  %2269 = vtanh.f32 %v1269_v15  ;;  %v1142_v27 = vmul.f32 0.044715, %v1078_v44 }
 0x17d   : > { %v1268_v31 = vmul.f32 0.7978846, %v1204_v54  ;;  %v1079_v38 = vmul.f32 %v1015_v20, %v2969_v62  ;;  %v1081_v32 = vmul.f32 %v1017_v17, %v2972_v11  ;;  %v1080_v41 = vmul.f32 %v1016_v18, %v2975_v33 }
 0x17e   : > { %v2260_v45 = vpop.eup %2259  ;;  %v2027_v47 = vpack.c.bf16 %v1516_v53, %v1515_v13  ;;  %v1518_v46 = vmul.f32 %v1454_v21, %v2887_v29  ;;  %v1206_v49 = vadd.f32 %v1142_v27, %v2961_v2  ;;  %v2992_v50 = vadd.f32 %v948_v34, %v2605_v26 }
 0x17f   : > { %v2262_v42 = vpop.eup %2261  ;;  %v1391_v55 = vadd.f32 1.0, %v2260_v45  ;;  %2271 = vtanh.f32 %v1268_v31  ;;  %v1143_v57 = vmul.f32 0.044715, %v1079_v38  ;;  %v1145_v1 = vmul.f32 0.044715, %v1081_v32 }
 0x180   : > { %1755 = vst [vmem:[%s2728_s11 + $0x80] sm:$0xff] %v2027_v47  ;;  %v2028_v22 = vpack.c.bf16 %v1518_v46, %v1517_v4  ;;  %v1393_v60 = vadd.f32 1.0, %v2262_v42  ;;  %v1270_v61 = vmul.f32 0.7978846, %v1206_v49  ;;  %v1144_v51 = vmul.f32 0.044715, %v1080_v41  ;;  %v843_v46 = vpop.f32.mrf.mxu0 }
 0x181   : > { %v1455_v5 = vmul.f32 0.5, %v1391_v55  ;;  %v1207_v29 = vadd.f32 %v1143_v57, %v2969_v62  ;;  %v1209_v58 = vadd.f32 %v1145_v1, %v2972_v11  ;;  %v1018_v16 = vmul.f32 %v2992_v50, %v2992_v50 }
 0x182   : > { %1756 = vst [vmem:[%s2728_s11 + $0x88] sm:$0xff] %v2028_v22  ;;  %v1457_v30 = vmul.f32 0.5, %v1393_v60  ;;  %2273 = vtanh.f32 %v1270_v61  ;;  %v1208_v63 = vadd.f32 %v1144_v51, %v2975_v33  ;;  %v3002_v13 = vadd.f32 %v839_v59, %v2599_v23 }
 0x183   : > { %v2264_v35 = vpop.eup %2263  ;;  %v1519_v3 = vmul.f32 %v1455_v5, %v2902_v39  ;;  %v1271_v9 = vmul.f32 0.7978846, %v1207_v29  ;;  %v1273_v4 = vmul.f32 0.7978846, %v1209_v58  ;;  %v1082_v43 = vmul.f32 %v1018_v16, %v2992_v50 }
 0x184   : > { %v2266_v7 = vpop.eup %2265  ;;  %v1521_v19 = vmul.f32 %v1457_v30, %v2905_v37  ;;  %v1392_v28 = vadd.f32 1.0, %v2264_v35  ;;  %v1272_v10 = vmul.f32 0.7978846, %v1208_v63  ;;  %v1019_v36 = vmul.f32 %v3002_v13, %v3002_v13  ;;  %v954_v37 = vpop.f32.mrf.mxu1 }
 0x185   : > { %v1394_v12 = vadd.f32 1.0, %v2266_v7  ;;  %2275 = vtanh.f32 %v1271_v9  ;;  %v1146_v14 = vmul.f32 0.044715, %v1082_v43  ;;  %v3010_v15 = vadd.f32 %v952_v0, %v2601_v24 }
 0x186   : > { %v2268_v39 = vpop.eup %2267  ;;  %v1456_v44 = vmul.f32 0.5, %v1392_v28  ;;  %2277 = vtanh.f32 %v1273_v4  ;;  %v1083_v54 = vmul.f32 %v1019_v36, %v3002_v13  ;;  %v3014_v20 = vadd.f32 %v841_v6, %v2603_v25  ;;  %v956_v57 = vpop.f32.mrf.mxu1 }
 0x187   : > { %v1458_v17 = vmul.f32 0.5, %v1394_v12  ;;  %v1395_v18 = vadd.f32 1.0, %v2268_v39  ;;  %2279 = vtanh.f32 %v1272_v10  ;;  %v1210_v34 = vadd.f32 %v1146_v14, %v2992_v50 }
 0x188   : > { %v1520_v53 = vmul.f32 %v1456_v44, %v2909_v48  ;;  %v1147_v21 = vmul.f32 0.044715, %v1083_v54  ;;  %v1021_v27 = vmul.f32 %v3010_v15, %v3010_v15  ;;  %v1020_v31 = vmul.f32 %v3014_v20, %v3014_v20 }
 0x189   : > { %v2270_v38 = vpop.eup %2269  ;;  %v1522_v32 = vmul.f32 %v1458_v17, %v2917_v56  ;;  %v1459_v41 = vmul.f32 0.5, %v1395_v18  ;;  %v1274_v45 = vmul.f32 0.7978846, %v1210_v34  ;;  %v3024_v47 = vadd.f32 %v954_v37, %v2605_v26  ;;  %v958_v17 = vpop.f32.mrf.mxu1 }
 0x18a   : > { %v2029_v49 = vpack.c.bf16 %v1520_v53, %v1519_v3  ;;  %v1397_v48 = vadd.f32 1.0, %v2270_v38  ;;  %v1211_v42 = vadd.f32 %v1147_v21, %v3002_v13  ;;  %v1085_v55 = vmul.f32 %v1021_v27, %v3010_v15 }
 0x18b   : > { %v2030_v1 = vpack.c.bf16 %v1522_v32, %v1521_v19  ;;  %v1523_v59 = vmul.f32 %v1459_v41, %v2931_v8  ;;  %2281 = vtanh.f32 %v1274_v45  ;;  %v1084_v56 = vmul.f32 %v1020_v31, %v3014_v20  ;;  %v845_v8 = vpop.f32.mrf.mxu0 }
 0x18c   : > { %v2272_v22 = vpop.eup %2271  ;;  %1757 = vst [vmem:[%s2728_s11 + $0x90] sm:$0xff] %v2029_v49  ;;  %v1461_v60 = vmul.f32 0.5, %v1397_v48  ;;  %v1275_v61 = vmul.f32 0.7978846, %v1211_v42  ;;  %v1149_v51 = vmul.f32 0.044715, %v1085_v55  ;;  %v1022_v5 = vmul.f32 %v3024_v47, %v3024_v47 }
 0x18d   : > { %1758 = vst [vmem:[%s2728_s11 + $0x98] sm:$0xff] %v2030_v1  ;;  %v1396_v29 = vadd.f32 1.0, %v2272_v22  ;;  %v1148_v58 = vmul.f32 0.044715, %v1084_v56  ;;  %v3035_v16 = vadd.f32 %v843_v46, %v2599_v23  ;;  %v3038_v30 = vadd.f32 %v956_v57, %v2601_v24  ;;  %v849_v41 = vpop.f32.mrf.mxu0  ;;  %v962_v1 = vpop.f32.mrf.mxu1 }
 0x18e   : > { %v1525_v63 = vmul.f32 %v1461_v60, %v2941_v40  ;;  %2283 = vtanh.f32 %v1275_v61  ;;  %v1213_v0 = vadd.f32 %v1149_v51, %v3010_v15  ;;  %v1086_v35 = vmul.f32 %v1022_v5, %v3024_v47 }
 0x18f   : > { %v2274_v3 = vpop.eup %2273  ;;  %v1460_v9 = vmul.f32 0.5, %v1396_v29  ;;  %v1212_v4 = vadd.f32 %v1148_v58, %v3014_v20  ;;  %v1023_v43 = vmul.f32 %v3035_v16, %v3035_v16  ;;  %v1025_v6 = vmul.f32 %v3038_v30, %v3038_v30  ;;  %v851_v58 = vpop.f32.mrf.mxu0 }
 0x190   : > { %v1398_v7 = vadd.f32 1.0, %v2274_v3  ;;  %v1277_v19 = vmul.f32 0.7978846, %v1213_v0  ;;  %v1150_v28 = vmul.f32 0.044715, %v1086_v35  ;;  %v3049_v40 = vadd.f32 %v845_v8, %v2603_v25  ;;  %v964_v3 = vpop.f32.mrf.mxu1 }
 0x191   : > { %v1524_v10 = vmul.f32 %v1460_v9, %v2948_v52  ;;  %v1276_v36 = vmul.f32 0.7978846, %v1212_v4  ;;  %v1087_v12 = vmul.f32 %v1023_v43, %v3035_v16  ;;  %v1089_v14 = vmul.f32 %v1025_v6, %v3038_v30 }
 0x192   : > { %v2276_v39 = vpop.eup %2275  ;;  %v1462_v44 = vmul.f32 0.5, %v1398_v7  ;;  %2285 = vtanh.f32 %v1277_v19  ;;  %v1214_v54 = vadd.f32 %v1150_v28, %v3024_v47  ;;  %v1024_v37 = vmul.f32 %v3049_v40, %v3049_v40 }
 0x193   : > { %v2278_v18 = vpop.eup %2277  ;;  %v2031_v34 = vpack.c.bf16 %v1524_v10, %v1523_v59  ;;  %v1399_v53 = vadd.f32 1.0, %v2276_v39  ;;  %2287 = vtanh.f32 %v1276_v36  ;;  %v1151_v52 = vmul.f32 0.044715, %v1087_v12  ;;  %v853_v36 = vpop.f32.mrf.mxu0 }
 0x194   : > { %v2280_v21 = vpop.eup %2279  ;;  %v1526_v27 = vmul.f32 %v1462_v44, %v2961_v2  ;;  %v1401_v31 = vadd.f32 1.0, %v2278_v18  ;;  %v1278_v38 = vmul.f32 0.7978846, %v1214_v54  ;;  %v1153_v32 = vmul.f32 0.044715, %v1089_v14 }
 0x195   : > { %1759 = vst [vmem:[%s2728_s11 + $0xa0] sm:$0xff] %v2031_v34  ;;  %v1463_v45 = vmul.f32 0.5, %v1399_v53  ;;  %v1400_v46 = vadd.f32 1.0, %v2280_v21  ;;  %v1215_v49 = vadd.f32 %v1151_v52, %v3035_v16  ;;  %v1088_v48 = vmul.f32 %v1024_v37, %v3049_v40 }
 0x196   : > { %v2032_v42 = vpack.c.bf16 %v1526_v27, %v1525_v63  ;;  %v1465_v55 = vmul.f32 0.5, %v1401_v31  ;;  %2289 = vtanh.f32 %v1278_v38  ;;  %v1217_v57 = vadd.f32 %v1153_v32, %v3038_v30 }
 0x197   : > { %v1527_v2 = vmul.f32 %v1463_v45, %v2969_v62  ;;  %v1464_v59 = vmul.f32 0.5, %v1400_v46  ;;  %v1279_v56 = vmul.f32 0.7978846, %v1215_v49  ;;  %v1152_v22 = vmul.f32 0.044715, %v1088_v48 }
 0x198   : > { %v2282_v60 = vpop.eup %2281  ;;  %1760 = vst [vmem:[%s2728_s11 + $0xa8] sm:$0xff] %v2032_v42  ;;  %v1529_v61 = vmul.f32 %v1465_v55, %v2972_v11  ;;  %v1281_v51 = vmul.f32 0.7978846, %v1217_v57  ;;  %v3066_v5 = vadd.f32 %v958_v17, %v2605_v26  ;;  %v3069_v29 = vadd.f32 %v849_v41, %v2599_v23 }
 0x199   : > { %v1528_v8 = vmul.f32 %v1464_v59, %v2975_v33  ;;  %v1402_v63 = vadd.f32 1.0, %v2282_v60  ;;  %2291 = vtanh.f32 %v1279_v56  ;;  %v1216_v62 = vadd.f32 %v1152_v22, %v3049_v40  ;;  %v966_v56 = vpop.f32.mrf.mxu1 }
 0x19a   : > { %2293 = vtanh.f32 %v1281_v51  ;;  %v1026_v0 = vmul.f32 %v3066_v5, %v3066_v5  ;;  %v1027_v11 = vmul.f32 %v3069_v29, %v3069_v29  ;;  %v3078_v35 = vadd.f32 %v962_v1, %v2601_v24  ;;  %v855_v51 = vpop.f32.mrf.mxu0 }
 0x19b   : > { %v2284_v9 = vpop.eup %2283  ;;  %v2033_v4 = vpack.c.bf16 %v1528_v8, %v1527_v2  ;;  %v1466_v43 = vmul.f32 0.5, %v1402_v63  ;;  %v1280_v33 = vmul.f32 0.7978846, %v1216_v62  ;;  %v3081_v6 = vadd.f32 %v851_v58, %v2603_v25 }
 0x19c   : > { %v1403_v7 = vadd.f32 1.0, %v2284_v9  ;;  %v1090_v19 = vmul.f32 %v1026_v0, %v3066_v5  ;;  %v1091_v28 = vmul.f32 %v1027_v11, %v3069_v29  ;;  %v1029_v10 = vmul.f32 %v3078_v35, %v3078_v35 }
 0x19d   : > { %1761 = vst [vmem:[%s2728_s11 + $0xb0] sm:$0xff] %v2033_v4  ;;  %v1530_v12 = vmul.f32 %v1466_v43, %v2992_v50  ;;  %2295 = vtanh.f32 %v1280_v33  ;;  %v1028_v14 = vmul.f32 %v3081_v6, %v3081_v6  ;;  %v3092_v39 = vadd.f32 %v964_v3, %v2605_v26 }
 0x19e   : > { %v1467_v44 = vmul.f32 0.5, %v1403_v7  ;;  %v1154_v54 = vmul.f32 0.044715, %v1090_v19  ;;  %v1155_v37 = vmul.f32 0.044715, %v1091_v28  ;;  %v1093_v17 = vmul.f32 %v1029_v10, %v3078_v35 }
 0x19f   : > { %v2286_v18 = vpop.eup %2285  ;;  %v2034_v34 = vpack.c.bf16 %v1530_v12, %v1529_v61  ;;  %v1092_v53 = vmul.f32 %v1028_v14, %v3081_v6  ;;  %v1030_v50 = vmul.f32 %v3092_v39, %v3092_v39  ;;  %v3099_v52 = vadd.f32 %v853_v36, %v2599_v23 }
 0x1a0   : > { %v2288_v21 = vpop.eup %2287  ;;  %v1405_v27 = vadd.f32 1.0, %v2286_v18  ;;  %v1218_v31 = vadd.f32 %v1154_v54, %v3066_v5  ;;  %v1219_v38 = vadd.f32 %v1155_v37, %v3069_v29  ;;  %v1157_v41 = vmul.f32 0.044715, %v1093_v17 }
 0x1a1   : > { %1762 = vst [vmem:[%s2728_s11 + $0xb8] sm:$0xff] %v2034_v34  ;;  %v1404_v32 = vadd.f32 1.0, %v2288_v21  ;;  %v1156_v45 = vmul.f32 0.044715, %v1092_v53  ;;  %v1094_v46 = vmul.f32 %v1030_v50, %v3092_v39  ;;  %v1531_v49 = vmul.f32 %v1467_v44, %v3002_v13 }
 0x1a2   : > { %v1282_v48 = vmul.f32 0.7978846, %v1218_v31  ;;  %v1283_v42 = vmul.f32 0.7978846, %v1219_v38  ;;  %v1031_v23 = vmul.f32 %v3099_v52, %v3099_v52  ;;  %v1221_v1 = vadd.f32 %v1157_v41, %v3078_v35 }
 0x1a3   : > { %v2290_v55 = vpop.eup %2289  ;;  %v1468_v57 = vmul.f32 0.5, %v1404_v32  ;;  %v1220_v2 = vadd.f32 %v1156_v45, %v3081_v6  ;;  %v1158_v59 = vmul.f32 0.044715, %v1094_v46  ;;  %v1469_v22 = vmul.f32 0.5, %v1405_v27 }
 0x1a4   : > { %v1406_v60 = vadd.f32 1.0, %v2290_v55  ;;  %2297 = vtanh.f32 %v1282_v48  ;;  %v1095_v61 = vmul.f32 %v1031_v23, %v3099_v52  ;;  %v1285_v58 = vmul.f32 0.7978846, %v1221_v1 }
 0x1a5   : > { %v1532_v13 = vmul.f32 %v1468_v57, %v3014_v20  ;;  %2299 = vtanh.f32 %v1283_v42  ;;  %v1284_v8 = vmul.f32 0.7978846, %v1220_v2  ;;  %v1222_v0 = vadd.f32 %v1158_v59, %v3092_v39  ;;  %v968_v20 = vpop.f32.mrf.mxu1 }
 0x1a6   : > { %v2292_v63 = vpop.eup %2291  ;;  %v1470_v62 = vmul.f32 0.5, %v1406_v60  ;;  %v1159_v11 = vmul.f32 0.044715, %v1095_v61  ;;  %v3114_v3 = vadd.f32 %v966_v56, %v2601_v24  ;;  %2301 = vtanh.f32 %v1285_v58 }
 0x1a7   : > { %v2294_v9 = vpop.eup %2293  ;;  %v2035_v4 = vpack.c.bf16 %v1532_v13, %v1531_v49  ;;  %v1407_v43 = vadd.f32 1.0, %v2292_v63  ;;  %v3117_v33 = vadd.f32 %v855_v51, %v2603_v25  ;;  %v1533_v7 = vmul.f32 %v1469_v22, %v3010_v15 }
 0x1a8   : > { %v1534_v19 = vmul.f32 %v1470_v62, %v3024_v47  ;;  %2303 = vtanh.f32 %v1284_v8  ;;  %v1286_v28 = vmul.f32 0.7978846, %v1222_v0  ;;  %v1223_v10 = vadd.f32 %v1159_v11, %v3099_v52 }
 0x1a9   : > { %1763 = vst [vmem:[%s2728_s11 + $0xc0] sm:$0xff] %v2035_v4  ;;  %v1033_v24 = vmul.f32 %v3114_v3, %v3114_v3  ;;  %v1032_v36 = vmul.f32 %v3117_v33, %v3117_v33  ;;  %v3128_v14 = vadd.f32 %v968_v20, %v2605_v26  ;;  %v1471_v15 = vmul.f32 0.5, %v1407_v43 }
 0x1aa   : > { %v2296_v12 = vpop.eup %2295  ;;  %v2036_v25 = vpack.c.bf16 %v1534_v19, %v1533_v7  ;;  %2305 = vtanh.f32 %v1286_v28  ;;  %v1287_v47 = vmul.f32 0.7978846, %v1223_v10  ;;  %v1409_v18 = vadd.f32 1.0, %v2294_v9 }
 0x1ab   : > { %v1408_v44 = vadd.f32 1.0, %v2296_v12  ;;  %v1097_v54 = vmul.f32 %v1033_v24, %v3114_v3  ;;  %v1096_v37 = vmul.f32 %v1032_v36, %v3117_v33  ;;  %v1034_v17 = vmul.f32 %v3128_v14, %v3128_v14 }
 0x1ac   : > { %1764 = vst [vmem:[%s2728_s11 + $0xc8] sm:$0xff] %v2036_v25  ;;  %2307 = vtanh.f32 %v1287_v47  ;;  %v1535_v21 = vmul.f32 %v1471_v15, %v3035_v16  ;;  %v1473_v45 = vmul.f32 0.5, %v1409_v18 }
 0x1ad   : > { %v1472_v34 = vmul.f32 0.5, %v1408_v44  ;;  %v1161_v53 = vmul.f32 0.044715, %v1097_v54  ;;  %v1160_v50 = vmul.f32 0.044715, %v1096_v37  ;;  %v1098_v26 = vmul.f32 %v1034_v17, %v3128_v14 }
 0x1ae   : > { %v1537_v59 = vmul.f32 %v1473_v45, %v3038_v30 }
 0x1af   : > { %v1536_v27 = vmul.f32 %v1472_v34, %v3049_v40  ;;  %v1225_v31 = vadd.f32 %v1161_v53, %v3114_v3  ;;  %v1224_v38 = vadd.f32 %v1160_v50, %v3117_v33  ;;  %v1162_v32 = vmul.f32 0.044715, %v1098_v26 }
 0x1b1   : > { %v2298_v41 = vpop.eup %2297  ;;  %v2037_v46 = vpack.c.bf16 %v1536_v27, %v1535_v21  ;;  %v1289_v49 = vmul.f32 0.7978846, %v1225_v31  ;;  %v1288_v23 = vmul.f32 0.7978846, %v1224_v38  ;;  %v1226_v55 = vadd.f32 %v1162_v32, %v3128_v14 }
 0x1b2   : > { %v2300_v48 = vpop.eup %2299  ;;  %v1410_v42 = vadd.f32 1.0, %v2298_v41 }
 0x1b3   : > { %1765 = vst [vmem:[%s2728_s11 + $0xd0] sm:$0xff] %v2037_v46  ;;  %v1411_v57 = vadd.f32 1.0, %v2300_v48  ;;  %2309 = vtanh.f32 %v1289_v49  ;;  %v2302_v16 = vpop.eup %2301  ;;  %v1290_v1 = vmul.f32 0.7978846, %v1226_v55 }
 0x1b4   : > { %v1474_v40 = vmul.f32 0.5, %v1410_v42  ;;  %2311 = vtanh.f32 %v1288_v23  ;;  %v1413_v56 = vadd.f32 1.0, %v2302_v16 }
 0x1b5   : > { %v2304_v2 = vpop.eup %2303  ;;  %v1475_v60 = vmul.f32 0.5, %v1411_v57  ;;  %2313 = vtanh.f32 %v1290_v1 }
 0x1b6   : > { %v1538_v22 = vmul.f32 %v1474_v40, %v3066_v5  ;;  %v1412_v61 = vadd.f32 1.0, %v2304_v2  ;;  %v1477_v58 = vmul.f32 0.5, %v1413_v56 }
 0x1b7   : > { %v2306_v51 = vpop.eup %2305  ;;  %v1539_v62 = vmul.f32 %v1475_v60, %v3069_v29 }
 0x1b8   : > { %v2038_v13 = vpack.c.bf16 %v1538_v22, %v1537_v59  ;;  %v1476_v8 = vmul.f32 0.5, %v1412_v61  ;;  %v1414_v63 = vadd.f32 1.0, %v2306_v51  ;;  %v1541_v9 = vmul.f32 %v1477_v58, %v3078_v35 }
 0x1b9   : > { %v2308_v30 = vpop.eup %2307 }
 0x1ba   : > { %1766 = vst [vmem:[%s2728_s11 + $0xd8] sm:$0xff] %v2038_v13  ;;  %v1540_v0 = vmul.f32 %v1476_v8, %v3081_v6  ;;  %v1478_v11 = vmul.f32 0.5, %v1414_v63  ;;  %v1415_v20 = vadd.f32 1.0, %v2308_v30 }
 0x1bc   : > { %v2039_v5 = vpack.c.bf16 %v1540_v0, %v1539_v62  ;;  %v1542_v4 = vmul.f32 %v1478_v11, %v3092_v39  ;;  %v1479_v10 = vmul.f32 0.5, %v1415_v20 }
 0x1be   : > { %1767 = vst [vmem:[%s2728_s11 + $0xe0] sm:$0xff] %v2039_v5  ;;  %v2040_v43 = vpack.c.bf16 %v1542_v4, %v1541_v9  ;;  %v1543_v35 = vmul.f32 %v1479_v10, %v3099_v52 }
 0x1c0   : > { %v2310_v7 = vpop.eup %2309  ;;  %1768 = vst [vmem:[%s2728_s11 + $0xe8] sm:$0xff] %v2040_v43 }
 0x1c1   : > { %v2312_v19 = vpop.eup %2311  ;;  %v1417_v28 = vadd.f32 1.0, %v2310_v7 }
 0x1c2   : > { %v1416_v29 = vadd.f32 1.0, %v2312_v19  ;;  %v2314_v24 = vpop.eup %2313 }
 0x1c3   : > { %v1481_v6 = vmul.f32 0.5, %v1417_v28  ;;  %v1418_v12 = vadd.f32 1.0, %v2314_v24 }
 0x1c4   : > { %v1480_v36 = vmul.f32 0.5, %v1416_v29 }
 0x1c5   : > { %v1482_v39 = vmul.f32 0.5, %v1418_v12  ;;  %v1545_v15 = vmul.f32 %v1481_v6, %v3114_v3 }
 0x1c6   : > { %v1544_v25 = vmul.f32 %v1480_v36, %v3117_v33 }
 0x1c7   : > { %v1546_v47 = vmul.f32 %v1482_v39, %v3128_v14 }
 0x1c8   : > { %v2041_v44 = vpack.c.bf16 %v1544_v25, %v1543_v35 }
 0x1c9   : > { %v2042_v54 = vpack.c.bf16 %v1546_v47, %v1545_v15 }
 0x1ca   : > { %1769 = vst [vmem:[%s2728_s11 + $0xf0] sm:$0xff] %v2041_v44 }
 0x1cb   : > { %1770 = vst [vmem:[%s2728_s11 + $0xf8] sm:$0xff] %v2042_v54 }
 0x1cc PF: > { %s13_s14 = sadd.s32 1, %s2337_s14   ;;  %s3170_s12 = smov %s2333_s13 }
 0x1cd   : > { %p10_p5 = scmp.ge.s32.totalorder %s13_s14, 4   ;;  %s3171_s13 = smov %s3173_s15 }
 0x1cf   :  { %12 = sbr.rel (!%p10_p5) target bundleno = 2 (0x2), region = 68 }

// kernel: classifier_forward.17
= control target key start
LH: loop header
LB: loop body
LE: loop exit
PB: predicated region body
PF: predicated region fallthrough
CT: control target
= control target key end

     0   :  { %s2080_s21 = smov 0   ;;  %s2787_s0 = inlined_call_operand.vmem [shape: bf16[256,512], index: 0, kind: input, shape index: {}]   ;;  %s2788_s1 = inlined_call_operand.vmem [shape: bf16[512,256], index: 1, kind: input, shape index: {}]   ;;  %s2789_s2 = inlined_call_operand.vmem [shape: f32[1,256], index: 2, kind: input, shape index: {}]   ;;  %s2790_s3 = inlined_call_operand.vmem [shape: bf16[256,256], index: 3, kind: input, shape index: {}]   ;;  %s2791_s4 = inlined_call_operand.vmem [shape: f32[1,256], index: 4, kind: input, shape index: {}]   ;;  %s2792_s5 = inlined_call_operand.vmem [shape: f32[1,256], index: 5, kind: input, shape index: {}]   ;;  %s2793_s6 = inlined_call_operand.vmem [shape: bf16[256,256], index: 6, kind: output, shape index: {}]  }
   0x1 LB: > { %s1706_s22 = sadd.s32 4294967295, %s2043_s21   ;;  %p1710_p0 = scmp.ge.s32.totalorder %s2043_s21, 1  ;;  %s2043_s21 = sphi %s2080_s21, %s16_s21  }
   0x2   : > { %p226_p1 = scmp.lt.s32.totalorder %s2043_s21, 3 }
   0x4   : > { %p227_p2 = pnand %p1710_p0, %p226_p1 }
   0x5   : > { %s1711_s15 = sshll.u32 (!%p227_p2), %s1706_s22, 4 }
   0x6   : > { %230 = sbr.rel (%p227_p2) target bundleno = 651 (0x28b), region = 44  ;;  %p265_p3 = scmp.lt.s32.totalorder (!%p227_p2), %s1711_s15, 31 }
   0xb   : > { %v1861_v0 = vld [vmem:[%s2788_s1 + $0x74] ss:$8 sps:$4 sm:$0xff]   ;;  %v1865_v2 = vld [vmem:[%s2788_s1 + $0x70] ss:$8 sps:$4 sm:$0xff]   ;;  %v1867_v4 = vld [vmem:[%s2788_s1 + $0x64] ss:$8 sps:$4 sm:$0xff]  }
   0xc   : > { %v1863_v1 = vld [vmem:[%s2788_s1 + $0x174] ss:$8 sps:$4 sm:$0xff]   ;;  %873 = vmatprep.subr.bf16.mxu0 %v1861_v0  ;;  %v1866_v3 = vld [vmem:[%s2788_s1 + $0x170] ss:$8 sps:$4 sm:$0xff]   ;;  %v1869_v5 = vld [vmem:[%s2788_s1 + $0x164] ss:$8 sps:$4 sm:$0xff]  }
   0xd   : > { %986 = vmatprep.subr.bf16.mxu1 %v1863_v1  ;;  %874 = vmatpush1.bf16.msra.mxu0 %v1865_v2  ;;  %v1871_v6 = vld [vmem:[%s2788_s1 + $0x60] ss:$8 sps:$4 sm:$0xff]   ;;  %v1873_v8 = vld [vmem:[%s2788_s1 + $0x54] ss:$8 sps:$4 sm:$0xff]   ;;  %v1877_v10 = vld [vmem:[%s2788_s1 + $0x50] ss:$8 sps:$4 sm:$0xff]  }
   0xe   : > { %987 = vmatpush1.bf16.msra.mxu1 %v1866_v3  ;;  %875 = vmatprep.subr.bf16.mxu0 %v1867_v4  ;;  %v1872_v7 = vld [vmem:[%s2788_s1 + $0x160] ss:$8 sps:$4 sm:$0xff]   ;;  %v1875_v9 = vld [vmem:[%s2788_s1 + $0x154] ss:$8 sps:$4 sm:$0xff]   ;;  %v1878_v11 = vld [vmem:[%s2788_s1 + $0x150] ss:$8 sps:$4 sm:$0xff]  }
   0xf   : > { %988 = vmatprep.subr.bf16.mxu1 %v1869_v5  ;;  %v1879_v12 = vld [vmem:[%s2788_s1 + $0x44] ss:$8 sps:$4 sm:$0xff]   ;;  %v1883_v14 = vld [vmem:[%s2788_s1 + $0x40] ss:$8 sps:$4 sm:$0xff]   ;;  %v1885_v16 = vld [vmem:[%s2788_s1 + $0x34] ss:$8 sps:$4 sm:$0xff]  }
  0x10   : > { %v1881_v13 = vld [vmem:[%s2788_s1 + $0x144] ss:$8 sps:$4 sm:$0xff]   ;;  %v1884_v15 = vld [vmem:[%s2788_s1 + $0x140] ss:$8 sps:$4 sm:$0xff]   ;;  %v1887_v17 = vld [vmem:[%s2788_s1 + $0x134] ss:$8 sps:$4 sm:$0xff]  }
  0x11   : > { %876 = vmatpush1.bf16.msra.mxu0 %v1871_v6  ;;  %v1889_v18 = vld [vmem:[%s2788_s1 + $0x30] ss:$8 sps:$4 sm:$0xff]   ;;  %v1891_v20 = vld [vmem:[%s2788_s1 + $0x24] ss:$8 sps:$4 sm:$0xff]   ;;  %v1895_v22 = vld [vmem:[%s2788_s1 + $0x20] ss:$8 sps:$4 sm:$0xff]  }
  0x12   : > { %989 = vmatpush1.bf16.msra.mxu1 %v1872_v7  ;;  %877 = vmatprep.subr.bf16.mxu0 %v1873_v8  ;;  %v1890_v19 = vld [vmem:[%s2788_s1 + $0x130] ss:$8 sps:$4 sm:$0xff]   ;;  %v1893_v21 = vld [vmem:[%s2788_s1 + $0x124] ss:$8 sps:$4 sm:$0xff]   ;;  %v1896_v23 = vld [vmem:[%s2788_s1 + $0x120] ss:$8 sps:$4 sm:$0xff]  }
  0x13   : > { %990 = vmatprep.subr.bf16.mxu1 %v1875_v9  ;;  %v1897_v24 = vld [vmem:[%s2788_s1 + $0x14] ss:$8 sps:$4 sm:$0xff]   ;;  %v1901_v26 = vld [vmem:[%s2788_s1 + $0x10] ss:$8 sps:$4 sm:$0xff]   ;;  %v1903_v28 = vld [vmem:[%s2788_s1 + $0x4] ss:$8 sps:$4 sm:$0xff]  }
  0x14   : > { %v1899_v25 = vld [vmem:[%s2788_s1 + $0x114] ss:$8 sps:$4 sm:$0xff]   ;;  %v1902_v27 = vld [vmem:[%s2788_s1 + $0x110] ss:$8 sps:$4 sm:$0xff]   ;;  %v1905_v29 = vld [vmem:[%s2788_s1 + $0x104] ss:$8 sps:$4 sm:$0xff]  }
  0x15   : > { %878 = vmatpush1.bf16.msra.mxu0 %v1877_v10  ;;  %v1907_v30 = vld [vmem:[%s2788_s1] ss:$8 sps:$4 sm:$0xff]   ;;  %v1909_v32 = vld [vmem:[%s2788_s1 + $0xf4] ss:$8 sps:$4 sm:$0xff]   ;;  %v1913_v34 = vld [vmem:[%s2788_s1 + $0xf0] ss:$8 sps:$4 sm:$0xff]  }
  0x16   : > { %991 = vmatpush1.bf16.msra.mxu1 %v1878_v11  ;;  %879 = vmatprep.subr.bf16.mxu0 %v1879_v12  ;;  %v1908_v31 = vld [vmem:[%s2788_s1 + $0x100] ss:$8 sps:$4 sm:$0xff]   ;;  %v1911_v33 = vld [vmem:[%s2788_s1 + $0x1f4] ss:$8 sps:$4 sm:$0xff]   ;;  %v1914_v35 = vld [vmem:[%s2788_s1 + $0x1f0] ss:$8 sps:$4 sm:$0xff]  }
  0x17   : > { %992 = vmatprep.subr.bf16.mxu1 %v1881_v13  ;;  %v1915_v36 = vld [vmem:[%s2788_s1 + $0xe4] ss:$8 sps:$4 sm:$0xff]   ;;  %s2795_s15 = smov (!%p265_p3, %s1711_s15), 31  ;;  %v1919_v38 = vld [vmem:[%s2788_s1 + $0xe0] ss:$8 sps:$4 sm:$0xff]  }
  0x18   : > { %v1917_v37 = vld [vmem:[%s2788_s1 + $0x1e4] ss:$8 sps:$4 sm:$0xff]   ;;  %v1920_v39 = vld [vmem:[%s2788_s1 + $0x1e0] ss:$8 sps:$4 sm:$0xff]   ;;  %v1921_v40 = vld [vmem:[%s2788_s1 + $0xd4] ss:$8 sps:$4 sm:$0xff]  }
  0x19   : > { %880 = vmatpush1.bf16.msra.mxu0 %v1883_v14  ;;  %v1923_v41 = vld [vmem:[%s2788_s1 + $0x1d4] ss:$8 sps:$4 sm:$0xff]   ;;  %s1834_s18 = sshll.u32 %s2795_s15, 4  ;;  %v1925_v42 = vld [vmem:[%s2788_s1 + $0xd0] ss:$8 sps:$4 sm:$0xff]   ;;  %s1835_s26 = sshll.u32 %s2795_s15, 3 }
  0x1a   : > { %993 = vmatpush1.bf16.msra.mxu1 %v1884_v15  ;;  %881 = vmatprep.subr.bf16.mxu0 %v1885_v16  ;;  %v1926_v43 = vld [vmem:[%s2788_s1 + $0x1d0] ss:$8 sps:$4 sm:$0xff]   ;;  %v1927_v44 = vld [vmem:[%s2788_s1 + $0xc4] ss:$8 sps:$4 sm:$0xff]   ;;  %s2231_s28 = scalar_lea.vmem %s2787_s0, %s1834_s18  ;;  %v1931_v46 = vld [vmem:[%s2788_s1 + $0xc0] ss:$8 sps:$4 sm:$0xff]   ;;  %s2678_s12 = scalar_lea.vmem %s2793_s6, %s1835_s26 }
  0x1b   : > { %994 = vmatprep.subr.bf16.mxu1 %v1887_v17  ;;  %v1929_v45 = vld [vmem:[%s2788_s1 + $0x1c4] ss:$8 sps:$4 sm:$0xff]   ;;  %v1932_v47 = vld [vmem:[%s2788_s1 + $0x1c0] ss:$8 sps:$4 sm:$0xff]   ;;  %v1933_v48 = vld [vmem:[%s2788_s1 + $0xb4] ss:$8 sps:$4 sm:$0xff]  }
  0x1c   : > { %v1959_v49 = vld [vmem:[%s2231_s28 + $0x4] ss:$16 sps:$4 sm:$0xff]   ;;  %v1962_v51 = vld [vmem:[%s2231_s28 + $0xc] ss:$16 sps:$4 sm:$0xff]   ;;  %v1937_v52 = vld [vmem:[%s2788_s1 + $0xb0] ss:$8 sps:$4 sm:$0xff]  }
  0x1d   : > { %882 = vmatpush1.bf16.msra.mxu0 %v1889_v18  ;;  %v1935_v50 = vld [vmem:[%s2788_s1 + $0x1b4] ss:$8 sps:$4 sm:$0xff]   ;;  %905 = vmatprep.mubr.bf16.mxu0 %v1959_v49  ;;  %v1938_v53 = vld [vmem:[%s2788_s1 + $0x1b0] ss:$8 sps:$4 sm:$0xff]   ;;  %v1939_v54 = vld [vmem:[%s2788_s1 + $0xa4] ss:$8 sps:$4 sm:$0xff]  }
  0x1e   : > { %995 = vmatpush1.bf16.msra.mxu1 %v1890_v19  ;;  %883 = vmatprep.subr.bf16.mxu0 %v1891_v20  ;;  %v1941_v55 = vld [vmem:[%s2788_s1 + $0x1a4] ss:$8 sps:$4 sm:$0xff]   ;;  %v1943_v56 = vld [vmem:[%s2788_s1 + $0xa0] ss:$8 sps:$4 sm:$0xff]   ;;  %v1945_v58 = vld [vmem:[%s2788_s1 + $0x94] ss:$8 sps:$4 sm:$0xff]  }
  0x1f   : > { %996 = vmatprep.subr.bf16.mxu1 %v1893_v21  ;;  %1018 = vmatprep.mubr.bf16.mxu1 %v1962_v51  ;;  %v1944_v57 = vld [vmem:[%s2788_s1 + $0x1a0] ss:$8 sps:$4 sm:$0xff]   ;;  %v1947_v59 = vld [vmem:[%s2788_s1 + $0x194] ss:$8 sps:$4 sm:$0xff]   ;;  %v1949_v60 = vld [vmem:[%s2788_s1 + $0x90] ss:$8 sps:$4 sm:$0xff]  }
  0x20   : > { %v1950_v61 = vld [vmem:[%s2788_s1 + $0x190] ss:$8 sps:$4 sm:$0xff]   ;;  %v1951_v62 = vld [vmem:[%s2788_s1 + $0x84] ss:$8 sps:$4 sm:$0xff]   ;;  %v1955_v0 = vld [vmem:[%s2788_s1 + $0x80] ss:$8 sps:$4 sm:$0xff]  }
  0x21   : > { %884 = vmatpush1.bf16.msra.mxu0 %v1895_v22  ;;  %v1953_v63 = vld [vmem:[%s2788_s1 + $0x184] ss:$8 sps:$4 sm:$0xff]   ;;  %v1956_v1 = vld [vmem:[%s2788_s1 + $0x180] ss:$8 sps:$4 sm:$0xff]  }
  0x22   : > { %997 = vmatpush1.bf16.msra.mxu1 %v1896_v23  ;;  %885 = vmatprep.subr.bf16.mxu0 %v1897_v24  ;;  %v1957_v2 = vld [vmem:[%s2231_s28] ss:$16 sps:$4 sm:$0xff]   ;;  %v1960_v3 = vld [vmem:[%s2231_s28 + $0x8] ss:$16 sps:$4 sm:$0xff]   ;;  %v1963_v4 = vld [vmem:[%s2231_s28 + $0x24] ss:$16 sps:$4 sm:$0xff]  }
  0x23   : > { %998 = vmatprep.subr.bf16.mxu1 %v1899_v25  ;;  %v1965_v5 = vld [vmem:[%s2231_s28 + $0x2c] ss:$16 sps:$4 sm:$0xff]   ;;  %v1967_v6 = vld [vmem:[%s2231_s28 + $0x20] ss:$16 sps:$4 sm:$0xff]   ;;  %v1968_v7 = vld [vmem:[%s2231_s28 + $0x28] ss:$16 sps:$4 sm:$0xff]  }
  0x24   : > { %v1969_v8 = vld [vmem:[%s2231_s28 + $0x44] ss:$16 sps:$4 sm:$0xff]   ;;  %v1971_v9 = vld [vmem:[%s2231_s28 + $0x4c] ss:$16 sps:$4 sm:$0xff]   ;;  %v1973_v10 = vld [vmem:[%s2231_s28 + $0x40] ss:$16 sps:$4 sm:$0xff]  }
  0x25   : > { %886 = vmatpush1.bf16.msra.mxu0 %v1901_v26  ;;  %v1974_v11 = vld [vmem:[%s2231_s28 + $0x48] ss:$16 sps:$4 sm:$0xff]   ;;  %v1975_v12 = vld [vmem:[%s2231_s28 + $0x64] ss:$16 sps:$4 sm:$0xff]   ;;  %v1977_v13 = vld [vmem:[%s2231_s28 + $0x6c] ss:$16 sps:$4 sm:$0xff]  }
  0x26   : > { %999 = vmatpush1.bf16.msra.mxu1 %v1902_v27  ;;  %887 = vmatprep.subr.bf16.mxu0 %v1903_v28  ;;  %v1979_v14 = vld [vmem:[%s2231_s28 + $0x60] ss:$16 sps:$4 sm:$0xff]   ;;  %v1980_v15 = vld [vmem:[%s2231_s28 + $0x68] ss:$16 sps:$4 sm:$0xff]   ;;  %v1981_v16 = vld [vmem:[%s2231_s28 + $0x84] ss:$16 sps:$4 sm:$0xff]  }
  0x27   : > { %1000 = vmatprep.subr.bf16.mxu1 %v1905_v29  ;;  %v1983_v17 = vld [vmem:[%s2231_s28 + $0x8c] ss:$16 sps:$4 sm:$0xff]   ;;  %v1985_v18 = vld [vmem:[%s2231_s28 + $0x80] ss:$16 sps:$4 sm:$0xff]   ;;  %v1986_v19 = vld [vmem:[%s2231_s28 + $0x88] ss:$16 sps:$4 sm:$0xff]  }
  0x28   : > { %v1987_v20 = vld [vmem:[%s2231_s28 + $0xa4] ss:$16 sps:$4 sm:$0xff]   ;;  %v1989_v21 = vld [vmem:[%s2231_s28 + $0xac] ss:$16 sps:$4 sm:$0xff]   ;;  %v1991_v22 = vld [vmem:[%s2231_s28 + $0xa0] ss:$16 sps:$4 sm:$0xff]  }
  0x29   : > { %888 = vmatpush1.bf16.msra.mxu0 %v1907_v30  ;;  %v1992_v23 = vld [vmem:[%s2231_s28 + $0xa8] ss:$16 sps:$4 sm:$0xff]   ;;  %v1993_v24 = vld [vmem:[%s2231_s28 + $0xc4] ss:$16 sps:$4 sm:$0xff]   ;;  %v1995_v25 = vld [vmem:[%s2231_s28 + $0xcc] ss:$16 sps:$4 sm:$0xff]  }
  0x2a   : > { %1001 = vmatpush1.bf16.msra.mxu1 %v1908_v31  ;;  %889 = vmatprep.subr.bf16.mxu0 %v1909_v32  ;;  %v1997_v26 = vld [vmem:[%s2231_s28 + $0xc0] ss:$16 sps:$4 sm:$0xff]   ;;  %v1998_v27 = vld [vmem:[%s2231_s28 + $0xc8] ss:$16 sps:$4 sm:$0xff]   ;;  %v1999_v28 = vld [vmem:[%s2231_s28 + $0xe4] ss:$16 sps:$4 sm:$0xff]   ;;  %v383_v32 = vlaneseq }
  0x2b   : > { %1002 = vmatprep.subr.bf16.mxu1 %v1911_v33  ;;  %v2001_v29 = vld [vmem:[%s2231_s28 + $0xec] ss:$16 sps:$4 sm:$0xff]   ;;  %v2003_v30 = vld [vmem:[%s2231_s28 + $0xe0] ss:$16 sps:$4 sm:$0xff]   ;;  %v2004_v31 = vld [vmem:[%s2231_s28 + $0xe8] ss:$16 sps:$4 sm:$0xff]   ;;  %s2338_s28 = scalar_lea.vmem %s2790_s3, %s1835_s26 }
  0x2c   : > { %v384_v33 = vshrl.u32 %v383_v32, 7 }
  0x2d   : > { %890 = vmatpush2.bf16.msra.mxu0 %v1913_v34 }
  0x2e   : > { %1003 = vmatpush2.bf16.msra.mxu1 %v1914_v35  ;;  %891 = vmatprep.subr.bf16.mxu0 %v1915_v36  ;;  %v2322_v34 = vsub.s32 0, %v384_v33  ;;  %v381_v35 = vld [vmem:[%s2789_s2] sm:$0x3]  ;;  %v2328_v36 = vsub.s32 1, %v384_v33 }
  0x2f   : > { %1004 = vmatprep.subr.bf16.mxu1 %v1917_v37 }
  0x30   : > { %v2331_v37 = vrot.slane %v381_v35, %v2322_v34 }
  0x31   : > { %892 = vmatpush2.bf16.msra.mxu0 %v1919_v38  ;;  %v2341_v38 = vrot.slane %v381_v35, %v2328_v36 }
  0x32   : > { %1005 = vmatpush2.bf16.msra.mxu1 %v1920_v39  ;;  %893 = vmatprep.subr.bf16.mxu0 %v1921_v40 }
  0x33   : > { %1006 = vmatprep.subr.bf16.mxu1 %v1923_v41  ;;  %v1099_v41 = vld [vmem:[%s2338_s28] sm:$0xff] }
  0x34   : > { %v1118_v49 = vunpack.c.h.bf16 %v1099_v41 }
  0x35   : > { %894 = vmatpush2.bf16.msra.mxu0 %v1925_v42 }
  0x36   : > { %1007 = vmatpush2.bf16.msra.mxu1 %v1926_v43  ;;  %895 = vmatprep.subr.bf16.mxu0 %v1927_v44 }
  0x37   : > { %1008 = vmatprep.subr.bf16.mxu1 %v1929_v45 }
  0x39   : > { %896 = vmatpush2.bf16.msra.mxu0 %v1931_v46 }
  0x3a   : > { %1009 = vmatpush2.bf16.msra.mxu1 %v1932_v47  ;;  %897 = vmatprep.subr.bf16.mxu0 %v1933_v48  ;;  %v1100_v47 = vld [vmem:[%s2338_s28 + $0x8] sm:$0xff]  ;;  %v1117_v48 = vunpack.c.l.bf16 %v1099_v41 }
  0x3b   : > { %1010 = vmatprep.subr.bf16.mxu1 %v1935_v50 }
  0x3d   : > { %898 = vmatpush2.bf16.msra.mxu0 %v1937_v52 }
  0x3e   : > { %1011 = vmatpush2.bf16.msra.mxu1 %v1938_v53  ;;  %899 = vmatprep.subr.bf16.mxu0 %v1939_v54  ;;  %v1119_v54 = vunpack.c.l.bf16 %v1100_v47 }
  0x3f   : > { %1012 = vmatprep.subr.bf16.mxu1 %v1941_v55 }
  0x41   : > { %900 = vmatpush2.bf16.msra.mxu0 %v1943_v56 }
  0x42   : > { %1013 = vmatpush2.bf16.msra.mxu1 %v1944_v57  ;;  %901 = vmatprep.subr.bf16.mxu0 %v1945_v58  ;;  %v1120_v57 = vunpack.c.h.bf16 %v1100_v47 }
  0x43   : > { %1014 = vmatprep.subr.bf16.mxu1 %v1947_v59 }
  0x45   : > { %902 = vmatpush2.bf16.msra.mxu0 %v1949_v60 }
  0x46   : > { %1015 = vmatpush2.bf16.msra.mxu1 %v1950_v61  ;;  %903 = vmatprep.subr.bf16.mxu0 %v1951_v62  ;;  %v1101_v62 = vld [vmem:[%s2338_s28 + $0x10] sm:$0xff] }
  0x47   : > { %1016 = vmatprep.subr.bf16.mxu1 %v1953_v63 }
  0x49   : > { %904 = vmatpush2.bf16.msra.mxu0 %v1955_v0 }
  0x4a   : > { %1017 = vmatpush2.bf16.msra.mxu1 %v1956_v1 }
  0x4c   : > { %906 = vmatmul.mubr.bf16.vlgmr.msra.gmra.mxu0 %v1957_v2 }
  0x4d   : > { %1019 = vmatmul.mubr.bf16.vlgmr.msra.gmra.mxu1 %v1960_v3  ;;  %915 = vmatprep.mubr.bf16.mxu0 %v1963_v4 }
  0x4e   : > { %1028 = vmatprep.mubr.bf16.mxu1 %v1965_v5 }
  0x54   : > { %916 = vmatmul.mubr.bf16.gmra.mxu0 %v1967_v6  ;;  %v1121_v6 = vunpack.c.l.bf16 %v1101_v62 }
  0x55   : > { %1029 = vmatmul.mubr.bf16.gmra.mxu1 %v1968_v7  ;;  %925 = vmatprep.mubr.bf16.mxu0 %v1969_v8  ;;  %v1122_v7 = vunpack.c.h.bf16 %v1101_v62 }
  0x56   : > { %1038 = vmatprep.mubr.bf16.mxu1 %v1971_v9 }
  0x5c   : > { %926 = vmatmul.mubr.bf16.gmra.mxu0 %v1973_v10 }
  0x5d   : > { %1039 = vmatmul.mubr.bf16.gmra.mxu1 %v1974_v11  ;;  %935 = vmatprep.mubr.bf16.mxu0 %v1975_v12  ;;  %v1102_v12 = vld [vmem:[%s2338_s28 + $0x18] sm:$0xff] }
  0x5e   : > { %1048 = vmatprep.mubr.bf16.mxu1 %v1977_v13 }
  0x64   : > { %936 = vmatmul.mubr.bf16.gmra.mxu0 %v1979_v14 }
  0x65   : > { %1049 = vmatmul.mubr.bf16.gmra.mxu1 %v1980_v15  ;;  %945 = vmatprep.mubr.bf16.mxu0 %v1981_v16 }
  0x66   : > { %1058 = vmatprep.mubr.bf16.mxu1 %v1983_v17 }
  0x6c   : > { %946 = vmatmul.mubr.bf16.gmra.mxu0 %v1985_v18  ;;  %v1123_v18 = vunpack.c.l.bf16 %v1102_v12 }
  0x6d   : > { %1059 = vmatmul.mubr.bf16.gmra.mxu1 %v1986_v19  ;;  %955 = vmatprep.mubr.bf16.mxu0 %v1987_v20 }
  0x6e   : > { %1068 = vmatprep.mubr.bf16.mxu1 %v1989_v21  ;;  %v1124_v21 = vunpack.c.h.bf16 %v1102_v12  ;;  %v1106_v12 = vld [vmem:[%s2338_s28 + $0x38] sm:$0xff] }
  0x74   : > { %956 = vmatmul.mubr.bf16.gmra.mxu0 %v1991_v22 }
  0x75   : > { %1069 = vmatmul.mubr.bf16.gmra.mxu1 %v1992_v23  ;;  %965 = vmatprep.mubr.bf16.mxu0 %v1993_v24  ;;  %v1103_v24 = vld [vmem:[%s2338_s28 + $0x20] sm:$0xff] }
  0x76   : > { %1078 = vmatprep.mubr.bf16.mxu1 %v1995_v25  ;;  %v1125_v32 = vunpack.c.l.bf16 %v1103_v24 }
  0x7c   : > { %966 = vmatmul.mubr.bf16.gmra.mxu0 %v1997_v26 }
  0x7d   : > { %1079 = vmatmul.mubr.bf16.gmra.mxu1 %v1998_v27  ;;  %975 = vmatprep.mubr.bf16.mxu0 %v1999_v28 }
  0x7e   : > { %1088 = vmatprep.mubr.bf16.mxu1 %v2001_v29 }
  0x84   : > { %976 = vmatmul.mubr.bf16.gmra.mxu0 %v2003_v30 }
  0x85   : > { %1089 = vmatmul.mubr.bf16.gmra.mxu1 %v2004_v31 }
 0x10c   : > { %v907_v39 = vpop.f32.mrf.mxu0 }
 0x10d   : > { %v1020_v40 = vpop.f32.mrf.mxu1  ;;  %v908_v42 = vadd.f32 %v907_v39, %v2331_v37  ;;  %v1126_v39 = vunpack.c.h.bf16 %v1103_v24 }
 0x10e   : > { %v909_v43 = vpop.f32.mrf.mxu0 }
 0x10f   : > { %v1022_v44 = vpop.f32.mrf.mxu1  ;;  %v1021_v45 = vadd.f32 %v1020_v40, %v908_v42  ;;  %v910_v46 = vadd.f32 %v909_v43, %v2341_v38 }
 0x110   : > { %v911_v50 = vpop.f32.mrf.mxu0 }
 0x111   : > { %v1024_v51 = vpop.f32.mrf.mxu1  ;;  %v1023_v52 = vadd.f32 %v1022_v44, %v910_v46  ;;  %v912_v53 = vadd.f32 %v911_v50, %v2331_v37  ;;  %v2349_v60 = vadd.f32 %v1117_v48, %v1021_v45  ;;  %v1104_v44 = vld [vmem:[%s2338_s28 + $0x28] sm:$0xff] }
 0x112   : > { %v913_v55 = vpop.f32.mrf.mxu0  ;;  %v1127_v50 = vunpack.c.l.bf16 %v1104_v44 }
 0x113   : > { %v1026_v56 = vpop.f32.mrf.mxu1  ;;  %v1025_v58 = vadd.f32 %v1024_v51, %v912_v53  ;;  %v914_v59 = vadd.f32 %v913_v55, %v2341_v38  ;;  %v2351_v61 = vadd.f32 %v1118_v49, %v1023_v52  ;;  %v1128_v53 = vunpack.c.h.bf16 %v1104_v44 }
 0x114   : > { %v917_v63 = vpop.f32.mrf.mxu0 }
 0x115   : > { %v1030_v0 = vpop.f32.mrf.mxu1  ;;  %v1027_v1 = vadd.f32 %v1026_v56, %v914_v59  ;;  %v918_v2 = vadd.f32 %v917_v63, %v2331_v37  ;;  %v1181_v3 = vadd.f32 %v2351_v61, %v2349_v60  ;;  %v2357_v8 = vadd.f32 %v1119_v54, %v1025_v58  ;;  %v1105_v58 = vld [vmem:[%s2338_s28 + $0x30] sm:$0xff] }
 0x116   : > { %v919_v4 = vpop.f32.mrf.mxu0 }
 0x117   : > { %v1032_v5 = vpop.f32.mrf.mxu1  ;;  %v2359_v9 = vadd.f32 %v1120_v57, %v1027_v1  ;;  %v1031_v10 = vadd.f32 %v1030_v0, %v918_v2  ;;  %v920_v11 = vadd.f32 %v919_v4, %v2341_v38  ;;  %1182 = vadd.xlane.f32.xlu0 %v1181_v3  ;;  %v1129_v2 = vunpack.c.l.bf16 %v1105_v58 }
 0x118   : > { %v921_v13 = vpop.f32.mrf.mxu0 }
 0x119   : > { %v1034_v14 = vpop.f32.mrf.mxu1  ;;  %v1033_v15 = vadd.f32 %v1032_v5, %v920_v11  ;;  %v922_v16 = vadd.f32 %v921_v13, %v2331_v37  ;;  %v1184_v17 = vadd.f32 %v2359_v9, %v2357_v8  ;;  %v2368_v25 = vadd.f32 %v1121_v6, %v1031_v10 }
 0x11a   : > { %v923_v19 = vpop.f32.mrf.mxu0  ;;  %v1130_v5 = vunpack.c.h.bf16 %v1105_v58 }
 0x11b   : > { %v1036_v20 = vpop.f32.mrf.mxu1  ;;  %v1035_v22 = vadd.f32 %v1034_v14, %v922_v16  ;;  %v924_v23 = vadd.f32 %v923_v19, %v2341_v38  ;;  %1185 = vadd.xlane.f32.xlu0 %v1184_v17  ;;  %v2370_v26 = vadd.f32 %v1122_v7, %v1033_v15 }
 0x11c   : > { %v927_v27 = vpop.f32.mrf.mxu0 }
 0x11d   : > { %v1040_v28 = vpop.f32.mrf.mxu1  ;;  %v1037_v29 = vadd.f32 %v1036_v20, %v924_v23  ;;  %v928_v30 = vadd.f32 %v927_v27, %v2331_v37  ;;  %v1187_v31 = vadd.f32 %v2370_v26, %v2368_v25  ;;  %v2375_v40 = vadd.f32 %v1123_v18, %v1035_v22 }
 0x11e   : > { %v929_v33 = vpop.f32.mrf.mxu0  ;;  %v1131_v18 = vunpack.c.l.bf16 %v1106_v12 }
 0x11f   : > { %v1042_v35 = vpop.f32.mrf.mxu1  ;;  %v2377_v41 = vadd.f32 %v1124_v21, %v1037_v29  ;;  %v1041_v42 = vadd.f32 %v1040_v28, %v928_v30  ;;  %v930_v43 = vadd.f32 %v929_v33, %v2341_v38  ;;  %1188 = vadd.xlane.f32.xlu1 %v1187_v31  ;;  %v1132_v21 = vunpack.c.h.bf16 %v1106_v12  ;;  %v1107_v28 = vld [vmem:[%s2338_s28 + $0x40] sm:$0xff] }
 0x120   : > { %v931_v45 = vpop.f32.mrf.mxu0 }
 0x121   : > { %v1044_v46 = vpop.f32.mrf.mxu1  ;;  %v1043_v47 = vadd.f32 %v1042_v35, %v930_v43  ;;  %v932_v48 = vadd.f32 %v931_v45, %v2331_v37  ;;  %v1190_v49 = vadd.f32 %v2377_v41, %v2375_v40  ;;  %v2384_v54 = vadd.f32 %v1125_v32, %v1041_v42 }
 0x122   : > { %v933_v51 = vpop.f32.mrf.mxu0  ;;  %v1133_v35 = vunpack.c.l.bf16 %v1107_v28  ;;  %v1134_v43 = vunpack.c.h.bf16 %v1107_v28 }
 0x123   : > { %v1046_v52 = vpop.f32.mrf.mxu1  ;;  %v2386_v55 = vadd.f32 %v1126_v39, %v1043_v47  ;;  %v1045_v56 = vadd.f32 %v1044_v46, %v932_v48  ;;  %v934_v57 = vadd.f32 %v933_v51, %v2341_v38  ;;  %1191 = vadd.xlane.f32.xlu1 %v1190_v49  ;;  %v1108_v48 = vld [vmem:[%s2338_s28 + $0x48] sm:$0xff] }
 0x124   : > { %v937_v59 = vpop.f32.mrf.mxu0 }
 0x125   : > { %v1050_v62 = vpop.f32.mrf.mxu1  ;;  %v1047_v63 = vadd.f32 %v1046_v52, %v934_v57  ;;  %v938_v0 = vadd.f32 %v937_v59, %v2331_v37  ;;  %v1193_v1 = vadd.f32 %v2386_v55, %v2384_v54  ;;  %v2393_v6 = vadd.f32 %v1127_v50, %v1045_v56 }
 0x126   : > { %v939_v3 = vpop.f32.mrf.mxu0  ;;  %v1135_v56 = vunpack.c.l.bf16 %v1108_v48  ;;  %v1136_v59 = vunpack.c.h.bf16 %v1108_v48 }
 0x127   : > { %v1052_v4 = vpop.f32.mrf.mxu1  ;;  %v2395_v7 = vadd.f32 %v1128_v53, %v1047_v63  ;;  %v1051_v10 = vadd.f32 %v1050_v62, %v938_v0  ;;  %v940_v11 = vadd.f32 %v939_v3, %v2341_v38  ;;  %1194 = vadd.xlane.f32.xlu0 %v1193_v1 }
 0x128   : > { %v941_v13 = vpop.f32.mrf.mxu0 }
 0x129   : > { %v1054_v14 = vpop.f32.mrf.mxu1  ;;  %v1053_v15 = vadd.f32 %v1052_v4, %v940_v11  ;;  %v942_v16 = vadd.f32 %v941_v13, %v2331_v37  ;;  %v1196_v17 = vadd.f32 %v2395_v7, %v2393_v6  ;;  %v2402_v22 = vadd.f32 %v1129_v2, %v1051_v10  ;;  %v1109_v2 = vld [vmem:[%s2338_s28 + $0x50] sm:$0xff] }
 0x12a   : > { %v943_v19 = vpop.f32.mrf.mxu0  ;;  %v1137_v12 = vunpack.c.l.bf16 %v1109_v2 }
 0x12b   : > { %v1056_v20 = vpop.f32.mrf.mxu1  ;;  %v2404_v23 = vadd.f32 %v1130_v5, %v1053_v15  ;;  %v1055_v24 = vadd.f32 %v1054_v14, %v942_v16  ;;  %v944_v27 = vadd.f32 %v943_v19, %v2341_v38  ;;  %1197 = vadd.xlane.f32.xlu1 %v1196_v17  ;;  %v1138_v15 = vunpack.c.h.bf16 %v1109_v2  ;;  %v1112_v2 = vld [vmem:[%s2338_s28 + $0x68] sm:$0xff] }
 0x12c   : > { %v947_v29 = vpop.f32.mrf.mxu0 }
 0x12d   : > { %v1060_v30 = vpop.f32.mrf.mxu1  ;;  %v1057_v31 = vadd.f32 %v1056_v20, %v944_v27  ;;  %v948_v32 = vadd.f32 %v947_v29, %v2331_v37  ;;  %v1199_v33 = vadd.f32 %v2404_v23, %v2402_v22  ;;  %v2411_v44 = vadd.f32 %v1131_v18, %v1055_v24  ;;  %v1110_v20 = vld [vmem:[%s2338_s28 + $0x58] sm:$0xff] }
 0x12e   : > { %v949_v39 = vpop.f32.mrf.mxu0 }
 0x12f   : > { %v1062_v42 = vpop.f32.mrf.mxu1  ;;  %v2413_v45 = vadd.f32 %v1132_v21, %v1057_v31  ;;  %v1061_v46 = vadd.f32 %v1060_v30, %v948_v32  ;;  %v950_v47 = vadd.f32 %v949_v39, %v2341_v38  ;;  %1200 = vadd.xlane.f32.xlu0 %v1199_v33  ;;  %v1139_v30 = vunpack.c.l.bf16 %v1110_v20 }
 0x130   : > { %v951_v49 = vpop.f32.mrf.mxu0  ;;  %v1140_v33 = vunpack.c.h.bf16 %v1110_v20 }
 0x131   : > { %v1064_v50 = vpop.f32.mrf.mxu1  ;;  %v1063_v51 = vadd.f32 %v1062_v42, %v950_v47  ;;  %v952_v52 = vadd.f32 %v951_v49, %v2331_v37  ;;  %v1202_v53 = vadd.f32 %v2413_v45, %v2411_v44  ;;  %v2420_v62 = vadd.f32 %v1133_v35, %v1061_v46  ;;  %v1111_v46 = vld [vmem:[%s2338_s28 + $0x60] sm:$0xff] }
 0x132   : > { %v953_v57 = vpop.f32.mrf.mxu0 }
 0x133   : > { %v1066_v58 = vpop.f32.mrf.mxu1  ;;  %v2422_v63 = vadd.f32 %v1134_v43, %v1063_v51  ;;  %v1065_v0 = vadd.f32 %v1064_v50, %v952_v52  ;;  %v954_v1 = vadd.f32 %v953_v57, %v2341_v38  ;;  %1203 = vadd.xlane.f32.xlu1 %v1202_v53  ;;  %v1141_v52 = vunpack.c.l.bf16 %v1111_v46 }
 0x134   : > { %v957_v3 = vpop.f32.mrf.mxu0  ;;  %v1142_v57 = vunpack.c.h.bf16 %v1111_v46 }
 0x135   : > { %v1070_v4 = vpop.f32.mrf.mxu1  ;;  %v1067_v5 = vadd.f32 %v1066_v58, %v954_v1  ;;  %v958_v10 = vadd.f32 %v957_v3, %v2331_v37  ;;  %v1205_v11 = vadd.f32 %v2422_v63, %v2420_v62  ;;  %v2429_v16 = vadd.f32 %v1135_v56, %v1065_v0 }
 0x136   : > { %v959_v13 = vpop.f32.mrf.mxu0 }
 0x137   : > { %v1072_v14 = vpop.f32.mrf.mxu1  ;;  %v2431_v17 = vadd.f32 %v1136_v59, %v1067_v5  ;;  %v1071_v18 = vadd.f32 %v1070_v4, %v958_v10  ;;  %v960_v19 = vadd.f32 %v959_v13, %v2341_v38  ;;  %1206 = vadd.xlane.f32.xlu0 %v1205_v11 }
 0x138   : > { %v961_v21 = vpop.f32.mrf.mxu0 }
 0x139   : > { %v1074_v24 = vpop.f32.mrf.mxu1  ;;  %v1073_v27 = vadd.f32 %v1072_v14, %v960_v19  ;;  %v962_v28 = vadd.f32 %v961_v21, %v2331_v37  ;;  %v1208_v29 = vadd.f32 %v2431_v17, %v2429_v16  ;;  %v2438_v35 = vadd.f32 %v1137_v12, %v1071_v18 }
 0x13a   : > { %v963_v31 = vpop.f32.mrf.mxu0  ;;  %v1143_v12 = vunpack.c.l.bf16 %v1112_v2 }
 0x13b   : > { %v1076_v32 = vpop.f32.mrf.mxu1  ;;  %v2440_v39 = vadd.f32 %v1138_v15, %v1073_v27  ;;  %v1075_v42 = vadd.f32 %v1074_v24, %v962_v28  ;;  %v964_v43 = vadd.f32 %v963_v31, %v2341_v38  ;;  %1209 = vadd.xlane.f32.xlu1 %v1208_v29  ;;  %v1144_v15 = vunpack.c.h.bf16 %v1112_v2  ;;  %v1113_v24 = vld [vmem:[%s2338_s28 + $0x70] sm:$0xff] }
 0x13c   : > { %v967_v47 = vpop.f32.mrf.mxu0 }
 0x13d   : > { %v1080_v48 = vpop.f32.mrf.mxu1  ;;  %v1077_v49 = vadd.f32 %v1076_v32, %v964_v43  ;;  %v968_v50 = vadd.f32 %v967_v47, %v2331_v37  ;;  %v1211_v51 = vadd.f32 %v2440_v39, %v2438_v35  ;;  %v2447_v58 = vadd.f32 %v1139_v30, %v1075_v42 }
 0x13e   : > { %v969_v53 = vpop.f32.mrf.mxu0  ;;  %v1145_v32 = vunpack.c.l.bf16 %v1113_v24  ;;  %v1146_v43 = vunpack.c.h.bf16 %v1113_v24 }
 0x13f   : > { %v1082_v56 = vpop.f32.mrf.mxu1  ;;  %v2449_v59 = vadd.f32 %v1140_v33, %v1077_v49  ;;  %v1081_v0 = vadd.f32 %v1080_v48, %v968_v50  ;;  %v970_v1 = vadd.f32 %v969_v53, %v2341_v38  ;;  %1212 = vadd.xlane.f32.xlu0 %v1211_v51  ;;  %v1114_v50 = vld [vmem:[%s2338_s28 + $0x78] sm:$0xff] }
 0x140   : > { %v971_v3 = vpop.f32.mrf.mxu0  ;;  %v1148_v2 = vunpack.c.h.bf16 %v1114_v50 }
 0x141   : > { %v1084_v4 = vpop.f32.mrf.mxu1  ;;  %v1083_v5 = vadd.f32 %v1082_v56, %v970_v1  ;;  %v972_v10 = vadd.f32 %v971_v3, %v2331_v37  ;;  %v1214_v11 = vadd.f32 %v2449_v59, %v2447_v58  ;;  %v2456_v18 = vadd.f32 %v1141_v52, %v1081_v0 }
 0x142   : > { %v973_v13 = vpop.f32.mrf.mxu0  ;;  %v1147_v0 = vunpack.c.l.bf16 %v1114_v50 }
 0x143   : > { %v1086_v14 = vpop.f32.mrf.mxu1  ;;  %v2458_v19 = vadd.f32 %v1142_v57, %v1083_v5  ;;  %v1085_v20 = vadd.f32 %v1084_v4, %v972_v10  ;;  %v974_v21 = vadd.f32 %v973_v13, %v2341_v38  ;;  %1215 = vadd.xlane.f32.xlu1 %v1214_v11 }
 0x144   : > { %v977_v27 = vpop.f32.mrf.mxu0 }
 0x145   : > { %v1090_v28 = vpop.f32.mrf.mxu1  ;;  %v1087_v29 = vadd.f32 %v1086_v14, %v974_v21  ;;  %v978_v30 = vadd.f32 %v977_v27, %v2331_v37  ;;  %v1217_v31 = vadd.f32 %v2458_v19, %v2456_v18  ;;  %v2465_v46 = vadd.f32 %v1143_v12, %v1085_v20 }
 0x146   : > { %v979_v33 = vpop.f32.mrf.mxu0 }
 0x147   : > { %v1092_v42 = vpop.f32.mrf.mxu1  ;;  %v2467_v47 = vadd.f32 %v1144_v15, %v1087_v29  ;;  %v1091_v48 = vadd.f32 %v1090_v28, %v978_v30  ;;  %v980_v49 = vadd.f32 %v979_v33, %v2341_v38  ;;  %1218 = vadd.xlane.f32.xlu0 %v1217_v31 }
 0x148   : > { %v981_v51 = vpop.f32.mrf.mxu0 }
 0x149   : > { %v1094_v52 = vpop.f32.mrf.mxu1  ;;  %v1093_v53 = vadd.f32 %v1092_v42, %v980_v49  ;;  %v982_v56 = vadd.f32 %v981_v51, %v2331_v37  ;;  %v1220_v57 = vadd.f32 %v2467_v47, %v2465_v46  ;;  %v2474_v3 = vadd.f32 %v1145_v32, %v1091_v48 }
 0x14a   : > { %v983_v1 = vpop.f32.mrf.mxu0 }
 0x14b   : > { %v2476_v4 = vadd.f32 %v1146_v43, %v1093_v53  ;;  %v1095_v5 = vadd.f32 %v1094_v52, %v982_v56  ;;  %v984_v10 = vadd.f32 %v983_v1, %v2341_v38  ;;  %1221 = vadd.xlane.f32.xlu1 %v1220_v57  ;;  %v1096_v11 = vpop.f32.mrf.mxu1 }
 0x14d   : > { %v1097_v12 = vadd.f32 %v1096_v11, %v984_v10  ;;  %v1223_v13 = vadd.f32 %v2476_v4, %v2474_v3  ;;  %v2481_v37 = vadd.f32 %v1147_v0, %v1095_v5 }
 0x14f   : > { %v2483_v14 = vadd.f32 %v1148_v2, %v1097_v12  ;;  %1224 = vadd.xlane.f32.xlu0 %v1223_v13 }
 0x151   : > { %v1226_v15 = vadd.f32 %v2483_v14, %v2481_v37 }
 0x153   : > { %1227 = vadd.xlane.f32.xlu1 %v1226_v15 }
 0x1a0   : > { %v1183_v20 = vpop.xlane.xlu0 %1182 }
 0x1a1   : > { %v1230_v21 = vmul.f32 0.00390625, %v1183_v20 }
 0x1a3   : > { %v2488_v24 = vsub.f32 %v2349_v60, %v1230_v21  ;;  %v2491_v38 = vsub.f32 %v2351_v61, %v1230_v21 }
 0x1a4   : > { %v1186_v27 = vpop.xlane.xlu0 %1185 }
 0x1a5   : > { %v1231_v28 = vmul.f32 0.00390625, %v1186_v27  ;;  %v1278_v29 = vmul.f32 %v2488_v24, %v2488_v24  ;;  %v1279_v30 = vmul.f32 %v2491_v38, %v2491_v38 }
 0x1a7   : > { %v2498_v31 = vsub.f32 %v2357_v8, %v1231_v28  ;;  %v2501_v32 = vsub.f32 %v2359_v9, %v1231_v28  ;;  %v1310_v33 = vadd.f32 %v1279_v30, %v1278_v29 }
 0x1a8   : > { %v1189_v60 = vpop.xlane.xlu1 %1188 }
 0x1a9   : > { %v1232_v42 = vmul.f32 0.00390625, %v1189_v60  ;;  %1311 = vadd.xlane.f32.xlu0 %v1310_v33  ;;  %v1280_v61 = vmul.f32 %v2498_v31, %v2498_v31  ;;  %v1281_v43 = vmul.f32 %v2501_v32, %v2501_v32 }
 0x1ab   : > { %v2508_v48 = vsub.f32 %v2368_v25, %v1232_v42  ;;  %v2511_v49 = vsub.f32 %v2370_v26, %v1232_v42  ;;  %v1313_v8 = vadd.f32 %v1281_v43, %v1280_v61 }
 0x1ac   : > { %v1192_v50 = vpop.xlane.xlu1 %1191 }
 0x1ad   : > { %v1233_v9 = vmul.f32 0.00390625, %v1192_v50  ;;  %1314 = vadd.xlane.f32.xlu1 %v1313_v8  ;;  %v1282_v51 = vmul.f32 %v2508_v48, %v2508_v48  ;;  %v1283_v52 = vmul.f32 %v2511_v49, %v2511_v49 }
 0x1af   : > { %v2518_v53 = vsub.f32 %v2375_v40, %v1233_v9  ;;  %v2521_v56 = vsub.f32 %v2377_v41, %v1233_v9  ;;  %v1316_v25 = vadd.f32 %v1283_v52, %v1282_v51 }
 0x1b0   : > { %v1195_v57 = vpop.xlane.xlu0 %1194 }
 0x1b1   : > { %v1234_v26 = vmul.f32 0.00390625, %v1195_v57  ;;  %1317 = vadd.xlane.f32.xlu0 %v1316_v25  ;;  %v1284_v0 = vmul.f32 %v2518_v53, %v2518_v53  ;;  %v1285_v1 = vmul.f32 %v2521_v56, %v2521_v56 }
 0x1b3   : > { %v2528_v2 = vsub.f32 %v2384_v54, %v1234_v26  ;;  %v2531_v5 = vsub.f32 %v2386_v55, %v1234_v26  ;;  %v1319_v40 = vadd.f32 %v1285_v1, %v1284_v0 }
 0x1b4   : > { %v1198_v10 = vpop.xlane.xlu1 %1197 }
 0x1b5   : > { %v1235_v41 = vmul.f32 0.00390625, %v1198_v10  ;;  %1320 = vadd.xlane.f32.xlu1 %v1319_v40  ;;  %v1286_v11 = vmul.f32 %v2528_v2, %v2528_v2  ;;  %v1287_v12 = vmul.f32 %v2531_v5, %v2531_v5 }
 0x1b7   : > { %v2538_v13 = vsub.f32 %v2393_v6, %v1235_v41  ;;  %v2541_v15 = vsub.f32 %v2395_v7, %v1235_v41  ;;  %v1322_v54 = vadd.f32 %v1287_v12, %v1286_v11 }
 0x1b8   : > { %v1201_v20 = vpop.xlane.xlu0 %1200 }
 0x1b9   : > { %v1236_v55 = vmul.f32 0.00390625, %v1201_v20  ;;  %1323 = vadd.xlane.f32.xlu0 %v1322_v54  ;;  %v1288_v21 = vmul.f32 %v2538_v13, %v2538_v13  ;;  %v1289_v27 = vmul.f32 %v2541_v15, %v2541_v15 }
 0x1bb   : > { %v2548_v28 = vsub.f32 %v2402_v22, %v1236_v55  ;;  %v2551_v29 = vsub.f32 %v2404_v23, %v1236_v55  ;;  %v1325_v6 = vadd.f32 %v1289_v27, %v1288_v21 }
 0x1bc   : > { %v1204_v30 = vpop.xlane.xlu1 %1203 }
 0x1bd   : > { %v1237_v7 = vmul.f32 0.00390625, %v1204_v30  ;;  %1326 = vadd.xlane.f32.xlu1 %v1325_v6  ;;  %v1290_v33 = vmul.f32 %v2548_v28, %v2548_v28  ;;  %v1291_v60 = vmul.f32 %v2551_v29, %v2551_v29 }
 0x1bf   : > { %v2558_v42 = vsub.f32 %v2411_v44, %v1237_v7  ;;  %v2561_v61 = vsub.f32 %v2413_v45, %v1237_v7  ;;  %v1328_v22 = vadd.f32 %v1291_v60, %v1290_v33 }
 0x1c0   : > { %v1207_v43 = vpop.xlane.xlu0 %1206 }
 0x1c1   : > { %v1238_v23 = vmul.f32 0.00390625, %v1207_v43  ;;  %1329 = vadd.xlane.f32.xlu0 %v1328_v22  ;;  %v1292_v8 = vmul.f32 %v2558_v42, %v2558_v42  ;;  %v1293_v50 = vmul.f32 %v2561_v61, %v2561_v61 }
 0x1c3   : > { %v2568_v9 = vsub.f32 %v2420_v62, %v1238_v23  ;;  %v2571_v51 = vsub.f32 %v2422_v63, %v1238_v23  ;;  %v1331_v44 = vadd.f32 %v1293_v50, %v1292_v8 }
 0x1c4   : > { %v1210_v52 = vpop.xlane.xlu1 %1209 }
 0x1c5   : > { %v1239_v45 = vmul.f32 0.00390625, %v1210_v52  ;;  %1332 = vadd.xlane.f32.xlu1 %v1331_v44  ;;  %v1294_v25 = vmul.f32 %v2568_v9, %v2568_v9  ;;  %v1295_v57 = vmul.f32 %v2571_v51, %v2571_v51 }
 0x1c7   : > { %v2578_v26 = vsub.f32 %v2429_v16, %v1239_v45  ;;  %v2581_v0 = vsub.f32 %v2431_v17, %v1239_v45  ;;  %v1334_v62 = vadd.f32 %v1295_v57, %v1294_v25 }
 0x1c8   : > { %v1213_v1 = vpop.xlane.xlu0 %1212 }
 0x1c9   : > { %v1240_v63 = vmul.f32 0.00390625, %v1213_v1  ;;  %1335 = vadd.xlane.f32.xlu0 %v1334_v62  ;;  %v1296_v40 = vmul.f32 %v2578_v26, %v2578_v26  ;;  %v1297_v10 = vmul.f32 %v2581_v0, %v2581_v0 }
 0x1cb   : > { %v2588_v41 = vsub.f32 %v2438_v35, %v1240_v63  ;;  %v2591_v11 = vsub.f32 %v2440_v39, %v1240_v63  ;;  %v1337_v16 = vadd.f32 %v1297_v10, %v1296_v40 }
 0x1cc   : > { %v1216_v12 = vpop.xlane.xlu1 %1215 }
 0x1cd   : > { %v1241_v17 = vmul.f32 0.00390625, %v1216_v12  ;;  %1338 = vadd.xlane.f32.xlu1 %v1337_v16  ;;  %v1298_v54 = vmul.f32 %v2588_v41, %v2588_v41  ;;  %v1299_v20 = vmul.f32 %v2591_v11, %v2591_v11 }
 0x1cf   : > { %v2598_v55 = vsub.f32 %v2447_v58, %v1241_v17  ;;  %v2601_v21 = vsub.f32 %v2449_v59, %v1241_v17  ;;  %v1340_v35 = vadd.f32 %v1299_v20, %v1298_v54 }
 0x1d0   : > { %v1219_v27 = vpop.xlane.xlu0 %1218 }
 0x1d1   : > { %v1242_v39 = vmul.f32 0.00390625, %v1219_v27  ;;  %1341 = vadd.xlane.f32.xlu0 %v1340_v35  ;;  %v1300_v6 = vmul.f32 %v2598_v55, %v2598_v55  ;;  %v1301_v30 = vmul.f32 %v2601_v21, %v2601_v21 }
 0x1d3   : > { %v2608_v7 = vsub.f32 %v2456_v18, %v1242_v39  ;;  %v2611_v33 = vsub.f32 %v2458_v19, %v1242_v39  ;;  %v1343_v58 = vadd.f32 %v1301_v30, %v1300_v6 }
 0x1d4   : > { %v1222_v60 = vpop.xlane.xlu1 %1221 }
 0x1d5   : > { %v1243_v59 = vmul.f32 0.00390625, %v1222_v60  ;;  %1344 = vadd.xlane.f32.xlu1 %v1343_v58  ;;  %v1302_v22 = vmul.f32 %v2608_v7, %v2608_v7  ;;  %v1303_v43 = vmul.f32 %v2611_v33, %v2611_v33  ;;  %v1115_v58 = vld [vmem:[%s2791_s4] sm:$0x3] }
 0x1d6   : > { %v1116_v60 = vld [vmem:[%s2792_s5] sm:$0x3] }
 0x1d7   : > { %v2618_v23 = vsub.f32 %v2465_v46, %v1243_v59  ;;  %v2621_v8 = vsub.f32 %v2467_v47, %v1243_v59  ;;  %v1346_v18 = vadd.f32 %v1303_v43, %v1302_v22  ;;  %v2654_v43 = vrot.slane %v1115_v58, %v2322_v34 }
 0x1d8   : > { %v1225_v50 = vpop.xlane.xlu0 %1224 }
 0x1d9   : > { %v1244_v19 = vmul.f32 0.00390625, %v1225_v50  ;;  %1347 = vadd.xlane.f32.xlu0 %v1346_v18  ;;  %v1304_v44 = vmul.f32 %v2618_v23, %v2618_v23  ;;  %v1305_v52 = vmul.f32 %v2621_v8, %v2621_v8  ;;  %v2657_v18 = vrot.slane %v1115_v58, %v2328_v36 }
 0x1db   : > { %v2628_v45 = vsub.f32 %v2474_v3, %v1244_v19  ;;  %v2631_v25 = vsub.f32 %v2476_v4, %v1244_v19  ;;  %v1349_v46 = vadd.f32 %v1305_v52, %v1304_v44  ;;  %v2660_v44 = vrot.slane %v1116_v60, %v2322_v34 }
 0x1dc   : > { %v1228_v57 = vpop.xlane.xlu1 %1227  ;;  %v2663_v52 = vrot.slane %v1116_v60, %v2328_v36 }
 0x1dd   : > { %v1245_v47 = vmul.f32 0.00390625, %v1228_v57  ;;  %1350 = vadd.xlane.f32.xlu1 %v1349_v46  ;;  %v1306_v62 = vmul.f32 %v2628_v45, %v2628_v45  ;;  %v1307_v1 = vmul.f32 %v2631_v25, %v2631_v25 }
 0x1df   : > { %v2638_v63 = vsub.f32 %v2481_v37, %v1245_v47  ;;  %v2641_v40 = vsub.f32 %v2483_v14, %v1245_v47  ;;  %v1352_v3 = vadd.f32 %v1307_v1, %v1306_v62 }
 0x1e1   : > { %1353 = vadd.xlane.f32.xlu0 %v1352_v3  ;;  %v1308_v4 = vmul.f32 %v2638_v63, %v2638_v63  ;;  %v1309_v10 = vmul.f32 %v2641_v40, %v2641_v40 }
 0x1e3   : > { %v1355_v16 = vadd.f32 %v1309_v10, %v1308_v4 }
 0x1e5   : > { %1356 = vadd.xlane.f32.xlu1 %v1355_v16 }
 0x232   : > { %v1312_v12 = vpop.xlane.xlu0 %1311 }
 0x233   : > { %v1358_v17 = vmul.f32 0.00390625, %v1312_v12 }
 0x235   : > { %v1374_v54 = vadd.f32 1e-12, %v1358_v17 }
 0x236   : > { %v1315_v20 = vpop.xlane.xlu1 %1314 }
 0x237   : > { %2005 = vrsqrt.f32 %v1374_v54  ;;  %v1359_v37 = vmul.f32 0.00390625, %v1315_v20 }
 0x239   : > { %v1375_v35 = vadd.f32 1e-12, %v1359_v37 }
 0x23a   : > { %v1318_v27 = vpop.xlane.xlu0 %1317 }
 0x23b   : > { %2007 = vrsqrt.f32 %v1375_v35  ;;  %v1360_v14 = vmul.f32 0.00390625, %v1318_v27 }
 0x23d   : > { %v1376_v39 = vadd.f32 1e-12, %v1360_v14 }
 0x23e   : > { %v1321_v6 = vpop.xlane.xlu1 %1320 }
 0x23f   : > { %2009 = vrsqrt.f32 %v1376_v39  ;;  %v1361_v30 = vmul.f32 0.00390625, %v1321_v6 }
 0x241   : > { %v1377_v59 = vadd.f32 1e-12, %v1361_v30 }
 0x242   : > { %v1324_v22 = vpop.xlane.xlu0 %1323 }
 0x243   : > { %2011 = vrsqrt.f32 %v1377_v59  ;;  %v1362_v50 = vmul.f32 0.00390625, %v1324_v22 }
 0x244   : > { %v2006_v19 = vpop.eup %2005 }
 0x245   : > { %v1406_v46 = vmul.f32 %v2006_v19, %v2488_v24  ;;  %v1407_v57 = vmul.f32 %v2006_v19, %v2491_v38  ;;  %v1378_v47 = vadd.f32 1e-12, %v1362_v50 }
 0x246   : > { %v1327_v62 = vpop.xlane.xlu1 %1326 }
 0x247   : > { %v1449_v1 = vmul.f32 %v2654_v43, %v1406_v46  ;;  %v1450_v3 = vmul.f32 %v2657_v18, %v1407_v57  ;;  %2013 = vrsqrt.f32 %v1378_v47  ;;  %v1363_v4 = vmul.f32 0.00390625, %v1327_v62 }
 0x248   : > { %v2008_v10 = vpop.eup %2007 }
 0x249   : > { %v1492_v16 = vadd.f32 %v2660_v44, %v1449_v1  ;;  %v1493_v34 = vadd.f32 %v2663_v52, %v1450_v3  ;;  %v1408_v36 = vmul.f32 %v2008_v10, %v2498_v31  ;;  %v1409_v12 = vmul.f32 %v2008_v10, %v2501_v32 }
 0x24a   : > { %v1379_v24 = vadd.f32 1e-12, %v1363_v4  ;;  %v1330_v38 = vpop.xlane.xlu0 %1329 }
 0x24b   : > { %v1837_v17 = vpack.c.bf16 %v1493_v34, %v1492_v16  ;;  %v1451_v54 = vmul.f32 %v2654_v43, %v1408_v36  ;;  %v1452_v20 = vmul.f32 %v2657_v18, %v1409_v12  ;;  %v1364_v37 = vmul.f32 0.00390625, %v1330_v38 }
 0x24c   : > { %v2010_v35 = vpop.eup %2009  ;;  %2015 = vrsqrt.f32 %v1379_v24 }
 0x24d   : > { %1620 = vst [vmem:[%s2678_s12] sm:$0xff] %v1837_v17  ;;  %v1494_v31 = vadd.f32 %v2660_v44, %v1451_v54  ;;  %v1495_v32 = vadd.f32 %v2663_v52, %v1452_v20  ;;  %v1410_v27 = vmul.f32 %v2010_v35, %v2508_v48  ;;  %v1411_v14 = vmul.f32 %v2010_v35, %v2511_v49 }
 0x24e   : > { %v1380_v39 = vadd.f32 1e-12, %v1364_v37  ;;  %v1333_v6 = vpop.xlane.xlu1 %1332 }
 0x24f   : > { %v1838_v30 = vpack.c.bf16 %v1495_v32, %v1494_v31  ;;  %v1453_v58 = vmul.f32 %v2654_v43, %v1410_v27  ;;  %v1454_v60 = vmul.f32 %v2657_v18, %v1411_v14  ;;  %v1365_v59 = vmul.f32 0.00390625, %v1333_v6 }
 0x250   : > { %v2012_v22 = vpop.eup %2011  ;;  %2017 = vrsqrt.f32 %v1380_v39 }
 0x251   : > { %1621 = vst [vmem:[%s2678_s12 + $0x8] sm:$0xff] %v1838_v30  ;;  %v1496_v50 = vadd.f32 %v2660_v44, %v1453_v58  ;;  %v1497_v19 = vadd.f32 %v2663_v52, %v1454_v60  ;;  %v1412_v48 = vmul.f32 %v2012_v22, %v2518_v53  ;;  %v1413_v49 = vmul.f32 %v2012_v22, %v2521_v56 }
 0x252   : > { %v1381_v46 = vadd.f32 1e-12, %v1365_v59  ;;  %v1336_v57 = vpop.xlane.xlu0 %1335 }
 0x253   : > { %v1839_v47 = vpack.c.bf16 %v1497_v19, %v1496_v50  ;;  %v1455_v62 = vmul.f32 %v2654_v43, %v1412_v48  ;;  %v1456_v1 = vmul.f32 %v2657_v18, %v1413_v49  ;;  %v1366_v3 = vmul.f32 0.00390625, %v1336_v57 }
 0x254   : > { %v2014_v4 = vpop.eup %2013  ;;  %2019 = vrsqrt.f32 %v1381_v46 }
 0x255   : > { %1622 = vst [vmem:[%s2678_s12 + $0x10] sm:$0xff] %v1839_v47  ;;  %v1498_v10 = vadd.f32 %v2660_v44, %v1455_v62  ;;  %v1499_v16 = vadd.f32 %v2663_v52, %v1456_v1  ;;  %v1414_v53 = vmul.f32 %v2014_v4, %v2528_v2  ;;  %v1415_v56 = vmul.f32 %v2014_v4, %v2531_v5 }
 0x256   : > { %v1382_v34 = vadd.f32 1e-12, %v1366_v3  ;;  %v1339_v36 = vpop.xlane.xlu1 %1338 }
 0x257   : > { %v1840_v12 = vpack.c.bf16 %v1499_v16, %v1498_v10  ;;  %v1457_v24 = vmul.f32 %v2654_v43, %v1414_v53  ;;  %v1458_v38 = vmul.f32 %v2657_v18, %v1415_v56  ;;  %v1367_v17 = vmul.f32 0.00390625, %v1339_v36 }
 0x258   : > { %2021 = vrsqrt.f32 %v1382_v34 }
 0x259   : > { %v2016_v54 = vpop.eup %2015  ;;  %1623 = vst [vmem:[%s2678_s12 + $0x18] sm:$0xff] %v1840_v12  ;;  %v1500_v20 = vadd.f32 %v2660_v44, %v1457_v24  ;;  %v1501_v37 = vadd.f32 %v2663_v52, %v1458_v38  ;;  %v1383_v35 = vadd.f32 1e-12, %v1367_v17 }
 0x25a   : > { %v1416_v2 = vmul.f32 %v2016_v54, %v2538_v13  ;;  %v1417_v5 = vmul.f32 %v2016_v54, %v2541_v15  ;;  %v1342_v31 = vpop.xlane.xlu0 %1341 }
 0x25b   : > { %v1841_v32 = vpack.c.bf16 %v1501_v37, %v1500_v20  ;;  %2023 = vrsqrt.f32 %v1383_v35  ;;  %v1368_v27 = vmul.f32 0.00390625, %v1342_v31 }
 0x25c   : > { %v1459_v14 = vmul.f32 %v2654_v43, %v1416_v2  ;;  %v1460_v39 = vmul.f32 %v2657_v18, %v1417_v5 }
 0x25d   : > { %v2018_v6 = vpop.eup %2017  ;;  %1624 = vst [vmem:[%s2678_s12 + $0x20] sm:$0xff] %v1841_v32  ;;  %v1384_v30 = vadd.f32 1e-12, %v1368_v27 }
 0x25e   : > { %v1502_v58 = vadd.f32 %v2660_v44, %v1459_v14  ;;  %v1503_v60 = vadd.f32 %v2663_v52, %v1460_v39  ;;  %v1418_v13 = vmul.f32 %v2018_v6, %v2548_v28  ;;  %v1419_v15 = vmul.f32 %v2018_v6, %v2551_v29  ;;  %v1345_v59 = vpop.xlane.xlu1 %1344 }
 0x25f   : > { %2025 = vrsqrt.f32 %v1384_v30  ;;  %v1369_v22 = vmul.f32 0.00390625, %v1345_v59 }
 0x260   : > { %v1842_v50 = vpack.c.bf16 %v1503_v60, %v1502_v58  ;;  %v1461_v19 = vmul.f32 %v2654_v43, %v1418_v13  ;;  %v1462_v48 = vmul.f32 %v2657_v18, %v1419_v15 }
 0x261   : > { %v2020_v49 = vpop.eup %2019  ;;  %v1385_v46 = vadd.f32 1e-12, %v1369_v22 }
 0x262   : > { %1625 = vst [vmem:[%s2678_s12 + $0x28] sm:$0xff] %v1842_v50  ;;  %v1504_v57 = vadd.f32 %v2660_v44, %v1461_v19  ;;  %v1505_v47 = vadd.f32 %v2663_v52, %v1462_v48  ;;  %v1420_v28 = vmul.f32 %v2020_v49, %v2558_v42  ;;  %v1421_v29 = vmul.f32 %v2020_v49, %v2561_v61  ;;  %v1348_v62 = vpop.xlane.xlu0 %1347 }
 0x263   : > { %2027 = vrsqrt.f32 %v1385_v46  ;;  %v1370_v1 = vmul.f32 0.00390625, %v1348_v62 }
 0x264   : > { %v1843_v3 = vpack.c.bf16 %v1505_v47, %v1504_v57  ;;  %v1463_v4 = vmul.f32 %v2654_v43, %v1420_v28  ;;  %v1464_v10 = vmul.f32 %v2657_v18, %v1421_v29 }
 0x265   : > { %v2022_v16 = vpop.eup %2021  ;;  %v1386_v53 = vadd.f32 1e-12, %v1370_v1 }
 0x266   : > { %1626 = vst [vmem:[%s2678_s12 + $0x30] sm:$0xff] %v1843_v3  ;;  %v1506_v56 = vadd.f32 %v2660_v44, %v1463_v4  ;;  %v1507_v34 = vadd.f32 %v2663_v52, %v1464_v10  ;;  %v1422_v42 = vmul.f32 %v2022_v16, %v2568_v9  ;;  %v1423_v61 = vmul.f32 %v2022_v16, %v2571_v51  ;;  %v1351_v36 = vpop.xlane.xlu1 %1350 }
 0x267   : > { %2029 = vrsqrt.f32 %v1386_v53  ;;  %v1371_v12 = vmul.f32 0.00390625, %v1351_v36 }
 0x268   : > { %v2024_v24 = vpop.eup %2023  ;;  %v1844_v38 = vpack.c.bf16 %v1507_v34, %v1506_v56  ;;  %v1465_v17 = vmul.f32 %v2654_v43, %v1422_v42  ;;  %v1466_v54 = vmul.f32 %v2657_v18, %v1423_v61 }
 0x269   : > { %v1424_v20 = vmul.f32 %v2024_v24, %v2578_v26  ;;  %v1425_v37 = vmul.f32 %v2024_v24, %v2581_v0  ;;  %v1387_v35 = vadd.f32 1e-12, %v1371_v12 }
 0x26a   : > { %1627 = vst [vmem:[%s2678_s12 + $0x38] sm:$0xff] %v1844_v38  ;;  %v1508_v9 = vadd.f32 %v2660_v44, %v1465_v17  ;;  %v1509_v51 = vadd.f32 %v2663_v52, %v1466_v54  ;;  %v1354_v2 = vpop.xlane.xlu0 %1353 }
 0x26b   : > { %v1467_v5 = vmul.f32 %v2654_v43, %v1424_v20  ;;  %v1468_v31 = vmul.f32 %v2657_v18, %v1425_v37  ;;  %2031 = vrsqrt.f32 %v1387_v35  ;;  %v1372_v32 = vmul.f32 0.00390625, %v1354_v2 }
 0x26c   : > { %v2026_v27 = vpop.eup %2025  ;;  %v1845_v14 = vpack.c.bf16 %v1509_v51, %v1508_v9 }
 0x26d   : > { %v1510_v26 = vadd.f32 %v2660_v44, %v1467_v5  ;;  %v1511_v0 = vadd.f32 %v2663_v52, %v1468_v31  ;;  %v1426_v39 = vmul.f32 %v2026_v27, %v2588_v41  ;;  %v1427_v6 = vmul.f32 %v2026_v27, %v2591_v11 }
 0x26e   : > { %1628 = vst [vmem:[%s2678_s12 + $0x40] sm:$0xff] %v1845_v14  ;;  %v1388_v30 = vadd.f32 1e-12, %v1372_v32  ;;  %v1357_v58 = vpop.xlane.xlu1 %1356 }
 0x26f   : > { %v1846_v60 = vpack.c.bf16 %v1511_v0, %v1510_v26  ;;  %v1469_v13 = vmul.f32 %v2654_v43, %v1426_v39  ;;  %v1470_v15 = vmul.f32 %v2657_v18, %v1427_v6  ;;  %v1373_v59 = vmul.f32 0.00390625, %v1357_v58 }
 0x270   : > { %v2028_v22 = vpop.eup %2027  ;;  %2033 = vrsqrt.f32 %v1388_v30 }
 0x271   : > { %1629 = vst [vmem:[%s2678_s12 + $0x48] sm:$0xff] %v1846_v60  ;;  %v1512_v50 = vadd.f32 %v2660_v44, %v1469_v13  ;;  %v1513_v19 = vadd.f32 %v2663_v52, %v1470_v15  ;;  %v1428_v41 = vmul.f32 %v2028_v22, %v2598_v55  ;;  %v1429_v11 = vmul.f32 %v2028_v22, %v2601_v21 }
 0x272   : > { %v1389_v48 = vadd.f32 1e-12, %v1373_v59 }
 0x273   : > { %v1847_v49 = vpack.c.bf16 %v1513_v19, %v1512_v50  ;;  %v1471_v46 = vmul.f32 %v2654_v43, %v1428_v41  ;;  %v1472_v57 = vmul.f32 %v2657_v18, %v1429_v11 }
 0x274   : > { %v2030_v47 = vpop.eup %2029  ;;  %2035 = vrsqrt.f32 %v1389_v48 }
 0x275   : > { %1630 = vst [vmem:[%s2678_s12 + $0x50] sm:$0xff] %v1847_v49  ;;  %v1514_v28 = vadd.f32 %v2660_v44, %v1471_v46  ;;  %v1515_v29 = vadd.f32 %v2663_v52, %v1472_v57  ;;  %v1430_v62 = vmul.f32 %v2030_v47, %v2608_v7  ;;  %v1431_v55 = vmul.f32 %v2030_v47, %v2611_v33 }
 0x277   : > { %v1848_v21 = vpack.c.bf16 %v1515_v29, %v1514_v28  ;;  %v1473_v1 = vmul.f32 %v2654_v43, %v1430_v62  ;;  %v1474_v3 = vmul.f32 %v2657_v18, %v1431_v55 }
 0x278   : > { %v2032_v4 = vpop.eup %2031 }
 0x279   : > { %1631 = vst [vmem:[%s2678_s12 + $0x58] sm:$0xff] %v1848_v21  ;;  %v1516_v10 = vadd.f32 %v2660_v44, %v1473_v1  ;;  %v1517_v16 = vadd.f32 %v2663_v52, %v1474_v3  ;;  %v1432_v53 = vmul.f32 %v2032_v4, %v2618_v23  ;;  %v1433_v56 = vmul.f32 %v2032_v4, %v2621_v8 }
 0x27b   : > { %v1849_v34 = vpack.c.bf16 %v1517_v16, %v1516_v10  ;;  %v1475_v7 = vmul.f32 %v2654_v43, %v1432_v53  ;;  %v1476_v33 = vmul.f32 %v2657_v18, %v1433_v56 }
 0x27d   : > { %v2034_v42 = vpop.eup %2033  ;;  %1632 = vst [vmem:[%s2678_s12 + $0x60] sm:$0xff] %v1849_v34  ;;  %v1518_v61 = vadd.f32 %v2660_v44, %v1475_v7  ;;  %v1519_v36 = vadd.f32 %v2663_v52, %v1476_v33 }
 0x27e   : > { %v1434_v12 = vmul.f32 %v2034_v42, %v2628_v45  ;;  %v1435_v24 = vmul.f32 %v2034_v42, %v2631_v25 }
 0x27f   : > { %v1850_v38 = vpack.c.bf16 %v1519_v36, %v1518_v61 }
 0x280   : > { %v1477_v23 = vmul.f32 %v2654_v43, %v1434_v12  ;;  %v1478_v8 = vmul.f32 %v2657_v18, %v1435_v24 }
 0x281   : > { %v2036_v17 = vpop.eup %2035  ;;  %1633 = vst [vmem:[%s2678_s12 + $0x68] sm:$0xff] %v1850_v38 }
 0x282   : > { %v1520_v54 = vadd.f32 %v2660_v44, %v1477_v23  ;;  %v1521_v20 = vadd.f32 %v2663_v52, %v1478_v8  ;;  %v1436_v37 = vmul.f32 %v2036_v17, %v2638_v63  ;;  %v1437_v35 = vmul.f32 %v2036_v17, %v2641_v40 }
 0x284   : > { %v1851_v9 = vpack.c.bf16 %v1521_v20, %v1520_v54  ;;  %v1479_v45 = vmul.f32 %v2654_v43, %v1436_v37  ;;  %v1480_v25 = vmul.f32 %v2657_v18, %v1437_v35 }
 0x286   : > { %1634 = vst [vmem:[%s2678_s12 + $0x70] sm:$0xff] %v1851_v9  ;;  %v1522_v51 = vadd.f32 %v2660_v44, %v1479_v45  ;;  %v1523_v2 = vadd.f32 %v2663_v52, %v1480_v25 }
 0x288   : > { %v1852_v5 = vpack.c.bf16 %v1523_v2, %v1522_v51 }
 0x28a   : > { %1635 = vst [vmem:[%s2678_s12 + $0x78] sm:$0xff] %v1852_v5 }
 0x28b PF: > { %s16_s21 = sadd.s32 1, %s2043_s21  }
 0x28c   : > { %p13_p4 = scmp.ge.s32.totalorder %s16_s21, 4  }
 0x28e   :  { %15 = sbr.rel (!%p13_p4) target bundleno = 1 (0x1), region = 77 }

// kernel: classifier_forward.23
= control target key start
LH: loop header
LB: loop body
LE: loop exit
PB: predicated region body
PF: predicated region fallthrough
CT: control target
= control target key end

     0   :  { %v68_v9 = vlaneseq  ;;  %v312_v13 = vmov 1966171168   ;;  %s391_s0 = inlined_call_operand.vmem [shape: bf16[2,256], index: 0, kind: input, shape index: {}]   ;;  %s392_s1 = inlined_call_operand.vmem [shape: bf16[256,128], index: 1, kind: input, shape index: {}]   ;;  %s393_s2 = inlined_call_operand.vmem [shape: f32[1,128], index: 2, kind: input, shape index: {}]   ;;  %s394_s3 = inlined_call_operand.hbm [shape: f32[2,128], index: 3, kind: output, shape index: {}]  }
   0x1   :  { %v274_v0 = vld [vmem:[%s392_s1 + $0x78] sm:$0xff]   ;;  %v276_v2 = vld [vmem:[%s392_s1 + $0x70] sm:$0xff]   ;;  %v278_v4 = vld [vmem:[%s392_s1 + $0x68] sm:$0xff]   ;;  %v66_v14 = vunpack.c.l.s4 %v312_v13 }
   0x2   :  { %v275_v1 = vld [vmem:[%s392_s1 + $0x38] sm:$0xff]   ;;  %250 = vmatprep.subr.bf16.mxu0 %v274_v0  ;;  %v277_v3 = vld [vmem:[%s392_s1 + $0x30] sm:$0xff]   ;;  %v279_v5 = vld [vmem:[%s392_s1 + $0x28] sm:$0xff]   ;;  %v69_v15 = vshrl.u32 %v68_v9, 7 }
   0x3   :  { %251 = vmatpush3.bf16.msra.mxu0 %v275_v1  ;;  %v280_v6 = vld [vmem:[%s392_s1 + $0x60] sm:$0xff]   ;;  %v282_v8 = vld [vmem:[%s392_s1 + $0x58] sm:$0xff]   ;;  %v284_v11 = vld [vmem:[%s392_s1 + $0x50] sm:$0xff]  }
   0x4   :  { %252 = vmatprep.subr.bf16.mxu0 %v276_v2  ;;  %v281_v7 = vld [vmem:[%s392_s1 + $0x20] sm:$0xff]   ;;  %v283_v10 = vld [vmem:[%s392_s1 + $0x18] sm:$0xff]  }
   0x5   :  { %v233_v12 = vld.sshfl [vmem:[%s391_s0] sm:$0x11 pattern:$0x75316420] }
   0x7   :  { %253 = vmatpush3.bf16.msra.mxu0 %v277_v3 }
   0x8   :  { %254 = vmatprep.subr.bf16.mxu0 %v278_v4 }
   0xb   :  { %255 = vmatpush3.bf16.msra.mxu0 %v279_v5 }
   0xc   :  { %256 = vmatprep.subr.bf16.mxu0 %v280_v6 }
   0xf   :  { %257 = vmatpush3.bf16.msra.mxu0 %v281_v7 }
  0x10   :  { %258 = vmatprep.subr.bf16.mxu0 %v282_v8 }
  0x11   :  { %8 = vsyncpa [#allocation3], 0  ;;  %v285_v16 = vld [vmem:[%s392_s1 + $0x10] sm:$0xff]   ;;  %v64_v17 = vcombine.high %v233_v12, %v233_v12  ;;  %v67_v18 = vunpack.c.0.s8 %v66_v14  ;;  %v286_v19 = vld [vmem:[%s392_s1 + $0x48] sm:$0xff]   ;;  %s313_s20 = smov [#allocation2]  }
  0x12   :  { %v287_v21 = vld [vmem:[%s392_s1 + $0x8] sm:$0xff]   ;;  %v288_v23 = vld [vmem:[%s392_s1 + $0x40] sm:$0xff]   ;;  %s224_s21 = sshll.u32 %s313_s20, 4  ;;  %s225_s21 = int_to_ptr.vmem [resolvable:$true] %s224_s21 }
  0x13   :  { %259 = vmatpush3.bf16.msra.mxu0 %v283_v10  ;;  %v70_v20 = vsub.s32 %v67_v18, %v69_v15  ;;  %v289_v24 = vld [vmem:[%s392_s1] sm:$0xff]   ;;  %s290_s22 = scalar_lea.vmem %s225_s21, 32  ;;  %p295_p1 = scmp.lt.s32.totalorder %s225_s21, %s225_s21 }
  0x14   :  { %260 = vmatprep.subr.bf16.mxu0 %v284_v11  ;;  %v232_v28 = vld [vmem:[%s393_s2] ss:$0 sm:$0xff]  ;;  %p291_p0 = scmp.ne.s32.totalorder %s225_s21, %s290_s22  ;;  %p296_p2 = scmp.lt.s32.totalorder %s290_s22, %s290_s22 }
  0x15   :  { %v78_v22 = vrot.slane %v64_v17, %v70_v20  ;;  %v71_v25 = vrot.slane %v233_v12, %v70_v20 }
  0x16   :  { %p297_p3 = por %p296_p2, %p295_p1 }
  0x17   :  { %261 = vmatpush3.bf16.msra.mxu0 %v285_v16  ;;  %209 = vmatprep.mubr.bf16.mxu0 %v78_v22 }
  0x18   :  { %262 = vmatprep.subr.bf16.mxu0 %v286_v19  ;;  %p298_p4 = pnand %p297_p3, %p291_p0 }
  0x1b   :  { %263 = vmatpush3.bf16.msra.mxu0 %v287_v21 }
  0x1c   :  { %264 = vmatprep.subr.bf16.mxu0 %v288_v23 }
  0x1f   :  { %265 = vmatpush3.bf16.msra.mxu0 %v289_v24 }
  0x22   :  { %210 = vmatmul.mubr.bf16.vlgmr.msra.gmra.mxu0 %v71_v25 }
  0xe2   :  { %v266_v26 = vpop.f32.mrf.mxu0 }
  0xe4   :  { %v267_v27 = vpop.f32.mrf.mxu0 }
  0xe5   :  { %v268_v29 = vadd.f32 %v267_v27, %v266_v26 }
  0xe6   :  { %v269_v30 = vpop.f32.mrf.mxu0 }
  0xe7   :  { %v212_v31 = vadd.f32 %v268_v29, %v232_v28 }
  0xe8   :  { %v270_v32 = vpop.f32.mrf.mxu0 }
  0xe9   :  { %217 = vst [vmem:[#allocation2] sm:$0x3] %v212_v31 }
  0xea   :  { %301 = shalt.err (!%p298_p4)
}
  0xeb   :  { %227 = dma.vmem_to_hbm [thread:$0]  %s225_s21, 32, %s394_s3, [#allocation3]  }
  0xec   :  { %310 = dma.done.wait [#allocation3], 32  }
  0xed   :  { %311 = vsyncadd [#allocation3], 4294967264 }
  0xee   :  { %231 = vsyncpa [#allocation3], 1 }

</bundles_post_ra>
